<compile_context>
chip_gen: v7x
topology: tpu7x:2x2x1
jax: 0.10.0
libtpu: 0.0.40
codegen_flags: <defaults>
</compile_context>

<pallas_src>
import functools

import jax
import jax.numpy as jnp
from jax.experimental import pallas as pl
from jax.experimental.pallas import tpu as pltpu

BN_EPS = 1e-5
LANE = 128
SUBLANE = 8

_VMEM_LIMIT = 32 * 1024 * 1024


def _round_up(x, m):
    return (x + m - 1) // m * m


def _conv3x3_tile(h, w_ref):
    """3x3 same-convolution of one activation tile, fully in VMEM/registers.

    h:     [Bt, H, W, Cin] float32 activation tile (no halo).
    w_ref: [9*Cin, Cp] bfloat16 weights, row = (dy*3 + dx)*Cin + cin.
    Returns [Bt, H, W, Cp] float32 (f32 MXU accumulation).
    """
    Bt, H, W, Cin = h.shape
    Cp = w_ref.shape[-1]
    Hp = H + 2
    Wp = _round_up(W + 2, SUBLANE)               # sublane-aligned halo'd width

    # 1-pixel zero halo built in registers (extra right pad is only for alignment).
    hp = jnp.pad(h, ((0, 0), (1, 1), (1, Wp - W - 1), (0, 0)))
    hp = hp.reshape(Bt * Hp, Wp, Cin)

    # dx shifts realized as XLU sublane rotates; the halo guarantees no wrapped element
    # ever lands inside columns [0, W).
    shifted = [hp if dx == 0 else pltpu.roll(hp, shift=Wp - dx, axis=1)
               for dx in range(3)]
    shifted = [s.reshape(Bt, Hp, Wp, Cin) for s in shifted]

    taps = []
    for dy in range(3):
        for dx in range(3):
            t = shifted[dx][:, dy:dy + H, :W, :]          # aligned slices only
            taps.append(t.reshape(Bt * H * W, Cin))

    # In-VMEM im2col -> one K = 9*Cin bf16 MXU contraction with f32 accumulation.
    patches = jnp.concatenate(taps, axis=-1).astype(jnp.bfloat16)
    y = jnp.dot(patches, w_ref[...], preferred_element_type=jnp.float32)
    return y.reshape(Bt, H, W, Cp)


def _partial_stats(y2d):
    """[M, Cp] f32 -> ([1, 8, Cp], [1, 8, Cp]) partial sum / sum-of-squares (f32)."""
    Cp = y2d.shape[-1]
    ps = jnp.sum(y2d.reshape(SUBLANE, -1, Cp), axis=1)
    pq = jnp.sum((y2d * y2d).reshape(SUBLANE, -1, Cp), axis=1)
    return ps[None], pq[None]


def _conv_stats_kernel(x_ref, w_ref, y_ref, sum_ref, ssq_ref):
    """conv3x3 + per-tile partial batch statistics."""
    y = _conv3x3_tile(x_ref[...].astype(jnp.float32), w_ref)
    ps, pq = _partial_stats(y.reshape(-1, y.shape[-1]))
    sum_ref[...] = ps
    ssq_ref[...] = pq
    y_ref[...] = y.astype(y_ref.dtype)


def _bn_relu_conv_stats_kernel(y_in_ref, scale_ref, shift_ref, w_ref,
                               y_ref, sum_ref, ssq_ref):
    """Previous layer's BN affine + ReLU fused into conv3x3 + partial batch stats."""
    h = y_in_ref[...].astype(jnp.float32) * scale_ref[...] + shift_ref[...]
    h = jnp.maximum(h, 0.0)
    y = _conv3x3_tile(h, w_ref)
    ps, pq = _partial_stats(y.reshape(-1, y.shape[-1]))
    sum_ref[...] = ps
    ssq_ref[...] = pq
    y_ref[...] = y.astype(y_ref.dtype)


def _bn_relu_pool_kernel(y_ref, scale_ref, shift_ref, out_ref, pool_ref):
    """BN affine + ReLU + fused 2x2 max pool."""
    z = jnp.maximum(y_ref[...].astype(jnp.float32) * scale_ref[...] + shift_ref[...], 0.0)
    out_ref[...] = z
    _, H, W, Cp = z.shape
    pool_ref[...] = jnp.max(z.reshape(1, H // 2, 2, W // 2, 2, Cp), axis=(2, 4))


def _compiler_params():
    return pltpu.CompilerParams(dimension_semantics=("parallel",),
                                vmem_limit_bytes=_VMEM_LIMIT)


def _conv_stats(x, w2d, *, bt):
    """x: [N, H, W, Cin] f32 NHWC (unpadded).  w2d: [9*Cin, Cp] bf16."""
    N, H, W, Cin = x.shape
    K, Cp = w2d.shape
    assert N % bt == 0
    G = N // bt
    flops = 2 * K * Cp * N * H * W + 3 * N * H * W * Cp
    bytes_accessed = (x.size * 4 + w2d.size * 2 + N * H * W * Cp * 2
                      + 2 * G * SUBLANE * Cp * 4)
    return pl.pallas_call(
        _conv_stats_kernel,
        grid=(G,),
        in_specs=[
            pl.BlockSpec((bt, H, W, Cin), lambda n: (n, 0, 0, 0)),
            # TODO(synk): single-buffer the grid-invariant weights once row-tiling makes
            # VMEM tight (they never change block index).
            pl.BlockSpec((K, Cp), lambda n: (0, 0)),
        ],
        out_specs=(
            pl.BlockSpec((bt, H, W, Cp), lambda n: (n, 0, 0, 0)),
            pl.BlockSpec((1, SUBLANE, Cp), lambda n: (n, 0, 0)),
            pl.BlockSpec((1, SUBLANE, Cp), lambda n: (n, 0, 0)),
        ),
        out_shape=(
            jax.ShapeDtypeStruct((N, H, W, Cp), jnp.bfloat16),   # bf16 conv1->conv2 tensor
            jax.ShapeDtypeStruct((G, SUBLANE, Cp), jnp.float32),
            jax.ShapeDtypeStruct((G, SUBLANE, Cp), jnp.float32),
        ),
        compiler_params=_compiler_params(),
        cost_estimate=pl.CostEstimate(flops=flops, transcendentals=0,
                                      bytes_accessed=bytes_accessed),
    )(x, w2d)


def _bn_relu_conv_stats(y_in, scale, shift, w2d):
    N, H, W, Cp_in = y_in.shape
    K, Cp = w2d.shape
    flops = 2 * K * Cp * N * H * W + 3 * N * H * W * (Cp_in + Cp)
    bytes_accessed = (y_in.size * y_in.dtype.itemsize + w2d.size * 2
                      + N * H * W * Cp * 4 + 2 * N * SUBLANE * Cp * 4 + 4 * Cp * 4)
    return pl.pallas_call(
        _bn_relu_conv_stats_kernel,
        grid=(N,),
        in_specs=[
            pl.BlockSpec((1, H, W, Cp_in), lambda n: (n, 0, 0, 0)),
            pl.BlockSpec((1, Cp_in), lambda n: (0, 0)),
            pl.BlockSpec((1, Cp_in), lambda n: (0, 0)),
            pl.BlockSpec((K, Cp), lambda n: (0, 0)),
        ],
        out_specs=(
            pl.BlockSpec((1, H, W, Cp), lambda n: (n, 0, 0, 0)),
            pl.BlockSpec((1, SUBLANE, Cp), lambda n: (n, 0, 0)),
            pl.BlockSpec((1, SUBLANE, Cp), lambda n: (n, 0, 0)),
        ),
        out_shape=(
            jax.ShapeDtypeStruct((N, H, W, Cp), jnp.float32),
            jax.ShapeDtypeStruct((N, SUBLANE, Cp), jnp.float32),
            jax.ShapeDtypeStruct((N, SUBLANE, Cp), jnp.float32),
        ),
        compiler_params=_compiler_params(),
        cost_estimate=pl.CostEstimate(flops=flops, transcendentals=0,
                                      bytes_accessed=bytes_accessed),
    )(y_in, scale, shift, w2d)


def _bn_relu_pool(y, scale, shift):
    N, H, W, Cp = y.shape
    flops = 6 * N * H * W * Cp
    bytes_accessed = (y.size * 4 + N * H * W * Cp * 4
                      + N * (H // 2) * (W // 2) * Cp * 4 + 4 * Cp * 4)
    return pl.pallas_call(
        _bn_relu_pool_kernel,
        grid=(N,),
        in_specs=[
            pl.BlockSpec((1, H, W, Cp), lambda n: (n, 0, 0, 0)),
            pl.BlockSpec((1, Cp), lambda n: (0, 0)),
            pl.BlockSpec((1, Cp), lambda n: (0, 0)),
        ],
        out_specs=(
            pl.BlockSpec((1, H, W, Cp), lambda n: (n, 0, 0, 0)),
            pl.BlockSpec((1, H // 2, W // 2, Cp), lambda n: (n, 0, 0, 0)),
        ),
        out_shape=(
            jax.ShapeDtypeStruct((N, H, W, Cp), jnp.float32),
            jax.ShapeDtypeStruct((N, H // 2, W // 2, Cp), jnp.float32),
        ),
        compiler_params=_compiler_params(),
        cost_estimate=pl.CostEstimate(flops=flops, transcendentals=0,
                                      bytes_accessed=bytes_accessed),
    )(y, scale, shift)


def _bn_scale_shift(psum, pssq, gamma, beta, count):
    """Training-mode BatchNorm: batch mean & biased variance over (N, H, W) -> affine."""
    mean = jnp.sum(psum, axis=(0, 1)) / count                    # [Cp]
    var = jnp.sum(pssq, axis=(0, 1)) / count - mean * mean       # biased, E[y^2]-mean^2
    # TODO(synk): E[y^2]-mean^2 is cancellation-prone; fine in f32 at these magnitudes.
    scale = gamma * jax.lax.rsqrt(var + BN_EPS)                  # [1, Cp]
    shift = beta - mean * scale                                  # [1, Cp]
    return scale, shift


def _pack_conv_weight(w, cin_pad, cout_pad):
    # PyTorch Conv2d layout [Cout, Cin, 3, 3] -> bf16 [9*cin_pad, cout_pad]; row index
    # (dy*3 + dx)*cin_pad + cin matches the kernel's im2col tap order.
    Cout, Cin, _, _ = w.shape
    wt = jnp.transpose(w, (2, 3, 1, 0))                                   # [3, 3, Cin, Cout]
    wt = jnp.pad(wt, ((0, 0), (0, 0), (0, cin_pad - Cin), (0, cout_pad - Cout)))
    return wt.reshape(9 * cin_pad, cout_pad).astype(jnp.bfloat16)


def _pad_channels(v, cp):
    return jnp.pad(v, (0, cp - v.shape[0])).reshape(1, cp)


def init_params(key, in_channel, out_channel):
    k1, k2, k3, k4 = jax.random.split(key, 4)
    return {
        "conv1_w": 0.1 * jax.random.normal(k1, (out_channel, in_channel, 3, 3), jnp.float32),
        "conv1_b": 0.05 * jax.random.normal(k2, (out_channel,), jnp.float32),  # cancels under BN
        "bn1_gamma": jnp.ones((out_channel,), jnp.float32),
        "bn1_beta": jnp.zeros((out_channel,), jnp.float32),
        "conv2_w": 0.1 * jax.random.normal(k3, (out_channel, out_channel, 3, 3), jnp.float32),
        "conv2_b": 0.05 * jax.random.normal(k4, (out_channel,), jnp.float32),  # cancels under BN
        "bn2_gamma": jnp.ones((out_channel,), jnp.float32),
        "bn2_beta": jnp.zeros((out_channel,), jnp.float32),
    }


@jax.jit
def encoder_forward(x_nchw, params):
    N, Cin, H, W = x_nchw.shape
    Cout = params["conv1_w"].shape[0]
    Cp = _round_up(Cout, LANE)                  # lane-dense channel width
    assert H % 2 == 0 and W % 2 == 0, "MaxPool2d(2) needs even spatial dims"
    assert (H * W) % SUBLANE == 0

    x = jnp.transpose(x_nchw, (0, 2, 3, 1))     # NCHW -> NHWC once at the API boundary

    w1 = _pack_conv_weight(params["conv1_w"], Cin, Cp)
    w2 = _pack_conv_weight(params["conv2_w"], Cp, Cp)
    g1 = _pad_channels(params["bn1_gamma"], Cp)
    b1 = _pad_channels(params["bn1_beta"], Cp)
    g2 = _pad_channels(params["bn2_gamma"], Cp)
    b2 = _pad_channels(params["bn2_beta"], Cp)
    count = float(N * H * W)

    # conv1 + partial batch stats.  Tiny Cin -> batch all images into one grid step.
    # NOTE: conv bias omitted in both convs; the training-mode BN batch mean absorbs it
    # exactly, so the forward output is unchanged.
    y1, s1, q1 = _conv_stats(x, w1, bt=N)
    scale1, shift1 = _bn_scale_shift(s1, q1, g1, b1, count)

    # bn1 + relu fused into conv2 + partial stats; y1 stays bf16 in HBM.
    y2, s2, q2 = _bn_relu_conv_stats(y1, scale1, shift1, w2)
    scale2, shift2 = _bn_scale_shift(s2, q2, g2, b2, count)

    # bn2 + relu with the 2x2 max-pool fused into the same kernel.
    feat, pooled = _bn_relu_pool(y2, scale2, shift2)

    # Drop channel padding, back to NCHW to match the PyTorch module.
    feat = jnp.transpose(feat[..., :Cout], (0, 3, 1, 2))
    pooled = jnp.transpose(pooled[..., :Cout], (0, 3, 1, 2))
    # TODO(synk): BatchNorm running_mean/running_var buffer updates (a training-time side
    # effect) are not modeled; they do not affect this forward output.
    # TODO(synk): for large spatial sizes add a row-tile grid axis with a 1-row halo so the
    # per-step im2col stays inside v7x's 64 MiB VMEM; if real Cout stays tiny, reconsider
    # the lane layout (spatial in lanes) instead of padding channels to 128.
    return feat, pooled


def _reference_encoder(x_nchw, params):
    # Plain-JAX reference mirroring the PyTorch module (training-mode BN, biased var).
    def block(x, w, b, gamma, beta):
        y = jax.lax.conv_general_dilated(
            x, w, window_strides=(1, 1), padding=((1, 1), (1, 1)),
            dimension_numbers=("NCHW", "OIHW", "NCHW"),
            precision=jax.lax.Precision.HIGHEST)
        y = y + b[None, :, None, None]
        mean = jnp.mean(y, axis=(0, 2, 3), keepdims=True)
        var = jnp.mean((y - mean) ** 2, axis=(0, 2, 3), keepdims=True)
        y = (y - mean) * jax.lax.rsqrt(var + BN_EPS)
        y = y * gamma[None, :, None, None] + beta[None, :, None, None]
        return jnp.maximum(y, 0.0)

    h = block(x_nchw, params["conv1_w"], params["conv1_b"],
              params["bn1_gamma"], params["bn1_beta"])
    h = block(h, params["conv2_w"], params["conv2_b"],
              params["bn2_gamma"], params["bn2_beta"])
    n, c, hh, ww = h.shape
    p = jnp.max(h.reshape(n, c, hh // 2, 2, ww // 2, 2), axis=(3, 5))
    return h, p


if __name__ == "__main__":
    N, Cin, Cout, S = 2, 4, 8, 16
    x = jax.random.normal(jax.random.PRNGKey(0), (N, Cin, S, S), jnp.float32)
    params = init_params(jax.random.PRNGKey(1), Cin, Cout)

    feat, pooled = encoder_forward(x, params)
    jax.block_until_ready((feat, pooled))

    assert feat.shape == (N, Cout, S, S), feat.shape
    assert pooled.shape == (N, Cout, S // 2, S // 2), pooled.shape
    assert bool(jnp.all(feat >= 0.0)) and bool(jnp.all(pooled >= 0.0))  # post-ReLU

    feat_ref, pooled_ref = _reference_encoder(x, params)
    # bf16 MXU operands + bf16 conv1->conv2 intermediate vs. an all-f32 reference.
    tol = dict(atol=4e-2, rtol=4e-2)
    assert bool(jnp.allclose(feat, feat_ref, **tol)), \
        float(jnp.max(jnp.abs(feat - feat_ref)))
    assert bool(jnp.allclose(pooled, pooled_ref, **tol)), \
        float(jnp.max(jnp.abs(pooled - pooled_ref)))
    assert float(jnp.mean(jnp.abs(feat - feat_ref))) < 1e-2
    print("KERNEL_OK")
</pallas_src>

<mosaic_0001>
module attributes {stable_mosaic.version = 11 : i64} {
  func.func @_conv_stats_kernel(%arg0: i32, %arg1: memref<2x16x16x4xf32, #tpu.memory_space<vmem>>, %arg2: memref<36x128xbf16, #tpu.memory_space<vmem>>, %arg3: memref<2x16x16x128xbf16, #tpu.memory_space<vmem>>, %arg4: memref<1x8x128xf32, #tpu.memory_space<vmem>>, %arg5: memref<1x8x128xf32, #tpu.memory_space<vmem>>) attributes {dimension_semantics = [#tpu.dimension_semantics<parallel>], iteration_bounds = array<i64: 1>, scalar_prefetch = 0 : i64, scratch_operands = 0 : i64, tpu.core_type = #tpu.core_type<tc>, window_params = [{transform_indices = @transform_0, window_bounds = array<i64: 2, 16, 16, 4>}, {pipeline_mode = #tpu.pipeline_mode<synchronous>, transform_indices = @transform_1, window_bounds = array<i64: 36, 128>}, {transform_indices = @transform_2, window_bounds = array<i64: 2, 16, 16, 128>}, {transform_indices = @transform_3, window_bounds = array<i64: 1, 8, 128>}, {transform_indices = @transform_4, window_bounds = array<i64: 1, 8, 128>}]} {
    %c0 = arith.constant 0 : index
    %c0_0 = arith.constant 0 : index
    %c0_1 = arith.constant 0 : index
    %c0_2 = arith.constant 0 : index
    %0 = vector.load %arg1[%c0, %c0_0, %c0_1, %c0_2] : memref<2x16x16x4xf32, #tpu.memory_space<vmem>>, vector<2x16x16x4xf32>
    %c0_i32 = arith.constant 0 : i32
    %1 = arith.sitofp %c0_i32 : i32 to f32
    %2 = vector.broadcast %1 : f32 to vector<2x1x16x4xf32>
    %3 = tpu.concatenate %2, %0 in 1 : vector<2x1x16x4xf32>, vector<2x16x16x4xf32> -> vector<2x17x16x4xf32>
    %4 = vector.broadcast %1 : f32 to vector<2x1x16x4xf32>
    %5 = tpu.concatenate %3, %4 in 1 : vector<2x17x16x4xf32>, vector<2x1x16x4xf32> -> vector<2x18x16x4xf32>
    %6 = vector.broadcast %1 : f32 to vector<2x18x1x4xf32>
    %7 = tpu.concatenate %6, %5 in 2 : vector<2x18x1x4xf32>, vector<2x18x16x4xf32> -> vector<2x18x17x4xf32>
    %8 = vector.broadcast %1 : f32 to vector<2x18x7x4xf32>
    %9 = tpu.concatenate %7, %8 in 2 : vector<2x18x17x4xf32>, vector<2x18x7x4xf32> -> vector<2x18x24x4xf32>
    %10 = vector.shape_cast %9 : vector<2x18x24x4xf32> to vector<36x24x4xf32>
    %c23_i32 = arith.constant 23 : i32
    %11 = tpu.dynamic_rotate %10 by %c23_i32 dim 1 : vector<36x24x4xf32>, i32 -> vector<36x24x4xf32>
    %c22_i32 = arith.constant 22 : i32
    %12 = tpu.dynamic_rotate %10 by %c22_i32 dim 1 : vector<36x24x4xf32>, i32 -> vector<36x24x4xf32>
    %13 = vector.shape_cast %10 : vector<36x24x4xf32> to vector<2x18x24x4xf32>
    %14 = vector.shape_cast %11 : vector<36x24x4xf32> to vector<2x18x24x4xf32>
    %15 = vector.shape_cast %12 : vector<36x24x4xf32> to vector<2x18x24x4xf32>
    %16 = vector.extract_strided_slice %13 {offsets = [0, 0, 0, 0], sizes = [2, 16, 16, 4], strides = [1, 1, 1, 1]} : vector<2x18x24x4xf32> to vector<2x16x16x4xf32>
    %17 = vector.shape_cast %16 : vector<2x16x16x4xf32> to vector<512x4xf32>
    %18 = vector.extract_strided_slice %14 {offsets = [0, 0, 0, 0], sizes = [2, 16, 16, 4], strides = [1, 1, 1, 1]} : vector<2x18x24x4xf32> to vector<2x16x16x4xf32>
    %19 = vector.shape_cast %18 : vector<2x16x16x4xf32> to vector<512x4xf32>
    %20 = vector.extract_strided_slice %15 {offsets = [0, 0, 0, 0], sizes = [2, 16, 16, 4], strides = [1, 1, 1, 1]} : vector<2x18x24x4xf32> to vector<2x16x16x4xf32>
    %21 = vector.shape_cast %20 : vector<2x16x16x4xf32> to vector<512x4xf32>
    %22 = vector.extract_strided_slice %13 {offsets = [0, 1, 0, 0], sizes = [2, 16, 16, 4], strides = [1, 1, 1, 1]} : vector<2x18x24x4xf32> to vector<2x16x16x4xf32>
    %23 = vector.shape_cast %22 : vector<2x16x16x4xf32> to vector<512x4xf32>
    %24 = vector.extract_strided_slice %14 {offsets = [0, 1, 0, 0], sizes = [2, 16, 16, 4], strides = [1, 1, 1, 1]} : vector<2x18x24x4xf32> to vector<2x16x16x4xf32>
    %25 = vector.shape_cast %24 : vector<2x16x16x4xf32> to vector<512x4xf32>
    %26 = vector.extract_strided_slice %15 {offsets = [0, 1, 0, 0], sizes = [2, 16, 16, 4], strides = [1, 1, 1, 1]} : vector<2x18x24x4xf32> to vector<2x16x16x4xf32>
    %27 = vector.shape_cast %26 : vector<2x16x16x4xf32> to vector<512x4xf32>
    %28 = vector.extract_strided_slice %13 {offsets = [0, 2, 0, 0], sizes = [2, 16, 16, 4], strides = [1, 1, 1, 1]} : vector<2x18x24x4xf32> to vector<2x16x16x4xf32>
    %29 = vector.shape_cast %28 : vector<2x16x16x4xf32> to vector<512x4xf32>
    %30 = vector.extract_strided_slice %14 {offsets = [0, 2, 0, 0], sizes = [2, 16, 16, 4], strides = [1, 1, 1, 1]} : vector<2x18x24x4xf32> to vector<2x16x16x4xf32>
    %31 = vector.shape_cast %30 : vector<2x16x16x4xf32> to vector<512x4xf32>
    %32 = vector.extract_strided_slice %15 {offsets = [0, 2, 0, 0], sizes = [2, 16, 16, 4], strides = [1, 1, 1, 1]} : vector<2x18x24x4xf32> to vector<2x16x16x4xf32>
    %33 = vector.shape_cast %32 : vector<2x16x16x4xf32> to vector<512x4xf32>
    %34 = tpu.concatenate %17, %19, %21, %23, %25, %27, %29, %31, %33 in 1 : vector<512x4xf32>, vector<512x4xf32>, vector<512x4xf32>, vector<512x4xf32>, vector<512x4xf32>, vector<512x4xf32>, vector<512x4xf32>, vector<512x4xf32>, vector<512x4xf32> -> vector<512x36xf32>
    %35 = arith.truncf %34 : vector<512x36xf32> to vector<512x36xbf16>
    %c0_3 = arith.constant 0 : index
    %c0_4 = arith.constant 0 : index
    %36 = vector.load %arg2[%c0_3, %c0_4] : memref<36x128xbf16, #tpu.memory_space<vmem>>, vector<36x128xbf16>
    %cst = arith.constant dense<0.000000e+00> : vector<512x128xf32>
    %37 = tpu.matmul %35, %36, %cst {dimension_numbers = #tpu.dot_dimension_numbers<[1], [0], [0], [1], [0, 0, 1, 1], [], []>} : vector<512x36xbf16>, vector<36x128xbf16>, vector<512x128xf32> -> vector<512x128xf32>
    %38 = vector.shape_cast %37 : vector<512x128xf32> to vector<2x16x16x128xf32>
    %39 = vector.shape_cast %38 : vector<2x16x16x128xf32> to vector<512x128xf32>
    %40 = vector.shape_cast %39 : vector<512x128xf32> to vector<8x64x128xf32>
    %cst_5 = arith.constant dense<0.000000e+00> : vector<8x128xf32>
    %41 = vector.multi_reduction <add>, %40, %cst_5 [1] : vector<8x64x128xf32> to vector<8x128xf32>
    %42 = arith.mulf %39, %39 : vector<512x128xf32>
    %43 = vector.shape_cast %42 : vector<512x128xf32> to vector<8x64x128xf32>
    %cst_6 = arith.constant dense<0.000000e+00> : vector<8x128xf32>
    %44 = vector.multi_reduction <add>, %43, %cst_6 [1] : vector<8x64x128xf32> to vector<8x128xf32>
    %45 = vector.shape_cast %41 : vector<8x128xf32> to vector<1x8x128xf32>
    %46 = vector.shape_cast %44 : vector<8x128xf32> to vector<1x8x128xf32>
    %c0_7 = arith.constant 0 : index
    %c0_8 = arith.constant 0 : index
    %c0_9 = arith.constant 0 : index
    %47 = vector.load %arg4[%c0_7, %c0_8, %c0_9] : memref<1x8x128xf32, #tpu.memory_space<vmem>>, vector<1x8x128xf32>
    tpu.vector_store %arg4[%c0_7, %c0_8, %c0_9], %45 {strides = array<i32>} : memref<1x8x128xf32, #tpu.memory_space<vmem>>, vector<1x8x128xf32>,
    %c0_10 = arith.constant 0 : index
    %c0_11 = arith.constant 0 : index
    %c0_12 = arith.constant 0 : index
    %48 = vector.load %arg5[%c0_10, %c0_11, %c0_12] : memref<1x8x128xf32, #tpu.memory_space<vmem>>, vector<1x8x128xf32>
    tpu.vector_store %arg5[%c0_10, %c0_11, %c0_12], %46 {strides = array<i32>} : memref<1x8x128xf32, #tpu.memory_space<vmem>>, vector<1x8x128xf32>,
    %49 = arith.truncf %38 : vector<2x16x16x128xf32> to vector<2x16x16x128xbf16>
    %c0_13 = arith.constant 0 : index
    %c0_14 = arith.constant 0 : index
    %c0_15 = arith.constant 0 : index
    %c0_16 = arith.constant 0 : index
    %50 = vector.load %arg3[%c0_13, %c0_14, %c0_15, %c0_16] : memref<2x16x16x128xbf16, #tpu.memory_space<vmem>>, vector<2x16x16x128xbf16>
    tpu.vector_store %arg3[%c0_13, %c0_14, %c0_15, %c0_16], %49 {strides = array<i32>} : memref<2x16x16x128xbf16, #tpu.memory_space<vmem>>, vector<2x16x16x128xbf16>,
    return
  }
  func.func @transform_0(%arg0: i32) -> (i32, i32, i32, i32) {
    %c0_i32 = arith.constant 0 : i32
    %c0_i32_0 = arith.constant 0 : i32
    %c0_i32_1 = arith.constant 0 : i32
    %c0_i32_2 = arith.constant 0 : i32
    return %arg0, %c0_i32, %c0_i32_0, %c0_i32_1 : i32, i32, i32, i32
  }
  func.func @transform_1(%arg0: i32) -> (i32, i32) {
    %c0_i32 = arith.constant 0 : i32
    %c0_i32_0 = arith.constant 0 : i32
    %c0_i32_1 = arith.constant 0 : i32
    return %c0_i32, %c0_i32_0 : i32, i32
  }
  func.func @transform_2(%arg0: i32) -> (i32, i32, i32, i32) {
    %c0_i32 = arith.constant 0 : i32
    %c0_i32_0 = arith.constant 0 : i32
    %c0_i32_1 = arith.constant 0 : i32
    %c0_i32_2 = arith.constant 0 : i32
    return %arg0, %c0_i32, %c0_i32_0, %c0_i32_1 : i32, i32, i32, i32
  }
  func.func @transform_3(%arg0: i32) -> (i32, i32, i32) {
    %c0_i32 = arith.constant 0 : i32
    %c0_i32_0 = arith.constant 0 : i32
    %c0_i32_1 = arith.constant 0 : i32
    return %arg0, %c0_i32, %c0_i32_0 : i32, i32, i32
  }
  func.func @transform_4(%arg0: i32) -> (i32, i32, i32) {
    %c0_i32 = arith.constant 0 : i32
    %c0_i32_0 = arith.constant 0 : i32
    %c0_i32_1 = arith.constant 0 : i32
    return %arg0, %c0_i32, %c0_i32_0 : i32, i32, i32
  }
}

module attributes {stable_mosaic.version = 11 : i64} {
  func.func @_bn_relu_conv_stats_kernel(%arg0: i32, %arg1: memref<1x16x16x128xbf16, #tpu.memory_space<vmem>>, %arg2: memref<1x128xf32, #tpu.memory_space<vmem>>, %arg3: memref<1x128xf32, #tpu.memory_space<vmem>>, %arg4: memref<1152x128xbf16, #tpu.memory_space<vmem>>, %arg5: memref<1x16x16x128xf32, #tpu.memory_space<vmem>>, %arg6: memref<1x8x128xf32, #tpu.memory_space<vmem>>, %arg7: memref<1x8x128xf32, #tpu.memory_space<vmem>>) attributes {dimension_semantics = [#tpu.dimension_semantics<parallel>], iteration_bounds = array<i64: 2>, scalar_prefetch = 0 : i64, scratch_operands = 0 : i64, tpu.core_type = #tpu.core_type<tc>, window_params = [{transform_indices = @transform_0, window_bounds = array<i64: 1, 16, 16, 128>}, {pipeline_mode = #tpu.pipeline_mode<synchronous>, transform_indices = @transform_1, window_bounds = array<i64: 1, 128>}, {pipeline_mode = #tpu.pipeline_mode<synchronous>, transform_indices = @transform_2, window_bounds = array<i64: 1, 128>}, {pipeline_mode = #tpu.pipeline_mode<synchronous>, transform_indices = @transform_3, window_bounds = array<i64: 1152, 128>}, {transform_indices = @transform_4, window_bounds = array<i64: 1, 16, 16, 128>}, {transform_indices = @transform_5, window_bounds = array<i64: 1, 8, 128>}, {transform_indices = @transform_6, window_bounds = array<i64: 1, 8, 128>}]} {
    %c0 = arith.constant 0 : index
    %c0_0 = arith.constant 0 : index
    %c0_1 = arith.constant 0 : index
    %c0_2 = arith.constant 0 : index
    %0 = vector.load %arg1[%c0, %c0_0, %c0_1, %c0_2] : memref<1x16x16x128xbf16, #tpu.memory_space<vmem>>, vector<1x16x16x128xbf16>
    %1 = arith.extf %0 : vector<1x16x16x128xbf16> to vector<1x16x16x128xf32>
    %c0_3 = arith.constant 0 : index
    %c0_4 = arith.constant 0 : index
    %2 = vector.load %arg2[%c0_3, %c0_4] : memref<1x128xf32, #tpu.memory_space<vmem>>, vector<1x128xf32>
    %3 = vector.shape_cast %2 : vector<1x128xf32> to vector<1x1x1x128xf32>
    %4 = vector.broadcast %3 : vector<1x1x1x128xf32> to vector<1x16x16x128xf32>
    %5 = arith.mulf %1, %4 : vector<1x16x16x128xf32>
    %c0_5 = arith.constant 0 : index
    %c0_6 = arith.constant 0 : index
    %6 = vector.load %arg3[%c0_5, %c0_6] : memref<1x128xf32, #tpu.memory_space<vmem>>, vector<1x128xf32>
    %7 = vector.shape_cast %6 : vector<1x128xf32> to vector<1x1x1x128xf32>
    %8 = vector.broadcast %7 : vector<1x1x1x128xf32> to vector<1x16x16x128xf32>
    %9 = arith.addf %5, %8 : vector<1x16x16x128xf32>
    %cst = arith.constant 0.000000e+00 : f32
    %10 = vector.broadcast %cst : f32 to vector<1x16x16x128xf32>
    %11 = arith.maximumf %9, %10 : vector<1x16x16x128xf32>
    %c0_i32 = arith.constant 0 : i32
    %12 = arith.sitofp %c0_i32 : i32 to f32
    %13 = vector.broadcast %12 : f32 to vector<1x1x16x128xf32>
    %14 = tpu.concatenate %13, %11 in 1 : vector<1x1x16x128xf32>, vector<1x16x16x128xf32> -> vector<1x17x16x128xf32>
    %15 = vector.broadcast %12 : f32 to vector<1x1x16x128xf32>
    %16 = tpu.concatenate %14, %15 in 1 : vector<1x17x16x128xf32>, vector<1x1x16x128xf32> -> vector<1x18x16x128xf32>
    %17 = vector.broadcast %12 : f32 to vector<1x18x1x128xf32>
    %18 = tpu.concatenate %17, %16 in 2 : vector<1x18x1x128xf32>, vector<1x18x16x128xf32> -> vector<1x18x17x128xf32>
    %19 = vector.broadcast %12 : f32 to vector<1x18x7x128xf32>
    %20 = tpu.concatenate %18, %19 in 2 : vector<1x18x17x128xf32>, vector<1x18x7x128xf32> -> vector<1x18x24x128xf32>
    %21 = vector.shape_cast %20 : vector<1x18x24x128xf32> to vector<18x24x128xf32>
    %c23_i32 = arith.constant 23 : i32
    %22 = tpu.dynamic_rotate %21 by %c23_i32 dim 1 : vector<18x24x128xf32>, i32 -> vector<18x24x128xf32>
    %c22_i32 = arith.constant 22 : i32
    %23 = tpu.dynamic_rotate %21 by %c22_i32 dim 1 : vector<18x24x128xf32>, i32 -> vector<18x24x128xf32>
    %24 = vector.shape_cast %21 : vector<18x24x128xf32> to vector<1x18x24x128xf32>
    %25 = vector.shape_cast %22 : vector<18x24x128xf32> to vector<1x18x24x128xf32>
    %26 = vector.shape_cast %23 : vector<18x24x128xf32> to vector<1x18x24x128xf32>
    %27 = vector.extract_strided_slice %24 {offsets = [0, 0, 0, 0], sizes = [1, 16, 16, 128], strides = [1, 1, 1, 1]} : vector<1x18x24x128xf32> to vector<1x16x16x128xf32>
    %28 = vector.shape_cast %27 : vector<1x16x16x128xf32> to vector<256x128xf32>
    %29 = vector.extract_strided_slice %25 {offsets = [0, 0, 0, 0], sizes = [1, 16, 16, 128], strides = [1, 1, 1, 1]} : vector<1x18x24x128xf32> to vector<1x16x16x128xf32>
    %30 = vector.shape_cast %29 : vector<1x16x16x128xf32> to vector<256x128xf32>
    %31 = vector.extract_strided_slice %26 {offsets = [0, 0, 0, 0], sizes = [1, 16, 16, 128], strides = [1, 1, 1, 1]} : vector<1x18x24x128xf32> to vector<1x16x16x128xf32>
    %32 = vector.shape_cast %31 : vector<1x16x16x128xf32> to vector<256x128xf32>
    %33 = vector.extract_strided_slice %24 {offsets = [0, 1, 0, 0], sizes = [1, 16, 16, 128], strides = [1, 1, 1, 1]} : vector<1x18x24x128xf32> to vector<1x16x16x128xf32>
    %34 = vector.shape_cast %33 : vector<1x16x16x128xf32> to vector<256x128xf32>
    %35 = vector.extract_strided_slice %25 {offsets = [0, 1, 0, 0], sizes = [1, 16, 16, 128], strides = [1, 1, 1, 1]} : vector<1x18x24x128xf32> to vector<1x16x16x128xf32>
    %36 = vector.shape_cast %35 : vector<1x16x16x128xf32> to vector<256x128xf32>
    %37 = vector.extract_strided_slice %26 {offsets = [0, 1, 0, 0], sizes = [1, 16, 16, 128], strides = [1, 1, 1, 1]} : vector<1x18x24x128xf32> to vector<1x16x16x128xf32>
    %38 = vector.shape_cast %37 : vector<1x16x16x128xf32> to vector<256x128xf32>
    %39 = vector.extract_strided_slice %24 {offsets = [0, 2, 0, 0], sizes = [1, 16, 16, 128], strides = [1, 1, 1, 1]} : vector<1x18x24x128xf32> to vector<1x16x16x128xf32>
    %40 = vector.shape_cast %39 : vector<1x16x16x128xf32> to vector<256x128xf32>
    %41 = vector.extract_strided_slice %25 {offsets = [0, 2, 0, 0], sizes = [1, 16, 16, 128], strides = [1, 1, 1, 1]} : vector<1x18x24x128xf32> to vector<1x16x16x128xf32>
    %42 = vector.shape_cast %41 : vector<1x16x16x128xf32> to vector<256x128xf32>
    %43 = vector.extract_strided_slice %26 {offsets = [0, 2, 0, 0], sizes = [1, 16, 16, 128], strides = [1, 1, 1, 1]} : vector<1x18x24x128xf32> to vector<1x16x16x128xf32>
    %44 = vector.shape_cast %43 : vector<1x16x16x128xf32> to vector<256x128xf32>
    %45 = tpu.concatenate %28, %30, %32, %34, %36, %38, %40, %42, %44 in 1 : vector<256x128xf32>, vector<256x128xf32>, vector<256x128xf32>, vector<256x128xf32>, vector<256x128xf32>, vector<256x128xf32>, vector<256x128xf32>, vector<256x128xf32>, vector<256x128xf32> -> vector<256x1152xf32>
    %46 = arith.truncf %45 : vector<256x1152xf32> to vector<256x1152xbf16>
    %c0_7 = arith.constant 0 : index
    %c0_8 = arith.constant 0 : index
    %47 = vector.load %arg4[%c0_7, %c0_8] : memref<1152x128xbf16, #tpu.memory_space<vmem>>, vector<1152x128xbf16>
    %cst_9 = arith.constant dense<0.000000e+00> : vector<256x128xf32>
    %48 = tpu.matmul %46, %47, %cst_9 {dimension_numbers = #tpu.dot_dimension_numbers<[1], [0], [0], [1], [0, 0, 1, 1], [], []>} : vector<256x1152xbf16>, vector<1152x128xbf16>, vector<256x128xf32> -> vector<256x128xf32>
    %49 = vector.shape_cast %48 : vector<256x128xf32> to vector<1x16x16x128xf32>
    %50 = vector.shape_cast %49 : vector<1x16x16x128xf32> to vector<256x128xf32>
    %51 = vector.shape_cast %50 : vector<256x128xf32> to vector<8x32x128xf32>
    %cst_10 = arith.constant dense<0.000000e+00> : vector<8x128xf32>
    %52 = vector.multi_reduction <add>, %51, %cst_10 [1] : vector<8x32x128xf32> to vector<8x128xf32>
    %53 = arith.mulf %50, %50 : vector<256x128xf32>
    %54 = vector.shape_cast %53 : vector<256x128xf32> to vector<8x32x128xf32>
    %cst_11 = arith.constant dense<0.000000e+00> : vector<8x128xf32>
    %55 = vector.multi_reduction <add>, %54, %cst_11 [1] : vector<8x32x128xf32> to vector<8x128xf32>
    %56 = vector.shape_cast %52 : vector<8x128xf32> to vector<1x8x128xf32>
    %57 = vector.shape_cast %55 : vector<8x128xf32> to vector<1x8x128xf32>
    %c0_12 = arith.constant 0 : index
    %c0_13 = arith.constant 0 : index
    %c0_14 = arith.constant 0 : index
    %58 = vector.load %arg6[%c0_12, %c0_13, %c0_14] : memref<1x8x128xf32, #tpu.memory_space<vmem>>, vector<1x8x128xf32>
    tpu.vector_store %arg6[%c0_12, %c0_13, %c0_14], %56 {strides = array<i32>} : memref<1x8x128xf32, #tpu.memory_space<vmem>>, vector<1x8x128xf32>,
    %c0_15 = arith.constant 0 : index
    %c0_16 = arith.constant 0 : index
    %c0_17 = arith.constant 0 : index
    %59 = vector.load %arg7[%c0_15, %c0_16, %c0_17] : memref<1x8x128xf32, #tpu.memory_space<vmem>>, vector<1x8x128xf32>
    tpu.vector_store %arg7[%c0_15, %c0_16, %c0_17], %57 {strides = array<i32>} : memref<1x8x128xf32, #tpu.memory_space<vmem>>, vector<1x8x128xf32>,
    %c0_18 = arith.constant 0 : index
    %c0_19 = arith.constant 0 : index
    %c0_20 = arith.constant 0 : index
    %c0_21 = arith.constant 0 : index
    %60 = vector.load %arg5[%c0_18, %c0_19, %c0_20, %c0_21] : memref<1x16x16x128xf32, #tpu.memory_space<vmem>>, vector<1x16x16x128xf32>
    tpu.vector_store %arg5[%c0_18, %c0_19, %c0_20, %c0_21], %49 {strides = array<i32>} : memref<1x16x16x128xf32, #tpu.memory_space<vmem>>, vector<1x16x16x128xf32>,
    return
  }
  func.func @transform_0(%arg0: i32) -> (i32, i32, i32, i32) {
    %c0_i32 = arith.constant 0 : i32
    %c0_i32_0 = arith.constant 0 : i32
    %c0_i32_1 = arith.constant 0 : i32
    %c0_i32_2 = arith.constant 0 : i32
    return %arg0, %c0_i32, %c0_i32_0, %c0_i32_1 : i32, i32, i32, i32
  }
  func.func @transform_1(%arg0: i32) -> (i32, i32) {
    %c0_i32 = arith.constant 0 : i32
    %c0_i32_0 = arith.constant 0 : i32
    %c0_i32_1 = arith.constant 0 : i32
    return %c0_i32, %c0_i32_0 : i32, i32
  }
  func.func @transform_2(%arg0: i32) -> (i32, i32) {
    %c0_i32 = arith.constant 0 : i32
    %c0_i32_0 = arith.constant 0 : i32
    %c0_i32_1 = arith.constant 0 : i32
    return %c0_i32, %c0_i32_0 : i32, i32
  }
  func.func @transform_3(%arg0: i32) -> (i32, i32) {
    %c0_i32 = arith.constant 0 : i32
    %c0_i32_0 = arith.constant 0 : i32
    %c0_i32_1 = arith.constant 0 : i32
    return %c0_i32, %c0_i32_0 : i32, i32
  }
  func.func @transform_4(%arg0: i32) -> (i32, i32, i32, i32) {
    %c0_i32 = arith.constant 0 : i32
    %c0_i32_0 = arith.constant 0 : i32
    %c0_i32_1 = arith.constant 0 : i32
    %c0_i32_2 = arith.constant 0 : i32
    return %arg0, %c0_i32, %c0_i32_0, %c0_i32_1 : i32, i32, i32, i32
  }
  func.func @transform_5(%arg0: i32) -> (i32, i32, i32) {
    %c0_i32 = arith.constant 0 : i32
    %c0_i32_0 = arith.constant 0 : i32
    %c0_i32_1 = arith.constant 0 : i32
    return %arg0, %c0_i32, %c0_i32_0 : i32, i32, i32
  }
  func.func @transform_6(%arg0: i32) -> (i32, i32, i32) {
    %c0_i32 = arith.constant 0 : i32
    %c0_i32_0 = arith.constant 0 : i32
    %c0_i32_1 = arith.constant 0 : i32
    return %arg0, %c0_i32, %c0_i32_0 : i32, i32, i32
  }
}

module attributes {stable_mosaic.version = 11 : i64} {
  func.func @_bn_relu_pool_kernel(%arg0: i32, %arg1: memref<1x16x16x128xf32, #tpu.memory_space<vmem>>, %arg2: memref<1x128xf32, #tpu.memory_space<vmem>>, %arg3: memref<1x128xf32, #tpu.memory_space<vmem>>, %arg4: memref<1x16x16x128xf32, #tpu.memory_space<vmem>>, %arg5: memref<1x8x8x128xf32, #tpu.memory_space<vmem>>) attributes {dimension_semantics = [#tpu.dimension_semantics<parallel>], iteration_bounds = array<i64: 2>, scalar_prefetch = 0 : i64, scratch_operands = 0 : i64, tpu.core_type = #tpu.core_type<tc>, window_params = [{transform_indices = @transform_0, window_bounds = array<i64: 1, 16, 16, 128>}, {pipeline_mode = #tpu.pipeline_mode<synchronous>, transform_indices = @transform_1, window_bounds = array<i64: 1, 128>}, {pipeline_mode = #tpu.pipeline_mode<synchronous>, transform_indices = @transform_2, window_bounds = array<i64: 1, 128>}, {transform_indices = @transform_3, window_bounds = array<i64: 1, 16, 16, 128>}, {transform_indices = @transform_4, window_bounds = array<i64: 1, 8, 8, 128>}]} {
    %c0 = arith.constant 0 : index
    %c0_0 = arith.constant 0 : index
    %c0_1 = arith.constant 0 : index
    %c0_2 = arith.constant 0 : index
    %0 = vector.load %arg1[%c0, %c0_0, %c0_1, %c0_2] : memref<1x16x16x128xf32, #tpu.memory_space<vmem>>, vector<1x16x16x128xf32>
    %c0_3 = arith.constant 0 : index
    %c0_4 = arith.constant 0 : index
    %1 = vector.load %arg2[%c0_3, %c0_4] : memref<1x128xf32, #tpu.memory_space<vmem>>, vector<1x128xf32>
    %2 = vector.shape_cast %1 : vector<1x128xf32> to vector<1x1x1x128xf32>
    %3 = vector.broadcast %2 : vector<1x1x1x128xf32> to vector<1x16x16x128xf32>
    %4 = arith.mulf %0, %3 : vector<1x16x16x128xf32>
    %c0_5 = arith.constant 0 : index
    %c0_6 = arith.constant 0 : index
    %5 = vector.load %arg3[%c0_5, %c0_6] : memref<1x128xf32, #tpu.memory_space<vmem>>, vector<1x128xf32>
    %6 = vector.shape_cast %5 : vector<1x128xf32> to vector<1x1x1x128xf32>
    %7 = vector.broadcast %6 : vector<1x1x1x128xf32> to vector<1x16x16x128xf32>
    %8 = arith.addf %4, %7 : vector<1x16x16x128xf32>
    %cst = arith.constant 0.000000e+00 : f32
    %9 = vector.broadcast %cst : f32 to vector<1x16x16x128xf32>
    %10 = arith.maximumf %8, %9 : vector<1x16x16x128xf32>
    %c0_7 = arith.constant 0 : index
    %c0_8 = arith.constant 0 : index
    %c0_9 = arith.constant 0 : index
    %c0_10 = arith.constant 0 : index
    %11 = vector.load %arg4[%c0_7, %c0_8, %c0_9, %c0_10] : memref<1x16x16x128xf32, #tpu.memory_space<vmem>>, vector<1x16x16x128xf32>
    tpu.vector_store %arg4[%c0_7, %c0_8, %c0_9, %c0_10], %10 {strides = array<i32>} : memref<1x16x16x128xf32, #tpu.memory_space<vmem>>, vector<1x16x16x128xf32>,
    %12 = vector.shape_cast %10 : vector<1x16x16x128xf32> to vector<1x8x2x8x2x128xf32>
    %cst_11 = arith.constant dense<0xFF800000> : vector<1x8x8x128xf32>
    %13 = vector.multi_reduction <maximumf>, %12, %cst_11 [2, 4] : vector<1x8x2x8x2x128xf32> to vector<1x8x8x128xf32>
    %c0_12 = arith.constant 0 : index
    %c0_13 = arith.constant 0 : index
    %c0_14 = arith.constant 0 : index
    %c0_15 = arith.constant 0 : index
    %14 = vector.load %arg5[%c0_12, %c0_13, %c0_14, %c0_15] : memref<1x8x8x128xf32, #tpu.memory_space<vmem>>, vector<1x8x8x128xf32>
    tpu.vector_store %arg5[%c0_12, %c0_13, %c0_14, %c0_15], %13 {strides = array<i32>} : memref<1x8x8x128xf32, #tpu.memory_space<vmem>>, vector<1x8x8x128xf32>,
    return
  }
  func.func @transform_0(%arg0: i32) -> (i32, i32, i32, i32) {
    %c0_i32 = arith.constant 0 : i32
    %c0_i32_0 = arith.constant 0 : i32
    %c0_i32_1 = arith.constant 0 : i32
    %c0_i32_2 = arith.constant 0 : i32
    return %arg0, %c0_i32, %c0_i32_0, %c0_i32_1 : i32, i32, i32, i32
  }
  func.func @transform_1(%arg0: i32) -> (i32, i32) {
    %c0_i32 = arith.constant 0 : i32
    %c0_i32_0 = arith.constant 0 : i32
    %c0_i32_1 = arith.constant 0 : i32
    return %c0_i32, %c0_i32_0 : i32, i32
  }
  func.func @transform_2(%arg0: i32) -> (i32, i32) {
    %c0_i32 = arith.constant 0 : i32
    %c0_i32_0 = arith.constant 0 : i32
    %c0_i32_1 = arith.constant 0 : i32
    return %c0_i32, %c0_i32_0 : i32, i32
  }
  func.func @transform_3(%arg0: i32) -> (i32, i32, i32, i32) {
    %c0_i32 = arith.constant 0 : i32
    %c0_i32_0 = arith.constant 0 : i32
    %c0_i32_1 = arith.constant 0 : i32
    %c0_i32_2 = arith.constant 0 : i32
    return %arg0, %c0_i32, %c0_i32_0, %c0_i32_1 : i32, i32, i32, i32
  }
  func.func @transform_4(%arg0: i32) -> (i32, i32, i32, i32) {
    %c0_i32 = arith.constant 0 : i32
    %c0_i32_0 = arith.constant 0 : i32
    %c0_i32_1 = arith.constant 0 : i32
    %c0_i32_2 = arith.constant 0 : i32
    return %arg0, %c0_i32, %c0_i32_0, %c0_i32_1 : i32, i32, i32, i32
  }
}

</mosaic_0001>

<bundles_post_ra>
// kernel: encoder_forward.5
= control target key start
LH: loop header
LB: loop body
LE: loop exit
PB: predicated region body
PF: predicated region fallthrough
CT: control target
= control target key end

     0   :  { %s1960_s15 = smov 0   ;;  %s2823_s0 = inlined_call_operand.vmem [shape: f32[2,16,16,128], index: 0, kind: input, shape index: {}]   ;;  %s2824_s1 = inlined_call_operand.vmem [shape: f32[1,128], index: 1, kind: input, shape index: {}]   ;;  %s2825_s2 = inlined_call_operand.vmem [shape: f32[1,128], index: 2, kind: input, shape index: {}]   ;;  %s2826_s3 = inlined_call_operand.vmem [shape: f32[2,16,16,128], index: 3, kind: output, shape index: {0}]   ;;  %s2827_s4 = inlined_call_operand.vmem [shape: f32[2,8,8,128], index: 4, kind: output, shape index: {1}]  }
   0x1 LB: > { %s1897_s16 = sadd.s32 4294967295, %s1932_s15   ;;  %p1901_p0 = scmp.ge.s32.totalorder %s1932_s15, 1  ;;  %s1932_s15 = sphi %s1960_s15, %s15_s15  }
   0x2   : > { %p165_p1 = scmp.lt.s32.totalorder %s1932_s15, 3 }
   0x4   : > { %p166_p2 = pnand %p1901_p0, %p165_p1 }
   0x6   : > { %169 = sbr.rel (%p166_p2) target bundleno = 252 (0xfc), region = 32 }
   0xd   : > { %p196_p3 = scmp.lt.s32.totalorder %s1897_s16, 1  ;;  %v421_v0 = vlaneseq  ;;  %v1934_v1 = vmov 1983009808   ;;  %v1974_v3 = vld [vmem:[%s2824_s1] ss:$0 sm:$0xff]  ;;  %vm1089_vm0 = vcmask 1041408  }
   0xe   : > { %v419_v2 = vunpack.c.l.s4 %v1934_v1  ;;  %v1984_v6 = vld [vmem:[%s2825_s2] ss:$0 sm:$0xff]  ;;  %vm1730_vm1 = vcmask 1041409   ;;  %vm1732_vm2 = vcmask 1042434   ;;  %vm1734_vm3 = vcmask 1043459  }
   0xf   : > { %s2967_s16 = smov (!%p196_p3, %s1897_s16), 1  ;;  %v422_v5 = vshrl.u32 %v421_v0, 7  ;;  %vm1736_vm4 = vcmask 1044484   ;;  %vm1738_vm5 = vcmask 1045509   ;;  %vm1740_vm6 = vcmask 1046534  }
  0x10   : > { %s1912_s17 = sshll.u32 %s2967_s16, 8  ;;  %v420_v4 = vunpack.c.0.s8 %v419_v2  ;;  %vm1742_vm7 = vcmask 1047559   ;;  %s1914_s6 = sshll.u32 %s2967_s16, 6 }
  0x11   : > { %s1979_s22 = scalar_lea.vmem %s2823_s0, %s1912_s17  ;;  %s2009_s27 = scalar_lea.vmem %s2826_s3, %s1912_s17 }
  0x12   : > { %v211_v7 = vld [vmem:[%s1979_s22] sm:$0xff]  ;;  %v212_v8 = vld [vmem:[%s1979_s22 + $0x8] sm:$0xff]  ;;  %v213_v9 = vld [vmem:[%s1979_s22 + $0x10] sm:$0xff]  ;;  %v1995_v16 = vsub.s32 %v420_v4, %v422_v5  ;;  %s2623_s9 = scalar_lea.vmem %s2827_s4, %s1914_s6 }
  0x13   : > { %v250_v10 = vmul.f32 %v1974_v3, %v211_v7  ;;  %v251_v11 = vmul.f32 %v1974_v3, %v212_v8  ;;  %v252_v12 = vmul.f32 %v1974_v3, %v213_v9  ;;  %v214_v13 = vld [vmem:[%s1979_s22 + $0x18] sm:$0xff]  ;;  %v215_v14 = vld [vmem:[%s1979_s22 + $0x20] sm:$0xff]  ;;  %v216_v15 = vld [vmem:[%s1979_s22 + $0x28] sm:$0xff] }
  0x14   : > { %v253_v17 = vmul.f32 %v1974_v3, %v214_v13  ;;  %v254_v18 = vmul.f32 %v1974_v3, %v215_v14  ;;  %v255_v19 = vmul.f32 %v1974_v3, %v216_v15  ;;  %v217_v20 = vld [vmem:[%s1979_s22 + $0x30] sm:$0xff]  ;;  %v218_v21 = vld [vmem:[%s1979_s22 + $0x38] sm:$0xff] }
  0x15   : > { %v289_v22 = vadd.f32 %v1984_v6, %v250_v10  ;;  %v290_v23 = vadd.f32 %v1984_v6, %v251_v11  ;;  %v291_v24 = vadd.f32 %v1984_v6, %v252_v12  ;;  %v256_v25 = vmul.f32 %v1974_v3, %v217_v20 }
  0x16   : > { %v292_v26 = vadd.f32 %v1984_v6, %v253_v17  ;;  %v293_v27 = vadd.f32 %v1984_v6, %v254_v18  ;;  %v294_v28 = vadd.f32 %v1984_v6, %v255_v19  ;;  %v257_v29 = vmul.f32 %v1974_v3, %v218_v21 }
  0x17   : > { %v321_v30 = vmax.f32 %v289_v22, 0.0  ;;  %v322_v31 = vmax.f32 %v290_v23, 0.0  ;;  %v323_v32 = vmax.f32 %v291_v24, 0.0  ;;  %v2016_v33 = vadd.f32 %v1984_v6, %v256_v25 }
  0x18   : > { %v324_v34 = vmax.f32 %v292_v26, 0.0  ;;  %v2018_v35 = vmax.f32 %v293_v27, 0.0  ;;  %v2020_v36 = vmax.f32 %v294_v28, 0.0  ;;  %v2023_v37 = vadd.f32 %v1984_v6, %v257_v29 }
  0x19   : > { %353 = vst [vmem:[%s2009_s27] sm:$0xff] %v321_v30  ;;  %v417_v38 = vcombine.high %v321_v30, %v321_v30  ;;  %v424_v39 = vrot.slane %v321_v30, %v1995_v16  ;;  %354 = vst [vmem:[%s2009_s27 + $0x8] sm:$0xff] %v322_v31  ;;  %v434_v40 = vcombine.high %v322_v31, %v322_v31 }
  0x1a   : > { %v441_v41 = vrot.slane %v322_v31, %v1995_v16  ;;  %355 = vst [vmem:[%s2009_s27 + $0x10] sm:$0xff] %v323_v32  ;;  %v451_v42 = vcombine.high %v323_v32, %v323_v32  ;;  %v458_v43 = vrot.slane %v323_v32, %v1995_v16  ;;  %356 = vst [vmem:[%s2009_s27 + $0x18] sm:$0xff] %v324_v34 }
  0x1b   : > { %v468_v44 = vcombine.high %v324_v34, %v324_v34  ;;  %v475_v45 = vrot.slane %v324_v34, %v1995_v16  ;;  %357 = vst [vmem:[%s2009_s27 + $0x20] sm:$0xff] %v2018_v35  ;;  %358 = vst [vmem:[%s2009_s27 + $0x28] sm:$0xff] %v2020_v36  ;;  %v431_v46 = vrot.slane %v417_v38, %v1995_v16  ;;  %v1090_v48 = vsel %vm1089_vm0, %v424_v39, -inf }
  0x1c   : > { %v432_v47 = vcombine.high %v424_v39, %v424_v39  ;;  %v2040_v49 = vrot.slane %v434_v40, %v1995_v16  ;;  %v449_v50 = vcombine.high %v441_v41, %v441_v41  ;;  %v1126_v51 = vsel %vm1089_vm0, %v441_v41, -inf }
  0x1d   : > { %v465_v52 = vrot.slane %v451_v42, %v1995_v16  ;;  %v466_v53 = vcombine.high %v458_v43, %v458_v43  ;;  %v433_v54 = vcombine.high %v431_v46, %v431_v46  ;;  %v1108_v56 = vsel %vm1089_vm0, %v431_v46, -inf }
  0x1e   : > { %v1099_v55 = vsel %vm1089_vm0, %v432_v47, -inf  ;;  %v1135_v58 = vsel %vm1089_vm0, %v449_v50, -inf  ;;  %v2051_v59 = vsel %vm1089_vm0, %v2040_v49, -inf  ;;  %v1091_v61 = vsel %vm1089_vm0, %v458_v43, -inf  ;;  %v233_v50 = vld [vmem:[%s1979_s22 + $0xb0] sm:$0xff] }
  0x1f   : > { %v467_v60 = vcombine.high %v465_v52, %v465_v52  ;;  %v1117_v62 = vsel %vm1089_vm0, %v433_v54, -inf  ;;  %v1092_v63 = vmax.f32 %v1090_v48, %v1091_v61  ;;  %v1100_v0 = vsel %vm1089_vm0, %v466_v53, -inf  ;;  %v219_v48 = vld [vmem:[%s1979_s22 + $0x40] sm:$0xff]  ;;  %v222_v61 = vld [vmem:[%s1979_s22 + $0x58] sm:$0xff] }
  0x20   : > { %v1109_v1 = vsel %vm1089_vm0, %v465_v52, -inf  ;;  %v1101_v2 = vmax.f32 %v1099_v55, %v1100_v0  ;;  %v2059_v7 = vrot.slane %v468_v44, %v1995_v16  ;;  %v483_v10 = vcombine.high %v475_v45, %v475_v45 }
  0x21   : > { %v1110_v4 = vmax.f32 %v1108_v56, %v1109_v1  ;;  %v1118_v5 = vsel %vm1089_vm0, %v467_v60, -inf  ;;  %v1093_v8 = vrot.slane %v1092_v63, 4  ;;  %v1127_v11 = vsel %vm1089_vm0, %v475_v45, -inf  ;;  %v221_v60 = vld [vmem:[%s1979_s22 + $0x50] sm:$0xff] }
  0x22   : > { %v1119_v9 = vmax.f32 %v1117_v62, %v1118_v5  ;;  %v1102_v12 = vrot.slane %v1101_v2, 4  ;;  %v1128_v15 = vmax.f32 %v1126_v51, %v1127_v11  ;;  %v1136_v19 = vsel %vm1089_vm0, %v483_v10, -inf }
  0x23   : > { %v1111_v13 = vrot.slane %v1110_v4, 4  ;;  %v1094_v17 = vmax.f32 %v1092_v63, %v1093_v8  ;;  %v2067_v20 = vsel %vm1089_vm0, %v2059_v7, -inf  ;;  %v2069_v24 = vmax.f32 %v1135_v58, %v1136_v19  ;;  %v220_v58 = vld [vmem:[%s1979_s22 + $0x48] sm:$0xff] }
  0x24   : > { %v1120_v18 = vrot.slane %v1119_v9, 4  ;;  %v1103_v21 = vmax.f32 %v1101_v2, %v1102_v12  ;;  %v1129_v23 = vrot.slane %v1128_v15, 4  ;;  %v485_v27 = vcombine.high %v2018_v35, %v2018_v35 }
  0x25   : > { %v1112_v22 = vmax.f32 %v1110_v4, %v1111_v13  ;;  %v1095_v25 = vrot.slane %v1094_v17, 2  ;;  %v492_v28 = vrot.slane %v2018_v35, %v1995_v16  ;;  %v502_v32 = vcombine.high %v2020_v36, %v2020_v36 }
  0x26   : > { %v2071_v26 = vmax.f32 %v1119_v9, %v1120_v18  ;;  %v1104_v29 = vrot.slane %v1103_v21, 2  ;;  %v2077_v31 = vmax.f32 %v1128_v15, %v1129_v23  ;;  %v499_v38 = vrot.slane %v485_v27, %v1995_v16 }
  0x27   : > { %v1113_v30 = vrot.slane %v1112_v22, 2  ;;  %v1096_v34 = vmax.f32 %v1094_v17, %v1095_v25  ;;  %v500_v39 = vcombine.high %v492_v28, %v492_v28  ;;  %v1162_v40 = vsel %vm1089_vm0, %v492_v28, -inf }
  0x28   : > { %v2083_v41 = vmax.f32 %v1103_v21, %v1104_v29  ;;  %v509_v43 = vrot.slane %v2020_v36, %v1995_v16  ;;  %v501_v45 = vcombine.high %v499_v38, %v499_v38  ;;  %v1180_v47 = vsel %vm1089_vm0, %v499_v38, -inf }
  0x29   : > { %v2085_v42 = vmax.f32 %v1112_v22, %v1113_v30  ;;  %v1097_v44 = vrot.slane %v1096_v34, 1  ;;  %v1171_v46 = vsel %vm1089_vm0, %v500_v39, -inf  ;;  %v2095_v51 = vrot.slane %v502_v32, %v1995_v16 }
  0x2a   : > { %v517_v52 = vcombine.high %v509_v43, %v509_v43  ;;  %v1198_v53 = vsel %vm1089_vm0, %v509_v43, -inf  ;;  %v1189_v36 = vsel %vm1089_vm0, %v501_v45, -inf  ;;  %v327_v55 = vmax.f32 %v2016_v33, 0.0 }
  0x2b   : > { %v2098_v54 = vmax.f32 %v1096_v34, %v1097_v44  ;;  %v328_v56 = vmax.f32 %v2023_v37, 0.0  ;;  %v2111_v0 = vsel %vm1089_vm0, %v2095_v51, -inf  ;;  %v258_v1 = vmul.f32 %v1974_v3, %v219_v48 }
  0x2c   : > { %v1207_v63 = vsel %vm1089_vm0, %v517_v52, -inf  ;;  %359 = vst [vmem:[%s2009_s27 + $0x30] sm:$0xff] %v327_v55  ;;  %v519_v2 = vcombine.high %v327_v55, %v327_v55  ;;  %v526_v33 = vrot.slane %v327_v55, %v1995_v16  ;;  %v259_v8 = vmul.f32 %v1974_v3, %v220_v58 }
  0x2d   : > { %360 = vst [vmem:[%s2009_s27 + $0x38] sm:$0xff] %v328_v56  ;;  %v536_v37 = vcombine.high %v328_v56, %v328_v56  ;;  %v543_v4 = vrot.slane %v328_v56, %v1995_v16  ;;  %v297_v5 = vadd.f32 %v1984_v6, %v258_v1  ;;  %v260_v9 = vmul.f32 %v1974_v3, %v221_v60 }
  0x2e   : > { %v261_v10 = vmul.f32 %v1974_v3, %v222_v61  ;;  %v533_v11 = vrot.slane %v519_v2, %v1995_v16  ;;  %v534_v12 = vcombine.high %v526_v33, %v526_v33  ;;  %v1163_v13 = vsel %vm1089_vm0, %v526_v33, -inf }
  0x2f   : > { %v2125_v15 = vrot.slane %v536_v37, %v1995_v16  ;;  %v1164_v17 = vmax.f32 %v1162_v40, %v1163_v13  ;;  %v551_v18 = vcombine.high %v543_v4, %v543_v4  ;;  %v1199_v19 = vsel %vm1089_vm0, %v543_v4, -inf }
  0x30   : > { %v329_v21 = vmax.f32 %v297_v5, 0.0  ;;  %v535_v22 = vcombine.high %v533_v11, %v533_v11  ;;  %v1172_v23 = vsel %vm1089_vm0, %v534_v12, -inf  ;;  %v1181_v25 = vsel %vm1089_vm0, %v533_v11, -inf  ;;  %v223_v5 = vld [vmem:[%s1979_s22 + $0x60] sm:$0xff]  ;;  %v224_v11 = vld [vmem:[%s1979_s22 + $0x68] sm:$0xff] }
  0x31   : > { %v1165_v28 = vrot.slane %v1164_v17, 4  ;;  %v1173_v29 = vmax.f32 %v1171_v46, %v1172_v23  ;;  %v1182_v30 = vmax.f32 %v1180_v47, %v1181_v25  ;;  %v1200_v32 = vmax.f32 %v1198_v53, %v1199_v19  ;;  %v225_v19 = vld [vmem:[%s1979_s22 + $0x70] sm:$0xff] }
  0x32   : > { %361 = vst [vmem:[%s2009_s27 + $0x40] sm:$0xff] %v329_v21  ;;  %v1190_v34 = vsel %vm1089_vm0, %v535_v22, -inf  ;;  %v1208_v38 = vsel %vm1089_vm0, %v551_v18, -inf  ;;  %v2137_v39 = vsel %vm1089_vm0, %v2125_v15, -inf  ;;  %v553_v40 = vcombine.high %v329_v21, %v329_v21 }
  0x33   : > { %v1166_v43 = vmax.f32 %v1164_v17, %v1165_v28  ;;  %v1174_v44 = vrot.slane %v1173_v29, 4  ;;  %v1183_v45 = vrot.slane %v1182_v30, 4  ;;  %v1191_v48 = vmax.f32 %v1189_v36, %v1190_v34  ;;  %v226_v34 = vld [vmem:[%s1979_s22 + $0x78] sm:$0xff] }
  0x34   : > { %v1201_v52 = vrot.slane %v1200_v32, 4  ;;  %v2139_v55 = vmax.f32 %v1207_v63, %v1208_v38  ;;  %v560_v46 = vrot.slane %v329_v21, %v1995_v16  ;;  %v567_v47 = vrot.slane %v553_v40, %v1995_v16 }
  0x35   : > { %v1167_v53 = vrot.slane %v1166_v43, 2  ;;  %v1175_v56 = vmax.f32 %v1173_v29, %v1174_v44  ;;  %v1184_v58 = vmax.f32 %v1182_v30, %v1183_v45  ;;  %v1192_v60 = vrot.slane %v1191_v48, 4 }
  0x36   : > { %v2143_v61 = vmax.f32 %v1200_v32, %v1201_v52  ;;  %v568_v1 = vcombine.high %v560_v46, %v560_v46  ;;  %v569_v2 = vcombine.high %v567_v47, %v567_v47  ;;  %v1234_v36 = vsel %vm1089_vm0, %v560_v46, -inf }
  0x37   : > { %v1168_v33 = vmax.f32 %v1166_v43, %v1167_v53  ;;  %v1176_v37 = vrot.slane %v1175_v56, 2  ;;  %v1185_v63 = vrot.slane %v1184_v58, 2  ;;  %v2146_v4 = vmax.f32 %v1191_v48, %v1192_v60 }
  0x38   : > { %v1243_v13 = vsel %vm1089_vm0, %v568_v1, -inf  ;;  %v1252_v17 = vsel %vm1089_vm0, %v567_v47, -inf  ;;  %v1261_v18 = vsel %vm1089_vm0, %v569_v2, -inf  ;;  %v298_v25 = vadd.f32 %v1984_v6, %v259_v8 }
  0x39   : > { %v1169_v21 = vrot.slane %v1168_v33, 1  ;;  %v2155_v22 = vmax.f32 %v1175_v56, %v1176_v37  ;;  %v2157_v23 = vmax.f32 %v1184_v58, %v1185_v63  ;;  %v299_v28 = vadd.f32 %v1984_v6, %v260_v9 }
  0x3a   : > { %v300_v29 = vadd.f32 %v1984_v6, %v261_v10  ;;  %v262_v30 = vmul.f32 %v1974_v3, %v223_v5  ;;  %v263_v32 = vmul.f32 %v1974_v3, %v224_v11  ;;  %v330_v43 = vmax.f32 %v298_v25, 0.0 }
  0x3b   : > { %v2165_v38 = vmax.f32 %v1168_v33, %v1169_v21  ;;  %v264_v44 = vmul.f32 %v1974_v3, %v225_v19  ;;  %v331_v45 = vmax.f32 %v299_v28, 0.0  ;;  %v2179_v47 = vmul.f32 %v1974_v3, %v226_v34 }
  0x3c   : > { %v332_v8 = vmax.f32 %v300_v29, 0.0  ;;  %v301_v9 = vadd.f32 %v1984_v6, %v262_v30  ;;  %v2171_v10 = vadd.f32 %v1984_v6, %v263_v32  ;;  %362 = vst [vmem:[%s2009_s27 + $0x48] sm:$0xff] %v330_v43  ;;  %v570_v48 = vcombine.high %v330_v43, %v330_v43 }
  0x3d   : > { %v577_v52 = vrot.slane %v330_v43, %v1995_v16  ;;  %v2176_v46 = vadd.f32 %v1984_v6, %v264_v44  ;;  %363 = vst [vmem:[%s2009_s27 + $0x50] sm:$0xff] %v331_v45  ;;  %v587_v53 = vcombine.high %v331_v45, %v331_v45  ;;  %v594_v56 = vrot.slane %v331_v45, %v1995_v16 }
  0x3e   : > { %364 = vst [vmem:[%s2009_s27 + $0x58] sm:$0xff] %v332_v8  ;;  %v604_v58 = vcombine.high %v332_v8, %v332_v8  ;;  %v611_v60 = vrot.slane %v332_v8, %v1995_v16  ;;  %v2186_v1 = vrot.slane %v570_v48, %v1995_v16  ;;  %v333_v37 = vmax.f32 %v301_v9, 0.0 }
  0x3f   : > { %v585_v2 = vcombine.high %v577_v52, %v577_v52  ;;  %v1270_v33 = vsel %vm1089_vm0, %v577_v52, -inf  ;;  %v601_v63 = vrot.slane %v587_v53, %v1995_v16  ;;  %v602_v5 = vcombine.high %v594_v56, %v594_v56 }
  0x40   : > { %v1235_v11 = vsel %vm1089_vm0, %v594_v56, -inf  ;;  %v2192_v19 = vrot.slane %v604_v58, %v1995_v16  ;;  %v2199_v28 = vsel %vm1089_vm0, %v2186_v1, -inf  ;;  %365 = vst [vmem:[%s2009_s27 + $0x60] sm:$0xff] %v333_v37  ;;  %v619_v43 = vcombine.high %v611_v60, %v611_v60 }
  0x41   : > { %v1279_v25 = vsel %vm1089_vm0, %v585_v2, -inf  ;;  %v1236_v29 = vmax.f32 %v1234_v36, %v1235_v11  ;;  %v603_v30 = vcombine.high %v601_v63, %v601_v63  ;;  %v1244_v32 = vsel %vm1089_vm0, %v602_v5, -inf }
  0x42   : > { %v1253_v34 = vsel %vm1089_vm0, %v601_v63, -inf  ;;  %v1245_v45 = vmax.f32 %v1243_v13, %v1244_v32  ;;  %v1271_v52 = vsel %vm1089_vm0, %v611_v60, -inf  ;;  %v1280_v53 = vsel %vm1089_vm0, %v619_v43, -inf }
  0x43   : > { %v1237_v44 = vrot.slane %v1236_v29, 4  ;;  %v1254_v8 = vmax.f32 %v1252_v17, %v1253_v34  ;;  %v1262_v48 = vsel %vm1089_vm0, %v603_v30, -inf  ;;  %v2211_v36 = vsel %vm1089_vm0, %v2192_v19, -inf }
  0x44   : > { %v1246_v58 = vrot.slane %v1245_v45, 4  ;;  %v1263_v63 = vmax.f32 %v1261_v18, %v1262_v48  ;;  %v1272_v5 = vmax.f32 %v1270_v33, %v1271_v52  ;;  %v2213_v13 = vmax.f32 %v1279_v25, %v1280_v53 }
  0x45   : > { %v1238_v56 = vmax.f32 %v1236_v29, %v1237_v44  ;;  %v1255_v2 = vrot.slane %v1254_v8, 4  ;;  %v621_v17 = vcombine.high %v333_v37, %v333_v37  ;;  %v628_v11 = vrot.slane %v333_v37, %v1995_v16 }
  0x46   : > { %v1247_v30 = vmax.f32 %v1245_v45, %v1246_v58  ;;  %v1264_v60 = vrot.slane %v1263_v63, 4  ;;  %v1273_v9 = vrot.slane %v1272_v5, 4  ;;  %v227_v58 = vld [vmem:[%s1979_s22 + $0x80] sm:$0xff] }
  0x47   : > { %v1239_v32 = vrot.slane %v1238_v56, 2  ;;  %v1256_v34 = vmax.f32 %v1254_v8, %v1255_v2  ;;  %v635_v43 = vrot.slane %v621_v17, %v1995_v16  ;;  %v636_v21 = vcombine.high %v628_v11, %v628_v11 }
  0x48   : > { %v1306_v29 = vsel %vm1089_vm0, %v628_v11, -inf  ;;  %v1248_v27 = vrot.slane %v1247_v30, 2  ;;  %v2218_v33 = vmax.f32 %v1263_v63, %v1264_v60  ;;  %v2220_v25 = vmax.f32 %v1272_v5, %v1273_v9  ;;  %v228_v5 = vld [vmem:[%s1979_s22 + $0x88] sm:$0xff] }
  0x49   : > { %v1240_v44 = vmax.f32 %v1238_v56, %v1239_v32  ;;  %v1257_v18 = vrot.slane %v1256_v34, 2  ;;  %v637_v37 = vcombine.high %v635_v43, %v635_v43  ;;  %v1315_v45 = vsel %vm1089_vm0, %v636_v21, -inf }
  0x4a   : > { %v1324_v8 = vsel %vm1089_vm0, %v635_v43, -inf  ;;  %v2224_v52 = vmax.f32 %v1247_v30, %v1248_v27  ;;  %v334_v56 = vmax.f32 %v2171_v10, 0.0  ;;  %v335_v63 = vmax.f32 %v2176_v46, 0.0 }
  0x4b   : > { %v1241_v48 = vrot.slane %v1240_v44, 1  ;;  %v2226_v53 = vmax.f32 %v1256_v34, %v1257_v18  ;;  %v1333_v9 = vsel %vm1089_vm0, %v637_v37, -inf  ;;  %v304_v21 = vadd.f32 %v1984_v6, %v2179_v47 }
  0x4c   : > { %366 = vst [vmem:[%s2009_s27 + $0x68] sm:$0xff] %v334_v56  ;;  %v638_v11 = vcombine.high %v334_v56, %v334_v56  ;;  %v645_v10 = vrot.slane %v334_v56, %v1995_v16  ;;  %367 = vst [vmem:[%s2009_s27 + $0x70] sm:$0xff] %v335_v63  ;;  %v655_v32 = vcombine.high %v335_v63, %v335_v63 }
  0x4d   : > { %v2236_v17 = vmax.f32 %v1240_v44, %v1241_v48  ;;  %v662_v30 = vrot.slane %v335_v63, %v1995_v16  ;;  %v336_v34 = vmax.f32 %v304_v21, 0.0  ;;  %v266_v46 = vmul.f32 %v1974_v3, %v227_v58 }
  0x4e   : > { %v2245_v60 = vrot.slane %v638_v11, %v1995_v16  ;;  %v653_v47 = vcombine.high %v645_v10, %v645_v10  ;;  %v1342_v43 = vsel %vm1089_vm0, %v645_v10, -inf  ;;  %v267_v44 = vmul.f32 %v1974_v3, %v228_v5 }
  0x4f   : > { %v669_v18 = vrot.slane %v655_v32, %v1995_v16  ;;  %v670_v37 = vcombine.high %v662_v30, %v662_v30  ;;  %v1307_v48 = vsel %vm1089_vm0, %v662_v30, -inf  ;;  %368 = vst [vmem:[%s2009_s27 + $0x78] sm:$0xff] %v336_v34  ;;  %v672_v56 = vcombine.high %v336_v34, %v336_v34 }
  0x50   : > { %2865 = vst [vmem:[#allocation2_spill] sm:$0xff] %v2245_v60  ;;  %v1351_v58 = vsel %vm1089_vm0, %v653_v47, -inf  ;;  %v2257_v21 = vsel %vm1089_vm0, %v2245_v60, -inf  ;;  %v1308_v11 = vmax.f32 %v1306_v29, %v1307_v48  ;;  %v679_v2 = vrot.slane %v336_v34, %v1995_v16 }
  0x51   : > { %2866 = vst [vmem:[#allocation3_spill] sm:$0xff] %v2257_v21  ;;  %v671_v10 = vcombine.high %v669_v18, %v669_v18  ;;  %v1316_v5 = vsel %vm1089_vm0, %v670_v37, -inf  ;;  %v1325_v32 = vsel %vm1089_vm0, %v669_v18, -inf  ;;  %v2263_v12 = vrot.slane %v672_v56, %v1995_v16 }
  0x52   : > { %v1309_v30 = vrot.slane %v1308_v11, 4  ;;  %v1317_v27 = vmax.f32 %v1315_v45, %v1316_v5  ;;  %v1326_v62 = vmax.f32 %v1324_v8, %v1325_v32  ;;  %v687_v63 = vcombine.high %v679_v2, %v679_v2 }
  0x53   : > { %2867 = vst [vmem:[#allocation4_spill] sm:$0xff] %v2263_v12  ;;  %v1334_v47 = vsel %vm1089_vm0, %v671_v10, -inf  ;;  %v1343_v40 = vsel %vm1089_vm0, %v679_v2, -inf  ;;  %v305_v29 = vadd.f32 %v1984_v6, %v266_v46  ;;  %v2273_v56 = vsel %vm1089_vm0, %v2263_v12, -inf }
  0x54   : > { %v1310_v48 = vmax.f32 %v1308_v11, %v1309_v30  ;;  %v1318_v37 = vrot.slane %v1317_v27, 4  ;;  %v1327_v14 = vrot.slane %v1326_v62, 4  ;;  %v1335_v18 = vmax.f32 %v1333_v9, %v1334_v47  ;;  %2868 = vst [vmem:[#allocation5_spill] sm:$0xff] %v2273_v56  ;;  %v229_v47 = vld [vmem:[%s1979_s22 + $0x90] sm:$0xff] }
  0x55   : > { %v1344_v45 = vmax.f32 %v1342_v43, %v1343_v40  ;;  %v1352_v8 = vsel %vm1089_vm0, %v687_v63, -inf  ;;  %v337_v30 = vmax.f32 %v305_v29, 0.0  ;;  %v306_v9 = vadd.f32 %v1984_v6, %v267_v44 }
  0x56   : > { %v1311_v10 = vrot.slane %v1310_v48, 2  ;;  %v1319_v2 = vmax.f32 %v1317_v27, %v1318_v37  ;;  %v1328_v5 = vmax.f32 %v1326_v62, %v1327_v14  ;;  %v1336_v46 = vrot.slane %v1335_v18, 4 }
  0x57   : > { %v1345_v11 = vrot.slane %v1344_v45, 4  ;;  %v2275_v32 = vmax.f32 %v1351_v58, %v1352_v8  ;;  %369 = vst [vmem:[%s2009_s27 + $0x80] sm:$0xff] %v337_v30  ;;  %v689_v27 = vcombine.high %v337_v30, %v337_v30  ;;  %v696_v14 = vrot.slane %v337_v30, %v1995_v16 }
  0x58   : > { %v1312_v34 = vmax.f32 %v1310_v48, %v1311_v10  ;;  %v1320_v40 = vrot.slane %v1319_v2, 2  ;;  %v1329_v43 = vrot.slane %v1328_v5, 2  ;;  %v2279_v63 = vmax.f32 %v1335_v18, %v1336_v46  ;;  %v230_v10 = vld [vmem:[%s1979_s22 + $0x98] sm:$0xff] }
  0x59   : > { %2869 = vst [vmem:[#allocation6_spill] sm:$0xff] %v2275_v32  ;;  %v2281_v57 = vmax.f32 %v1344_v45, %v1345_v11  ;;  %v338_v62 = vmax.f32 %v306_v9, 0.0  ;;  %v268_v48 = vmul.f32 %v1974_v3, %v229_v47  ;;  %v703_v18 = vrot.slane %v689_v27, %v1995_v16  ;;  %v232_v9 = vld [vmem:[%s1979_s22 + $0xa8] sm:$0xff] }
  0x5a   : > { %2870 = vst [vmem:[#allocation7_spill] sm:$0xff] %v2279_v63  ;;  %v1313_v58 = vrot.slane %v1312_v34, 1  ;;  %v2285_v29 = vmax.f32 %v1319_v2, %v1320_v40  ;;  %v2287_v44 = vmax.f32 %v1328_v5, %v1329_v43  ;;  %v704_v45 = vcombine.high %v696_v14, %v696_v14  ;;  %v231_v5 = vld [vmem:[%s1979_s22 + $0xa0] sm:$0xff] }
  0x5b   : > { %2871 = vst [vmem:[#allocation8_spill] sm:$0xff] %v2281_v57  ;;  %v1378_v8 = vsel %vm1089_vm0, %v696_v14, -inf  ;;  %370 = vst [vmem:[%s2009_s27 + $0x88] sm:$0xff] %v338_v62  ;;  %v706_v30 = vcombine.high %v338_v62, %v338_v62  ;;  %v713_v2 = vrot.slane %v338_v62, %v1995_v16  ;;  %v705_v47 = vcombine.high %v703_v18, %v703_v18 }
  0x5c   : > { %2872 = vst [vmem:[#allocation9_spill] sm:$0xff] %v2285_v29  ;;  %2873 = vst [vmem:[#allocation10_spill] sm:$0xff] %v2287_v44  ;;  %v2295_v46 = vmax.f32 %v1312_v34, %v1313_v58  ;;  %v1387_v40 = vsel %vm1089_vm0, %v704_v45, -inf  ;;  %v1396_v43 = vsel %vm1089_vm0, %v703_v18, -inf  ;;  %v307_v27 = vadd.f32 %v1984_v6, %v268_v48  ;;  %v234_v18 = vld [vmem:[%s1979_s22 + $0xb8] sm:$0xff] }
  0x5d   : > { %v2305_v34 = vrot.slane %v706_v30, %v1995_v16  ;;  %v721_v14 = vcombine.high %v713_v2, %v713_v2  ;;  %v1414_v58 = vsel %vm1089_vm0, %v713_v2, -inf  ;;  %v269_v62 = vmul.f32 %v1974_v3, %v230_v10 }
  0x5e   : > { %2874 = vst [vmem:[#allocation11_spill] sm:$0xff] %v2295_v46  ;;  %v1405_v37 = vsel %vm1089_vm0, %v705_v47, -inf  ;;  %v339_v11 = vmax.f32 %v307_v27, 0.0  ;;  %v270_v35 = vmul.f32 %v1974_v3, %v231_v5  ;;  %v271_v45 = vmul.f32 %v1974_v3, %v232_v9  ;;  %v235_v46 = vld [vmem:[%s1979_s22 + $0xc0] sm:$0xff] }
  0x5f   : > { %2875 = vst [vmem:[#allocation12_spill] sm:$0xff] %v2305_v34  ;;  %v1423_v30 = vsel %vm1089_vm0, %v721_v14, -inf  ;;  %v2320_v2 = vsel %vm1089_vm0, %v2305_v34, -inf  ;;  %v308_v10 = vadd.f32 %v1984_v6, %v269_v62  ;;  %v272_v48 = vmul.f32 %v1974_v3, %v233_v50 }
  0x60   : > { %2876 = vst [vmem:[#allocation13_spill] sm:$0xff] %v2320_v2  ;;  %371 = vst [vmem:[%s2009_s27 + $0x90] sm:$0xff] %v339_v11  ;;  %v723_v47 = vcombine.high %v339_v11, %v339_v11  ;;  %v730_v5 = vrot.slane %v339_v11, %v1995_v16  ;;  %v309_v9 = vadd.f32 %v1984_v6, %v270_v35 }
  0x61   : > { %v310_v27 = vadd.f32 %v1984_v6, %v271_v45  ;;  %v340_v12 = vmax.f32 %v308_v10, 0.0  ;;  %v273_v14 = vmul.f32 %v1974_v3, %v234_v18  ;;  %v2330_v34 = vmul.f32 %v1974_v3, %v235_v46 }
  0x62   : > { %v737_v2 = vrot.slane %v723_v47, %v1995_v16  ;;  %v738_v62 = vcombine.high %v730_v5, %v730_v5  ;;  %v1379_v60 = vsel %vm1089_vm0, %v730_v5, -inf  ;;  %v341_v11 = vmax.f32 %v309_v9, 0.0 }
  0x63   : > { %v1380_v21 = vmax.f32 %v1378_v8, %v1379_v60  ;;  %372 = vst [vmem:[%s2009_s27 + $0x98] sm:$0xff] %v340_v12  ;;  %v740_v35 = vcombine.high %v340_v12, %v340_v12  ;;  %v747_v45 = vrot.slane %v340_v12, %v1995_v16  ;;  %v342_v10 = vmax.f32 %v310_v27, 0.0 }
  0x64   : > { %v739_v56 = vcombine.high %v737_v2, %v737_v2  ;;  %v1388_v50 = vsel %vm1089_vm0, %v738_v62, -inf  ;;  %v1397_v18 = vsel %vm1089_vm0, %v737_v2, -inf  ;;  %373 = vst [vmem:[%s2009_s27 + $0xa0] sm:$0xff] %v341_v11  ;;  %v757_v46 = vcombine.high %v341_v11, %v341_v11 }
  0x65   : > { %v1381_v32 = vrot.slane %v1380_v21, 4  ;;  %v1389_v47 = vmax.f32 %v1387_v40, %v1388_v50  ;;  %v1398_v57 = vmax.f32 %v1396_v43, %v1397_v18  ;;  %v2340_v5 = vrot.slane %v740_v35, %v1995_v16  ;;  %374 = vst [vmem:[%s2009_s27 + $0xa8] sm:$0xff] %v342_v10 }
  0x66   : > { %v1406_v60 = vsel %vm1089_vm0, %v739_v56, -inf  ;;  %v755_v8 = vcombine.high %v747_v45, %v747_v45  ;;  %v1415_v12 = vsel %vm1089_vm0, %v747_v45, -inf  ;;  %v764_v9 = vrot.slane %v341_v11, %v1995_v16 }
  0x67   : > { %2877 = vst [vmem:[#allocation14_spill] sm:$0xff] %v2340_v5  ;;  %v1382_v27 = vmax.f32 %v1380_v21, %v1381_v32  ;;  %v1390_v62 = vrot.slane %v1389_v47, 4  ;;  %v1399_v63 = vrot.slane %v1398_v57, 4  ;;  %v1407_v2 = vmax.f32 %v1405_v37, %v1406_v60 }
  0x68   : > { %v1416_v40 = vmax.f32 %v1414_v58, %v1415_v12  ;;  %v1424_v43 = vsel %vm1089_vm0, %v755_v8, -inf  ;;  %v2351_v35 = vsel %vm1089_vm0, %v2340_v5, -inf  ;;  %v771_v21 = vrot.slane %v757_v46, %v1995_v16 }
  0x69   : > { %2878 = vst [vmem:[#allocation15_spill] sm:$0xff] %v2351_v35  ;;  %v1383_v56 = vrot.slane %v1382_v27, 2  ;;  %v1391_v50 = vmax.f32 %v1389_v47, %v1390_v62  ;;  %v1400_v18 = vmax.f32 %v1398_v57, %v1399_v63  ;;  %v1408_v45 = vrot.slane %v1407_v2, 4 }
  0x6a   : > { %v1417_v29 = vrot.slane %v1416_v40, 4  ;;  %v2353_v11 = vmax.f32 %v1423_v30, %v1424_v43  ;;  %v772_v32 = vcombine.high %v764_v9, %v764_v9  ;;  %v773_v44 = vcombine.high %v771_v21, %v771_v21 }
  0x6b   : > { %v1384_v37 = vmax.f32 %v1382_v27, %v1383_v56  ;;  %v1392_v60 = vrot.slane %v1391_v50, 2  ;;  %v1401_v58 = vrot.slane %v1400_v18, 2  ;;  %v2356_v8 = vmax.f32 %v1407_v2, %v1408_v45  ;;  %v237_v56 = vld [vmem:[%s1979_s22 + $0xd0] sm:$0xff] }
  0x6c   : > { %2879 = vst [vmem:[#allocation16_spill] sm:$0xff] %v2353_v11  ;;  %v2358_v12 = vmax.f32 %v1416_v40, %v1417_v29  ;;  %v1450_v47 = vsel %vm1089_vm0, %v764_v9, -inf  ;;  %v1459_v57 = vsel %vm1089_vm0, %v772_v32, -inf  ;;  %v1468_v46 = vsel %vm1089_vm0, %v771_v21, -inf  ;;  %v236_v40 = vld [vmem:[%s1979_s22 + $0xc8] sm:$0xff] }
  0x6d   : > { %2880 = vst [vmem:[#allocation17_spill] sm:$0xff] %v2356_v8  ;;  %v1385_v63 = vrot.slane %v1384_v37, 1  ;;  %v2362_v30 = vmax.f32 %v1391_v50, %v1392_v60  ;;  %v2364_v62 = vmax.f32 %v1400_v18, %v1401_v58  ;;  %v1477_v43 = vsel %vm1089_vm0, %v773_v44, -inf }
  0x6e   : > { %2881 = vst [vmem:[#allocation18_spill] sm:$0xff] %v2358_v12  ;;  %v774_v2 = vcombine.high %v342_v10, %v342_v10  ;;  %v781_v29 = vrot.slane %v342_v10, %v1995_v16  ;;  %v311_v50 = vadd.f32 %v1984_v6, %v272_v48  ;;  %v312_v18 = vadd.f32 %v1984_v6, %v273_v14 }
  0x6f   : > { %v2372_v45 = vmax.f32 %v1384_v37, %v1385_v63  ;;  %v313_v10 = vadd.f32 %v1984_v6, %v2330_v34  ;;  %v275_v58 = vmul.f32 %v1974_v3, %v236_v40  ;;  %v276_v63 = vmul.f32 %v1974_v3, %v237_v56 }
  0x70   : > { %v2378_v21 = vrot.slane %v774_v2, %v1995_v16  ;;  %v789_v32 = vcombine.high %v781_v29, %v781_v29  ;;  %v1486_v44 = vsel %vm1089_vm0, %v781_v29, -inf  ;;  %v343_v37 = vmax.f32 %v311_v50, 0.0 }
  0x71   : > { %2882 = vst [vmem:[#allocation19_spill] sm:$0xff] %v2372_v45  ;;  %v344_v60 = vmax.f32 %v312_v18, 0.0  ;;  %v345_v29 = vmax.f32 %v313_v10, 0.0  ;;  %v314_v48 = vadd.f32 %v1984_v6, %v275_v58 }
  0x72   : > { %2883 = vst [vmem:[#allocation20_spill] sm:$0xff] %v2378_v21  ;;  %v1495_v14 = vsel %vm1089_vm0, %v789_v32, -inf  ;;  %v2390_v2 = vsel %vm1089_vm0, %v2378_v21, -inf  ;;  %375 = vst [vmem:[%s2009_s27 + $0xb0] sm:$0xff] %v343_v37  ;;  %v791_v27 = vcombine.high %v343_v37, %v343_v37  ;;  %v798_v34 = vrot.slane %v343_v37, %v1995_v16 }
  0x73   : > { %2884 = vst [vmem:[#allocation21_spill] sm:$0xff] %v2390_v2  ;;  %376 = vst [vmem:[%s2009_s27 + $0xb8] sm:$0xff] %v344_v60  ;;  %v808_v50 = vcombine.high %v344_v60, %v344_v60  ;;  %v815_v40 = vrot.slane %v344_v60, %v1995_v16  ;;  %v825_v56 = vcombine.high %v345_v29, %v345_v29 }
  0x74   : > { %377 = vst [vmem:[%s2009_s27 + $0xc0] sm:$0xff] %v345_v29  ;;  %v832_v18 = vrot.slane %v345_v29, %v1995_v16  ;;  %v315_v32 = vadd.f32 %v1984_v6, %v276_v63  ;;  %v805_v9 = vrot.slane %v791_v27, %v1995_v16  ;;  %v806_v21 = vcombine.high %v798_v34, %v798_v34 }
  0x75   : > { %v1451_v10 = vsel %vm1089_vm0, %v798_v34, -inf  ;;  %v2403_v2 = vrot.slane %v808_v50, %v1995_v16  ;;  %v823_v45 = vcombine.high %v815_v40, %v815_v40  ;;  %v1487_v60 = vsel %vm1089_vm0, %v815_v40, -inf }
  0x76   : > { %v1452_v37 = vmax.f32 %v1450_v47, %v1451_v10  ;;  %v839_v5 = vrot.slane %v825_v56, %v1995_v16  ;;  %v807_v35 = vcombine.high %v805_v9, %v805_v9  ;;  %v1460_v29 = vsel %vm1089_vm0, %v806_v21, -inf }
  0x77   : > { %2885 = vst [vmem:[#allocation22_spill] sm:$0xff] %v2403_v2  ;;  %v1469_v58 = vsel %vm1089_vm0, %v805_v9, -inf  ;;  %v1461_v63 = vmax.f32 %v1459_v57, %v1460_v29  ;;  %v1488_v11 = vmax.f32 %v1486_v44, %v1487_v60  ;;  %v1496_v47 = vsel %vm1089_vm0, %v823_v45, -inf  ;;  %v238_v29 = vld [vmem:[%s1979_s22 + $0xd8] sm:$0xff] }
  0x78   : > { %v1453_v27 = vrot.slane %v1452_v37, 4  ;;  %v1470_v34 = vmax.f32 %v1468_v46, %v1469_v58  ;;  %v1478_v50 = vsel %vm1089_vm0, %v807_v35, -inf  ;;  %v2415_v40 = vsel %vm1089_vm0, %v2403_v2, -inf }
  0x79   : > { %2886 = vst [vmem:[#allocation23_spill] sm:$0xff] %v2415_v40  ;;  %v840_v56 = vcombine.high %v832_v18, %v832_v18  ;;  %v1462_v10 = vrot.slane %v1461_v63, 4  ;;  %v1479_v12 = vmax.f32 %v1477_v43, %v1478_v50  ;;  %v1489_v6 = vrot.slane %v1488_v11, 4 }
  0x7a   : > { %v1454_v21 = vmax.f32 %v1452_v37, %v1453_v27  ;;  %v1471_v9 = vrot.slane %v1470_v34, 4  ;;  %v2417_v8 = vmax.f32 %v1495_v14, %v1496_v47  ;;  %v841_v57 = vcombine.high %v839_v5, %v839_v5  ;;  %v239_v27 = vld [vmem:[%s1979_s22 + $0xe0] sm:$0xff] }
  0x7b   : > { %v1522_v46 = vsel %vm1089_vm0, %v832_v18, -inf  ;;  %v1463_v44 = vmax.f32 %v1461_v63, %v1462_v10  ;;  %v1480_v45 = vrot.slane %v1479_v12, 4  ;;  %v2421_v58 = vmax.f32 %v1488_v11, %v1489_v6 }
  0x7c   : > { %2887 = vst [vmem:[#allocation24_spill] sm:$0xff] %v2417_v8  ;;  %v1455_v35 = vrot.slane %v1454_v21, 2  ;;  %v1472_v60 = vmax.f32 %v1470_v34, %v1471_v9  ;;  %v1531_v2 = vsel %vm1089_vm0, %v840_v56, -inf  ;;  %v1540_v37 = vsel %vm1089_vm0, %v839_v5, -inf }
  0x7d   : > { %2888 = vst [vmem:[#allocation25_spill] sm:$0xff] %v2421_v58  ;;  %v1549_v43 = vsel %vm1089_vm0, %v841_v57, -inf  ;;  %v1464_v50 = vrot.slane %v1463_v44, 2  ;;  %v2427_v18 = vmax.f32 %v1479_v12, %v1480_v45  ;;  %v346_v34 = vmax.f32 %v314_v48, 0.0 }
  0x7e   : > { %v1456_v14 = vmax.f32 %v1454_v21, %v1455_v35  ;;  %v1473_v47 = vrot.slane %v1472_v60, 2  ;;  %v347_v10 = vmax.f32 %v315_v32, 0.0  ;;  %v277_v11 = vmul.f32 %v1974_v3, %v238_v29  ;;  %v2446_v32 = vld [vmem:[%s2825_s2] ss:$0 sm:$0xff] }
  0x7f   : > { %v2431_v56 = vmax.f32 %v1463_v44, %v1464_v50  ;;  %v278_v5 = vmul.f32 %v1974_v3, %v239_v27  ;;  %378 = vst [vmem:[%s2009_s27 + $0xc8] sm:$0xff] %v346_v34  ;;  %v842_v57 = vcombine.high %v346_v34, %v346_v34  ;;  %v849_v21 = vrot.slane %v346_v34, %v1995_v16 }
  0x80   : > { %v1457_v6 = vrot.slane %v1456_v14, 1  ;;  %v2433_v9 = vmax.f32 %v1472_v60, %v1473_v47  ;;  %379 = vst [vmem:[%s2009_s27 + $0xd0] sm:$0xff] %v347_v10  ;;  %v859_v12 = vcombine.high %v347_v10, %v347_v10  ;;  %v866_v35 = vrot.slane %v347_v10, %v1995_v16 }
  0x81   : > { %v316_v44 = vadd.f32 %v2446_v32, %v277_v11  ;;  %v317_v3 = vadd.f32 %v2446_v32, %v278_v5  ;;  %v2451_v60 = vrot.slane %v842_v57, %v1995_v16  ;;  %v857_v29 = vcombine.high %v849_v21, %v849_v21 }
  0x82   : > { %v2440_v45 = vmax.f32 %v1456_v14, %v1457_v6  ;;  %v1558_v27 = vsel %vm1089_vm0, %v849_v21, -inf  ;;  %v873_v14 = vrot.slane %v859_v12, %v1995_v16  ;;  %v874_v50 = vcombine.high %v866_v35, %v866_v35 }
  0x83   : > { %2890 = vst [vmem:[#allocation27_spill] sm:$0xff] %v2451_v60  ;;  %v1523_v47 = vsel %vm1089_vm0, %v866_v35, -inf  ;;  %v348_v34 = vmax.f32 %v316_v44, 0.0  ;;  %v349_v10 = vmax.f32 %v317_v3, 0.0  ;;  %v1567_v6 = vsel %vm1089_vm0, %v857_v29, -inf }
  0x84   : > { %2889 = vst [vmem:[#allocation26_spill] sm:$0xff] %v2440_v45  ;;  %v2461_v5 = vsel %vm1089_vm0, %v2451_v60, -inf  ;;  %v875_v57 = vcombine.high %v873_v14, %v873_v14  ;;  %v1524_v63 = vmax.f32 %v1522_v46, %v1523_v47  ;;  %v1532_v21 = vsel %vm1089_vm0, %v874_v50, -inf }
  0x85   : > { %2891 = vst [vmem:[#allocation28_spill] sm:$0xff] %v2461_v5  ;;  %v1541_v12 = vsel %vm1089_vm0, %v873_v14, -inf  ;;  %380 = vst [vmem:[%s2009_s27 + $0xd8] sm:$0xff] %v348_v34  ;;  %v876_v48 = vcombine.high %v348_v34, %v348_v34  ;;  %v1533_v35 = vmax.f32 %v1531_v2, %v1532_v21  ;;  %v883_v11 = vrot.slane %v348_v34, %v1995_v16 }
  0x86   : > { %381 = vst [vmem:[%s2009_s27 + $0xe0] sm:$0xff] %v349_v10  ;;  %v1542_v44 = vmax.f32 %v1540_v37, %v1541_v12  ;;  %v1550_v3 = vsel %vm1089_vm0, %v875_v57, -inf  ;;  %v1525_v29 = vrot.slane %v1524_v63, 4  ;;  %v893_v46 = vcombine.high %v349_v10, %v349_v10  ;;  %v240_v12 = vld [vmem:[%s1979_s22 + $0xe8] sm:$0xff] }
  0x87   : > { %v1551_v45 = vmax.f32 %v1549_v43, %v1550_v3  ;;  %v2470_v60 = vrot.slane %v876_v48, %v1995_v16  ;;  %v1534_v50 = vrot.slane %v1533_v35, 4  ;;  %v891_v14 = vcombine.high %v883_v11, %v883_v11  ;;  %v241_v3 = vld [vmem:[%s1979_s22 + $0xf0] sm:$0xff] }
  0x88   : > { %v1543_v47 = vrot.slane %v1542_v44, 4  ;;  %v1559_v5 = vsel %vm1089_vm0, %v883_v11, -inf  ;;  %v1526_v40 = vmax.f32 %v1524_v63, %v1525_v29 }
  0x89   : > { %2892 = vst [vmem:[#allocation29_spill] sm:$0xff] %v2470_v60  ;;  %v1552_v2 = vrot.slane %v1551_v45, 4  ;;  %v1560_v57 = vmax.f32 %v1558_v27, %v1559_v5  ;;  %v1535_v34 = vmax.f32 %v1533_v35, %v1534_v50  ;;  %v1568_v43 = vsel %vm1089_vm0, %v891_v14, -inf  ;;  %v1925_v50 = vld [vmem:[%s2824_s1] ss:$0 sm:$0xff] }
  0x8a   : > { %v1544_v21 = vmax.f32 %v1542_v44, %v1543_v47  ;;  %v2478_v48 = vsel %vm1089_vm0, %v2470_v60, -inf  ;;  %v1527_v8 = vrot.slane %v1526_v40, 2  ;;  %v2484_v11 = vmax.f32 %v1567_v6, %v1568_v43  ;;  %v242_v60 = vld [vmem:[%s1979_s22 + $0xf8] sm:$0xff] }
  0x8b   : > { %2893 = vst [vmem:[#allocation30_spill] sm:$0xff] %v2478_v48  ;;  %v2482_v58 = vmax.f32 %v1551_v45, %v1552_v2  ;;  %v1561_v63 = vrot.slane %v1560_v57, 4  ;;  %v1536_v29 = vrot.slane %v1535_v34, 2  ;;  %v900_v27 = vrot.slane %v349_v10, %v1995_v16 }
  0x8c   : > { %2895 = vst [vmem:[#allocation32_spill] sm:$0xff] %v2484_v11  ;;  %v1545_v37 = vrot.slane %v1544_v21, 2  ;;  %v907_v5 = vrot.slane %v893_v46, %v1995_v16  ;;  %v1528_v35 = vmax.f32 %v1526_v40, %v1527_v8  ;;  %v279_v47 = vmul.f32 %v1925_v50, %v240_v12 }
  0x8d   : > { %2894 = vst [vmem:[#allocation31_spill] sm:$0xff] %v2482_v58  ;;  %v2488_v44 = vmax.f32 %v1560_v57, %v1561_v63  ;;  %v280_v45 = vmul.f32 %v1925_v50, %v241_v3  ;;  %v2493_v14 = vmax.f32 %v1535_v34, %v1536_v29  ;;  %v908_v6 = vcombine.high %v900_v27, %v900_v27 }
  0x8e   : > { %v2495_v2 = vmax.f32 %v1544_v21, %v1545_v37  ;;  %v909_v43 = vcombine.high %v907_v5, %v907_v5  ;;  %v1529_v48 = vrot.slane %v1528_v35, 1  ;;  %v1594_v8 = vsel %vm1089_vm0, %v900_v27, -inf }
  0x8f   : > { %2896 = vst [vmem:[#allocation33_spill] sm:$0xff] %v2488_v44  ;;  %v1612_v40 = vsel %vm1089_vm0, %v907_v5, -inf  ;;  %v1603_v57 = vsel %vm1089_vm0, %v908_v6, -inf  ;;  %v318_v37 = vadd.f32 %v2446_v32, %v279_v47  ;;  %v319_v12 = vadd.f32 %v2446_v32, %v280_v45 }
  0x90   : > { %2897 = vst [vmem:[#allocation34_spill] sm:$0xff] %v2495_v2  ;;  %v1621_v34 = vsel %vm1089_vm0, %v909_v43, -inf  ;;  %v2505_v21 = vmax.f32 %v1528_v35, %v1529_v48  ;;  %v281_v3 = vmul.f32 %v1925_v50, %v242_v60  ;;  %v2899_v63 = vrot.slane %v2083_v41, 1 }
  0x91   : > { %v350_v27 = vmax.f32 %v318_v37, 0.0  ;;  %v1115_v5 = vrot.slane %v2085_v42, 1  ;;  %v1122_v6 = vrot.slane %v2071_v26, 2  ;;  %v2900_v43 = vrot.slane %v2077_v31, 2 }
  0x92   : > { %2898 = vst [vmem:[#allocation35_spill] sm:$0xff] %v2505_v21  ;;  %v2511_v29 = vmax.f32 %v2083_v41, %v2899_v63  ;;  %v351_v48 = vmax.f32 %v319_v12, 0.0  ;;  %v320_v35 = vadd.f32 %v2446_v32, %v281_v3  ;;  %v1138_v45 = vrot.slane %v2069_v24, 4 }
  0x93   : > { %v1132_v47 = vmax.f32 %v2077_v31, %v2900_v43  ;;  %v2522_v60 = vmax.f32 %v2051_v59, %v2067_v20  ;;  %382 = vst [vmem:[%s2009_s27 + $0xe8] sm:$0xff] %v350_v27  ;;  %v910_v41 = vcombine.high %v350_v27, %v350_v27  ;;  %v917_v50 = vrot.slane %v350_v27, %v1995_v16 }
  0x94   : > { %v2527_v37 = vmax.f32 %v2085_v42, %v1115_v5  ;;  %v1123_v63 = vmax.f32 %v2071_v26, %v1122_v6  ;;  %383 = vst [vmem:[%s2009_s27 + $0xf0] sm:$0xff] %v351_v48  ;;  %v927_v31 = vcombine.high %v351_v48, %v351_v48  ;;  %v934_v32 = vrot.slane %v351_v48, %v1995_v16 }
  0x95   : > { %v352_v12 = vmax.f32 %v320_v35, 0.0  ;;  %v1133_v3 = vrot.slane %v1132_v47, 1  ;;  %v2533_v43 = vrot.slane %v910_v41, %v1995_v16  ;;  %v925_v59 = vcombine.high %v917_v50, %v917_v50 }
  0x96   : > { %v1630_v20 = vsel %vm1089_vm0, %v917_v50, -inf  ;;  %v1124_v10 = vrot.slane %v1123_v63, 1  ;;  %v941_v27 = vrot.slane %v927_v31, %v1995_v16  ;;  %v942_v46 = vcombine.high %v934_v32, %v934_v32 }
  0x97   : > { %2901 = vst [vmem:[#allocation36_spill] sm:$0xff] %v2533_v43  ;;  %v1595_v42 = vsel %vm1089_vm0, %v934_v32, -inf  ;;  %384 = vst [vmem:[%s2009_s27 + $0xf8] sm:$0xff] %v352_v12  ;;  %v944_v26 = vcombine.high %v352_v12, %v352_v12  ;;  %v1639_v6 = vsel %vm1089_vm0, %v925_v59, -inf  ;;  %v2544_v48 = vsel %vm1089_vm0, %v2533_v43, -inf }
  0x98   : > { %2902 = vst [vmem:[#allocation37_spill] sm:$0xff] %v2544_v48  ;;  %v1596_v35 = vmax.f32 %v1594_v8, %v1595_v42  ;;  %v943_v41 = vcombine.high %v941_v27, %v941_v27  ;;  %v1604_v50 = vsel %vm1089_vm0, %v942_v46, -inf  ;;  %v1613_v31 = vsel %vm1089_vm0, %v941_v27, -inf }
  0x99   : > { %v951_v21 = vrot.slane %v352_v12, %v1995_v16  ;;  %v1605_v11 = vmax.f32 %v1603_v57, %v1604_v50  ;;  %v1614_v44 = vmax.f32 %v1612_v40, %v1613_v31  ;;  %v2550_v58 = vrot.slane %v944_v26, %v1995_v16 }
  0x9a   : > { %v1597_v32 = vrot.slane %v1596_v35, 4  ;;  %v1622_v59 = vsel %vm1089_vm0, %v943_v41, -inf  ;;  %v1125_v48 = vmax.f32 %v1123_v63, %v1124_v10  ;;  %v1134_v63 = vmax.f32 %v1132_v47, %v1133_v3 }
  0x9b   : > { %v959_v5 = vcombine.high %v951_v21, %v951_v21  ;;  %v1631_v43 = vsel %vm1089_vm0, %v951_v21, -inf  ;;  %v1606_v42 = vrot.slane %v1605_v11, 4  ;;  %v1615_v2 = vrot.slane %v1614_v44, 4 }
  0x9c   : > { %v1598_v8 = vmax.f32 %v1596_v35, %v1597_v32  ;;  %v1623_v46 = vmax.f32 %v1621_v34, %v1622_v59  ;;  %v960_v27 = vcombine.high %v2550_v58, %v2550_v58  ;;  %v1632_v12 = vmax.f32 %v1630_v20, %v1631_v43 }
  0x9d   : > { %v1640_v57 = vsel %vm1089_vm0, %v959_v5, -inf  ;;  %v2559_v16 = vsel %vm1089_vm0, %v2550_v58, -inf  ;;  %v1607_v26 = vmax.f32 %v1605_v11, %v1606_v42  ;;  %v1616_v41 = vmax.f32 %v1614_v44, %v1615_v2 }
  0x9e   : > { %v1599_v40 = vrot.slane %v1598_v8, 2  ;;  %v1624_v50 = vrot.slane %v1623_v46, 4  ;;  %v1633_v21 = vrot.slane %v1632_v12, 4  ;;  %v2561_v10 = vmax.f32 %v1639_v6, %v1640_v57 }
  0x9f   : > { %v1139_v34 = vmax.f32 %v2069_v24, %v1138_v45  ;;  %v1608_v31 = vrot.slane %v1607_v26, 2  ;;  %v1617_v32 = vrot.slane %v1616_v41, 2  ;;  %v1147_v59 = vrot.slane %v2522_v60, 4 }
  0xa0   : > { %v1600_v35 = vmax.f32 %v1598_v8, %v1599_v40  ;;  %v2564_v43 = vmax.f32 %v1623_v46, %v1624_v50  ;;  %v2566_v20 = vmax.f32 %v1632_v12, %v1633_v21  ;;  %v2903_v11 = vcombine.high %v2040_v49, %v2040_v49 }
  0xa1   : > { %v1140_v5 = vrot.slane %v1139_v34, 2  ;;  %v2573_v6 = vmax.f32 %v1607_v26, %v1608_v31  ;;  %v2575_v47 = vmax.f32 %v1616_v41, %v1617_v32  ;;  %v2904_v24 = vcombine.high %v2059_v7, %v2059_v7 }
  0xa2   : > { %v1153_v44 = vsel %vm1089_vm0, %v2903_v11, -inf  ;;  %v1601_v2 = vrot.slane %v1600_v35, 1  ;;  %v1635_v3 = vrot.slane %v2566_v20, 2  ;;  %v1148_v42 = vmax.f32 %v2522_v60, %v1147_v59 }
  0xa3   : > { %v1154_v45 = vsel %vm1089_vm0, %v2904_v24, -inf  ;;  %v1141_v8 = vmax.f32 %v1139_v34, %v1140_v5  ;;  %v1610_v49 = vrot.slane %v2573_v6, 1  ;;  %v1731_v7 = vsel %vm1730_vm1, %v2511_v29, %v2098_v54 }
  0xa4   : > { %v1155_v46 = vmax.f32 %v1153_v44, %v1154_v45  ;;  %v2583_v12 = vmax.f32 %v1600_v35, %v1601_v2  ;;  %v1149_v40 = vrot.slane %v1148_v42, 2  ;;  %v1733_v41 = vsel %vm1732_vm2, %v2527_v37, %v1731_v7 }
  0xa5   : > { %v1142_v57 = vrot.slane %v1141_v8, 1  ;;  %v1735_v34 = vsel %vm1734_vm3, %v1125_v48, %v1733_v41  ;;  %v2905_v31 = vrot.slane %v2155_v22, 1  ;;  %v1187_v5 = vrot.slane %v2157_v23, 1 }
  0xa6   : > { %v1156_v26 = vrot.slane %v1155_v46, 4  ;;  %v1150_v50 = vmax.f32 %v1148_v42, %v1149_v40  ;;  %v1737_v35 = vsel %vm1736_vm4, %v1134_v63, %v1735_v34  ;;  %v1194_v59 = vrot.slane %v2146_v4, 2 }
  0xa7   : > { %v1143_v60 = vmax.f32 %v1141_v8, %v1142_v57  ;;  %v1179_v54 = vmax.f32 %v2155_v22, %v2905_v31  ;;  %v2906_v11 = vrot.slane %v2143_v61, 2  ;;  %v1210_v63 = vrot.slane %v2139_v55, 4 }
  0xa8   : > { %v1157_v21 = vmax.f32 %v1155_v46, %v1156_v26  ;;  %v1151_v29 = vrot.slane %v1150_v50, 1  ;;  %v1218_v44 = vmax.f32 %v2111_v0, %v2137_v39  ;;  %v1188_v22 = vmax.f32 %v2157_v23, %v1187_v5 }
  0xa9   : > { %v1739_v37 = vsel %vm1738_vm5, %v1143_v60, %v1737_v35  ;;  %v1204_v48 = vmax.f32 %v2143_v61, %v2906_v11  ;;  %v2907_v45 = vcombine.high %v2095_v51, %v2095_v51  ;;  %v1195_v42 = vmax.f32 %v2146_v4, %v1194_v59 }
  0xaa   : > { %v1158_v32 = vrot.slane %v1157_v21, 2  ;;  %v1152_v2 = vmax.f32 %v1150_v50, %v1151_v29  ;;  %v1211_v61 = vmax.f32 %v2139_v55, %v1210_v63  ;;  %v1219_v57 = vrot.slane %v1218_v44, 4 }
  0xab   : > { %v1225_v8 = vsel %vm1089_vm0, %v2907_v45, -inf  ;;  %v1205_v46 = vrot.slane %v1204_v48, 1  ;;  %v2908_v0 = vcombine.high %v2125_v15, %v2125_v15  ;;  %v1744_v51 = vsel %vm1730_vm1, %v1179_v54, %v2165_v38 }
  0xac   : > { %v1159_v24 = vmax.f32 %v1157_v21, %v1158_v32  ;;  %v1741_v26 = vsel %vm1740_vm6, %v1152_v2, %v1739_v37  ;;  %v1196_v23 = vrot.slane %v1195_v42, 1  ;;  %v1212_v41 = vrot.slane %v1211_v61, 2 }
  0xad   : > { %v1226_v39 = vsel %vm1089_vm0, %v2908_v0, -inf  ;;  %v1206_v7 = vmax.f32 %v1204_v48, %v1205_v46  ;;  %v1220_v60 = vmax.f32 %v1218_v44, %v1219_v57  ;;  %v1745_v50 = vsel %vm1732_vm2, %v1188_v22, %v1744_v51 }
  0xae   : > { %v1160_v40 = vrot.slane %v1159_v24, 1  ;;  %v1227_v4 = vmax.f32 %v1225_v8, %v1226_v39  ;;  %v2909_v15 = vrot.slane %v2224_v52, 1  ;;  %v1197_v34 = vmax.f32 %v1195_v42, %v1196_v23 }
  0xaf   : > { %v1213_v38 = vmax.f32 %v1211_v61, %v1212_v41  ;;  %v1221_v35 = vrot.slane %v1220_v60, 2  ;;  %v1259_v31 = vrot.slane %v2226_v53, 1  ;;  %v1266_v32 = vrot.slane %v2218_v33, 2 }
  0xb0   : > { %v1161_v55 = vmax.f32 %v1159_v24, %v1160_v40  ;;  %v1251_v21 = vmax.f32 %v2224_v52, %v2909_v15  ;;  %v1228_v29 = vrot.slane %v1227_v4, 4  ;;  %v2910_v37 = vrot.slane %v2220_v25, 2 }
  0xb1   : > { %v1214_v59 = vrot.slane %v1213_v38, 1  ;;  %v1222_v11 = vmax.f32 %v1220_v60, %v1221_v35  ;;  %v1746_v48 = vsel %vm1734_vm3, %v1197_v34, %v1745_v50  ;;  %v1260_v52 = vmax.f32 %v2226_v53, %v1259_v31  ;;  %v2915_v34 = vld [vmem:[#allocation10_spill] sm:$0xff] }
  0xb2   : > { %v1743_v54 = vsel %vm1742_vm7, %v1161_v55, %v1741_v26  ;;  %v1276_v5 = vmax.f32 %v2220_v25, %v2910_v37  ;;  %v1229_v63 = vmax.f32 %v1227_v4, %v1228_v29  ;;  %v1747_v44 = vsel %vm1736_vm4, %v1206_v7, %v1746_v48  ;;  %v2917_v48 = vld [vmem:[#allocation8_spill] sm:$0xff] }
  0xb3   : > { %1801 = vst [vmem:[%s2623_s9] sm:$0xff] %v1743_v54  ;;  %v1267_v2 = vmax.f32 %v2218_v33, %v1266_v32  ;;  %v1215_v22 = vmax.f32 %v1213_v38, %v1214_v59  ;;  %v1223_v45 = vrot.slane %v1222_v11, 1  ;;  %v1282_v8 = vrot.slane %v2213_v13, 4  ;;  %v2916_v32 = vld [vmem:[#allocation7_spill] sm:$0xff] }
  0xb4   : > { %v1277_v24 = vrot.slane %v1276_v5, 1  ;;  %v1290_v25 = vmax.f32 %v2199_v28, %v2211_v36  ;;  %v1230_v42 = vrot.slane %v1229_v63, 2  ;;  %v2911_v57 = vcombine.high %v2186_v1, %v2186_v1 }
  0xb5   : > { %v1268_v46 = vrot.slane %v1267_v2, 1  ;;  %v1224_v40 = vmax.f32 %v1222_v11, %v1223_v45  ;;  %v1748_v26 = vsel %vm1738_vm5, %v1215_v22, %v1747_v44  ;;  %v1283_v33 = vmax.f32 %v2213_v13, %v1282_v8  ;;  %v2913_v13 = vld [vmem:[#allocation9_spill] sm:$0xff]  ;;  %v2921_v8 = vld [vmem:[#allocation3_spill] sm:$0xff] }
  0xb6   : > { %v1278_v61 = vmax.f32 %v1276_v5, %v1277_v24  ;;  %v1297_v53 = vsel %vm1089_vm0, %v2911_v57, -inf  ;;  %v1291_v0 = vrot.slane %v1290_v25, 4  ;;  %v1231_v39 = vmax.f32 %v1229_v63, %v1230_v42  ;;  %v2919_v24 = vld [vmem:[#allocation6_spill] sm:$0xff]  ;;  %v2920_v45 = vld [vmem:[#allocation5_spill] sm:$0xff] }
  0xb7   : > { %v1269_v51 = vmax.f32 %v1267_v2, %v1268_v46  ;;  %v2912_v23 = vcombine.high %v2192_v19, %v2192_v19  ;;  %v1751_v36 = vsel %vm1730_vm1, %v1251_v21, %v2236_v17  ;;  %v1749_v1 = vsel %vm1740_vm6, %v1224_v40, %v1748_v26 }
  0xb8   : > { %v1284_v7 = vrot.slane %v1283_v33, 2  ;;  %v1292_v41 = vmax.f32 %v1290_v25, %v1291_v0  ;;  %v1232_v55 = vrot.slane %v1231_v39, 1  ;;  %v1752_v4 = vsel %vm1732_vm2, %v1260_v52, %v1751_v36 }
  0xb9   : > { %v1298_v28 = vsel %vm1089_vm0, %v2912_v23, -inf  ;;  %v2914_v50 = vrot.slane %v2913_v13, 1  ;;  %v1331_v38 = vrot.slane %v2915_v34, 1  ;;  %v1753_v17 = vsel %vm1734_vm3, %v1269_v51, %v1752_v4 }
  0xba   : > { %v1299_v60 = vmax.f32 %v1297_v53, %v1298_v28  ;;  %v1285_v19 = vmax.f32 %v1283_v33, %v1284_v7  ;;  %v1293_v35 = vrot.slane %v1292_v41, 2  ;;  %v1233_v21 = vmax.f32 %v1231_v39, %v1232_v55  ;;  %v2922_v33 = vld [vmem:[#allocation2_spill] sm:$0xff] }
  0xbb   : > { %v1323_v15 = vmax.f32 %v2913_v13, %v2914_v50  ;;  %v1754_v54 = vsel %vm1736_vm4, %v1278_v61, %v1753_v17  ;;  %v1332_v29 = vmax.f32 %v2915_v34, %v1331_v38  ;;  %v1338_v37 = vrot.slane %v2916_v32, 2  ;;  %v2926_v38 = vld [vmem:[#allocation11_spill] sm:$0xff] }
  0xbc   : > { %v1300_v31 = vrot.slane %v1299_v60, 4  ;;  %v1286_v5 = vrot.slane %v1285_v19, 1  ;;  %v1294_v59 = vmax.f32 %v1292_v41, %v1293_v35  ;;  %v2918_v52 = vrot.slane %v2917_v48, 2 }
  0xbd   : > { %v1750_v44 = vsel %vm1742_vm7, %v1233_v21, %v1749_v1  ;;  %v1339_v2 = vmax.f32 %v2916_v32, %v1338_v37  ;;  %v1354_v22 = vrot.slane %v2919_v24, 4  ;;  %v1362_v25 = vmax.f32 %v2921_v8, %v2920_v45 }
  0xbe   : > { %v1301_v11 = vmax.f32 %v1299_v60, %v1300_v31  ;;  %v1348_v63 = vmax.f32 %v2917_v48, %v2918_v52  ;;  %1802 = vst [vmem:[%s2623_s9 + $0x8] sm:$0xff] %v1750_v44  ;;  %v1287_v42 = vmax.f32 %v1285_v19, %v1286_v5  ;;  %v1295_v46 = vrot.slane %v1294_v59, 1  ;;  %v2924_v60 = vld [vmem:[#allocation4_spill] sm:$0xff] }
  0xbf   : > { %v1340_v53 = vrot.slane %v1339_v2, 1  ;;  %v1355_v40 = vmax.f32 %v2919_v24, %v1354_v22  ;;  %v1363_v26 = vrot.slane %v1362_v25, 4  ;;  %v2923_v0 = vcombine.high %v2922_v33, %v2922_v33  ;;  %v2929_v24 = vld [vmem:[#allocation18_spill] sm:$0xff]  ;;  %v2934_v33 = vld [vmem:[#allocation12_spill] sm:$0xff] }
  0xc0   : > { %v1302_v61 = vrot.slane %v1301_v11, 2  ;;  %v1349_v57 = vrot.slane %v1348_v63, 1  ;;  %v1296_v51 = vmax.f32 %v1294_v59, %v1295_v46  ;;  %v1755_v28 = vsel %vm1738_vm5, %v1287_v42, %v1754_v54  ;;  %v2931_v42 = vld [vmem:[#allocation16_spill] sm:$0xff] }
  0xc1   : > { %v1369_v39 = vsel %vm1089_vm0, %v2923_v0, -inf  ;;  %v1341_v1 = vmax.f32 %v1339_v2, %v1340_v53  ;;  %v1356_v7 = vrot.slane %v1355_v40, 2  ;;  %v1364_v41 = vmax.f32 %v1362_v25, %v1363_v26  ;;  %v2932_v53 = vld [vmem:[#allocation15_spill] sm:$0xff] }
  0xc2   : > { %v1303_v23 = vmax.f32 %v1301_v11, %v1302_v61  ;;  %v1350_v36 = vmax.f32 %v1348_v63, %v1349_v57  ;;  %v2925_v55 = vcombine.high %v2924_v60, %v2924_v60  ;;  %v1756_v50 = vsel %vm1740_vm6, %v1296_v51, %v1755_v28 }
  0xc3   : > { %v1758_v19 = vsel %vm1730_vm1, %v1323_v15, %v2926_v38  ;;  %v1357_v35 = vmax.f32 %v1355_v40, %v1356_v7  ;;  %v1365_v31 = vrot.slane %v1364_v41, 2  ;;  %v2927_v21 = vrot.slane %v2362_v30, 1  ;;  %v2928_v15 = vld [vmem:[#allocation17_spill] sm:$0xff] }
  0xc4   : > { %v1370_v4 = vsel %vm1089_vm0, %v2925_v55, -inf  ;;  %v1304_v13 = vrot.slane %v1303_v23, 1  ;;  %v1759_v17 = vsel %vm1732_vm2, %v1332_v29, %v1758_v19  ;;  %v1403_v59 = vrot.slane %v2364_v62, 1  ;;  %v2933_v40 = vld [vmem:[#allocation13_spill] sm:$0xff] }
  0xc5   : > { %v1371_v34 = vmax.f32 %v1369_v39, %v1370_v4  ;;  %v1395_v54 = vmax.f32 %v2362_v30, %v2927_v21  ;;  %v1760_v5 = vsel %vm1734_vm3, %v1341_v1, %v1759_v17  ;;  %v1358_v11 = vrot.slane %v1357_v35, 1 }
  0xc6   : > { %v1305_v32 = vmax.f32 %v1303_v23, %v1304_v13  ;;  %v1366_v48 = vmax.f32 %v1364_v41, %v1365_v31  ;;  %v1761_v52 = vsel %vm1736_vm4, %v1350_v36, %v1760_v5  ;;  %v1410_v63 = vrot.slane %v2928_v15, 2  ;;  %v2936_v41 = vld [vmem:[#allocation14_spill] sm:$0xff] }
  0xc7   : > { %v1372_v37 = vrot.slane %v1371_v34, 4  ;;  %v1404_v29 = vmax.f32 %v2364_v62, %v1403_v59  ;;  %v2930_v22 = vrot.slane %v2929_v24, 2  ;;  %v1359_v45 = vmax.f32 %v1357_v35, %v1358_v11  ;;  %v2938_v35 = vld [vmem:[#allocation19_spill] sm:$0xff] }
  0xc8   : > { %v1757_v44 = vsel %vm1742_vm7, %v1305_v32, %v1756_v50  ;;  %v1367_v8 = vrot.slane %v1366_v48, 1  ;;  %v1411_v25 = vmax.f32 %v2928_v15, %v1410_v63  ;;  %v1426_v46 = vrot.slane %v2931_v42, 4 }
  0xc9   : > { %v1373_v2 = vmax.f32 %v1371_v34, %v1372_v37  ;;  %v1420_v30 = vmax.f32 %v2929_v24, %v2930_v22  ;;  %1803 = vst [vmem:[%s2623_s9 + $0x10] sm:$0xff] %v1757_v44  ;;  %v1434_v26 = vmax.f32 %v2933_v40, %v2932_v53  ;;  %v2935_v0 = vcombine.high %v2934_v33, %v2934_v33  ;;  %v2945_v33 = vld [vmem:[#allocation20_spill] sm:$0xff] }
  0xca   : > { %v1368_v39 = vmax.f32 %v1366_v48, %v1367_v8  ;;  %v1762_v51 = vsel %vm1738_vm5, %v1359_v45, %v1761_v52  ;;  %v1412_v23 = vrot.slane %v1411_v25, 1  ;;  %v1427_v28 = vmax.f32 %v2931_v42, %v1426_v46  ;;  %v2942_v42 = vld [vmem:[#allocation24_spill] sm:$0xff] }
  0xcb   : > { %v1374_v61 = vrot.slane %v1373_v2, 2  ;;  %v1421_v57 = vrot.slane %v1420_v30, 1  ;;  %v1441_v62 = vsel %vm1089_vm0, %v2935_v0, -inf  ;;  %v1435_v7 = vrot.slane %v1434_v26, 4 }
  0xcc   : > { %v2937_v60 = vcombine.high %v2936_v41, %v2936_v41  ;;  %v1763_v4 = vsel %vm1740_vm6, %v1368_v39, %v1762_v51  ;;  %v1413_v13 = vmax.f32 %v1411_v25, %v1412_v23  ;;  %v1428_v50 = vrot.slane %v1427_v28, 2 }
  0xcd   : > { %v1375_v36 = vmax.f32 %v1373_v2, %v1374_v61  ;;  %v1422_v1 = vmax.f32 %v1420_v30, %v1421_v57  ;;  %v1436_v19 = vmax.f32 %v1434_v26, %v1435_v7  ;;  %v1765_v31 = vsel %vm1730_vm1, %v1395_v54, %v2938_v35  ;;  %v2943_v61 = vld [vmem:[#allocation23_spill] sm:$0xff]  ;;  %v2944_v57 = vld [vmem:[#allocation21_spill] sm:$0xff]  ;;  %v2947_v7 = vld [vmem:[#allocation22_spill] sm:$0xff] }
  0xce   : > { %v1442_v55 = vsel %vm1089_vm0, %v2937_v60, -inf  ;;  %v2939_v17 = vrot.slane %v2431_v56, 1  ;;  %v1429_v32 = vmax.f32 %v1427_v28, %v1428_v50  ;;  %v1766_v5 = vsel %vm1732_vm2, %v1404_v29, %v1765_v31  ;;  %v2940_v29 = vld [vmem:[#allocation25_spill] sm:$0xff] }
  0xcf   : > { %v1443_v34 = vmax.f32 %v1441_v62, %v1442_v55  ;;  %v1376_v38 = vrot.slane %v1375_v36, 1  ;;  %v1475_v59 = vrot.slane %v2433_v9, 1  ;;  %v1437_v48 = vrot.slane %v1436_v19, 2 }
  0xd0   : > { %v1467_v21 = vmax.f32 %v2431_v56, %v2939_v17  ;;  %v1767_v52 = vsel %vm1734_vm3, %v1413_v13, %v1766_v5  ;;  %v1482_v15 = vrot.slane %v2427_v18, 2  ;;  %v1430_v63 = vrot.slane %v1429_v32, 1  ;;  %v2951_v17 = vld [vmem:[#allocation34_spill] sm:$0xff] }
  0xd1   : > { %v1444_v37 = vrot.slane %v1443_v34, 4  ;;  %v1377_v11 = vmax.f32 %v1375_v36, %v1376_v38  ;;  %v1768_v54 = vsel %vm1736_vm4, %v1422_v1, %v1767_v52  ;;  %v1476_v2 = vmax.f32 %v2433_v9, %v1475_v59  ;;  %v2949_v38 = vld [vmem:[#allocation26_spill] sm:$0xff] }
  0xd2   : > { %v1438_v24 = vmax.f32 %v1436_v19, %v1437_v48  ;;  %v1483_v22 = vmax.f32 %v2427_v18, %v1482_v15  ;;  %v2941_v30 = vrot.slane %v2940_v29, 2  ;;  %v1431_v8 = vmax.f32 %v1429_v32, %v1430_v63  ;;  %v2952_v15 = vld [vmem:[#allocation31_spill] sm:$0xff] }
  0xd3   : > { %v1445_v44 = vmax.f32 %v1443_v34, %v1444_v37  ;;  %v1764_v56 = vsel %vm1742_vm7, %v1377_v11, %v1763_v4  ;;  %v1498_v46 = vrot.slane %v2942_v42, 4  ;;  %v1506_v53 = vmax.f32 %v2944_v57, %v2943_v61 }
  0xd4   : > { %v1492_v45 = vmax.f32 %v2940_v29, %v2941_v30  ;;  %1804 = vst [vmem:[%s2623_s9 + $0x18] sm:$0xff] %v1764_v56  ;;  %v1439_v40 = vrot.slane %v1438_v24, 1  ;;  %v1484_v26 = vrot.slane %v1483_v22, 1  ;;  %v2946_v0 = vcombine.high %v2945_v33, %v2945_v33 }
  0xd5   : > { %v1446_v25 = vrot.slane %v1445_v44, 2  ;;  %v1769_v39 = vsel %vm1738_vm5, %v1431_v8, %v1768_v54  ;;  %v1499_v51 = vmax.f32 %v2942_v42, %v1498_v46  ;;  %v1507_v23 = vrot.slane %v1506_v53, 4 }
  0xd6   : > { %v1493_v9 = vrot.slane %v1492_v45, 1  ;;  %v1513_v18 = vsel %vm1089_vm0, %v2946_v0, -inf  ;;  %v1440_v28 = vmax.f32 %v1438_v24, %v1439_v40  ;;  %v1485_v36 = vmax.f32 %v1483_v22, %v1484_v26  ;;  %v2956_v26 = vld [vmem:[#allocation30_spill] sm:$0xff] }
  0xd7   : > { %v1447_v62 = vmax.f32 %v1445_v44, %v1446_v25  ;;  %v2948_v41 = vcombine.high %v2947_v7, %v2947_v7  ;;  %v1500_v4 = vrot.slane %v1499_v51, 2  ;;  %v1508_v13 = vmax.f32 %v1506_v53, %v1507_v23  ;;  %v2953_v44 = vld [vmem:[#allocation33_spill] sm:$0xff] }
  0xd8   : > { %v1494_v1 = vmax.f32 %v1492_v45, %v1493_v9  ;;  %v1770_v34 = vsel %vm1740_vm6, %v1440_v28, %v1769_v39  ;;  %v1772_v19 = vsel %vm1730_vm1, %v1467_v21, %v2949_v38  ;;  %v2950_v35 = vrot.slane %v2493_v14, 1  ;;  %v2957_v9 = vld [vmem:[#allocation28_spill] sm:$0xff]  ;;  %v2958_v39 = vld [vmem:[#allocation27_spill] sm:$0xff] }
  0xd9   : > { %v1514_v60 = vsel %vm1089_vm0, %v2948_v41, -inf  ;;  %v1448_v55 = vrot.slane %v1447_v62, 1  ;;  %v1547_v32 = vrot.slane %v2951_v17, 1  ;;  %v1501_v5 = vmax.f32 %v1499_v51, %v1500_v4 }
  0xda   : > { %v1515_v50 = vmax.f32 %v1513_v18, %v1514_v60  ;;  %v1539_v31 = vmax.f32 %v2493_v14, %v2950_v35  ;;  %v1509_v59 = vrot.slane %v1508_v13, 2  ;;  %v1773_v48 = vsel %vm1732_vm2, %v1476_v2, %v1772_v19  ;;  %v2955_v2 = vld [vmem:[#allocation32_spill] sm:$0xff] }
  0xdb   : > { %v1449_v37 = vmax.f32 %v1447_v62, %v1448_v55  ;;  %v1548_v52 = vmax.f32 %v2951_v17, %v1547_v32  ;;  %v1554_v63 = vrot.slane %v2952_v15, 2  ;;  %v2954_v54 = vrot.slane %v2953_v44, 2 }
  0xdc   : > { %v1516_v11 = vrot.slane %v1515_v50, 4  ;;  %v1502_v24 = vrot.slane %v1501_v5, 1  ;;  %v1510_v14 = vmax.f32 %v1508_v13, %v1509_v59  ;;  %v1774_v29 = vsel %vm1734_vm3, %v1485_v36, %v1773_v48 }
  0xdd   : > { %v1564_v21 = vmax.f32 %v2953_v44, %v2954_v54  ;;  %v1771_v56 = vsel %vm1742_vm7, %v1449_v37, %v1770_v34  ;;  %v1555_v30 = vmax.f32 %v2952_v15, %v1554_v63  ;;  %v1570_v8 = vrot.slane %v2955_v2, 4 }
  0xde   : > { %v1517_v22 = vmax.f32 %v1515_v50, %v1516_v11  ;;  %1805 = vst [vmem:[%s2623_s9 + $0x20] sm:$0xff] %v1771_v56  ;;  %v1503_v25 = vmax.f32 %v1501_v5, %v1502_v24  ;;  %v1511_v42 = vrot.slane %v1510_v14, 1  ;;  %v1775_v61 = vsel %vm1736_vm4, %v1494_v1, %v1774_v29  ;;  %v2960_v1 = vld [vmem:[#allocation29_spill] sm:$0xff]  ;;  %v2962_v50 = vld [vmem:[#allocation35_spill] sm:$0xff] }
  0xdf   : > { %v1565_v45 = vrot.slane %v1564_v21, 1  ;;  %v1556_v57 = vrot.slane %v1555_v30, 1  ;;  %v1571_v40 = vmax.f32 %v2955_v2, %v1570_v8  ;;  %v1578_v33 = vmax.f32 %v2957_v9, %v2956_v26 }
  0xe0   : > { %v1518_v46 = vrot.slane %v1517_v22, 2  ;;  %v1512_v0 = vmax.f32 %v1510_v14, %v1511_v42  ;;  %v1776_v62 = vsel %vm1738_vm5, %v1503_v25, %v1775_v61  ;;  %v2959_v51 = vcombine.high %v2958_v39, %v2958_v39 }
  0xe1   : > { %v1566_v53 = vmax.f32 %v1564_v21, %v1565_v45  ;;  %v1557_v28 = vmax.f32 %v1555_v30, %v1556_v57  ;;  %v1572_v36 = vrot.slane %v1571_v40, 2  ;;  %v1579_v7 = vrot.slane %v1578_v33, 4  ;;  %v2964_v30 = vld [vmem:[#allocation36_spill] sm:$0xff] }
  0xe2   : > { %v1519_v18 = vmax.f32 %v1517_v22, %v1518_v46  ;;  %v1585_v23 = vsel %vm1089_vm0, %v2959_v51, -inf  ;;  %v2961_v41 = vcombine.high %v2960_v1, %v2960_v1  ;;  %v1777_v4 = vsel %vm1740_vm6, %v1512_v0, %v1776_v62  ;;  %v2963_v22 = vld [vmem:[#allocation37_spill] sm:$0xff] }
  0xe3   : > { %v1779_v34 = vsel %vm1730_vm1, %v1539_v31, %v2962_v50  ;;  %v1573_v38 = vmax.f32 %v1571_v40, %v1572_v36  ;;  %v1580_v19 = vmax.f32 %v1578_v33, %v1579_v7  ;;  %v1611_v17 = vmax.f32 %v2573_v6, %v1610_v49 }
  0xe4   : > { %v1586_v60 = vsel %vm1089_vm0, %v2961_v41, -inf  ;;  %v1520_v55 = vrot.slane %v1519_v18, 1  ;;  %v1780_v35 = vsel %vm1732_vm2, %v1548_v52, %v1779_v34  ;;  %v1619_v59 = vrot.slane %v2575_v47, 1 }
  0xe5   : > { %v1587_v13 = vmax.f32 %v1585_v23, %v1586_v60  ;;  %v1781_v5 = vsel %vm1734_vm3, %v1557_v28, %v1780_v35  ;;  %v1574_v11 = vrot.slane %v1573_v38, 1  ;;  %v1581_v48 = vrot.slane %v1580_v19, 2 }
  0xe6   : > { %v1521_v32 = vmax.f32 %v1519_v18, %v1520_v55  ;;  %v1782_v15 = vsel %vm1736_vm4, %v1566_v53, %v1781_v5  ;;  %v1626_v31 = vrot.slane %v2564_v43, 2  ;;  %v1620_v52 = vmax.f32 %v2575_v47, %v1619_v59 }
  0xe7   : > { %v1588_v37 = vrot.slane %v1587_v13, 4  ;;  %v1636_v6 = vmax.f32 %v2566_v20, %v1635_v3  ;;  %v1575_v49 = vmax.f32 %v1573_v38, %v1574_v11  ;;  %v1582_v54 = vmax.f32 %v1580_v19, %v1581_v48 }
  0xe8   : > { %v1778_v63 = vsel %vm1742_vm7, %v1521_v32, %v1777_v4  ;;  %v1627_v21 = vmax.f32 %v2564_v43, %v1626_v31  ;;  %v1642_v56 = vrot.slane %v2561_v10, 4  ;;  %v1650_v29 = vmax.f32 %v2963_v22, %v2559_v16 }
  0xe9   : > { %v1589_v44 = vmax.f32 %v1587_v13, %v1588_v37  ;;  %1806 = vst [vmem:[%s2623_s9 + $0x28] sm:$0xff] %v1778_v63  ;;  %v1637_v14 = vrot.slane %v1636_v6, 1  ;;  %v2965_v45 = vcombine.high %v2964_v30, %v2964_v30  ;;  %v1583_v2 = vrot.slane %v1582_v54, 1 }
  0xea   : > { %v1783_v20 = vsel %vm1738_vm5, %v1575_v49, %v1782_v15  ;;  %v1628_v3 = vrot.slane %v1627_v21, 1  ;;  %v1643_v8 = vmax.f32 %v2561_v10, %v1642_v56  ;;  %v1651_v42 = vrot.slane %v1650_v29, 4 }
  0xeb   : > { %v1590_v24 = vrot.slane %v1589_v44, 2  ;;  %v1657_v47 = vsel %vm1089_vm0, %v2965_v45, -inf  ;;  %v1638_v43 = vmax.f32 %v1636_v6, %v1637_v14  ;;  %v1658_v46 = vsel %vm1089_vm0, %v960_v27, -inf }
  0xec   : > { %v1584_v16 = vmax.f32 %v1582_v54, %v1583_v2  ;;  %v1629_v61 = vmax.f32 %v1627_v21, %v1628_v3  ;;  %v1644_v57 = vrot.slane %v1643_v8, 2  ;;  %v1659_v53 = vmax.f32 %v1657_v47, %v1658_v46 }
  0xed   : > { %v1591_v25 = vmax.f32 %v1589_v44, %v1590_v24  ;;  %v1652_v26 = vmax.f32 %v1650_v29, %v1651_v42  ;;  %v1786_v9 = vsel %vm1730_vm1, %v1611_v17, %v2583_v12 }
  0xee   : > { %v1784_v10 = vsel %vm1740_vm6, %v1584_v16, %v1783_v20  ;;  %v1645_v33 = vmax.f32 %v1643_v8, %v1644_v57  ;;  %v1660_v0 = vrot.slane %v1659_v53, 4  ;;  %v1787_v18 = vsel %vm1732_vm2, %v1620_v52, %v1786_v9 }
  0xef   : > { %v1592_v40 = vrot.slane %v1591_v25, 1  ;;  %v1653_v58 = vrot.slane %v1652_v26, 2  ;;  %v1788_v27 = vsel %vm1734_vm3, %v1629_v61, %v1787_v18 }
  0xf0   : > { %v1646_v39 = vrot.slane %v1645_v33, 1  ;;  %v1661_v51 = vmax.f32 %v1659_v53, %v1660_v0  ;;  %v1789_v23 = vsel %vm1736_vm4, %v1638_v43, %v1788_v27 }
  0xf1   : > { %v1593_v62 = vmax.f32 %v1591_v25, %v1592_v40  ;;  %v1654_v36 = vmax.f32 %v1652_v26, %v1653_v58 }
  0xf2   : > { %v1647_v12 = vmax.f32 %v1645_v33, %v1646_v39  ;;  %v1662_v7 = vrot.slane %v1661_v51, 2 }
  0xf3   : > { %v1785_v28 = vsel %vm1742_vm7, %v1593_v62, %v1784_v10  ;;  %v1655_v1 = vrot.slane %v1654_v36, 1 }
  0xf4   : > { %1807 = vst [vmem:[%s2623_s9 + $0x30] sm:$0xff] %v1785_v28  ;;  %v1663_v41 = vmax.f32 %v1661_v51, %v1662_v7  ;;  %v1790_v60 = vsel %vm1738_vm5, %v1647_v12, %v1789_v23 }
  0xf5   : > { %v1656_v55 = vmax.f32 %v1654_v36, %v1655_v1 }
  0xf6   : > { %v1664_v4 = vrot.slane %v1663_v41, 1 }
  0xf7   : > { %v1791_v13 = vsel %vm1740_vm6, %v1656_v55, %v1790_v60 }
  0xf8   : > { %v1665_v50 = vmax.f32 %v1663_v41, %v1664_v4 }
  0xfa   : > { %v1792_v34 = vsel %vm1742_vm7, %v1665_v50, %v1791_v13 }
  0xfb   : > { %1808 = vst [vmem:[%s2623_s9 + $0x38] sm:$0xff] %v1792_v34 }
  0xfc PF: > { %s15_s15 = sadd.s32 1, %s1932_s15  }
  0xfd   : > { %p12_p4 = scmp.ge.s32.totalorder %s15_s15, 4  }
  0xff   :  { %14 = sbr.rel (!%p12_p4) target bundleno = 1 (0x1), region = 74 }

// kernel: encoder_forward.4
= control target key start
LH: loop header
LB: loop body
LE: loop exit
PB: predicated region body
PF: predicated region fallthrough
CT: control target
= control target key end

     0   :  { %s3613_s21 = smov 0   ;;  %s5161_s0 = inlined_call_operand.vmem [shape: bf16[2,16,16,128], index: 0, kind: input, shape index: {}]   ;;  %s5162_s1 = inlined_call_operand.vmem [shape: f32[1,128], index: 1, kind: input, shape index: {}]   ;;  %s5163_s2 = inlined_call_operand.vmem [shape: f32[1,128], index: 2, kind: input, shape index: {}]   ;;  %s5164_s3 = inlined_call_operand.vmem [shape: bf16[1152,128], index: 3, kind: input, shape index: {}]   ;;  %s5165_s4 = inlined_call_operand.vmem [shape: f32[2,16,16,128], index: 4, kind: output, shape index: {0}]   ;;  %s5166_s5 = inlined_call_operand.vmem [shape: f32[2,8,128], index: 5, kind: output, shape index: {1}]   ;;  %s5167_s6 = inlined_call_operand.vmem [shape: f32[2,8,128], index: 6, kind: output, shape index: {2}]  }
   0x1 LB: > { %s2588_s22 = sadd.s32 4294967295, %s3574_s21   ;;  %p2592_p0 = scmp.ge.s32.totalorder %s3574_s21, 1  ;;  %s3574_s21 = sphi %s3613_s21, %s17_s21  }
   0x2   : > { %p217_p1 = scmp.lt.s32.totalorder %s3574_s21, 3 }
   0x4   : > { %p218_p2 = pnand %p2592_p0, %p217_p1 }
   0x6   : > { %221 = sbr.rel (%p218_p2) target bundleno = 571 (0x23b), region = 36 }
   0xd   : > { %v3494_v0 = vld [vmem:[%s5164_s3 + $0x40] sm:$0xff]   ;;  %vm481_vm0 = vcmask 1040384   ;;  %v667_v2 = vlaneseq  ;;  %v3496_v3 = vld [vmem:[%s5164_s3 + $0x48] sm:$0xff]   ;;  %v3576_v4 = vmov 0.0   ;;  %v3498_v7 = vld [vmem:[%s5164_s3 + $0x50] sm:$0xff]   ;;  %p255_p3 = scmp.lt.s32.totalorder %s2588_s22, 1 }
   0xe   : > { %v3495_v1 = vld [vmem:[%s5164_s3] sm:$0xff]   ;;  %2948 = vmatprep.subr.bf16.mxu0 %v3494_v0  ;;  %3468 = vmatprep.subr.bf16.mxu1 %v3494_v0  ;;  %v3630_v5 = vrot.slane %v3576_v4, 7  ;;  %v3497_v6 = vld [vmem:[%s5164_s3 + $0x8] sm:$0xff]   ;;  %v3499_v12 = vld [vmem:[%s5164_s3 + $0x10] sm:$0xff]   ;;  %vm3577_vm3 = vmmov 1   ;;  %vm2406_vm6 = vcmask 1041409  }
   0xf   : > { %2949 = vmatpush3.bf16.msra.mxu0 %v3495_v1  ;;  %3476 = vmatpush3.bf16.msra.mxu1 %v3495_v1  ;;  %v3646_v10 = vshrl.u32 %v667_v2, 7  ;;  %v3500_v14 = vld [vmem:[%s5164_s3 + $0x58] sm:$0xff]   ;;  %v3502_v20 = vld [vmem:[%s5164_s3 + $0x60] sm:$0xff]   ;;  %s5242_s22 = smov (!%p255_p3, %s2588_s22), 1  ;;  %v3504_v22 = vld [vmem:[%s5164_s3 + $0x68] sm:$0xff]   ;;  %vm2408_vm7 = vcmask 1042434  }
  0x10   : > { %2950 = vmatprep.subr.bf16.mxu0 %v3496_v3  ;;  %3469 = vmatprep.subr.bf16.mxu1 %v3496_v3  ;;  %v3640_v8 = vsel %vm481_vm0, 0.0, %v3630_v5  ;;  %v3644_v9 = vsel %vm481_vm0, %v3630_v5, 0.0  ;;  %v633_v13 = vrot.slane %v3630_v5, 1  ;;  %v3501_v18 = vld [vmem:[%s5164_s3 + $0x18] sm:$0xff]   ;;  %v3503_v21 = vld [vmem:[%s5164_s3 + $0x20] sm:$0xff]   ;;  %s2867_s23 = sshll.u32 %s5242_s22, 7  ;;  %vm3725_vm2 = vmneg %vm481_vm0  ;;  %v3743_v59 = vpack.c.bf16 %v3630_v5, %v3630_v5 }
  0x11   : > { %v616_v11 = vrot.slane %v3640_v8, 1  ;;  %v650_v15 = vrot.slane %v3644_v9, 1  ;;  %vm669_vm1 = vcmp.lt.s32.totalorder %v3646_v10, 7  ;;  %v3505_v23 = vld [vmem:[%s5164_s3 + $0x28] sm:$0xff]   ;;  %s3690_s28 = scalar_lea.vmem %s5161_s0, %s2867_s23  ;;  %v3696_v25 = vld [vmem:[%s5162_s1] ss:$0 sm:$0xff]  ;;  %vm3765_vm4 = vmpackc.low %vm3577_vm3, %vm3725_vm2 }
  0x12   : > { %v2943_v24 = vld [vmem:[%s3690_s28 + $0x58] sm:$0xff]   ;;  %v3506_v26 = vld [vmem:[%s5164_s3 + $0x70] sm:$0xff]   ;;  %v3704_v29 = vld [vmem:[%s5163_s2] ss:$0 sm:$0xff]  ;;  %v738_v35 = vrot.slane %v3644_v9, 2  ;;  %v721_v44 = vrot.slane %v3630_v5, 2 }
  0x13   : > { %2951 = vmatpush3.bf16.msra.mxu0 %v3497_v6  ;;  %3477 = vmatpush3.bf16.msra.mxu1 %v3497_v6  ;;  %v670_v16 = vsel %vm669_vm1, %v633_v13, %v650_v15  ;;  %v687_v17 = vsel %vm669_vm1, %v616_v11, %v633_v13  ;;  %v2915_v27 = vunpack.c.l.bf16 %v2943_v24  ;;  %v2916_v28 = vunpack.c.h.bf16 %v2943_v24  ;;  %v3507_v30 = vld [vmem:[%s5164_s3 + $0x30] sm:$0xff]   ;;  %v3508_v33 = vld [vmem:[%s5164_s3 + $0x78] sm:$0xff]   ;;  %v2870_v36 = vld [vmem:[%s3690_s28] sm:$0xff]   ;;  %5199 = vst [vmem:[#allocation3_spill] sm:$0xff] %v3743_v59  ;;  %s2868_s30 = sshll.u32 %s5242_s22, 8  ;;  %s2597_s10 = sshll.u32 %s5242_s22, 3 }
  0x14   : > { %2952 = vmatprep.subr.bf16.mxu0 %v3498_v7  ;;  %3470 = vmatprep.subr.bf16.mxu1 %v3498_v7  ;;  %v3665_v19 = vpack.c.bf16 %v670_v16, %v687_v17  ;;  %v2871_v39 = vunpack.c.l.bf16 %v2870_v36  ;;  %v2872_v40 = vunpack.c.h.bf16 %v2870_v36  ;;  %v2944_v41 = vld [vmem:[%s3690_s28 + $0x60] sm:$0xff]   ;;  %v3509_v45 = vld [vmem:[%s5164_s3 + $0x38] sm:$0xff]   ;;  %v2933_v3 = vld [vmem:[%s3690_s28 + $0x8] sm:$0xff]   ;;  %vm755_vm5 = vcmp.lt.s32.totalorder %v3646_v10, 6  ;;  %s5045_s9 = scalar_lea.vmem %s5165_s4, %s2868_s30  ;;  %s268_s13 = scalar_lea.vmem %s5166_s5, %s2597_s10 }
  0x15   : > { %v367_v31 = vmul.f32 %v2915_v27, %v3696_v25  ;;  %v368_v32 = vmul.f32 %v2916_v28, %v3696_v25  ;;  %v2919_v42 = vunpack.c.l.bf16 %v2944_v41  ;;  %v2920_v43 = vunpack.c.h.bf16 %v2944_v41  ;;  %v3510_v55 = vld [vmem:[%s5164_s3 + $0xc0] sm:$0xff]   ;;  %v3519_v13 = vld [vmem:[%s5164_s3 + $0x148] sm:$0xff]   ;;  %s272_s15 = scalar_lea.vmem %s5167_s6, %s2597_s10 }
  0x16   : > { %5196 = vst [vmem:[#allocation2_spill] sm:$0xff] %v3665_v19  ;;  %1449 = vmatprep.mubr.bf16.mxu0 %v3665_v19  ;;  %v345_v49 = vmul.f32 %v2871_v39, %v3696_v25  ;;  %v346_v50 = vmul.f32 %v2872_v40, %v3696_v25  ;;  %v3511_v56 = vld [vmem:[%s5164_s3 + $0x140] sm:$0xff]   ;;  %v2876_v24 = vunpack.c.h.bf16 %v2933_v3  ;;  %v3515_v39 = vld [vmem:[%s5164_s3 + $0x88] sm:$0xff]   ;;  %v3543_v19 = vld [vmem:[%s5164_s3 + $0x190] sm:$0xff]   ;;  %vm2410_vm8 = vcmask 1043459  }
  0x17   : > { %2953 = vmatpush3.bf16.msra.mxu0 %v3499_v12  ;;  %3478 = vmatpush3.bf16.msra.mxu1 %v3499_v12  ;;  %v406_v37 = vadd.f32 %v3704_v29, %v367_v31  ;;  %v407_v38 = vadd.f32 %v3704_v29, %v368_v32  ;;  %v369_v51 = vmul.f32 %v2919_v42, %v3696_v25  ;;  %v3513_v1 = vld [vmem:[%s5164_s3 + $0x100] sm:$0xff]   ;;  %v3521_v32 = vld [vmem:[%s5164_s3 + $0x108] sm:$0xff]   ;;  %vm2412_vm9 = vcmask 1044484  }
  0x18   : > { %2954 = vmatprep.subr.bf16.mxu0 %v3500_v14  ;;  %3471 = vmatprep.subr.bf16.mxu1 %v3500_v14  ;;  %v370_v52 = vmul.f32 %v2920_v43, %v3696_v25  ;;  %v384_v57 = vadd.f32 %v3704_v29, %v345_v49  ;;  %v385_v58 = vadd.f32 %v3704_v29, %v346_v50  ;;  %v3512_v14 = vld [vmem:[%s5164_s3 + $0x80] sm:$0xff]   ;;  %v2934_v49 = vld [vmem:[%s3690_s28 + $0x10] sm:$0xff]   ;;  %vm2414_vm10 = vcmask 1045509  }
  0x19   : > { %v438_v46 = vmax.f32 %v406_v37, 0.0  ;;  %v439_v47 = vmax.f32 %v407_v38, 0.0  ;;  %v408_v60 = vadd.f32 %v3704_v29, %v369_v51  ;;  %v348_v38 = vmul.f32 %v2876_v24, %v3696_v25 }
  0x1a   : > { %v409_v61 = vadd.f32 %v3704_v29, %v370_v52  ;;  %v416_v2 = vmax.f32 %v384_v57, 0.0  ;;  %v417_v15 = vmax.f32 %v385_v58, 0.0  ;;  %vm2416_vm11 = vcmask 1046534  }
  0x1b   : > { %2955 = vmatpush3.bf16.msra.mxu0 %v3501_v18  ;;  %3479 = vmatpush3.bf16.msra.mxu1 %v3501_v18  ;;  %v517_v53 = vrot.slane %v438_v46, 7  ;;  %v518_v54 = vrot.slane %v439_v47, 7  ;;  %v440_v17 = vmax.f32 %v408_v60, 0.0  ;;  %v3527_v60 = vld [vmem:[%s5164_s3 + $0x150] sm:$0xff]   ;;  %vm2418_vm12 = vcmask 1047559  }
  0x1c   : > { %2956 = vmatprep.subr.bf16.mxu0 %v3502_v20  ;;  %3472 = vmatprep.subr.bf16.mxu1 %v3502_v20  ;;  %v484_v16 = vrot.slane %v416_v2, 7  ;;  %v441_v18 = vmax.f32 %v409_v61, 0.0  ;;  %v485_v28 = vrot.slane %v417_v15, 7  ;;  %v3529_v15 = vld [vmem:[%s5164_s3 + $0x110] sm:$0xff]  }
  0x1d   : > { %v3748_v62 = vsel %vm481_vm0, %v517_v53, %v518_v54  ;;  %v3751_v63 = vsel %vm481_vm0, 0.0, %v517_v53  ;;  %v3754_v0 = vsel %vm481_vm0, %v518_v54, 0.0  ;;  %v520_v31 = vrot.slane %v440_v17, 7  ;;  %v2946_v54 = vld [vmem:[%s3690_s28 + $0x70] sm:$0xff]  }
  0x1e   : > { %v628_v4 = vrot.slane %v3751_v63, 1  ;;  %v645_v6 = vrot.slane %v3748_v62, 1  ;;  %v662_v7 = vrot.slane %v3754_v0, 1  ;;  %v3770_v12 = vpack.c.bf16 %v3748_v62, %v517_v53 }
  0x1f   : > { %2957 = vmatpush3.bf16.msra.mxu0 %v3503_v21  ;;  %3480 = vmatpush3.bf16.msra.mxu1 %v3503_v21  ;;  %v521_v36 = vrot.slane %v441_v18, 7  ;;  %v3805_v40 = vsel %vm481_vm0, %v484_v16, %v485_v28  ;;  %v3808_v41 = vsel %vm481_vm0, %v485_v28, 0.0  ;;  %v3811_v42 = vsel %vm481_vm0, 0.0, %v520_v31 }
  0x20   : > { %2958 = vmatprep.subr.bf16.mxu0 %v3504_v22  ;;  %3473 = vmatprep.subr.bf16.mxu1 %v3504_v22  ;;  %v682_v20 = vsel %vm669_vm1, %v645_v6, %v662_v7  ;;  %v699_v21 = vsel %vm669_vm1, %v628_v4, %v645_v6  ;;  %v3514_v22 = vld [vmem:[%s5164_s3 + $0xc8] sm:$0xff]   ;;  %v651_v46 = vrot.slane %v3808_v41, 1  ;;  %v629_v50 = vrot.slane %v3811_v42, 1 }
  0x21   : > { %v3786_v27 = vpack.c.bf16 %v682_v20, %v699_v21  ;;  %v3819_v47 = vsel %vm481_vm0, %v520_v31, %v521_v36  ;;  %v3822_v48 = vsel %vm481_vm0, %v521_v36, 0.0  ;;  %v3829_v53 = vpack.c.bf16 %v3805_v40, %v484_v16 }
  0x22   : > { %v646_v51 = vrot.slane %v3819_v47, 1  ;;  %v663_v52 = vrot.slane %v3822_v48, 1  ;;  %v3837_v57 = vpack.c.bf16 %v3819_v47, %v520_v31  ;;  %v387_v7 = vadd.f32 %v3704_v29, %v348_v38 }
  0x23   : > { %2959 = vmatpush3.bf16.msra.mxu0 %v3505_v23  ;;  %3481 = vmatpush3.bf16.msra.mxu1 %v3505_v23  ;;  %v2875_v23 = vunpack.c.l.bf16 %v2933_v3  ;;  %5202 = vst [vmem:[#allocation4_spill] sm:$0xff] %v3786_v27  ;;  %v3516_v3 = vld [vmem:[%s5164_s3 + $0xd0] sm:$0xff]   ;;  %v2879_v18 = vunpack.c.l.bf16 %v2934_v49  ;;  %v2880_v20 = vunpack.c.h.bf16 %v2934_v49  ;;  %v2927_v21 = vunpack.c.l.bf16 %v2946_v54  ;;  %v3522_v49 = vld [vmem:[%s5164_s3 + $0xe0] sm:$0xff]  }
  0x24   : > { %2960 = vmatprep.subr.bf16.mxu0 %v3506_v26  ;;  %3474 = vmatprep.subr.bf16.mxu1 %v3506_v26  ;;  %v2945_v26 = vld [vmem:[%s3690_s28 + $0x68] sm:$0xff]   ;;  %v700_v2 = vsel %vm669_vm1, %v629_v50, %v646_v51  ;;  %v2928_v28 = vunpack.c.h.bf16 %v2946_v54 }
  0x25   : > { %v347_v37 = vmul.f32 %v2875_v23, %v3696_v25  ;;  %1545 = vmatprep.mubr.bf16.mxu1 %v3786_v27  ;;  %v2923_v43 = vunpack.c.l.bf16 %v2945_v26  ;;  %v2924_v58 = vunpack.c.h.bf16 %v2945_v26  ;;  %v419_v23 = vmax.f32 %v387_v7, 0.0  ;;  %v3523_v7 = vld [vmem:[%s5164_s3 + $0xa0] sm:$0xff]  }
  0x26   : > { %v373_v36 = vmul.f32 %v2927_v21, %v3696_v25 }
  0x27   : > { %2961 = vmatpush3.bf16.msra.mxu0 %v3507_v30  ;;  %3482 = vmatpush3.bf16.msra.mxu1 %v3507_v30  ;;  %v3792_v30 = vsel %vm481_vm0, 0.0, %v484_v16  ;;  %v386_v4 = vadd.f32 %v3704_v29, %v347_v37  ;;  %v3517_v16 = vld [vmem:[%s5164_s3 + $0x90] sm:$0xff]   ;;  %v3520_v37 = vld [vmem:[%s5164_s3 + $0x98] sm:$0xff]   ;;  %v488_v38 = vrot.slane %v419_v23, 7 }
  0x28   : > { %2962 = vmatprep.subr.bf16.mxu0 %v3508_v33  ;;  %3475 = vmatprep.subr.bf16.mxu1 %v3508_v33  ;;  %v617_v33 = vrot.slane %v3792_v30, 1 }
  0x29   : > { %v418_v17 = vmax.f32 %v386_v4, 0.0 }
  0x2b   : > { %2963 = vmatpush3.bf16.msra.mxu0 %v3509_v45  ;;  %3483 = vmatpush3.bf16.msra.mxu1 %v3509_v45  ;;  %v634_v45 = vrot.slane %v3805_v40, 1  ;;  %v487_v31 = vrot.slane %v418_v17, 7 }
  0x2c   : > { %3060 = vmatprep.subr.bf16.mxu1 %v3510_v55  ;;  %3172 = vmatprep.subr.bf16.mxu0 %v3511_v56 }
  0x2d   : > { %v671_v55 = vsel %vm669_vm1, %v634_v45, %v651_v46  ;;  %v688_v56 = vsel %vm669_vm1, %v617_v33, %v634_v45  ;;  %v350_v33 = vmul.f32 %v2880_v20, %v3696_v25  ;;  %v374_v45 = vmul.f32 %v2928_v28, %v3696_v25 }
  0x2e   : > { %2676 = vmatmul.mubr.msk.bf16.vlgmr.msra.gmra.mrb[0].mxu0 %vm3765_vm4, %v3743_v59  ;;  %2724 = vmatmul.mubr.msk.bf16.vlgmr.msra.gmra.mrb[0].mxu1 %vm3765_vm4, %v3770_v12  ;;  %v3842_v61 = vpack.c.bf16 %v671_v55, %v688_v56  ;;  %v3884_v46 = vsel %vm481_vm0, 0.0, %v487_v31  ;;  %v3893_v54 = vsel %vm481_vm0, %v487_v31, %v488_v38  ;;  %v3896_v55 = vsel %vm481_vm0, %v488_v38, 0.0 }
  0x2f   : > { %3173 = vmatpush3.bf16.msra.mxu0 %v3513_v1  ;;  %3061 = vmatpush3.bf16.msra.mxu1 %v3512_v14  ;;  %v683_v1 = vsel %vm669_vm1, %v646_v51, %v663_v52  ;;  %v372_v14 = vmul.f32 %v2924_v58, %v3696_v25  ;;  %v389_v51 = vadd.f32 %v3704_v29, %v350_v33  ;;  %v618_v56 = vrot.slane %v3884_v46, 1  ;;  %v3536_v33 = vld [vmem:[%s5164_s3 + $0x160] sm:$0xff]  }
  0x30   : > { %3174 = vmatprep.subr.bf16.mxu0 %v3519_v13  ;;  %3062 = vmatprep.subr.bf16.mxu1 %v3514_v22  ;;  %v3852_v6 = vpack.c.bf16 %v683_v1, %v700_v2  ;;  %v371_v13 = vmul.f32 %v2923_v43, %v3696_v25  ;;  %v3518_v22 = vld [vmem:[%s5164_s3 + $0xd8] sm:$0xff]   ;;  %v412_v52 = vadd.f32 %v3704_v29, %v373_v36  ;;  %v635_v1 = vrot.slane %v3893_v54, 1 }
  0x31   : > { %1457 = vmatprep.mubr.bf16.mxu0 %v3842_v61  ;;  %v411_v26 = vadd.f32 %v3704_v29, %v372_v14  ;;  %v652_v2 = vrot.slane %v3896_v55, 1  ;;  %v3905_v4 = vpack.c.bf16 %v3893_v54, %v487_v31  ;;  %v421_v17 = vmax.f32 %v389_v51, 0.0 }
  0x32   : > { %5203 = vst [vmem:[#allocation5_spill] sm:$0xff] %v3852_v6  ;;  %1553 = vmatprep.mubr.bf16.mxu1 %v3852_v6  ;;  %v410_v24 = vadd.f32 %v3704_v29, %v371_v13  ;;  %v3535_v13 = vld [vmem:[%s5164_s3 + $0x118] sm:$0xff]   ;;  %v689_v21 = vsel %vm669_vm1, %v618_v56, %v635_v1 }
  0x33   : > { %3175 = vmatpush3.bf16.msra.mxu0 %v3521_v32  ;;  %3063 = vmatpush3.bf16.msra.mxu1 %v3515_v39  ;;  %v349_v32 = vmul.f32 %v2879_v18, %v3696_v25  ;;  %v443_v43 = vmax.f32 %v411_v26, 0.0  ;;  %5204 = vst [vmem:[#allocation6_spill] sm:$0xff] %v3905_v4  ;;  %v413_v18 = vadd.f32 %v3704_v29, %v374_v45  ;;  %v3946_v45 = vld [vmem:[%s3690_s28 + $0x20] sm:$0xff]  }
  0x34   : > { %3176 = vmatprep.subr.bf16.mxu0 %v3527_v60  ;;  %3064 = vmatprep.subr.bf16.mxu1 %v3516_v3  ;;  %v442_v39 = vmax.f32 %v410_v24, 0.0  ;;  %v3534_v60 = vld [vmem:[%s5164_s3 + $0x158] sm:$0xff]   ;;  %v672_v20 = vsel %vm669_vm1, %v635_v1, %v652_v2 }
  0x35   : > { %v388_v50 = vadd.f32 %v3704_v29, %v349_v32  ;;  %v524_v3 = vrot.slane %v443_v43, 7  ;;  %v2935_v24 = vld [vmem:[%s3690_s28 + $0x18] sm:$0xff]   ;;  %v3931_v26 = vpack.c.bf16 %v672_v20, %v689_v21  ;;  %v444_v43 = vmax.f32 %v412_v52, 0.0 }
  0x36   : > { %2680 = vmatmul.mubr.msk.bf16.gmra.mrb[4].mxu0 %vm3765_vm4, %v3829_v53  ;;  %2728 = vmatmul.mubr.msk.bf16.gmra.mrb[4].mxu1 %vm3765_vm4, %v3837_v57  ;;  %v523_v58 = vrot.slane %v442_v39, 7  ;;  %v491_v39 = vrot.slane %v421_v17, 7  ;;  %v445_v51 = vmax.f32 %v413_v18, 0.0  ;;  %v2883_v56 = vunpack.c.l.bf16 %v2935_v24 }
  0x37   : > { %3177 = vmatpush3.bf16.msra.mxu0 %v3529_v15  ;;  %3065 = vmatpush3.bf16.msra.mxu1 %v3517_v16  ;;  %v3524_v15 = vld [vmem:[%s5164_s3 + $0xe8] sm:$0xff]   ;;  %v420_v16 = vmax.f32 %v388_v50, 0.0  ;;  %v3928_v23 = vsel %vm481_vm0, %v524_v3, 0.0  ;;  %v526_v17 = vrot.slane %v444_v43, 7  ;;  %v2884_v21 = vunpack.c.h.bf16 %v2935_v24 }
  0x38   : > { %3066 = vmatprep.subr.bf16.mxu1 %v3518_v22  ;;  %v3914_v14 = vsel %vm481_vm0, 0.0, %v523_v58  ;;  %3178 = vmatprep.subr.bf16.mxu0 %v3534_v60  ;;  %v3925_v22 = vsel %vm481_vm0, %v523_v58, %v524_v3  ;;  %5207 = vst [vmem:[#allocation9_spill] sm:$0xff] %v3928_v23  ;;  %v664_v32 = vrot.slane %v3928_v23, 1  ;;  %v3968_v2 = vsel %vm481_vm0, %v491_v39, 0.0 }
  0x39   : > { %5205 = vst [vmem:[#allocation7_spill] sm:$0xff] %v3914_v14  ;;  %5206 = vst [vmem:[#allocation8_spill] sm:$0xff] %v3925_v22  ;;  %v630_v28 = vrot.slane %v3914_v14, 1  ;;  %v647_v31 = vrot.slane %v3925_v22, 1  ;;  %v3940_v36 = vpack.c.bf16 %v3925_v22, %v523_v58  ;;  %v490_v38 = vrot.slane %v420_v16, 7  ;;  %1465 = vmatprep.mubr.bf16.mxu0 %v3931_v26  ;;  %v3538_v58 = vld [vmem:[%s5164_s3 + $0x120] sm:$0xff]  }
  0x3a   : > { %v653_v16 = vrot.slane %v3968_v2, 1  ;;  %v527_v18 = vrot.slane %v445_v51, 7  ;;  %v2887_v24 = vunpack.c.l.bf16 %v3946_v45  ;;  %v3528_v51 = vld [vmem:[%s5164_s3 + $0xb0] sm:$0xff]  }
  0x3b   : > { %3067 = vmatpush3.bf16.msra.mxu1 %v3520_v37  ;;  %3179 = vmatpush3.bf16.msra.mxu0 %v3535_v13  ;;  %v3525_v37 = vld [vmem:[%s5164_s3 + $0xa8] sm:$0xff]   ;;  %v701_v50 = vsel %vm669_vm1, %v630_v28, %v647_v31  ;;  %v3962_v52 = vsel %vm481_vm0, %v490_v38, %v491_v39  ;;  %v3965_v1 = vsel %vm481_vm0, 0.0, %v490_v38 }
  0x3c   : > { %3068 = vmatprep.subr.bf16.mxu1 %v3522_v49  ;;  %v684_v49 = vsel %vm669_vm1, %v647_v31, %v664_v32  ;;  %3180 = vmatprep.subr.bf16.mxu0 %v3536_v33  ;;  %v619_v3 = vrot.slane %v3965_v1, 1  ;;  %v636_v13 = vrot.slane %v3962_v52, 1  ;;  %v3978_v20 = vpack.c.bf16 %v3962_v52, %v490_v38  ;;  %v3540_v28 = vld [vmem:[%s5164_s3 + $0x168] sm:$0xff]  }
  0x3d   : > { %v3956_v60 = vpack.c.bf16 %v684_v49, %v701_v50  ;;  %v3992_v33 = vsel %vm481_vm0, 0.0, %v526_v17  ;;  %v3541_v38 = vld [vmem:[%s5164_s3 + $0x128] sm:$0xff]   ;;  %v4001_v43 = vsel %vm481_vm0, %v526_v17, %v527_v18  ;;  %v4004_v49 = vsel %vm481_vm0, %v527_v18, 0.0 }
  0x3e   : > { %2684 = vmatmul.mubr.msk.bf16.gmra.mrb[8].mxu0 %vm3765_vm4, %v3905_v4  ;;  %5209 = vst [vmem:[#allocation11_spill] sm:$0xff] %v3978_v20  ;;  %v673_v31 = vsel %vm669_vm1, %v636_v13, %v653_v16  ;;  %v690_v32 = vsel %vm669_vm1, %v619_v3, %v636_v13  ;;  %v631_v50 = vrot.slane %v3992_v33, 1  ;;  %v352_v3 = vmul.f32 %v2884_v21, %v3696_v25  ;;  %v3531_v13 = vld [vmem:[%s5164_s3 + $0xb8] sm:$0xff]  }
  0x3f   : > { %5208 = vst [vmem:[#allocation10_spill] sm:$0xff] %v3956_v60  ;;  %3069 = vmatpush3.bf16.msra.mxu1 %v3523_v7  ;;  %v3526_v7 = vld [vmem:[%s5164_s3 + $0xf0] sm:$0xff]   ;;  %3181 = vmatpush3.bf16.msra.mxu0 %v3538_v58  ;;  %v3998_v39 = vpack.c.bf16 %v673_v31, %v690_v32  ;;  %v665_v58 = vrot.slane %v4004_v49, 1  ;;  %v2888_v18 = vunpack.c.h.bf16 %v3946_v45  ;;  %v2937_v31 = vld [vmem:[%s3690_s28 + $0x28] sm:$0xff]   ;;  %v4030_v32 = vpack.c.bf16 %v4001_v43, %v526_v17 }
  0x40   : > { %3070 = vmatprep.subr.bf16.mxu1 %v3524_v15  ;;  %1561 = vmatprep.mubr.bf16.mxu1 %v3956_v60  ;;  %v351_v15 = vmul.f32 %v2883_v56, %v3696_v25  ;;  %v3530_v56 = vld [vmem:[%s5164_s3 + $0xf8] sm:$0xff]   ;;  %v3545_v17 = vld [vmem:[%s5164_s3 + $0x130] sm:$0xff]  }
  0x41   : > { %2732 = vmatmul.mubr.msk.bf16.gmra.mrb[8].mxu1 %vm3765_vm4, %v3940_v36  ;;  %3182 = vmatprep.subr.bf16.mxu0 %v3540_v28  ;;  %v353_v28 = vmul.f32 %v2887_v24, %v3696_v25  ;;  %5210 = vst [vmem:[#allocation12_spill] sm:$0xff] %v4030_v32  ;;  %v354_v24 = vmul.f32 %v2888_v18, %v3696_v25 }
  0x42   : > { %1473 = vmatprep.mubr.bf16.mxu0 %v3998_v39  ;;  %v390_v16 = vadd.f32 %v3704_v29, %v351_v15  ;;  %v3544_v15 = vld [vmem:[%s5164_s3 + $0x170] sm:$0xff]  }
  0x43   : > { %3071 = vmatpush3.bf16.msra.mxu1 %v3525_v37  ;;  %v648_v37 = vrot.slane %v4001_v43, 1  ;;  %3183 = vmatpush3.bf16.msra.mxu0 %v3541_v38  ;;  %v391_v38 = vadd.f32 %v3704_v29, %v352_v3  ;;  %v393_v18 = vadd.f32 %v3704_v29, %v354_v24 }
  0x44   : > { %3072 = vmatprep.subr.bf16.mxu1 %v3526_v7  ;;  %v422_v45 = vmax.f32 %v390_v16, 0.0  ;;  %v3532_v16 = vld [vmem:[%s5164_s3 + $0x1c0] sm:$0xff]   ;;  %3184 = vmatprep.subr.bf16.mxu0 %v3544_v15 }
  0x45   : > { %v685_v7 = vsel %vm669_vm1, %v648_v37, %v665_v58  ;;  %v702_v21 = vsel %vm669_vm1, %v631_v50, %v648_v37  ;;  %v392_v50 = vadd.f32 %v3704_v29, %v353_v28  ;;  %v423_v37 = vmax.f32 %v391_v38, 0.0 }
  0x46   : > { %v4036_v34 = vpack.c.bf16 %v685_v7, %v702_v21  ;;  %2688 = vmatmul.mubr.msk.bf16.gmra.mrb[12].mxu0 %vm3765_vm4, %v3978_v20  ;;  %v756_v58 = vsel %vm755_vm5, %v721_v44, %v738_v35  ;;  %v493_v9 = vrot.slane %v422_v45, 7  ;;  %v2892_v35 = vunpack.c.h.bf16 %v2937_v31  ;;  %v3548_v21 = vld [vmem:[%s5164_s3 + $0x178] sm:$0xff]  }
  0x47   : > { %3073 = vmatpush3.bf16.msra.mxu1 %v3528_v51  ;;  %v5212_v51 = vrot.slane %v3640_v8, 2  ;;  %v424_v28 = vmax.f32 %v392_v50, 0.0  ;;  %3185 = vmatpush3.bf16.msra.mxu0 %v3545_v17  ;;  %v494_v5 = vrot.slane %v423_v37, 7  ;;  %v705_v8 = vrot.slane %v3792_v30, 2 }
  0x48   : > { %5211 = vst [vmem:[#allocation13_spill] sm:$0xff] %v4036_v34  ;;  %3074 = vmatprep.subr.bf16.mxu1 %v3530_v56  ;;  %v2891_v56 = vunpack.c.l.bf16 %v2937_v31  ;;  %1569 = vmatprep.mubr.bf16.mxu1 %v4036_v34  ;;  %v4073_v38 = vsel %vm481_vm0, 0.0, %v493_v9  ;;  %v425_v15 = vmax.f32 %v393_v18, 0.0  ;;  %v356_v50 = vmul.f32 %v2892_v35, %v3696_v25 }
  0x49   : > { %v773_v3 = vsel %vm755_vm5, %v5212_v51, %v721_v44  ;;  %2736 = vmatmul.mubr.msk.bf16.gmra.mrb[12].mxu1 %vm3765_vm4, %v4030_v32  ;;  %v722_v44 = vrot.slane %v3805_v40, 2  ;;  %v496_v30 = vrot.slane %v424_v28, 7  ;;  %v3549_v40 = vld [vmem:[%s5164_s3 + $0x138] sm:$0xff]   ;;  %v4084_v45 = vsel %vm481_vm0, %v493_v9, %v494_v5  ;;  %3186 = vmatprep.subr.bf16.mxu0 %v3548_v21 }
  0x4a   : > { %v355_v7 = vmul.f32 %v2891_v56, %v3696_v25  ;;  %2740 = vmatprep.mubr.msk.bf16.mxu1 %vm3765_vm4, %v3829_v53  ;;  %v4078_v31 = vpack.c.bf16 %v756_v58, %v773_v3  ;;  %v620_v24 = vrot.slane %v4073_v38, 1  ;;  %v637_v53 = vrot.slane %v4084_v45, 1  ;;  %v3533_v3 = vld [vmem:[%s5164_s3 + $0x180] sm:$0xff]  }
  0x4b   : > { %3075 = vmatpush3.bf16.msra.mxu1 %v3531_v13  ;;  %v4087_v13 = vsel %vm481_vm0, %v494_v5, 0.0  ;;  %v497_v37 = vrot.slane %v425_v15, 7  ;;  %v739_v58 = vrot.slane %v3808_v41, 2  ;;  %3187 = vmatpush3.bf16.msra.mxu0 %v3549_v40  ;;  %v4095_v51 = vpack.c.bf16 %v4084_v45, %v493_v9  ;;  %v2938_v5 = vld [vmem:[%s3690_s28 + $0x30] sm:$0xff]  }
  0x4c   : > { %5213 = vst [vmem:[#allocation14_spill] sm:$0xff] %v4078_v31  ;;  %3284 = vmatprep.subr.bf16.mxu1 %v3532_v16  ;;  %v654_v17 = vrot.slane %v4087_v13, 1  ;;  %v4101_v16 = vsel %vm481_vm0, 0.0, %v496_v30  ;;  %v394_v56 = vadd.f32 %v3704_v29, %v355_v7  ;;  %v395_v18 = vadd.f32 %v3704_v29, %v356_v50  ;;  %v3537_v50 = vld [vmem:[%s5164_s3 + $0x1c8] sm:$0xff]  }
  0x4d   : > { %5214 = vst [vmem:[#allocation15_spill] sm:$0xff] %v4095_v51  ;;  %v691_v41 = vsel %vm669_vm1, %v620_v24, %v637_v53  ;;  %v4110_v9 = vsel %vm481_vm0, %v496_v30, %v497_v37  ;;  %v4113_v35 = vsel %vm481_vm0, %v497_v37, 0.0  ;;  %v621_v15 = vrot.slane %v4101_v16, 1 }
  0x4e   : > { %v674_v28 = vsel %vm669_vm1, %v637_v53, %v654_v17  ;;  %v638_v7 = vrot.slane %v4110_v9, 1  ;;  %v655_v40 = vrot.slane %v4113_v35, 1  ;;  %v757_v24 = vsel %vm755_vm5, %v722_v44, %v739_v58 }
  0x4f   : > { %v4116_v21 = vpack.c.bf16 %v674_v28, %v691_v41  ;;  %v774_v53 = vsel %vm755_vm5, %v705_v8, %v722_v44  ;;  %v426_v17 = vmax.f32 %v394_v56, 0.0  ;;  %v427_v37 = vmax.f32 %v395_v18, 0.0  ;;  %v4131_v28 = vld [vmem:[%s5164_s3 + $0x200] sm:$0xff]   ;;  %v3539_v8 = vld [vmem:[%s5164_s3 + $0x188] sm:$0xff]  }
  0x50   : > { %v675_v41 = vsel %vm669_vm1, %v638_v7, %v655_v40  ;;  %v692_v58 = vsel %vm669_vm1, %v621_v15, %v638_v7  ;;  %v2895_v44 = vunpack.c.l.bf16 %v2938_v5  ;;  %v4150_v15 = vpack.c.bf16 %v757_v24, %v774_v53  ;;  %3420 = vmatprep.subr.bf16.mxu0 %v4131_v28 }
  0x51   : > { %1481 = vmatprep.mubr.bf16.mxu0 %v4116_v21  ;;  %1611 = vmatmul.mubr.bf16.vlgmr.msra.gmra.mrb[16].mxu1 %v4078_v31  ;;  %v4145_v56 = vpack.c.bf16 %v675_v41, %v692_v58  ;;  %v499_v18 = vrot.slane %v426_v17, 7  ;;  %v500_v31 = vrot.slane %v427_v37, 7  ;;  %v706_v7 = vrot.slane %v3884_v46, 2 }
  0x52   : > { %2692 = vmatmul.mubr.msk.bf16.gmra.mrb[16].mxu0 %vm3765_vm4, %v4095_v51  ;;  %3285 = vmatpush3.bf16.msra.mxu1 %v3533_v3  ;;  %v2896_v40 = vunpack.c.h.bf16 %v2938_v5  ;;  %v357_v59 = vmul.f32 %v2895_v44, %v3696_v25  ;;  %v3542_v3 = vld [vmem:[%s5164_s3 + $0x1d0] sm:$0xff]   ;;  %v723_v46 = vrot.slane %v3893_v54, 2  ;;  %v2939_v5 = vld [vmem:[%s3690_s28 + $0x38] sm:$0xff]   ;;  %v740_v58 = vrot.slane %v3896_v55, 2 }
  0x53   : > { %2744 = vmatprep.mubr.msk.bf16.mxu1 %vm3765_vm4, %v3905_v4  ;;  %3286 = vmatprep.subr.bf16.mxu1 %v3537_v50  ;;  %v4159_v17 = vsel %vm481_vm0, %v499_v18, %v500_v31  ;;  %v4162_v37 = vsel %vm481_vm0, 0.0, %v499_v18  ;;  %v4165_v24 = vsel %vm481_vm0, %v500_v31, 0.0  ;;  %v4175_v44 = vpack.c.bf16 %v4110_v9, %v496_v30  ;;  %v2940_v30 = vld [vmem:[%s3690_s28 + $0x40] sm:$0xff]   ;;  %v3546_v4 = vld [vmem:[%s5164_s3 + $0x1d8] sm:$0xff]  }
  0x54   : > { %1489 = vmatprep.mubr.bf16.mxu0 %v4145_v56  ;;  %v622_v50 = vrot.slane %v4162_v37, 1  ;;  %v639_v53 = vrot.slane %v4159_v17, 1  ;;  %v656_v41 = vrot.slane %v4165_v24, 1  ;;  %v358_v31 = vmul.f32 %v2896_v40, %v3696_v25 }
  0x55   : > { %5215 = vst [vmem:[#allocation16_spill] sm:$0xff] %v4175_v44  ;;  %v396_v54 = vadd.f32 %v3704_v29, %v357_v59  ;;  %v2899_v6 = vunpack.c.l.bf16 %v2939_v5  ;;  %v2900_v55 = vunpack.c.h.bf16 %v2939_v5 }
  0x56   : > { %3287 = vmatpush3.bf16.msra.mxu1 %v3539_v8  ;;  %v676_v34 = vsel %vm669_vm1, %v639_v53, %v656_v41  ;;  %v693_v60 = vsel %vm669_vm1, %v622_v50, %v639_v53  ;;  %v775_v8 = vsel %vm755_vm5, %v706_v7, %v723_v46  ;;  %v397_v59 = vadd.f32 %v3704_v29, %v358_v31  ;;  %v3547_v31 = vld [vmem:[%s5164_s3 + $0x198] sm:$0xff]  }
  0x57   : > { %3288 = vmatprep.subr.bf16.mxu1 %v3542_v3  ;;  %v4187_v27 = vpack.c.bf16 %v676_v34, %v693_v60  ;;  %v428_v40 = vmax.f32 %v396_v54, 0.0  ;;  %v758_v50 = vsel %vm755_vm5, %v723_v46, %v740_v58  ;;  %v707_v3 = vrot.slane %v3965_v1, 2  ;;  %v3550_v54 = vld [vmem:[%s5164_s3 + $0x1e0] sm:$0xff]  }
  0x58   : > { %v359_v34 = vmul.f32 %v2899_v6, %v3696_v25  ;;  %v360_v60 = vmul.f32 %v2900_v55, %v3696_v25  ;;  %v429_v7 = vmax.f32 %v397_v59, 0.0  ;;  %v724_v53 = vrot.slane %v3962_v52, 2 }
  0x59   : > { %5216 = vst [vmem:[#allocation17_spill] sm:$0xff] %v4187_v27  ;;  %1619 = vmatmul.mubr.bf16.gmra.mrb[20].mxu1 %v4150_v15  ;;  %v4207_v5 = vrot.slane %v428_v40, 7  ;;  %v741_v46 = vrot.slane %v3968_v2, 2  ;;  %v2903_v41 = vunpack.c.l.bf16 %v2940_v30  ;;  %v2904_v58 = vunpack.c.h.bf16 %v2940_v30 }
  0x5a   : > { %2696 = vmatmul.mubr.msk.bf16.gmra.mrb[20].mxu0 %vm3765_vm4, %v4175_v44  ;;  %2748 = vmatprep.mubr.msk.bf16.mxu1 %vm3765_vm4, %v3978_v20  ;;  %v398_v6 = vadd.f32 %v3704_v29, %v359_v34  ;;  %v399_v1 = vadd.f32 %v3704_v29, %v360_v60  ;;  %v4220_v52 = vpack.c.bf16 %v758_v50, %v775_v8  ;;  %v503_v2 = vrot.slane %v429_v7, 7 }
  0x5b   : > { %1497 = vmatprep.mubr.bf16.mxu0 %v4187_v27  ;;  %3289 = vmatpush3.bf16.msra.mxu1 %v3543_v19  ;;  %v4224_v55 = vsel %vm481_vm0, 0.0, %v4207_v5  ;;  %v4227_v19 = vpack.c.bf16 %v4159_v17, %v499_v18  ;;  %v361_v50 = vmul.f32 %v2903_v41, %v3696_v25  ;;  %v362_v60 = vmul.f32 %v2904_v58, %v3696_v25 }
  0x5c   : > { %3290 = vmatprep.subr.bf16.mxu1 %v3546_v4  ;;  %v623_v30 = vrot.slane %v4224_v55, 1  ;;  %v430_v59 = vmax.f32 %v398_v6, 0.0  ;;  %v431_v40 = vmax.f32 %v399_v1, 0.0  ;;  %v4232_v34 = vsel %vm481_vm0, %v4207_v5, %v503_v2  ;;  %v3552_v1 = vld [vmem:[%s5164_s3 + $0x1a0] sm:$0xff]  }
  0x5d   : > { %5217 = vst [vmem:[#allocation18_spill] sm:$0xff] %v4227_v19  ;;  %v4235_v8 = vsel %vm481_vm0, %v503_v2, 0.0  ;;  %v640_v4 = vrot.slane %v4232_v34, 1  ;;  %v776_v7 = vsel %vm755_vm5, %v707_v3, %v724_v53  ;;  %v759_v41 = vsel %vm755_vm5, %v724_v53, %v741_v46  ;;  %v3553_v3 = vld [vmem:[%s5164_s3 + $0x1e8] sm:$0xff]  }
  0x5e   : > { %v657_v18 = vrot.slane %v4235_v8, 1  ;;  %v4243_v6 = vrot.slane %v430_v59, 7  ;;  %v506_v2 = vrot.slane %v431_v40, 7  ;;  %v400_v25 = vadd.f32 %v3704_v29, %v361_v50 }
  0x5f   : > { %3291 = vmatpush3.bf16.msra.mxu1 %v3547_v31  ;;  %v401_v58 = vadd.f32 %v3704_v29, %v362_v60  ;;  %v694_v59 = vsel %vm669_vm1, %v623_v30, %v640_v4  ;;  %v725_v46 = vrot.slane %v4084_v45, 2  ;;  %v2941_v29 = vld [vmem:[%s3690_s28 + $0x48] sm:$0xff]  }
  0x60   : > { %3292 = vmatprep.subr.bf16.mxu1 %v3550_v54  ;;  %v677_v31 = vsel %vm669_vm1, %v640_v4, %v657_v18  ;;  %v4262_v53 = vsel %vm481_vm0, 0.0, %v4243_v6  ;;  %v4276_v30 = vsel %vm481_vm0, %v4243_v6, %v506_v2  ;;  %v4279_v40 = vsel %vm481_vm0, %v506_v2, 0.0 }
  0x61   : > { %1627 = vmatmul.mubr.bf16.gmra.mrb[24].mxu1 %v4220_v52  ;;  %v4269_v54 = vpack.c.bf16 %v677_v31, %v694_v59  ;;  %v624_v45 = vrot.slane %v4262_v53, 1  ;;  %v641_v50 = vrot.slane %v4276_v30, 1  ;;  %v658_v60 = vrot.slane %v4279_v40, 1  ;;  %v3555_v31 = vld [vmem:[%s5164_s3 + $0x1a8] sm:$0xff]  }
  0x62   : > { %2700 = vmatmul.mubr.msk.bf16.gmra.mrb[24].mxu0 %vm3765_vm4, %v4227_v19  ;;  %2752 = vmatprep.mubr.msk.bf16.mxu1 %vm3765_vm4, %v4095_v51  ;;  %v742_v4 = vrot.slane %v4087_v13, 2  ;;  %v432_v18 = vmax.f32 %v400_v25, 0.0  ;;  %v4289_v59 = vpack.c.bf16 %v759_v41, %v776_v7  ;;  %v708_v2 = vrot.slane %v4073_v38, 2  ;;  %v3556_v13 = vld [vmem:[%s5164_s3 + $0x1f0] sm:$0xff]  }
  0x63   : > { %5218 = vst [vmem:[#allocation19_spill] sm:$0xff] %v4269_v54  ;;  %3293 = vmatpush3.bf16.msra.mxu1 %v3552_v1  ;;  %1505 = vmatprep.mubr.bf16.mxu0 %v4269_v54  ;;  %v433_v51 = vmax.f32 %v401_v58, 0.0  ;;  %v2907_v20 = vunpack.c.l.bf16 %v2941_v29  ;;  %v678_v1 = vsel %vm669_vm1, %v641_v50, %v658_v60  ;;  %v695_v25 = vsel %vm669_vm1, %v624_v45, %v641_v50  ;;  %v4308_v58 = vld [vmem:[%s5162_s1] ss:$0 sm:$0xff]  ;;  %v2942_v50 = vld [vmem:[%s3690_s28 + $0x50] sm:$0xff]  }
  0x64   : > { %3294 = vmatprep.subr.bf16.mxu1 %v3553_v3  ;;  %v4299_v32 = vrot.slane %v432_v18, 7  ;;  %v2908_v7 = vunpack.c.h.bf16 %v2941_v29  ;;  %v4303_v38 = vpack.c.bf16 %v4232_v34, %v4207_v5  ;;  %v4311_v54 = vpack.c.bf16 %v678_v1, %v695_v25  ;;  %v4335_v18 = vld [vmem:[%s5163_s2] ss:$0 sm:$0xff]  ;;  %v3559_v1 = vld [vmem:[%s5164_s3 + $0x1f8] sm:$0xff]  }
  0x65   : > { %v509_v41 = vrot.slane %v433_v51, 7  ;;  %v363_v3 = vmul.f32 %v4308_v58, %v2907_v20  ;;  %v760_v45 = vsel %vm755_vm5, %v725_v46, %v742_v4  ;;  %v3558_v51 = vld [vmem:[%s5164_s3 + $0x1b0] sm:$0xff]   ;;  %v777_v25 = vsel %vm755_vm5, %v708_v2, %v725_v46  ;;  %v3561_v2 = vld [vmem:[%s5164_s3 + $0x1b8] sm:$0xff]  }
  0x66   : > { %5219 = vst [vmem:[#allocation20_spill] sm:$0xff] %v4303_v38  ;;  %5220 = vst [vmem:[#allocation21_spill] sm:$0xff] %v4311_v54  ;;  %v4317_v29 = vsel %vm481_vm0, 0.0, %v4299_v32  ;;  %v364_v5 = vmul.f32 %v4308_v58, %v2908_v7  ;;  %v2912_v46 = vunpack.c.h.bf16 %v2942_v50 }
  0x67   : > { %3295 = vmatpush3.bf16.msra.mxu1 %v3555_v31  ;;  %v4326_v20 = vsel %vm481_vm0, %v4299_v32, %v509_v41  ;;  %v4329_v60 = vsel %vm481_vm0, %v509_v41, 0.0  ;;  %v625_v4 = vrot.slane %v4317_v29, 1  ;;  %v402_v31 = vadd.f32 %v4335_v18, %v363_v3 }
  0x68   : > { %3296 = vmatprep.subr.bf16.mxu1 %v3556_v13  ;;  %v642_v7 = vrot.slane %v4326_v20, 1  ;;  %v659_v41 = vrot.slane %v4329_v60, 1  ;;  %v403_v27 = vadd.f32 %v4335_v18, %v364_v5  ;;  %v2911_v3 = vunpack.c.l.bf16 %v2942_v50 }
  0x69   : > { %1635 = vmatmul.mubr.bf16.gmra.mrb[28].mxu1 %v4289_v59  ;;  %v434_v13 = vmax.f32 %v402_v31, 0.0  ;;  %v4357_v5 = vpack.c.bf16 %v760_v45, %v777_v25  ;;  %v709_v31 = vrot.slane %v4101_v16, 2  ;;  %v366_v50 = vmul.f32 %v4308_v58, %v2912_v46 }
  0x6a   : > { %2704 = vmatmul.mubr.msk.bf16.gmra.mrb[28].mxu0 %vm3765_vm4, %v4303_v38  ;;  %2756 = vmatprep.mubr.msk.bf16.mxu1 %vm3765_vm4, %v4175_v44  ;;  %v435_v23 = vmax.f32 %v403_v27, 0.0  ;;  %v679_v22 = vsel %vm669_vm1, %v642_v7, %v659_v41  ;;  %v696_v14 = vsel %vm669_vm1, %v625_v4, %v642_v7  ;;  %v365_v27 = vmul.f32 %v4308_v58, %v2911_v3 }
  0x6b   : > { %1513 = vmatprep.mubr.bf16.mxu0 %v4311_v54  ;;  %3297 = vmatpush3.bf16.msra.mxu1 %v3558_v51  ;;  %v511_v44 = vrot.slane %v434_v13, 7  ;;  %v4368_v51 = vpack.c.bf16 %v4276_v30, %v4243_v6  ;;  %v726_v45 = vrot.slane %v4110_v9, 2  ;;  %v743_v25 = vrot.slane %v4113_v35, 2 }
  0x6c   : > { %3298 = vmatprep.subr.bf16.mxu1 %v3559_v1  ;;  %v512_v54 = vrot.slane %v435_v23, 7  ;;  %v4375_v4 = vpack.c.bf16 %v679_v22, %v696_v14  ;;  %v404_v1 = vadd.f32 %v4335_v18, %v365_v27  ;;  %v405_v7 = vadd.f32 %v4335_v18, %v366_v50 }
  0x6d   : > { %v4373_v41 = vsel %vm481_vm0, 0.0, %v511_v44  ;;  %v761_v22 = vsel %vm755_vm5, %v726_v45, %v743_v25  ;;  %v4406_v50 = vpack.c.bf16 %v4326_v20, %v4299_v32  ;;  %v710_v25 = vrot.slane %v4162_v37, 2 }
  0x6e   : > { %v4378_v16 = vsel %vm481_vm0, %v511_v44, %v512_v54  ;;  %v4381_v23 = vsel %vm481_vm0, %v512_v54, 0.0  ;;  %v626_v6 = vrot.slane %v4373_v41, 1  ;;  %v436_v14 = vmax.f32 %v404_v1, 0.0 }
  0x6f   : > { %3299 = vmatpush3.bf16.msra.mxu1 %v3561_v2  ;;  %v643_v9 = vrot.slane %v4378_v16, 1  ;;  %v660_v35 = vrot.slane %v4381_v23, 1  ;;  %v778_v54 = vsel %vm755_vm5, %v709_v31, %v726_v45  ;;  %v437_v13 = vmax.f32 %v405_v7, 0.0 }
  0x70   : > { %v514_v3 = vrot.slane %v436_v14, 7  ;;  %v4408_v1 = vpack.c.bf16 %v761_v22, %v778_v54  ;;  %v727_v45 = vrot.slane %v4159_v17, 2 }
  0x71   : > { %1643 = vmatmul.mubr.bf16.gmra.mrb[32].mxu1 %v4357_v5  ;;  %v680_v46 = vsel %vm669_vm1, %v643_v9, %v660_v35  ;;  %v697_v2 = vsel %vm669_vm1, %v626_v6, %v643_v9  ;;  %v515_v27 = vrot.slane %v437_v13, 7  ;;  %v744_v35 = vrot.slane %v4165_v24, 2  ;;  %v2947_v13 = vld [vmem:[%s3690_s28 + $0x78] sm:$0xff]  }
  0x72   : > { %2708 = vmatmul.mubr.msk.bf16.gmra.mrb[32].mxu0 %vm3765_vm4, %v4368_v51  ;;  %2760 = vmatprep.mubr.msk.bf16.mxu1 %vm3765_vm4, %v4227_v19  ;;  %v4412_v31 = vsel %vm481_vm0, 0.0, %v514_v3  ;;  %v4422_v32 = vpack.c.bf16 %v680_v46, %v697_v2  ;;  %v779_v24 = vsel %vm755_vm5, %v710_v25, %v727_v45  ;;  %v4447_v2 = vpack.c.bf16 %v4378_v16, %v511_v44 }
  0x73   : > { %1521 = vmatprep.mubr.bf16.mxu0 %v4375_v4  ;;  %v4417_v7 = vsel %vm481_vm0, %v514_v3, %v515_v27  ;;  %v4420_v6 = vsel %vm481_vm0, %v515_v27, 0.0  ;;  %v627_v9 = vrot.slane %v4412_v31, 1  ;;  %v762_v17 = vsel %vm755_vm5, %v727_v45, %v744_v35 }
  0x74   : > { %v644_v37 = vrot.slane %v4417_v7, 1  ;;  %v661_v14 = vrot.slane %v4420_v6, 1  ;;  %v4444_v46 = vpack.c.bf16 %v762_v17, %v779_v24  ;;  %v711_v27 = vrot.slane %v4224_v55, 2 }
  0x75   : > { %v728_v35 = vrot.slane %v4232_v34, 2  ;;  %v745_v25 = vrot.slane %v4235_v8, 2  ;;  %v2932_v19 = vunpack.c.h.bf16 %v2947_v13  ;;  %v736_v44 = vrot.slane %v4001_v43, 2 }
  0x76   : > { %v681_v22 = vsel %vm669_vm1, %v644_v37, %v661_v14  ;;  %v698_v54 = vsel %vm669_vm1, %v627_v9, %v644_v37  ;;  %v719_v14 = vrot.slane %v3992_v33, 2  ;;  %v753_v34 = vrot.slane %v4004_v49, 2 }
  0x77   : > { %v4452_v45 = vpack.c.bf16 %v681_v22, %v698_v54  ;;  %v376_v37 = vmul.f32 %v4308_v58, %v2932_v19  ;;  %v763_v55 = vsel %vm755_vm5, %v728_v35, %v745_v25  ;;  %v780_v33 = vsel %vm755_vm5, %v711_v27, %v728_v35 }
  0x78   : > { %v788_v8 = vsel %vm755_vm5, %v719_v14, %v736_v44  ;;  %v4482_v49 = vpack.c.bf16 %v4417_v7, %v514_v3  ;;  %v712_v54 = vrot.slane %v4262_v53, 2 }
  0x79   : > { %1651 = vmatmul.mubr.bf16.gmra.mrb[36].mxu1 %v4408_v1  ;;  %v415_v19 = vadd.f32 %v4335_v18, %v376_v37 }
  0x7a   : > { %2712 = vmatmul.mubr.msk.bf16.gmra.mrb[36].mxu0 %vm3765_vm4, %v4406_v50  ;;  %2764 = vmatprep.mubr.msk.bf16.mxu1 %vm3765_vm4, %v4303_v38  ;;  %v2931_v38 = vunpack.c.l.bf16 %v2947_v13  ;;  %v729_v13 = vrot.slane %v4276_v30, 2 }
  0x7b   : > { %1529 = vmatprep.mubr.bf16.mxu0 %v4422_v32  ;;  %v447_v24 = vmax.f32 %v415_v19, 0.0 }
  0x7c   : > { %v375_v9 = vmul.f32 %v4308_v58, %v2931_v38  ;;  %v771_v38 = vsel %vm755_vm5, %v736_v44, %v753_v34  ;;  %v4477_v58 = vpack.c.bf16 %v763_v55, %v780_v33  ;;  %v781_v30 = vsel %vm755_vm5, %v712_v54, %v729_v13 }
  0x7d   : > { %v4479_v22 = vpack.c.bf16 %v771_v38, %v788_v8  ;;  %v530_v35 = vrot.slane %v447_v24, 7  ;;  %v713_v34 = vrot.slane %v4317_v29, 2  ;;  %v3554_v8 = vld [vmem:[%s5164_s3 + $0x208] sm:$0xff]   ;;  %v714_v38 = vrot.slane %v4373_v41, 2 }
  0x7e   : > { %v414_v43 = vadd.f32 %v4335_v18, %v375_v9  ;;  %v746_v18 = vrot.slane %v4279_v40, 2  ;;  %v748_v24 = vrot.slane %v4381_v23, 2  ;;  %v3562_v23 = vld [vmem:[%s5164_s3 + $0x220] sm:$0xff]  }
  0x7f   : > { %v4495_v14 = vsel %vm481_vm0, %v530_v35, 0.0 }
  0x80   : > { %v446_v17 = vmax.f32 %v414_v43, 0.0  ;;  %v764_v53 = vsel %vm755_vm5, %v729_v13, %v746_v18  ;;  %v666_v37 = vrot.slane %v4495_v14, 1  ;;  %v730_v43 = vrot.slane %v4326_v20, 2 }
  0x81   : > { %1659 = vmatmul.mubr.bf16.gmra.mrb[40].mxu1 %v4444_v46  ;;  %v4515_v44 = vpack.c.bf16 %v764_v53, %v781_v30  ;;  %v715_v13 = vrot.slane %v4412_v31, 2  ;;  %v732_v18 = vrot.slane %v4417_v7, 2  ;;  %v3563_v53 = vld [vmem:[%s5164_s3 + $0x228] sm:$0xff]  }
  0x82   : > { %2716 = vmatmul.mubr.msk.bf16.gmra.mrb[40].mxu0 %vm3765_vm4, %v4447_v2  ;;  %2768 = vmatprep.mubr.msk.bf16.mxu1 %vm3765_vm4, %v4368_v51  ;;  %v4487_v27 = vrot.slane %v446_v17, 7  ;;  %v782_v20 = vsel %vm755_vm5, %v713_v34, %v730_v43  ;;  %v731_v17 = vrot.slane %v4378_v16, 2  ;;  %v734_v34 = vrot.slane %v3819_v47, 2  ;;  %v5221_v47 = vld [vmem:[#allocation7_spill] sm:$0xff] }
  0x83   : > { %1537 = vmatprep.mubr.bf16.mxu0 %v4452_v45  ;;  %v784_v7 = vsel %vm755_vm5, %v715_v13, %v732_v18  ;;  %v5226_v13 = vld [vmem:[#allocation19_spill] sm:$0xff] }
  0x84   : > { %v4492_v25 = vsel %vm481_vm0, 0.0, %v4487_v27  ;;  %v4509_v40 = vsel %vm481_vm0, %v4487_v27, %v530_v35  ;;  %v766_v41 = vsel %vm755_vm5, %v731_v17, %v748_v24  ;;  %v783_v16 = vsel %vm755_vm5, %v714_v38, %v731_v17  ;;  %v5224_v17 = vld [vmem:[#allocation17_spill] sm:$0xff]  ;;  %v5225_v24 = vld [vmem:[#allocation12_spill] sm:$0xff] }
  0x85   : > { %v632_v3 = vrot.slane %v4492_v25, 1  ;;  %v649_v9 = vrot.slane %v4509_v40, 1  ;;  %v4564_v54 = vpack.c.bf16 %v766_v41, %v783_v16  ;;  %v749_v35 = vrot.slane %v4420_v6, 2  ;;  %v3564_v6 = vld [vmem:[%s5164_s3 + $0x230] sm:$0xff]  }
  0x87   : > { %v686_v55 = vsel %vm669_vm1, %v649_v9, %v666_v37  ;;  %v703_v33 = vsel %vm669_vm1, %v632_v3, %v649_v9  ;;  %v767_v31 = vsel %vm755_vm5, %v732_v18, %v749_v35  ;;  %v716_v3 = vrot.slane %v3751_v63, 2  ;;  %v5227_v18 = vld [vmem:[#allocation21_spill] sm:$0xff]  ;;  %v5229_v35 = vld [vmem:[#allocation11_spill] sm:$0xff] }
  0x88   : > { %v4524_v19 = vpack.c.bf16 %v686_v55, %v703_v33  ;;  %v4585_v30 = vpack.c.bf16 %v767_v31, %v784_v7  ;;  %v733_v9 = vrot.slane %v3748_v62, 2  ;;  %v750_v37 = vrot.slane %v3754_v0, 2  ;;  %v3565_v55 = vld [vmem:[%s5164_s3 + $0x238] sm:$0xff]  }
  0x89   : > { %1667 = vmatmul.mubr.bf16.gmra.mrb[44].mxu1 %v4477_v58  ;;  %v717_v33 = vrot.slane %v3811_v42, 2  ;;  %v5234_v31 = vld [vmem:[#allocation5_spill] sm:$0xff]  ;;  %v737_v7 = vrot.slane %v4509_v40, 2 }
  0x8a   : > { %2720 = vmatmul.mubr.msk.bf16.gmra.mrb[44].mxu0 %vm3765_vm4, %v4482_v49  ;;  %2772 = vmatprep.mubr.msk.bf16.mxu1 %vm3765_vm4, %v4406_v50  ;;  %v768_v63 = vsel %vm755_vm5, %v733_v9, %v750_v37  ;;  %v785_v62 = vsel %vm755_vm5, %v716_v3, %v733_v9  ;;  %v5235_v3 = vld [vmem:[#allocation20_spill] sm:$0xff]  ;;  %v5236_v9 = vld [vmem:[#allocation10_spill] sm:$0xff] }
  0x8b   : > { %1771 = vmatprep.mubr.bf16.mxu0 %v4150_v15  ;;  %v747_v15 = vrot.slane %v4329_v60, 2  ;;  %v3557_v60 = vld [vmem:[%s5164_s3 + $0x210] sm:$0xff]   ;;  %v4603_v0 = vpack.c.bf16 %v768_v63, %v785_v62 }
  0x8d   : > { %v765_v29 = vsel %vm755_vm5, %v730_v43, %v747_v15  ;;  %v751_v43 = vrot.slane %v3822_v48, 2  ;;  %v718_v48 = vrot.slane %v5221_v47, 2 }
  0x8f   : > { %v769_v15 = vsel %vm755_vm5, %v734_v34, %v751_v43 }
  0x91   : > { %1675 = vmatmul.mubr.bf16.gmra.mrb[48].mxu1 %v4515_v44 }
  0x92   : > { %1772 = vmatmul.mubr.bf16.vlgmr.msra.gmra.mrb[48].mxu0 %v3842_v61  ;;  %2776 = vmatprep.mubr.msk.bf16.mxu1 %vm3765_vm4, %v4447_v2  ;;  %v4543_v61 = vpack.c.bf16 %v765_v29, %v782_v20  ;;  %v5222_v29 = vld [vmem:[#allocation8_spill] sm:$0xff] }
  0x93   : > { %3421 = vmatpush3.bf16.msra.mxu0 %v4131_v28  ;;  %1779 = vmatprep.mubr.bf16.mxu0 %v4220_v52  ;;  %v3560_v28 = vld [vmem:[%s5164_s3 + $0x218] sm:$0xff]   ;;  %v735_v20 = vrot.slane %v5222_v29, 2 }
  0x94   : > { %3422 = vmatprep.subr.bf16.mxu0 %v3554_v8 }
  0x95   : > { %v787_v41 = vsel %vm755_vm5, %v718_v48, %v735_v20 }
  0x97   : > { %3423 = vmatpush3.bf16.msra.mxu0 %v3554_v8  ;;  %v786_v8 = vsel %vm755_vm5, %v717_v33, %v734_v34 }
  0x98   : > { %3424 = vmatprep.subr.bf16.mxu0 %v3557_v60  ;;  %v4618_v42 = vpack.c.bf16 %v769_v15, %v786_v8  ;;  %v5237_v8 = vld [vmem:[#allocation13_spill] sm:$0xff] }
  0x99   : > { %1683 = vmatmul.mubr.bf16.gmra.mrb[52].mxu1 %v4543_v61 }
  0x9a   : > { %1780 = vmatmul.mubr.bf16.gmra.mrb[52].mxu0 %v3931_v26  ;;  %2780 = vmatprep.mubr.msk.bf16.mxu1 %vm3765_vm4, %v4482_v49 }
  0x9b   : > { %1787 = vmatprep.mubr.bf16.mxu0 %v4289_v59  ;;  %3425 = vmatpush3.bf16.msra.mxu0 %v3557_v60  ;;  %v5223_v60 = vld [vmem:[#allocation9_spill] sm:$0xff] }
  0x9c   : > { %3426 = vmatprep.subr.bf16.mxu0 %v3560_v28  ;;  %v752_v38 = vrot.slane %v5223_v60, 2 }
  0x9f   : > { %3427 = vmatpush3.bf16.msra.mxu0 %v3560_v28  ;;  %v770_v28 = vsel %vm755_vm5, %v735_v20, %v752_v38 }
  0xa0   : > { %3428 = vmatprep.subr.bf16.mxu0 %v3562_v23  ;;  %v4633_v16 = vpack.c.bf16 %v770_v28, %v787_v41 }
  0xa1   : > { %1691 = vmatmul.mubr.bf16.gmra.mrb[56].mxu1 %v4564_v54 }
  0xa2   : > { %1788 = vmatmul.mubr.bf16.gmra.mrb[56].mxu0 %v3998_v39  ;;  %2784 = vmatprep.mubr.msk.bf16.mxu1 %vm3765_vm4, %v3770_v12 }
  0xa3   : > { %1795 = vmatprep.mubr.bf16.mxu0 %v4357_v5  ;;  %3429 = vmatpush3.bf16.msra.mxu0 %v3562_v23  ;;  %v4637_v23 = vpack.c.bf16 %v4509_v40, %v4487_v27  ;;  %v5228_v27 = vld [vmem:[#allocation6_spill] sm:$0xff] }
  0xa4   : > { %3430 = vmatprep.subr.bf16.mxu0 %v3563_v53 }
  0xa7   : > { %3431 = vmatpush3.bf16.msra.mxu0 %v3563_v53  ;;  %v5232_v53 = vld [vmem:[#allocation4_spill] sm:$0xff] }
  0xa8   : > { %3432 = vmatprep.subr.bf16.mxu0 %v3564_v6 }
  0xa9   : > { %1699 = vmatmul.mubr.bf16.gmra.mrb[60].mxu1 %v4585_v30 }
  0xaa   : > { %1796 = vmatmul.mubr.bf16.gmra.mrb[60].mxu0 %v4116_v21  ;;  %2788 = vmatprep.mubr.msk.bf16.mxu1 %vm3765_vm4, %v3837_v57 }
  0xab   : > { %1803 = vmatprep.mubr.bf16.mxu0 %v4408_v1  ;;  %3433 = vmatpush3.bf16.msra.mxu0 %v3564_v6  ;;  %v754_v6 = vrot.slane %v4495_v14, 2 }
  0xac   : > { %3434 = vmatprep.subr.bf16.mxu0 %v3565_v55 }
  0xad   : > { %v772_v37 = vsel %vm755_vm5, %v737_v7, %v754_v6 }
  0xaf   : > { %3435 = vmatpush3.bf16.msra.mxu0 %v3565_v55 }
  0xb1   : > { %1707 = vmatmul.mubr.bf16.gmra.mrb[64].mxu1 %v4603_v0 }
  0xb2   : > { %1804 = vmatmul.mubr.bf16.gmra.mrb[64].mxu0 %v4145_v56  ;;  %2792 = vmatprep.mubr.msk.bf16.mxu1 %vm3765_vm4, %v3940_v36 }
  0xb3   : > { %1811 = vmatprep.mubr.bf16.mxu0 %v4444_v46 }
  0xb9   : > { %1715 = vmatmul.mubr.bf16.gmra.mrb[68].mxu1 %v4618_v42 }
  0xba   : > { %1812 = vmatmul.mubr.bf16.gmra.mrb[68].mxu0 %v5224_v17  ;;  %2796 = vmatprep.mubr.msk.bf16.mxu1 %vm3765_vm4, %v5225_v24 }
  0xbb   : > { %1819 = vmatprep.mubr.bf16.mxu0 %v4477_v58 }
  0xc1   : > { %1723 = vmatmul.mubr.bf16.gmra.mrb[72].mxu1 %v4633_v16 }
  0xc2   : > { %1820 = vmatmul.mubr.bf16.gmra.mrb[72].mxu0 %v5226_v13  ;;  %2800 = vmatprep.mubr.msk.bf16.mxu1 %vm3765_vm4, %v4637_v23 }
  0xc3   : > { %1827 = vmatprep.mubr.bf16.mxu0 %v4515_v44 }
  0xc9   : > { %1731 = vmatmul.mubr.bf16.gmra.mrb[76].mxu1 %v4479_v22 }
  0xca   : > { %1828 = vmatmul.mubr.bf16.gmra.mrb[76].mxu0 %v5227_v18  ;;  %1932 = vmatprep.mubr.bf16.mxu1 %v3931_v26  ;;  %v5230_v26 = vld [vmem:[#allocation15_spill] sm:$0xff] }
  0xcb   : > { %1835 = vmatprep.mubr.bf16.mxu0 %v4543_v61 }
  0xd1   : > { %2804 = vmatmul.mubr.msk.bf16.vlgmr.msra.gmra.mrb[80].mxu1 %vm3765_vm4, %v5228_v27 }
  0xd2   : > { %1836 = vmatmul.mubr.bf16.gmra.mrb[80].mxu0 %v4375_v4  ;;  %1940 = vmatprep.mubr.bf16.mxu1 %v3998_v39  ;;  %v5231_v39 = vld [vmem:[#allocation16_spill] sm:$0xff] }
  0xd3   : > { %1843 = vmatprep.mubr.bf16.mxu0 %v4564_v54 }
  0xd9   : > { %2808 = vmatmul.mubr.msk.bf16.gmra.mrb[84].mxu1 %vm3765_vm4, %v5229_v35 }
  0xda   : > { %1844 = vmatmul.mubr.bf16.gmra.mrb[84].mxu0 %v4422_v32  ;;  %1948 = vmatprep.mubr.bf16.mxu1 %v4116_v21  ;;  %v5233_v21 = vld [vmem:[#allocation18_spill] sm:$0xff] }
  0xdb   : > { %1851 = vmatprep.mubr.bf16.mxu0 %v4585_v30 }
  0xe1   : > { %2812 = vmatmul.mubr.msk.bf16.gmra.mrb[88].mxu1 %vm3765_vm4, %v5230_v26 }
  0xe2   : > { %1852 = vmatmul.mubr.bf16.gmra.mrb[88].mxu0 %v4452_v45  ;;  %1956 = vmatprep.mubr.bf16.mxu1 %v4145_v56  ;;  %v720_v56 = vrot.slane %v4492_v25, 2 }
  0xe3   : > { %1859 = vmatprep.mubr.bf16.mxu0 %v4603_v0 }
  0xe4   : > { %v789_v25 = vsel %vm755_vm5, %v720_v56, %v737_v7 }
  0xe5   : > { %v4694_v62 = vpack.c.bf16 %v772_v37, %v789_v25 }
  0xe9   : > { %2816 = vmatmul.mubr.msk.bf16.gmra.mrb[92].mxu1 %vm3765_vm4, %v5231_v39 }
  0xea   : > { %1860 = vmatmul.mubr.bf16.gmra.mrb[92].mxu0 %v5232_v53  ;;  %1964 = vmatprep.mubr.bf16.mxu1 %v5224_v17 }
  0xeb   : > { %1867 = vmatprep.mubr.bf16.mxu0 %v4618_v42 }
  0xf1   : > { %2820 = vmatmul.mubr.msk.bf16.gmra.mrb[96].mxu1 %vm3765_vm4, %v5233_v21 }
  0xf2   : > { %1868 = vmatmul.mubr.bf16.gmra.mrb[96].mxu0 %v5234_v31  ;;  %1972 = vmatprep.mubr.bf16.mxu1 %v5226_v13 }
  0xf3   : > { %1875 = vmatprep.mubr.bf16.mxu0 %v4633_v16 }
  0xf9   : > { %2824 = vmatmul.mubr.msk.bf16.gmra.mrb[100].mxu1 %vm3765_vm4, %v5235_v3 }
  0xfa   : > { %1876 = vmatmul.mubr.bf16.gmra.mrb[100].mxu0 %v5236_v9  ;;  %1980 = vmatprep.mubr.bf16.mxu1 %v5227_v18 }
  0xfb   : > { %1883 = vmatprep.mubr.bf16.mxu0 %v4479_v22 }
 0x101   : > { %v2964_v55 = vpop.f32.mrb[0].mxu0  ;;  %v3036_v33 = vpop.f32.mrb[0].mxu1  ;;  %2828 = vmatmul.mubr.msk.bf16.gmra.mrb[104].mxu1 %vm3765_vm4, %v4368_v51 }
 0x102   : > { %v2965_v40 = vpop.f32.mrb[1].mxu0  ;;  %v3037_v43 = vpop.f32.mrb[1].mxu1  ;;  %1884 = vmatmul.mubr.bf16.gmra.mrb[104].mxu0 %v5237_v8  ;;  %1988 = vmatprep.mubr.bf16.mxu1 %v4375_v4 }
 0x103   : > { %v4692_v63 = vadd.f32 %v2965_v40, %v2964_v55  ;;  %v2967_v14 = vpop.f32.mrb[2].mxu0  ;;  %v4702_v10 = vadd.f32 %v3037_v43, %v3036_v33  ;;  %v3039_v47 = vpop.f32.mrb[2].mxu1  ;;  %1891 = vmatprep.mubr.bf16.mxu0 %v4694_v62 }
 0x104   : > { %v2968_v34 = vpop.f32.mrb[3].mxu0  ;;  %v3040_v48 = vpop.f32.mrb[3].mxu1 }
 0x105   : > { %v4699_v15 = vadd.f32 %v2968_v34, %v2967_v14  ;;  %v4706_v29 = vadd.f32 %v3040_v48, %v3039_v47 }
 0x109   : > { %v2970_v20 = vpop.f32.mrb[4].mxu0  ;;  %v3042_v38 = vpop.f32.mrb[4].mxu1  ;;  %2832 = vmatmul.mubr.msk.bf16.gmra.mrb[108].mxu1 %vm3765_vm4, %v4406_v50 }
 0x10a   : > { %v2971_v60 = vpop.f32.mrb[5].mxu0  ;;  %v3043_v28 = vpop.f32.mrb[5].mxu1  ;;  %1892 = vmatmul.mubr.bf16.gmra.mrb[108].mxu0 %v4524_v19  ;;  %1996 = vmatprep.mubr.bf16.mxu1 %v4422_v32 }
 0x10b   : > { %v4708_v17 = vadd.f32 %v2971_v60, %v2970_v20  ;;  %v2973_v51 = vpop.f32.mrb[6].mxu0  ;;  %v4714_v4 = vadd.f32 %v3043_v28, %v3042_v38  ;;  %v3045_v13 = vpop.f32.mrb[6].mxu1  ;;  %3436 = vmatprep.mubr.bf16.mxu0 %v4220_v52 }
 0x10c   : > { %v2974_v41 = vpop.f32.mrb[7].mxu0  ;;  %v3046_v27 = vpop.f32.mrb[7].mxu1 }
 0x10d   : > { %v4716_v18 = vadd.f32 %v2974_v41, %v2973_v51  ;;  %v4720_v35 = vadd.f32 %v3046_v27, %v3045_v13 }
 0x111   : > { %2836 = vmatmul.mubr.msk.bf16.gmra.mrb[112].mxu1 %vm3765_vm4, %v4447_v2  ;;  %v2976_v50 = vpop.f32.mrb[8].mxu0 }
 0x112   : > { %3437 = vmatmul.mubr.bf16.vlgmr.msra.gmra.mrb[112].mxu0 %v4289_v59  ;;  %v2977_v26 = vpop.f32.mrb[9].mxu0  ;;  %2004 = vmatprep.mubr.bf16.mxu1 %v4452_v45 }
 0x113   : > { %v4727_v39 = vadd.f32 %v2977_v26, %v2976_v50  ;;  %v2979_v21 = vpop.f32.mrb[10].mxu0  ;;  %3440 = vmatprep.mubr.bf16.mxu0 %v4357_v5 }
 0x114   : > { %v3048_v32 = vpop.f32.mrb[8].mxu1  ;;  %v2980_v56 = vpop.f32.mrb[11].mxu0 }
 0x115   : > { %v3049_v52 = vpop.f32.mrb[9].mxu1  ;;  %v4730_v7 = vadd.f32 %v2980_v56, %v2979_v21 }
 0x116   : > { %v4732_v6 = vadd.f32 %v3049_v52, %v3048_v32  ;;  %v3051_v3 = vpop.f32.mrb[10].mxu1 }
 0x117   : > { %v3052_v2 = vpop.f32.mrb[11].mxu1 }
 0x118   : > { %v4734_v37 = vadd.f32 %v3052_v2, %v3051_v3 }
 0x119   : > { %2840 = vmatmul.mubr.msk.bf16.gmra.mrb[116].mxu1 %vm3765_vm4, %v4482_v49  ;;  %v2982_v59 = vpop.f32.mrb[12].mxu0 }
 0x11a   : > { %3441 = vmatmul.mubr.bf16.gmra.mrb[116].mxu0 %v4408_v1  ;;  %v2983_v45 = vpop.f32.mrb[13].mxu0  ;;  %2012 = vmatprep.mubr.bf16.mxu1 %v5232_v53 }
 0x11b   : > { %v4741_v5 = vadd.f32 %v2983_v45, %v2982_v59  ;;  %v2985_v25 = vpop.f32.mrb[14].mxu0  ;;  %3444 = vmatprep.mubr.bf16.mxu0 %v4444_v46 }
 0x11c   : > { %v3054_v55 = vpop.f32.mrb[12].mxu1  ;;  %v2986_v40 = vpop.f32.mrb[15].mxu0 }
 0x11d   : > { %v3055_v14 = vpop.f32.mrb[13].mxu1  ;;  %v4744_v33 = vadd.f32 %v2986_v40, %v2985_v25 }
 0x11e   : > { %v4746_v34 = vadd.f32 %v3055_v14, %v3054_v55  ;;  %v3057_v43 = vpop.f32.mrb[14].mxu1 }
 0x11f   : > { %v3058_v49 = vpop.f32.mrb[15].mxu1 }
 0x120   : > { %v4748_v47 = vadd.f32 %v3058_v49, %v3057_v43 }
 0x121   : > { %2844 = vmatmul.mubr.msk.bf16.gmra.mrb[120].mxu1 %vm3765_vm4, %v3770_v12 }
 0x122   : > { %3445 = vmatmul.mubr.bf16.gmra.mrb[120].mxu0 %v4477_v58  ;;  %2020 = vmatprep.mubr.bf16.mxu1 %v5234_v31 }
 0x123   : > { %3448 = vmatprep.mubr.bf16.mxu0 %v4515_v44 }
 0x124   : > { %v3076_v1 = vpop.f32.mrb[16].mxu1 }
 0x125   : > { %v2988_v46 = vpop.f32.mrb[16].mxu0  ;;  %v3077_v53 = vpop.f32.mrb[17].mxu1 }
 0x126   : > { %v2989_v48 = vpop.f32.mrb[17].mxu0  ;;  %v3078_v20 = vadd.f32 %v3077_v53, %v3076_v1  ;;  %v3079_v60 = vpop.f32.mrb[18].mxu1 }
 0x127   : > { %v4756_v38 = vadd.f32 %v2989_v48, %v2988_v46  ;;  %v2991_v51 = vpop.f32.mrb[18].mxu0  ;;  %v3080_v28 = vpop.f32.mrb[19].mxu1 }
 0x128   : > { %v4759_v41 = vadd.f32 %v3078_v20, %v4692_v63  ;;  %v2992_v12 = vpop.f32.mrb[19].mxu0  ;;  %v3081_v13 = vadd.f32 %v3080_v28, %v3079_v60 }
 0x129   : > { %v4761_v58 = vadd.f32 %v2992_v12, %v2991_v51  ;;  %2848 = vmatmul.mubr.msk.bf16.gmra.mrb[124].mxu1 %vm3765_vm4, %v3837_v57 }
 0x12a   : > { %v4767_v44 = vadd.f32 %v3081_v13, %v4699_v15  ;;  %3449 = vmatmul.mubr.bf16.gmra.mrb[124].mxu0 %v4543_v61  ;;  %2028 = vmatprep.mubr.bf16.mxu1 %v5236_v9 }
 0x12b   : > { %3452 = vmatprep.mubr.bf16.mxu0 %v4564_v54 }
 0x12c   : > { %v3082_v31 = vpop.f32.mrb[20].mxu1 }
 0x12d   : > { %v2994_v63 = vpop.f32.mrb[20].mxu0  ;;  %v3083_v27 = vpop.f32.mrb[21].mxu1 }
 0x12e   : > { %v2995_v50 = vpop.f32.mrb[21].mxu0  ;;  %v3084_v26 = vadd.f32 %v3083_v27, %v3082_v31  ;;  %v3085_v21 = vpop.f32.mrb[22].mxu1 }
 0x12f   : > { %v4772_v32 = vadd.f32 %v2995_v50, %v2994_v63  ;;  %v2997_v56 = vpop.f32.mrb[22].mxu0  ;;  %v3086_v52 = vpop.f32.mrb[23].mxu1 }
 0x130   : > { %v4775_v57 = vadd.f32 %v3084_v26, %v4708_v17  ;;  %v2998_v15 = vpop.f32.mrb[23].mxu0  ;;  %v3087_v3 = vadd.f32 %v3086_v52, %v3085_v21  ;;  %v5240_v52 = vld [vmem:[#allocation14_spill] sm:$0xff] }
 0x131   : > { %v4777_v61 = vadd.f32 %v2998_v15, %v2997_v56  ;;  %2852 = vmatmul.mubr.msk.bf16.gmra.mrb[128].mxu1 %vm3765_vm4, %v3940_v36 }
 0x132   : > { %v4783_v54 = vadd.f32 %v3087_v3, %v4716_v18  ;;  %3453 = vmatmul.mubr.bf16.gmra.mrb[128].mxu0 %v4585_v30  ;;  %2036 = vmatprep.mubr.bf16.mxu1 %v5237_v8 }
 0x133   : > { %3456 = vmatprep.mubr.bf16.mxu0 %v4603_v0 }
 0x134   : > { %v3088_v9 = vpop.f32.mrb[24].mxu1 }
 0x135   : > { %v3000_v17 = vpop.f32.mrb[24].mxu0  ;;  %v3089_v2 = vpop.f32.mrb[25].mxu1 }
 0x136   : > { %v3001_v59 = vpop.f32.mrb[25].mxu0  ;;  %v3090_v45 = vadd.f32 %v3089_v2, %v3088_v9  ;;  %v3091_v25 = vpop.f32.mrb[26].mxu1 }
 0x137   : > { %v4788_v55 = vadd.f32 %v3001_v59, %v3000_v17  ;;  %v3003_v40 = vpop.f32.mrb[26].mxu0  ;;  %v3092_v14 = vpop.f32.mrb[27].mxu1 }
 0x138   : > { %v4791_v36 = vadd.f32 %v3090_v45, %v4727_v39  ;;  %v3004_v18 = vpop.f32.mrb[27].mxu0  ;;  %v3093_v43 = vadd.f32 %v3092_v14, %v3091_v25 }
 0x139   : > { %v4793_v30 = vadd.f32 %v3004_v18, %v3003_v40  ;;  %2856 = vmatmul.mubr.msk.bf16.gmra.mrb[132].mxu1 %vm3765_vm4, %v5225_v24 }
 0x13a   : > { %v4799_v0 = vadd.f32 %v3093_v43, %v4730_v7  ;;  %3457 = vmatmul.mubr.bf16.gmra.mrb[132].mxu0 %v4618_v42  ;;  %2044 = vmatprep.mubr.bf16.mxu1 %v4524_v19 }
 0x13b   : > { %3460 = vmatprep.mubr.bf16.mxu0 %v4633_v16  ;;  %v5238_v16 = vld [vmem:[#allocation2_spill] sm:$0xff] }
 0x13c   : > { %v3094_v8 = vpop.f32.mrb[28].mxu1 }
 0x13d   : > { %v3006_v39 = vpop.f32.mrb[28].mxu0  ;;  %v3095_v49 = vpop.f32.mrb[29].mxu1 }
 0x13e   : > { %v3007_v1 = vpop.f32.mrb[29].mxu0  ;;  %v3096_v46 = vadd.f32 %v3095_v49, %v3094_v8  ;;  %v3097_v53 = vpop.f32.mrb[30].mxu1 }
 0x13f   : > { %v4804_v48 = vadd.f32 %v3007_v1, %v3006_v39  ;;  %v3009_v20 = vpop.f32.mrb[30].mxu0  ;;  %v3098_v60 = vpop.f32.mrb[31].mxu1 }
 0x140   : > { %v4807_v24 = vadd.f32 %v3096_v46, %v4741_v5  ;;  %v3010_v7 = vpop.f32.mrb[31].mxu0  ;;  %v3099_v51 = vadd.f32 %v3098_v60, %v3097_v53 }
 0x141   : > { %v4809_v42 = vadd.f32 %v3010_v7, %v3009_v20  ;;  %2860 = vmatmul.mubr.msk.bf16.gmra.mrb[136].mxu1 %vm3765_vm4, %v4637_v23 }
 0x142   : > { %v4815_v19 = vadd.f32 %v3099_v51, %v4744_v33  ;;  %3461 = vmatmul.mubr.bf16.gmra.mrb[136].mxu0 %v4479_v22  ;;  %2052 = vmatprep.mubr.bf16.mxu1 %v5238_v16  ;;  %v5239_v22 = vld [vmem:[#allocation3_spill] sm:$0xff] }
 0x143   : > { %3464 = vmatprep.mubr.bf16.mxu0 %v4694_v62 }
 0x144   : > { %v3100_v28 = vpop.f32.mrb[32].mxu1 }
 0x145   : > { %v3012_v5 = vpop.f32.mrb[32].mxu0  ;;  %v3101_v12 = vpop.f32.mrb[33].mxu1 }
 0x146   : > { %v3013_v13 = vpop.f32.mrb[33].mxu0  ;;  %v3102_v31 = vadd.f32 %v3101_v12, %v3100_v28  ;;  %v3103_v63 = vpop.f32.mrb[34].mxu1 }
 0x147   : > { %v3014_v27 = vadd.f32 %v3013_v13, %v3012_v5  ;;  %v3015_v50 = vpop.f32.mrb[34].mxu0  ;;  %v3104_v26 = vpop.f32.mrb[35].mxu1 }
 0x148   : > { %v4821_v23 = vadd.f32 %v3102_v31, %v4756_v38  ;;  %v3016_v33 = vpop.f32.mrb[35].mxu0  ;;  %v3105_v21 = vadd.f32 %v3104_v26, %v3103_v63 }
 0x149   : > { %v3017_v56 = vadd.f32 %v3016_v33, %v3015_v50  ;;  %2864 = vmatmul.mubr.msk.bf16.gmra.mrb[140].mxu1 %vm3765_vm4, %v5239_v22 }
 0x14a   : > { %v4827_v62 = vadd.f32 %v3105_v21, %v4761_v58  ;;  %3465 = vmatmul.mubr.bf16.gmra.mrb[140].mxu0 %v5240_v52 }
 0x14c   : > { %v3106_v15 = vpop.f32.mrb[36].mxu1 }
 0x14d   : > { %v3018_v3 = vpop.f32.mrb[36].mxu0  ;;  %v3107_v9 = vpop.f32.mrb[37].mxu1 }
 0x14e   : > { %v3019_v17 = vpop.f32.mrb[37].mxu0  ;;  %v3108_v2 = vadd.f32 %v3107_v9, %v3106_v15  ;;  %v3109_v59 = vpop.f32.mrb[38].mxu1 }
 0x14f   : > { %v3020_v38 = vadd.f32 %v3019_v17, %v3018_v3  ;;  %v3021_v45 = vpop.f32.mrb[38].mxu0  ;;  %v3110_v25 = vpop.f32.mrb[39].mxu1 }
 0x150   : > { %v4831_v40 = vadd.f32 %v3108_v2, %v4772_v32  ;;  %v3022_v14 = vpop.f32.mrb[39].mxu0  ;;  %v3111_v11 = vadd.f32 %v3110_v25, %v3109_v59 }
 0x151   : > { %v3023_v18 = vadd.f32 %v3022_v14, %v3021_v45 }
 0x152   : > { %v4834_v58 = vadd.f32 %v3111_v11, %v4777_v61 }
 0x154   : > { %v3112_v43 = vpop.f32.mrb[40].mxu1 }
 0x155   : > { %v3024_v8 = vpop.f32.mrb[40].mxu0  ;;  %v3113_v39 = vpop.f32.mrb[41].mxu1 }
 0x156   : > { %v3025_v49 = vpop.f32.mrb[41].mxu0  ;;  %v3114_v1 = vadd.f32 %v3113_v39, %v3112_v43  ;;  %v3115_v46 = vpop.f32.mrb[42].mxu1 }
 0x157   : > { %v4836_v53 = vadd.f32 %v3025_v49, %v3024_v8  ;;  %v3027_v20 = vpop.f32.mrb[42].mxu0  ;;  %v3116_v60 = vpop.f32.mrb[43].mxu1 }
 0x158   : > { %v4839_v7 = vadd.f32 %v3114_v1, %v4788_v55  ;;  %v3028_v32 = vpop.f32.mrb[43].mxu0  ;;  %v3117_v51 = vadd.f32 %v3116_v60, %v3115_v46 }
 0x159   : > { %v3029_v16 = vadd.f32 %v3028_v32, %v3027_v20 }
 0x15a   : > { %v4842_v28 = vadd.f32 %v3117_v51, %v4793_v30 }
 0x15c   : > { %v3118_v61 = vpop.f32.mrb[44].mxu1 }
 0x15d   : > { %v3030_v5 = vpop.f32.mrb[44].mxu0  ;;  %v3119_v12 = vpop.f32.mrb[45].mxu1 }
 0x15e   : > { %v3031_v13 = vpop.f32.mrb[45].mxu0  ;;  %v3120_v31 = vadd.f32 %v3119_v12, %v3118_v61  ;;  %v3121_v63 = vpop.f32.mrb[46].mxu1 }
 0x15f   : > { %v4844_v50 = vadd.f32 %v3031_v13, %v3030_v5  ;;  %v3033_v26 = vpop.f32.mrb[46].mxu0  ;;  %v3122_v33 = vpop.f32.mrb[47].mxu1 }
 0x160   : > { %v4847_v21 = vadd.f32 %v3120_v31, %v4804_v48  ;;  %v3034_v55 = vpop.f32.mrb[47].mxu0  ;;  %v3123_v22 = vadd.f32 %v3122_v33, %v3121_v63 }
 0x161   : > { %v4849_v52 = vadd.f32 %v3034_v55, %v3033_v26 }
 0x162   : > { %v4852_v30 = vadd.f32 %v3123_v22, %v4809_v42 }
 0x164   : > { %v3124_v15 = vpop.f32.mrb[48].mxu1 }
 0x165   : > { %v3188_v3 = vpop.f32.mrb[48].mxu0  ;;  %v3125_v9 = vpop.f32.mrb[49].mxu1 }
 0x166   : > { %v3126_v17 = vadd.f32 %v3125_v9, %v3124_v15  ;;  %v3189_v2 = vpop.f32.mrb[49].mxu0  ;;  %v3127_v59 = vpop.f32.mrb[50].mxu1 }
 0x167   : > { %v3190_v45 = vadd.f32 %v3189_v2, %v3188_v3  ;;  %v3191_v25 = vpop.f32.mrb[50].mxu0  ;;  %v3128_v14 = vpop.f32.mrb[51].mxu1 }
 0x168   : > { %v4854_v11 = vadd.f32 %v3126_v17, %v3014_v27  ;;  %v3129_v48 = vadd.f32 %v3128_v14, %v3127_v59  ;;  %v3192_v43 = vpop.f32.mrb[51].mxu0 }
 0x169   : > { %v4857_v8 = vadd.f32 %v3190_v45, %v4759_v41  ;;  %v3193_v39 = vadd.f32 %v3192_v43, %v3191_v25 }
 0x16a   : > { %v4859_v49 = vadd.f32 %v3129_v48, %v3017_v56 }
 0x16b   : > { %v4862_v42 = vadd.f32 %v3193_v39, %v4767_v44 }
 0x16c   : > { %v3130_v1 = vpop.f32.mrb[52].mxu1 }
 0x16d   : > { %v3194_v46 = vpop.f32.mrb[52].mxu0  ;;  %v3131_v20 = vpop.f32.mrb[53].mxu1 }
 0x16e   : > { %v3132_v60 = vadd.f32 %v3131_v20, %v3130_v1  ;;  %v3195_v32 = vpop.f32.mrb[53].mxu0  ;;  %v3133_v51 = vpop.f32.mrb[54].mxu1 }
 0x16f   : > { %v3196_v61 = vadd.f32 %v3195_v32, %v3194_v46  ;;  %v3197_v27 = vpop.f32.mrb[54].mxu0  ;;  %v3134_v5 = vpop.f32.mrb[55].mxu1 }
 0x170   : > { %v4864_v12 = vadd.f32 %v3132_v60, %v3020_v38  ;;  %v3135_v13 = vadd.f32 %v3134_v5, %v3133_v51  ;;  %v3198_v41 = vpop.f32.mrb[55].mxu0 }
 0x171   : > { %v4867_v31 = vadd.f32 %v3196_v61, %v4775_v57  ;;  %v3199_v56 = vadd.f32 %v3198_v41, %v3197_v27 }
 0x172   : > { %v4869_v63 = vadd.f32 %v3135_v13, %v3023_v18 }
 0x173   : > { %v4872_v44 = vadd.f32 %v3199_v56, %v4783_v54 }
 0x174   : > { %v3136_v26 = vpop.f32.mrb[56].mxu1 }
 0x175   : > { %v3200_v33 = vpop.f32.mrb[56].mxu0  ;;  %v3137_v55 = vpop.f32.mrb[57].mxu1 }
 0x176   : > { %v3138_v22 = vadd.f32 %v3137_v55, %v3136_v26  ;;  %v3201_v15 = vpop.f32.mrb[57].mxu0  ;;  %v3139_v3 = vpop.f32.mrb[58].mxu1 }
 0x177   : > { %v3202_v9 = vadd.f32 %v3201_v15, %v3200_v33  ;;  %v3203_v38 = vpop.f32.mrb[58].mxu0  ;;  %v3140_v17 = vpop.f32.mrb[59].mxu1 }
 0x178   : > { %v4875_v2 = vadd.f32 %v3138_v22, %v4836_v53  ;;  %v3141_v57 = vadd.f32 %v3140_v17, %v3139_v3  ;;  %v3204_v59 = vpop.f32.mrb[59].mxu0 }
 0x179   : > { %v4878_v18 = vadd.f32 %v3202_v9, %v4791_v36  ;;  %v3205_v45 = vadd.f32 %v3204_v59, %v3203_v38 }
 0x17a   : > { %v4880_v54 = vadd.f32 %v3141_v57, %v3029_v16 }
 0x17b   : > { %v4883_v25 = vadd.f32 %v3205_v45, %v4799_v0 }
 0x17c   : > { %v3142_v14 = vpop.f32.mrb[60].mxu1 }
 0x17d   : > { %v3206_v48 = vpop.f32.mrb[60].mxu0  ;;  %v3143_v43 = vpop.f32.mrb[61].mxu1 }
 0x17e   : > { %v3144_v39 = vadd.f32 %v3143_v43, %v3142_v14  ;;  %v3207_v1 = vpop.f32.mrb[61].mxu0  ;;  %v3145_v46 = vpop.f32.mrb[62].mxu1 }
 0x17f   : > { %v3208_v20 = vadd.f32 %v3207_v1, %v3206_v48  ;;  %v3209_v53 = vpop.f32.mrb[62].mxu0  ;;  %v3146_v60 = vpop.f32.mrb[63].mxu1 }
 0x180   : > { %v4886_v32 = vadd.f32 %v3144_v39, %v4844_v50  ;;  %v3147_v36 = vadd.f32 %v3146_v60, %v3145_v46  ;;  %v3210_v51 = vpop.f32.mrb[63].mxu0 }
 0x181   : > { %v4889_v16 = vadd.f32 %v3208_v20, %v4807_v24  ;;  %v3211_v61 = vadd.f32 %v3210_v51, %v3209_v53 }
 0x182   : > { %v4892_v0 = vadd.f32 %v3147_v36, %v4849_v52 }
 0x183   : > { %v4895_v27 = vadd.f32 %v3211_v61, %v4815_v19 }
 0x184   : > { %v3148_v5 = vpop.f32.mrb[64].mxu1 }
 0x185   : > { %v3212_v13 = vpop.f32.mrb[64].mxu0  ;;  %v3149_v41 = vpop.f32.mrb[65].mxu1 }
 0x186   : > { %v3150_v56 = vadd.f32 %v3149_v41, %v3148_v5  ;;  %v3213_v26 = vpop.f32.mrb[65].mxu0  ;;  %v3151_v33 = vpop.f32.mrb[66].mxu1 }
 0x187   : > { %v3214_v50 = vadd.f32 %v3213_v26, %v3212_v13  ;;  %v3215_v55 = vpop.f32.mrb[66].mxu0  ;;  %v3152_v22 = vpop.f32.mrb[67].mxu1 }
 0x188   : > { %v4898_v15 = vadd.f32 %v3150_v56, %v4702_v10  ;;  %v3153_v24 = vadd.f32 %v3152_v22, %v3151_v33  ;;  %v3216_v3 = vpop.f32.mrb[67].mxu0 }
 0x189   : > { %v4901_v52 = vadd.f32 %v3214_v50, %v4821_v23  ;;  %v3217_v9 = vadd.f32 %v3216_v3, %v3215_v55 }
 0x18a   : > { %v4904_v19 = vadd.f32 %v3153_v24, %v4706_v29 }
 0x18b   : > { %v4907_v38 = vadd.f32 %v3217_v9, %v4827_v62 }
 0x18c   : > { %v3154_v17 = vpop.f32.mrb[68].mxu1 }
 0x18d   : > { %v3218_v57 = vpop.f32.mrb[68].mxu0  ;;  %v3155_v59 = vpop.f32.mrb[69].mxu1 }
 0x18e   : > { %v3156_v45 = vadd.f32 %v3155_v59, %v3154_v17  ;;  %v3219_v14 = vpop.f32.mrb[69].mxu0  ;;  %v3157_v48 = vpop.f32.mrb[70].mxu1 }
 0x18f   : > { %v3220_v10 = vadd.f32 %v3219_v14, %v3218_v57  ;;  %v3221_v43 = vpop.f32.mrb[70].mxu0  ;;  %v3158_v39 = vpop.f32.mrb[71].mxu1 }
 0x190   : > { %v4910_v1 = vadd.f32 %v3156_v45, %v4714_v4  ;;  %v3159_v23 = vadd.f32 %v3158_v39, %v3157_v48  ;;  %v3222_v46 = vpop.f32.mrb[71].mxu0 }
 0x191   : > { %v4913_v29 = vadd.f32 %v3220_v10, %v4831_v40  ;;  %v3223_v20 = vadd.f32 %v3222_v46, %v3221_v43 }
 0x192   : > { %v4916_v62 = vadd.f32 %v3159_v23, %v4720_v35 }
 0x193   : > { %v4919_v53 = vadd.f32 %v3223_v20, %v4834_v58 }
 0x194   : > { %v3160_v60 = vpop.f32.mrb[72].mxu1 }
 0x195   : > { %v3224_v36 = vpop.f32.mrb[72].mxu0  ;;  %v3161_v51 = vpop.f32.mrb[73].mxu1 }
 0x196   : > { %v3162_v61 = vadd.f32 %v3161_v51, %v3160_v60  ;;  %v3225_v5 = vpop.f32.mrb[73].mxu0  ;;  %v3163_v13 = vpop.f32.mrb[74].mxu1 }
 0x197   : > { %v3226_v4 = vadd.f32 %v3225_v5, %v3224_v36  ;;  %v3227_v41 = vpop.f32.mrb[74].mxu0  ;;  %v3164_v56 = vpop.f32.mrb[75].mxu1 }
 0x198   : > { %v4922_v26 = vadd.f32 %v3162_v61, %v4732_v6  ;;  %v3165_v40 = vadd.f32 %v3164_v56, %v3163_v13  ;;  %v3228_v33 = vpop.f32.mrb[75].mxu0 }
 0x199   : > { %v4925_v35 = vadd.f32 %v3226_v4, %v4839_v7  ;;  %v3229_v50 = vadd.f32 %v3228_v33, %v3227_v41 }
 0x19a   : > { %v4928_v58 = vadd.f32 %v3165_v40, %v4734_v37 }
 0x19b   : > { %v4931_v55 = vadd.f32 %v3229_v50, %v4842_v28 }
 0x19c   : > { %v3166_v22 = vpop.f32.mrb[76].mxu1 }
 0x19d   : > { %v3230_v24 = vpop.f32.mrb[76].mxu0  ;;  %v3167_v3 = vpop.f32.mrb[77].mxu1 }
 0x19e   : > { %v3168_v9 = vadd.f32 %v3167_v3, %v3166_v22  ;;  %v3231_v17 = vpop.f32.mrb[77].mxu0  ;;  %v3169_v57 = vpop.f32.mrb[78].mxu1 }
 0x19f   : > { %v3232_v6 = vadd.f32 %v3231_v17, %v3230_v24  ;;  %v3233_v59 = vpop.f32.mrb[78].mxu0  ;;  %v3170_v45 = vpop.f32.mrb[79].mxu1 }
 0x1a0   : > { %v4934_v14 = vadd.f32 %v3168_v9, %v4746_v34  ;;  %v3171_v7 = vadd.f32 %v3170_v45, %v3169_v57  ;;  %v3234_v48 = vpop.f32.mrb[79].mxu0 }
 0x1a1   : > { %v4937_v37 = vadd.f32 %v3232_v6, %v4847_v21  ;;  %v3235_v10 = vadd.f32 %v3234_v48, %v3233_v59 }
 0x1a2   : > { %v4940_v28 = vadd.f32 %v3171_v7, %v4748_v47 }
 0x1a3   : > { %v4943_v43 = vadd.f32 %v3235_v10, %v4852_v30 }
 0x1a4   : > { %v3300_v39 = vpop.f32.mrb[80].mxu1 }
 0x1a5   : > { %v3236_v23 = vpop.f32.mrb[80].mxu0  ;;  %v3301_v46 = vpop.f32.mrb[81].mxu1 }
 0x1a6   : > { %v3237_v20 = vpop.f32.mrb[81].mxu0  ;;  %v3302_v60 = vadd.f32 %v3301_v46, %v3300_v39  ;;  %v3303_v36 = vpop.f32.mrb[82].mxu1 }
 0x1a7   : > { %v3238_v34 = vadd.f32 %v3237_v20, %v3236_v23  ;;  %v3239_v51 = vpop.f32.mrb[82].mxu0  ;;  %v3304_v61 = vpop.f32.mrb[83].mxu1 }
 0x1a8   : > { %v3240_v5 = vpop.f32.mrb[83].mxu0  ;;  %v3305_v13 = vadd.f32 %v3304_v61, %v3303_v36  ;;  %v4946_v21 = vadd.f32 %v3302_v60, %v4857_v8 }
 0x1a9   : > { %v4949_v47 = vadd.f32 %v3238_v34, %v4854_v11  ;;  %v3241_v4 = vadd.f32 %v3240_v5, %v3239_v51 }
 0x1aa   : > { %v4952_v30 = vadd.f32 %v3305_v13, %v4862_v42 }
 0x1ab   : > { %v4955_v41 = vadd.f32 %v3241_v4, %v4859_v49 }
 0x1ac   : > { %v3306_v56 = vpop.f32.mrb[84].mxu1 }
 0x1ad   : > { %v3242_v40 = vpop.f32.mrb[84].mxu0  ;;  %v3307_v33 = vpop.f32.mrb[85].mxu1 }
 0x1ae   : > { %v3243_v50 = vpop.f32.mrb[85].mxu0  ;;  %v3308_v22 = vadd.f32 %v3307_v33, %v3306_v56  ;;  %v3309_v24 = vpop.f32.mrb[86].mxu1 }
 0x1af   : > { %v3244_v3 = vadd.f32 %v3243_v50, %v3242_v40  ;;  %v3245_v9 = vpop.f32.mrb[86].mxu0  ;;  %v3310_v8 = vpop.f32.mrb[87].mxu1 }
 0x1b0   : > { %v3246_v17 = vpop.f32.mrb[87].mxu0  ;;  %v3311_v57 = vadd.f32 %v3310_v8, %v3309_v24  ;;  %v4958_v11 = vadd.f32 %v3308_v22, %v4867_v31 }
 0x1b1   : > { %v4961_v42 = vadd.f32 %v3244_v3, %v4864_v12  ;;  %v3247_v6 = vadd.f32 %v3246_v17, %v3245_v9 }
 0x1b2   : > { %v4964_v49 = vadd.f32 %v3311_v57, %v4872_v44 }
 0x1b3   : > { %v4967_v59 = vadd.f32 %v3247_v6, %v4869_v63 }
 0x1b4   : > { %v3312_v45 = vpop.f32.mrb[88].mxu1 }
 0x1b5   : > { %v3248_v7 = vpop.f32.mrb[88].mxu0  ;;  %v3313_v48 = vpop.f32.mrb[89].mxu1 }
 0x1b6   : > { %v3249_v10 = vpop.f32.mrb[89].mxu0  ;;  %v3314_v39 = vadd.f32 %v3313_v48, %v3312_v45  ;;  %v3315_v23 = vpop.f32.mrb[90].mxu1 }
 0x1b7   : > { %v3250_v46 = vadd.f32 %v3249_v10, %v3248_v7  ;;  %v3251_v20 = vpop.f32.mrb[90].mxu0  ;;  %v3316_v31 = vpop.f32.mrb[91].mxu1 }
 0x1b8   : > { %v3252_v60 = vpop.f32.mrb[91].mxu0  ;;  %v3317_v36 = vadd.f32 %v3316_v31, %v3315_v23  ;;  %v4970_v12 = vadd.f32 %v3314_v39, %v4878_v18 }
 0x1b9   : > { %v4973_v44 = vadd.f32 %v3250_v46, %v4875_v2  ;;  %v3253_v34 = vadd.f32 %v3252_v60, %v3251_v20 }
 0x1ba   : > { %v4976_v63 = vadd.f32 %v3317_v36, %v4883_v25 }
 0x1bb   : > { %v4979_v51 = vadd.f32 %v3253_v34, %v4880_v54 }
 0x1bc   : > { %v3318_v61 = vpop.f32.mrb[92].mxu1 }
 0x1bd   : > { %v3254_v5 = vpop.f32.mrb[92].mxu0  ;;  %v3319_v13 = vpop.f32.mrb[93].mxu1 }
 0x1be   : > { %v3255_v4 = vpop.f32.mrb[93].mxu0  ;;  %v3320_v56 = vadd.f32 %v3319_v13, %v3318_v61  ;;  %v3321_v40 = vpop.f32.mrb[94].mxu1 }
 0x1bf   : > { %v3256_v33 = vadd.f32 %v3255_v4, %v3254_v5  ;;  %v3257_v50 = vpop.f32.mrb[94].mxu0  ;;  %v3322_v18 = vpop.f32.mrb[95].mxu1 }
 0x1c0   : > { %v3258_v22 = vpop.f32.mrb[95].mxu0  ;;  %v3323_v24 = vadd.f32 %v3322_v18, %v3321_v40  ;;  %v4982_v2 = vadd.f32 %v3320_v56, %v4889_v16 }
 0x1c1   : > { %v4985_v25 = vadd.f32 %v3256_v33, %v4886_v32  ;;  %v3259_v3 = vadd.f32 %v3258_v22, %v3257_v50 }
 0x1c2   : > { %v4988_v54 = vadd.f32 %v3323_v24, %v4895_v27 }
 0x1c3   : > { %v4991_v9 = vadd.f32 %v3259_v3, %v4892_v0 }
 0x1c4   : > { %v3324_v8 = vpop.f32.mrb[96].mxu1 }
 0x1c5   : > { %v3260_v17 = vpop.f32.mrb[96].mxu0  ;;  %v3325_v57 = vpop.f32.mrb[97].mxu1 }
 0x1c6   : > { %v3261_v6 = vpop.f32.mrb[97].mxu0  ;;  %v3326_v45 = vadd.f32 %v3325_v57, %v3324_v8  ;;  %v3327_v7 = vpop.f32.mrb[98].mxu1 }
 0x1c7   : > { %v3262_v48 = vadd.f32 %v3261_v6, %v3260_v17  ;;  %v3263_v10 = vpop.f32.mrb[98].mxu0  ;;  %v3328_v16 = vpop.f32.mrb[99].mxu1 }
 0x1c8   : > { %v3264_v39 = vpop.f32.mrb[99].mxu0  ;;  %v3329_v23 = vadd.f32 %v3328_v16, %v3327_v7  ;;  %v4994_v32 = vadd.f32 %v3326_v45, %v4901_v52 }
 0x1c9   : > { %v4997_v27 = vadd.f32 %v3262_v48, %v4898_v15  ;;  %v3265_v46 = vadd.f32 %v3264_v39, %v3263_v10 }
 0x1ca   : > { %v5000_v0 = vadd.f32 %v3329_v23, %v4907_v38 }
 0x1cb   : > { %v5003_v20 = vadd.f32 %v3265_v46, %v4904_v19 }
 0x1cc   : > { %v3330_v31 = vpop.f32.mrb[100].mxu1 }
 0x1cd   : > { %v3266_v60 = vpop.f32.mrb[100].mxu0  ;;  %v3331_v36 = vpop.f32.mrb[101].mxu1 }
 0x1ce   : > { %v3267_v34 = vpop.f32.mrb[101].mxu0  ;;  %v3332_v61 = vadd.f32 %v3331_v36, %v3330_v31  ;;  %v3333_v5 = vpop.f32.mrb[102].mxu1 }
 0x1cf   : > { %v3268_v13 = vadd.f32 %v3267_v34, %v3266_v60  ;;  %v3269_v4 = vpop.f32.mrb[102].mxu0  ;;  %v3334_v52 = vpop.f32.mrb[103].mxu1 }
 0x1d0   : > { %v3270_v56 = vpop.f32.mrb[103].mxu0  ;;  %v3335_v40 = vadd.f32 %v3334_v52, %v3333_v5  ;;  %v5006_v15 = vadd.f32 %v3332_v61, %v4913_v29 }
 0x1d1   : > { %v5009_v38 = vadd.f32 %v3268_v13, %v4910_v1  ;;  %v3271_v33 = vadd.f32 %v3270_v56, %v3269_v4 }
 0x1d2   : > { %v5012_v19 = vadd.f32 %v3335_v40, %v4919_v53 }
 0x1d3   : > { %v5015_v50 = vadd.f32 %v3271_v33, %v4916_v62 }
 0x1d4   : > { %v3336_v18 = vpop.f32.mrb[104].mxu1 }
 0x1d5   : > { %v3272_v22 = vpop.f32.mrb[104].mxu0  ;;  %v3337_v24 = vpop.f32.mrb[105].mxu1 }
 0x1d6   : > { %v3273_v3 = vpop.f32.mrb[105].mxu0  ;;  %v3338_v8 = vadd.f32 %v3337_v24, %v3336_v18  ;;  %v3339_v17 = vpop.f32.mrb[106].mxu1 }
 0x1d7   : > { %v3274_v57 = vadd.f32 %v3273_v3, %v3272_v22  ;;  %v3275_v6 = vpop.f32.mrb[106].mxu0  ;;  %v3340_v29 = vpop.f32.mrb[107].mxu1 }
 0x1d8   : > { %v3276_v45 = vpop.f32.mrb[107].mxu0  ;;  %v3341_v7 = vadd.f32 %v3340_v29, %v3339_v17  ;;  %v5018_v1 = vadd.f32 %v3338_v8, %v4925_v35 }
 0x1d9   : > { %v5021_v53 = vadd.f32 %v3274_v57, %v4922_v26  ;;  %v3277_v48 = vadd.f32 %v3276_v45, %v3275_v6 }
 0x1da   : > { %v5024_v62 = vadd.f32 %v3341_v7, %v4931_v55 }
 0x1db   : > { %v5027_v10 = vadd.f32 %v3277_v48, %v4928_v58 }
 0x1dc   : > { %v3342_v16 = vpop.f32.mrb[108].mxu1 }
 0x1dd   : > { %v3278_v39 = vpop.f32.mrb[108].mxu0  ;;  %v3343_v23 = vpop.f32.mrb[109].mxu1 }
 0x1de   : > { %v3279_v46 = vpop.f32.mrb[109].mxu0  ;;  %v3344_v31 = vadd.f32 %v3343_v23, %v3342_v16  ;;  %v3345_v60 = vpop.f32.mrb[110].mxu1 }
 0x1df   : > { %v3280_v36 = vadd.f32 %v3279_v46, %v3278_v39  ;;  %v3281_v35 = vpop.f32.mrb[110].mxu0  ;;  %v3346_v34 = vpop.f32.mrb[111].mxu1 }
 0x1e0   : > { %v3282_v61 = vpop.f32.mrb[111].mxu0  ;;  %v3347_v26 = vadd.f32 %v3346_v34, %v3345_v60  ;;  %v5030_v5 = vadd.f32 %v3344_v31, %v4937_v37 }
 0x1e1   : > { %v5033_v55 = vadd.f32 %v3280_v36, %v4934_v14  ;;  %v3283_v13 = vadd.f32 %v3282_v61, %v3281_v35 }
 0x1e2   : > { %v5037_v58 = vadd.f32 %v3347_v26, %v4943_v43 }
 0x1e3   : > { %v5040_v4 = vadd.f32 %v3283_v13, %v4940_v28 }
 0x1e4   : > { %v3348_v52 = vpop.f32.mrb[112].mxu1 }
 0x1e5   : > { %v3438_v37 = vpop.f32.mrb[112].mxu0  ;;  %v3349_v14 = vpop.f32.mrb[113].mxu1 }
 0x1e6   : > { %v2104_v56 = vadd.f32 %v3438_v37, %v4958_v11  ;;  %v3350_v40 = vadd.f32 %v3349_v14, %v3348_v52  ;;  %v2095_v33 = vpop.f32.mrb[113].mxu0  ;;  %v3351_v43 = vpop.f32.mrb[114].mxu1 }
 0x1e7   : > { %v2096_v28 = vadd.f32 %v2095_v33, %v4946_v21  ;;  %v3439_v18 = vpop.f32.mrb[114].mxu0  ;;  %v3352_v22 = vpop.f32.mrb[115].mxu1 }
 0x1e8   : > { %2441 = vst [vmem:[%s5045_s9 + $0x10] sm:$0xff] %v2104_v56  ;;  %v2107_v24 = vadd.f32 %v3439_v18, %v4964_v49  ;;  %v3353_v3 = vadd.f32 %v3352_v22, %v3351_v43  ;;  %v2098_v8 = vpop.f32.mrb[115].mxu0  ;;  %v5052_v17 = vadd.f32 %v3350_v40, %v4949_v47  ;;  %v2296_v7 = vmul.f32 %v2104_v56, %v2104_v56 }
 0x1e9   : > { %2439 = vst [vmem:[%s5045_s9] sm:$0xff] %v2096_v28  ;;  %v2099_v57 = vadd.f32 %v2098_v8, %v4952_v30  ;;  %v2294_v6 = vmul.f32 %v2096_v28, %v2096_v28 }
 0x1ea   : > { %2442 = vst [vmem:[%s5045_s9 + $0x18] sm:$0xff] %v2107_v24  ;;  %v5058_v11 = vadd.f32 %v3353_v3, %v4955_v41  ;;  %v2297_v31 = vmul.f32 %v2107_v24, %v2107_v24 }
 0x1eb   : > { %v2222_v29 = vadd.f32 %v2099_v57, %v2096_v28  ;;  %v2295_v21 = vmul.f32 %v2099_v57, %v2099_v57  ;;  %2440 = vst [vmem:[%s5045_s9 + $0x8] sm:$0xff] %v2099_v57 }
 0x1ec   : > { %v3354_v45 = vpop.f32.mrb[116].mxu1 }
 0x1ed   : > { %v2223_v49 = vadd.f32 %v2222_v29, %v2104_v56  ;;  %v2326_v48 = vadd.f32 %v2295_v21, %v2294_v6  ;;  %v3442_v16 = vpop.f32.mrb[116].mxu0  ;;  %v3355_v39 = vpop.f32.mrb[117].mxu1 }
 0x1ee   : > { %v2120_v47 = vadd.f32 %v3442_v16, %v4982_v2  ;;  %v3356_v23 = vadd.f32 %v3355_v39, %v3354_v45  ;;  %v2111_v30 = vpop.f32.mrb[117].mxu0  ;;  %v3357_v46 = vpop.f32.mrb[118].mxu1 }
 0x1ef   : > { %v2224_v41 = vadd.f32 %v2223_v49, %v2107_v24  ;;  %v2327_v60 = vadd.f32 %v2326_v48, %v2296_v7  ;;  %v2112_v36 = vadd.f32 %v2111_v30, %v4970_v12  ;;  %v3443_v35 = vpop.f32.mrb[118].mxu0  ;;  %v3358_v34 = vpop.f32.mrb[119].mxu1 }
 0x1f0   : > { %2445 = vst [vmem:[%s5045_s9 + $0x30] sm:$0xff] %v2120_v47  ;;  %v2123_v61 = vadd.f32 %v3443_v35, %v4988_v54  ;;  %v3359_v26 = vadd.f32 %v3358_v34, %v3357_v46  ;;  %v2114_v13 = vpop.f32.mrb[119].mxu0  ;;  %v5066_v2 = vadd.f32 %v3356_v23, %v4961_v42  ;;  %v2300_v54 = vmul.f32 %v2120_v47, %v2120_v47 }
 0x1f1   : > { %v2225_v52 = vrot.slane %v2224_v41, 4  ;;  %v2328_v37 = vadd.f32 %v2327_v60, %v2297_v31  ;;  %2443 = vst [vmem:[%s5045_s9 + $0x20] sm:$0xff] %v2112_v36  ;;  %v2115_v14 = vadd.f32 %v2114_v13, %v4976_v63  ;;  %v2298_v56 = vmul.f32 %v2112_v36, %v2112_v36 }
 0x1f2   : > { %2446 = vst [vmem:[%s5045_s9 + $0x38] sm:$0xff] %v2123_v61  ;;  %v5072_v12 = vadd.f32 %v3359_v26, %v4967_v59  ;;  %v2301_v63 = vmul.f32 %v2123_v61, %v2123_v61 }
 0x1f3   : > { %v2226_v40 = vadd.f32 %v2225_v52, %v2224_v41  ;;  %v2329_v33 = vrot.slane %v2328_v37, 4  ;;  %v2231_v43 = vadd.f32 %v2115_v14, %v2112_v36  ;;  %v2299_v28 = vmul.f32 %v2115_v14, %v2115_v14  ;;  %2444 = vst [vmem:[%s5045_s9 + $0x28] sm:$0xff] %v2115_v14 }
 0x1f4   : > { %v3360_v18 = vpop.f32.mrb[120].mxu1 }
 0x1f5   : > { %v2227_v22 = vrot.slane %v2226_v40, 2  ;;  %v2330_v42 = vadd.f32 %v2329_v33, %v2328_v37  ;;  %v2232_v24 = vadd.f32 %v2231_v43, %v2120_v47  ;;  %v2335_v3 = vadd.f32 %v2299_v28, %v2298_v56  ;;  %v3446_v8 = vpop.f32.mrb[120].mxu0  ;;  %v3361_v57 = vpop.f32.mrb[121].mxu1 }
 0x1f6   : > { %v2136_v6 = vadd.f32 %v3446_v8, %v5006_v15  ;;  %v3362_v29 = vadd.f32 %v3361_v57, %v3360_v18  ;;  %v2127_v59 = vpop.f32.mrb[121].mxu0  ;;  %v3363_v21 = vpop.f32.mrb[122].mxu1 }
 0x1f7   : > { %v2228_v45 = vadd.f32 %v2227_v22, %v2226_v40  ;;  %v2331_v7 = vrot.slane %v2330_v42, 2  ;;  %v2233_v49 = vadd.f32 %v2232_v24, %v2123_v61  ;;  %v2336_v48 = vadd.f32 %v2335_v3, %v2300_v54  ;;  %v3447_v16 = vpop.f32.mrb[122].mxu0  ;;  %v3364_v39 = vpop.f32.mrb[123].mxu1 }
 0x1f8   : > { %2449 = vst [vmem:[%s5045_s9 + $0x50] sm:$0xff] %v2136_v6  ;;  %v2128_v47 = vadd.f32 %v2127_v59, %v4994_v32  ;;  %v2139_v23 = vadd.f32 %v3447_v16, %v5012_v19  ;;  %v3365_v30 = vadd.f32 %v3364_v39, %v3363_v21  ;;  %v2130_v46 = vpop.f32.mrb[123].mxu0  ;;  %v5083_v36 = vadd.f32 %v3362_v29, %v4973_v44 }
 0x1f9   : > { %v2332_v15 = vadd.f32 %v2331_v7, %v2330_v42  ;;  %v2234_v31 = vrot.slane %v2233_v49, 4  ;;  %v2337_v41 = vadd.f32 %v2336_v48, %v2301_v63  ;;  %v2131_v60 = vadd.f32 %v2130_v46, %v5000_v0 }
 0x1fa   : > { %2447 = vst [vmem:[%s5045_s9 + $0x40] sm:$0xff] %v2128_v47  ;;  %2450 = vst [vmem:[%s5045_s9 + $0x58] sm:$0xff] %v2139_v23  ;;  %v2229_v35 = vrot.slane %v2228_v45, 1  ;;  %v2302_v32 = vmul.f32 %v2128_v47, %v2128_v47  ;;  %v5087_v52 = vadd.f32 %v3365_v30, %v4979_v51  ;;  %v2304_v40 = vmul.f32 %v2136_v6, %v2136_v6 }
 0x1fb   : > { %v2235_v34 = vadd.f32 %v2234_v31, %v2233_v49  ;;  %v2338_v61 = vrot.slane %v2337_v41, 4  ;;  %v2240_v26 = vadd.f32 %v2131_v60, %v2128_v47  ;;  %v2303_v19 = vmul.f32 %v2131_v60, %v2131_v60  ;;  %2448 = vst [vmem:[%s5045_s9 + $0x48] sm:$0xff] %v2131_v60 }
 0x1fc   : > { %v3366_v13 = vpop.f32.mrb[124].mxu1  ;;  %v2333_v37 = vrot.slane %v2332_v15, 1  ;;  %v2305_v3 = vmul.f32 %v2139_v23, %v2139_v23  ;;  %v2230_v63 = vadd.f32 %v2229_v35, %v2228_v45 }
 0x1fd   : > { %v2236_v14 = vrot.slane %v2235_v34, 2  ;;  %v2339_v56 = vadd.f32 %v2338_v61, %v2337_v41  ;;  %v3450_v0 = vpop.f32.mrb[124].mxu0  ;;  %v3367_v33 = vpop.f32.mrb[125].mxu1  ;;  %v2241_v44 = vadd.f32 %v2240_v26, %v2136_v6  ;;  %v2344_v43 = vadd.f32 %v2303_v19, %v2302_v32 }
 0x1fe   : > { %v2152_v28 = vadd.f32 %v3450_v0, %v5030_v5  ;;  %v3368_v54 = vadd.f32 %v3367_v33, %v3366_v13  ;;  %v2143_v18 = vpop.f32.mrb[125].mxu0  ;;  %v3369_v22 = vpop.f32.mrb[126].mxu1  ;;  %v2334_v5 = vadd.f32 %v2333_v37, %v2332_v15 }
 0x1ff   : > { %v2237_v42 = vadd.f32 %v2236_v14, %v2235_v34  ;;  %v2340_v24 = vrot.slane %v2339_v56, 2  ;;  %v2144_v51 = vadd.f32 %v2143_v18, %v5018_v1  ;;  %v3451_v8 = vpop.f32.mrb[126].mxu0  ;;  %v3370_v57 = vpop.f32.mrb[127].mxu1  ;;  %v2242_v29 = vadd.f32 %v2241_v44, %v2139_v23 }
 0x200   : > { %v2345_v59 = vadd.f32 %v2344_v43, %v2304_v40  ;;  %2453 = vst [vmem:[%s5045_s9 + $0x70] sm:$0xff] %v2152_v28  ;;  %v2155_v6 = vadd.f32 %v3451_v8, %v5037_v58  ;;  %v2146_v21 = vpop.f32.mrb[127].mxu0  ;;  %v3371_v48 = vadd.f32 %v3370_v57, %v3369_v22  ;;  %v5097_v23 = vadd.f32 %v3368_v54, %v4985_v25 }
 0x201   : > { %v2238_v7 = vrot.slane %v2237_v42, 1  ;;  %v2341_v49 = vadd.f32 %v2340_v24, %v2339_v56  ;;  %2451 = vst [vmem:[%s5045_s9 + $0x60] sm:$0xff] %v2144_v51  ;;  %v2243_v16 = vrot.slane %v2242_v29, 4  ;;  %v2306_v47 = vmul.f32 %v2144_v51, %v2144_v51 }
 0x202   : > { %v2346_v39 = vadd.f32 %v2345_v59, %v2305_v3  ;;  %2454 = vst [vmem:[%s5045_s9 + $0x78] sm:$0xff] %v2155_v6  ;;  %v2147_v1 = vadd.f32 %v2146_v21, %v5024_v62  ;;  %v5100_v58 = vadd.f32 %v3371_v48, %v4991_v9  ;;  %v2308_v61 = vmul.f32 %v2152_v28, %v2152_v28 }
 0x203   : > { %v2239_v30 = vadd.f32 %v2238_v7, %v2237_v42  ;;  %v2342_v45 = vrot.slane %v2341_v49, 1  ;;  %v2244_v46 = vadd.f32 %v2243_v16, %v2242_v29  ;;  %v2309_v32 = vmul.f32 %v2155_v6, %v2155_v6 }
 0x204   : > { %v2347_v15 = vrot.slane %v2346_v39, 4  ;;  %v2249_v31 = vadd.f32 %v2147_v1, %v2144_v51  ;;  %v2307_v41 = vmul.f32 %v2147_v1, %v2147_v1  ;;  %2452 = vst [vmem:[%s5045_s9 + $0x68] sm:$0xff] %v2147_v1  ;;  %v3372_v60 = vpop.f32.mrb[128].mxu1 }
 0x205   : > { %v2343_v35 = vadd.f32 %v2342_v45, %v2341_v49  ;;  %v2407_v34 = vsel %vm2406_vm6, %v2239_v30, %v2230_v63  ;;  %v3454_v62 = vpop.f32.mrb[128].mxu0  ;;  %v3373_v26 = vpop.f32.mrb[129].mxu1  ;;  %v2245_v19 = vrot.slane %v2244_v46, 2 }
 0x206   : > { %v2348_v13 = vadd.f32 %v2347_v15, %v2346_v39  ;;  %v2250_v25 = vadd.f32 %v2249_v31, %v2152_v28  ;;  %v2353_v37 = vadd.f32 %v2307_v41, %v2306_v47  ;;  %v2159_v9 = vpop.f32.mrb[129].mxu0  ;;  %v3375_v14 = vpop.f32.mrb[130].mxu1  ;;  %v2168_v40 = vadd.f32 %v3454_v62, %v5066_v2 }
 0x207   : > { %v2430_v56 = vsel %vm2406_vm6, %v2343_v35, %v2334_v5  ;;  %v3374_v0 = vadd.f32 %v3373_v26, %v3372_v60  ;;  %v2160_v33 = vadd.f32 %v2159_v9, %v5052_v17  ;;  %v3455_v44 = vpop.f32.mrb[130].mxu0  ;;  %v3376_v43 = vpop.f32.mrb[131].mxu1  ;;  %v2246_v54 = vadd.f32 %v2245_v19, %v2244_v46 }
 0x208   : > { %v2349_v18 = vrot.slane %v2348_v13, 2  ;;  %v2251_v22 = vadd.f32 %v2250_v25, %v2155_v6  ;;  %v2354_v42 = vadd.f32 %v2353_v37, %v2308_v61  ;;  %v2162_v28 = vpop.f32.mrb[131].mxu0  ;;  %2457 = vst [vmem:[%s5045_s9 + $0x90] sm:$0xff] %v2168_v40  ;;  %v2171_v24 = vadd.f32 %v3455_v44, %v5072_v12 }
 0x209   : > { %2455 = vst [vmem:[%s5045_s9 + $0x80] sm:$0xff] %v2160_v33  ;;  %v3377_v3 = vadd.f32 %v3376_v43, %v3375_v14  ;;  %v2247_v51 = vrot.slane %v2246_v54, 1  ;;  %v2163_v17 = vadd.f32 %v2162_v28, %v5058_v11  ;;  %v5113_v63 = vadd.f32 %v3374_v0, %v4997_v27 }
 0x20a   : > { %v2350_v8 = vadd.f32 %v2349_v18, %v2348_v13  ;;  %v2252_v2 = vrot.slane %v2251_v22, 4  ;;  %v2355_v57 = vadd.f32 %v2354_v42, %v2309_v32  ;;  %2458 = vst [vmem:[%s5045_s9 + $0x98] sm:$0xff] %v2171_v24  ;;  %v2312_v7 = vmul.f32 %v2168_v40, %v2168_v40 }
 0x20b   : > { %v5116_v29 = vadd.f32 %v3377_v3, %v5003_v20  ;;  %v2248_v59 = vadd.f32 %v2247_v51, %v2246_v54  ;;  %v2310_v49 = vmul.f32 %v2160_v33, %v2160_v33  ;;  %v2258_v48 = vadd.f32 %v2163_v17, %v2160_v33  ;;  %2456 = vst [vmem:[%s5045_s9 + $0x88] sm:$0xff] %v2163_v17 }
 0x20c   : > { %v2351_v6 = vrot.slane %v2350_v8, 1  ;;  %v2253_v21 = vadd.f32 %v2252_v2, %v2251_v22  ;;  %v2356_v12 = vrot.slane %v2355_v57, 4  ;;  %v3378_v5 = vpop.f32.mrb[132].mxu1  ;;  %v2311_v16 = vmul.f32 %v2163_v17, %v2163_v17 }
 0x20d   : > { %v3458_v39 = vpop.f32.mrb[132].mxu0  ;;  %v3379_v47 = vpop.f32.mrb[133].mxu1  ;;  %v2409_v11 = vsel %vm2408_vm7, %v2248_v59, %v2407_v34  ;;  %v2259_v46 = vadd.f32 %v2258_v48, %v2168_v40  ;;  %v2313_v19 = vmul.f32 %v2171_v24, %v2171_v24 }
 0x20e   : > { %v2352_v1 = vadd.f32 %v2351_v6, %v2350_v8  ;;  %v2254_v27 = vrot.slane %v2253_v21, 2  ;;  %v2357_v30 = vadd.f32 %v2356_v12, %v2355_v57  ;;  %v2175_v45 = vpop.f32.mrb[133].mxu0  ;;  %v3381_v20 = vpop.f32.mrb[134].mxu1  ;;  %v2362_v15 = vadd.f32 %v2311_v16, %v2310_v49 }
 0x20f   : > { %v2184_v31 = vadd.f32 %v3458_v39, %v5097_v23  ;;  %v3380_v41 = vadd.f32 %v3379_v47, %v3378_v5  ;;  %v3459_v60 = vpop.f32.mrb[134].mxu0  ;;  %v3382_v35 = vpop.f32.mrb[135].mxu1  ;;  %v2176_v34 = vadd.f32 %v2175_v45, %v5083_v36  ;;  %v2260_v13 = vadd.f32 %v2259_v46, %v2171_v24 }
 0x210   : > { %v2431_v61 = vsel %vm2408_vm7, %v2352_v1, %v2430_v56  ;;  %v2255_v32 = vadd.f32 %v2254_v27, %v2253_v21  ;;  %v2358_v62 = vrot.slane %v2357_v30, 2  ;;  %v2178_v26 = vpop.f32.mrb[135].mxu0  ;;  %v2363_v25 = vadd.f32 %v2362_v15, %v2312_v7 }
 0x211   : > { %2461 = vst [vmem:[%s5045_s9 + $0xb0] sm:$0xff] %v2184_v31  ;;  %v2187_v37 = vadd.f32 %v3459_v60, %v5100_v58  ;;  %v2316_v14 = vmul.f32 %v2184_v31, %v2184_v31  ;;  %2459 = vst [vmem:[%s5045_s9 + $0xa0] sm:$0xff] %v2176_v34  ;;  %v3383_v40 = vadd.f32 %v3382_v35, %v3381_v20  ;;  %v2261_v0 = vrot.slane %v2260_v13, 4 }
 0x212   : > { %v2256_v9 = vrot.slane %v2255_v32, 1  ;;  %v2359_v23 = vadd.f32 %v2358_v62, %v2357_v30  ;;  %v2364_v56 = vadd.f32 %v2363_v25, %v2313_v19  ;;  %v2314_v33 = vmul.f32 %v2176_v34, %v2176_v34 }
 0x213   : > { %2462 = vst [vmem:[%s5045_s9 + $0xb8] sm:$0xff] %v2187_v37  ;;  %v2179_v44 = vadd.f32 %v2178_v26, %v5087_v52  ;;  %v2039_v18 = vadd.f32 %v3380_v41, %v5009_v38  ;;  %v2042_v58 = vadd.f32 %v3383_v40, %v5015_v50  ;;  %v2262_v22 = vadd.f32 %v2261_v0, %v2260_v13 }
 0x214   : > { %v2257_v36 = vadd.f32 %v2256_v9, %v2255_v32  ;;  %v2360_v43 = vrot.slane %v2359_v23, 1  ;;  %v3384_v54 = vpop.f32.mrb[136].mxu1  ;;  %v2365_v42 = vrot.slane %v2364_v56, 4  ;;  %v2317_v49 = vmul.f32 %v2187_v37, %v2187_v37 }
 0x215   : > { %v2267_v28 = vadd.f32 %v2179_v44, %v2176_v34  ;;  %v2315_v24 = vmul.f32 %v2179_v44, %v2179_v44  ;;  %2460 = vst [vmem:[%s5045_s9 + $0xa8] sm:$0xff] %v2179_v44  ;;  %v3462_v3 = vpop.f32.mrb[136].mxu0  ;;  %v3385_v51 = vpop.f32.mrb[137].mxu1  ;;  %v2263_v6 = vrot.slane %v2262_v22, 2 }
 0x216   : > { %v2361_v8 = vadd.f32 %v2360_v43, %v2359_v23  ;;  %v2411_v2 = vsel %vm2410_vm8, %v2257_v36, %v2409_v11  ;;  %v2200_v52 = vadd.f32 %v3462_v3, %v2039_v18  ;;  %v3386_v57 = vadd.f32 %v3385_v51, %v3384_v54  ;;  %v2191_v17 = vpop.f32.mrb[137].mxu0  ;;  %v3387_v59 = vpop.f32.mrb[138].mxu1 }
 0x217   : > { %v2366_v21 = vadd.f32 %v2365_v42, %v2364_v56  ;;  %v2268_v38 = vadd.f32 %v2267_v28, %v2184_v31  ;;  %v2371_v50 = vadd.f32 %v2315_v24, %v2314_v33  ;;  %v3463_v12 = vpop.f32.mrb[138].mxu0  ;;  %v3388_v5 = vpop.f32.mrb[139].mxu1  ;;  %v2192_v48 = vadd.f32 %v2191_v17, %v5113_v63 }
 0x218   : > { %v2432_v7 = vsel %vm2410_vm8, %v2361_v8, %v2431_v61  ;;  %2465 = vst [vmem:[%s5045_s9 + $0xd0] sm:$0xff] %v2200_v52  ;;  %v2203_v16 = vadd.f32 %v3463_v12, %v2042_v58  ;;  %v2194_v39 = vpop.f32.mrb[139].mxu0  ;;  %v2264_v47 = vadd.f32 %v2263_v6, %v2262_v22  ;;  %v2320_v30 = vmul.f32 %v2200_v52, %v2200_v52 }
 0x219   : > { %v2367_v1 = vrot.slane %v2366_v21, 2  ;;  %v2269_v11 = vadd.f32 %v2268_v38, %v2187_v37  ;;  %v2372_v27 = vadd.f32 %v2371_v50, %v2316_v14  ;;  %v2318_v45 = vmul.f32 %v2192_v48, %v2192_v48  ;;  %2463 = vst [vmem:[%s5045_s9 + $0xc0] sm:$0xff] %v2192_v48 }
 0x21a   : > { %2466 = vst [vmem:[%s5045_s9 + $0xd8] sm:$0xff] %v2203_v16  ;;  %v3389_v20 = vadd.f32 %v3388_v5, %v3387_v59  ;;  %v2195_v46 = vadd.f32 %v2194_v39, %v5116_v29  ;;  %v2265_v15 = vrot.slane %v2264_v47, 1  ;;  %v2047_v32 = vadd.f32 %v3386_v57, %v5021_v53 }
 0x21b   : > { %v2368_v31 = vadd.f32 %v2367_v1, %v2366_v21  ;;  %v2270_v41 = vrot.slane %v2269_v11, 4  ;;  %v2373_v60 = vadd.f32 %v2372_v27, %v2317_v49  ;;  %v2321_v9 = vmul.f32 %v2203_v16, %v2203_v16 }
 0x21c   : > { %v2276_v35 = vadd.f32 %v2195_v46, %v2192_v48  ;;  %v2319_v63 = vmul.f32 %v2195_v46, %v2195_v46  ;;  %2464 = vst [vmem:[%s5045_s9 + $0xc8] sm:$0xff] %v2195_v46  ;;  %v3390_v61 = vpop.f32.mrb[140].mxu1  ;;  %v2050_v62 = vadd.f32 %v3389_v20, %v5027_v10  ;;  %v2266_v34 = vadd.f32 %v2265_v15, %v2264_v47 }
 0x21d   : > { %v2369_v26 = vrot.slane %v2368_v31, 1  ;;  %v2271_v19 = vadd.f32 %v2270_v41, %v2269_v11  ;;  %v2374_v13 = vrot.slane %v2373_v60, 4  ;;  %v3466_v25 = vpop.f32.mrb[140].mxu0  ;;  %v3391_v37 = vpop.f32.mrb[141].mxu1 }
 0x21e   : > { %v2277_v29 = vadd.f32 %v2276_v35, %v2200_v52  ;;  %v2380_v23 = vadd.f32 %v2319_v63, %v2318_v45  ;;  %v3392_v14 = vadd.f32 %v3391_v37, %v3390_v61  ;;  %v2207_v40 = vpop.f32.mrb[141].mxu0  ;;  %v3393_v0 = vpop.f32.mrb[142].mxu1  ;;  %v2413_v33 = vsel %vm2412_vm9, %v2266_v34, %v2411_v2 }
 0x21f   : > { %v2370_v56 = vadd.f32 %v2369_v26, %v2368_v31  ;;  %v2272_v44 = vrot.slane %v2271_v19, 2  ;;  %v2375_v53 = vadd.f32 %v2374_v13, %v2373_v60  ;;  %v3467_v36 = vpop.f32.mrb[142].mxu0  ;;  %v3394_v10 = vpop.f32.mrb[143].mxu1  ;;  %v2208_v58 = vadd.f32 %v2207_v40, %v2047_v32 }
 0x220   : > { %v2278_v43 = vadd.f32 %v2277_v29, %v2203_v16  ;;  %v2381_v54 = vadd.f32 %v2380_v23, %v2320_v30  ;;  %v2055_v18 = vadd.f32 %v3392_v14, %v5033_v55  ;;  %v2210_v22 = vpop.f32.mrb[143].mxu0  ;;  %v3395_v3 = vadd.f32 %v3394_v10, %v3393_v0 }
 0x221   : > { %v2433_v42 = vsel %vm2412_vm9, %v2370_v56, %v2432_v7  ;;  %v2273_v28 = vadd.f32 %v2272_v44, %v2271_v19  ;;  %v2376_v24 = vrot.slane %v2375_v53, 2  ;;  %2467 = vst [vmem:[%s5045_s9 + $0xe0] sm:$0xff] %v2208_v58  ;;  %v2211_v59 = vadd.f32 %v2210_v22, %v2050_v62 }
 0x222   : > { %v2279_v51 = vrot.slane %v2278_v43, 4  ;;  %v2382_v8 = vadd.f32 %v2381_v54, %v2321_v9  ;;  %v2216_v2 = vadd.f32 %v3466_v25, %v2055_v18  ;;  %v2058_v17 = vadd.f32 %v3395_v3, %v5040_v4 }
 0x223   : > { %v2274_v52 = vrot.slane %v2273_v28, 1  ;;  %v2377_v57 = vadd.f32 %v2376_v24, %v2375_v53  ;;  %v2322_v21 = vmul.f32 %v2208_v58, %v2208_v58  ;;  %v2285_v5 = vadd.f32 %v2211_v59, %v2208_v58  ;;  %2468 = vst [vmem:[%s5045_s9 + $0xe8] sm:$0xff] %v2211_v59 }
 0x224   : > { %v2280_v55 = vadd.f32 %v2279_v51, %v2278_v43  ;;  %v2383_v6 = vrot.slane %v2382_v8, 4  ;;  %2469 = vst [vmem:[%s5045_s9 + $0xf0] sm:$0xff] %v2216_v2  ;;  %v2219_v12 = vadd.f32 %v3467_v36, %v2058_v17  ;;  %v2324_v48 = vmul.f32 %v2216_v2, %v2216_v2 }
 0x225   : > { %v2275_v38 = vadd.f32 %v2274_v52, %v2273_v28  ;;  %v2378_v50 = vrot.slane %v2377_v57, 1  ;;  %v2323_v16 = vmul.f32 %v2211_v59, %v2211_v59  ;;  %v2286_v4 = vadd.f32 %v2285_v5, %v2216_v2 }
 0x226   : > { %v2281_v7 = vrot.slane %v2280_v55, 2  ;;  %v2384_v49 = vadd.f32 %v2383_v6, %v2382_v8  ;;  %2470 = vst [vmem:[%s5045_s9 + $0xf8] sm:$0xff] %v2219_v12  ;;  %v2325_v27 = vmul.f32 %v2219_v12, %v2219_v12 }
 0x227   : > { %v2379_v39 = vadd.f32 %v2378_v50, %v2377_v57  ;;  %v2415_v47 = vsel %vm2414_vm10, %v2275_v38, %v2413_v33  ;;  %v2389_v30 = vadd.f32 %v2323_v16, %v2322_v21  ;;  %v2287_v20 = vadd.f32 %v2286_v4, %v2219_v12 }
 0x228   : > { %v2282_v1 = vadd.f32 %v2281_v7, %v2280_v55  ;;  %v2385_v11 = vrot.slane %v2384_v49, 2 }
 0x229   : > { %v2434_v45 = vsel %vm2414_vm10, %v2379_v39, %v2433_v42  ;;  %v2390_v31 = vadd.f32 %v2389_v30, %v2324_v48  ;;  %v2288_v41 = vrot.slane %v2287_v20, 4 }
 0x22a   : > { %v2283_v46 = vrot.slane %v2282_v1, 1  ;;  %v2386_v15 = vadd.f32 %v2385_v11, %v2384_v49 }
 0x22b   : > { %v2391_v63 = vadd.f32 %v2390_v31, %v2325_v27  ;;  %v2289_v61 = vadd.f32 %v2288_v41, %v2287_v20 }
 0x22c   : > { %v2284_v60 = vadd.f32 %v2283_v46, %v2282_v1  ;;  %v2387_v35 = vrot.slane %v2386_v15, 1 }
 0x22d   : > { %v2392_v34 = vrot.slane %v2391_v63, 4  ;;  %v2290_v26 = vrot.slane %v2289_v61, 2 }
 0x22e   : > { %v2388_v32 = vadd.f32 %v2387_v35, %v2386_v15  ;;  %v2417_v62 = vsel %vm2416_vm11, %v2284_v60, %v2415_v47 }
 0x22f   : > { %v2393_v13 = vadd.f32 %v2392_v34, %v2391_v63  ;;  %v2291_v25 = vadd.f32 %v2290_v26, %v2289_v61 }
 0x230   : > { %v2435_v19 = vsel %vm2416_vm11, %v2388_v32, %v2434_v45 }
 0x231   : > { %v2394_v37 = vrot.slane %v2393_v13, 2  ;;  %v2292_v9 = vrot.slane %v2291_v25, 1 }
 0x233   : > { %v2395_v29 = vadd.f32 %v2394_v37, %v2393_v13  ;;  %v2293_v23 = vadd.f32 %v2292_v9, %v2291_v25 }
 0x235   : > { %v2396_v14 = vrot.slane %v2395_v29, 1  ;;  %v2419_v40 = vsel %vm2418_vm12, %v2293_v23, %v2417_v62 }
 0x236   : > { %2421 = vst [vmem:[%s268_s13] sm:$0xff] %v2419_v40 }
 0x237   : > { %v2397_v0 = vadd.f32 %v2396_v14, %v2395_v29 }
 0x239   : > { %v2436_v56 = vsel %vm2418_vm12, %v2397_v0, %v2435_v19 }
 0x23a   : > { %2438 = vst [vmem:[%s272_s15] sm:$0xff] %v2436_v56 }
 0x23b PF: > { %s17_s21 = sadd.s32 1, %s3574_s21  }
 0x23c   : > { %p14_p4 = scmp.ge.s32.totalorder %s17_s21, 4  }
 0x23e   :  { %16 = sbr.rel (!%p14_p4) target bundleno = 1 (0x1), region = 90 }

// kernel: encoder_forward.3
= control target key start
LH: loop header
LB: loop body
LE: loop exit
PB: predicated region body
PF: predicated region fallthrough
CT: control target
= control target key end

     0   :  { %vm144_vm0 = vcmask 1040384   ;;  %v506_v0 = vlaneseq  ;;  %v5749_v1 = vmov 0.0   ;;  %s5750_s5 = smov 4   ;;  %s5751_s10 = smov 8   ;;  %vm2412_vm3 = vcmask 31744   ;;  %s9345_s0 = inlined_call_operand.vmem [shape: f32[2,16,16,4], index: 0, kind: input, shape index: {}]   ;;  %s9346_s1 = inlined_call_operand.vmem [shape: bf16[36,128], index: 1, kind: input, shape index: {}]   ;;  %s9347_s2 = inlined_call_operand.vmem [shape: bf16[2,16,16,128], index: 2, kind: output, shape index: {0}]   ;;  %s9348_s3 = inlined_call_operand.vmem [shape: f32[1,8,128], index: 3, kind: output, shape index: {1}]   ;;  %s9349_s4 = inlined_call_operand.vmem [shape: f32[1,8,128], index: 4, kind: output, shape index: {2}]  }
   0x1   :  { %v5783_v2 = vrot.slane %v5749_v1, 7  ;;  %v17_v3 = vld [vmem:[%s9345_s0 + $0x10] sm:$0xff]  ;;  %v18_v4 = vld [vmem:[%s9345_s0 + $0x18] sm:$0xff]  ;;  %v15_v5 = vld [vmem:[%s9345_s0] sm:$0xff]  ;;  %vm2475_vm4 = vcmask 64512   ;;  %vm2538_vm5 = vcmask 97280  }
   0x2   :  { %v5794_v6 = vshrl.u32 %v506_v0, 7  ;;  %v150_v7 = vrot.slane %v17_v3, 7  ;;  %v151_v8 = vrot.slane %v18_v4, 7  ;;  %v16_v9 = vld [vmem:[%s9345_s0 + $0x8] sm:$0xff]  ;;  %v147_v10 = vrot.slane %v15_v5, 7  ;;  %v19_v25 = vld [vmem:[%s9345_s0 + $0x20] sm:$0xff] }
   0x3   :  { %9671 = vst [vmem:[#allocation2_spill] sm:$0xff] %v5783_v2  ;;  %v5801_v11 = vsel %vm144_vm0, 0.0, %v5783_v2  ;;  %v5805_v12 = vsel %vm144_vm0, %v5783_v2, 0.0  ;;  %v440_v13 = vrot.slane %v5783_v2, 1  ;;  %v148_v14 = vrot.slane %v16_v9, 7  ;;  %v20_v29 = vld [vmem:[%s9345_s0 + $0x28] sm:$0xff] }
   0x4   :  { %9672 = vst [vmem:[#allocation3_spill] sm:$0xff] %v5801_v11  ;;  %v407_v15 = vrot.slane %v5801_v11, 1  ;;  %v473_v16 = vrot.slane %v5805_v12, 1  ;;  %vm508_vm1 = vcmp.lt.s32.totalorder %v5794_v6, 7  ;;  %v5812_v17 = vsel %vm144_vm0, %v150_v7, %v151_v8  ;;  %v21_v30 = vld [vmem:[%s9345_s0 + $0x30] sm:$0xff]  ;;  %v22_v35 = vld [vmem:[%s9345_s0 + $0x38] sm:$0xff] }
   0x5   :  { %9673 = vst [vmem:[#allocation4_spill] sm:$0xff] %v5812_v17  ;;  %v5815_v18 = vsel %vm144_vm0, 0.0, %v150_v7  ;;  %v5818_v19 = vsel %vm144_vm0, %v151_v8, 0.0  ;;  %v5821_v20 = vsel %vm144_vm0, %v147_v10, %v148_v14  ;;  %v442_v24 = vrot.slane %v5812_v17, 1  ;;  %v23_v48 = vld [vmem:[%s9345_s0 + $0x40] sm:$0xff]  ;;  %v24_v53 = vld [vmem:[%s9345_s0 + $0x48] sm:$0xff] }
   0x6   :  { %9674 = vst [vmem:[#allocation5_spill] sm:$0xff] %v5815_v18  ;;  %9675 = vst [vmem:[#allocation6_spill] sm:$0xff] %v5821_v20  ;;  %v509_v21 = vsel %vm508_vm1, %v440_v13, %v473_v16  ;;  %v542_v22 = vsel %vm508_vm1, %v407_v15, %v440_v13  ;;  %v409_v23 = vrot.slane %v5815_v18, 1  ;;  %v475_v28 = vrot.slane %v5818_v19, 1  ;;  %v25_v58 = vld [vmem:[%s9345_s0 + $0x50] sm:$0xff]  ;;  %v26_v4 = vld [vmem:[%s9345_s0 + $0x58] sm:$0xff] }
   0x7   :  { %v5833_v27 = vpack.i.bf16 %v509_v21, %v542_v22  ;;  %v5845_v32 = vsel %vm144_vm0, 0.0, %v147_v10  ;;  %v5848_v33 = vsel %vm144_vm0, %v148_v14, 0.0  ;;  %v441_v34 = vrot.slane %v5821_v20, 1  ;;  %v27_v10 = vld [vmem:[%s9345_s0 + $0x60] sm:$0xff]  ;;  %v28_v13 = vld [vmem:[%s9345_s0 + $0x68] sm:$0xff]  ;;  %v29_v14 = vld [vmem:[%s9345_s0 + $0x70] sm:$0xff] }
   0x8   :  { %v544_v31 = vsel %vm508_vm1, %v409_v23, %v442_v24  ;;  %9677 = vst [vmem:[#allocation8_spill] sm:$0xff] %v5845_v32  ;;  %v511_v36 = vsel %vm508_vm1, %v442_v24, %v475_v28  ;;  %v408_v37 = vrot.slane %v5845_v32, 1  ;;  %v474_v38 = vrot.slane %v5848_v33, 1  ;;  %s5754_s19 = smov 20   ;;  %s5755_s26 = smov 24  }
   0x9   :  { %9676 = vst [vmem:[#allocation7_spill] sm:$0xff] %v5833_v27  ;;  %4492 = vrot.lane.b32.xlu0 %v5833_v27, %s5750_s5  ;;  %v153_v39 = vrot.slane %v19_v25, 7  ;;  %v5861_v41 = vpack.i.bf16 %v511_v36, %v544_v31  ;;  %v154_v42 = vrot.slane %v20_v29, 7  ;;  %v156_v43 = vrot.slane %v21_v30, 7  ;;  %s5757_s27 = smov 32  }
   0xa   :  { %v510_v44 = vsel %vm508_vm1, %v441_v34, %v474_v38  ;;  %v543_v45 = vsel %vm508_vm1, %v408_v37, %v441_v34  ;;  %v157_v47 = vrot.slane %v22_v35, 7  ;;  %v159_v62 = vrot.slane %v23_v48, 7  ;;  %v30_v34 = vld [vmem:[%s9345_s0 + $0x78] sm:$0xff] }
   0xb   :  { %9678 = vst [vmem:[#allocation9_spill] sm:$0xff] %v5861_v41  ;;  %v5868_v46 = vsel %vm144_vm0, 0.0, %v153_v39  ;;  %4502 = vrot.lane.b32.xlu1 %v5861_v41, %s5750_s5  ;;  %v5875_v49 = vpack.i.bf16 %v510_v44, %v543_v45  ;;  %v5878_v50 = vsel %vm144_vm0, %v153_v39, %v154_v42  ;;  %v5881_v51 = vsel %vm144_vm0, %v154_v42, 0.0  ;;  %v52_v41 = vld [vmem:[%s9345_s0 + $0x128] sm:$0xff] }
   0xc   :  { %9679 = vst [vmem:[#allocation10_spill] sm:$0xff] %v5868_v46  ;;  %9681 = vst [vmem:[#allocation12_spill] sm:$0xff] %v5878_v50  ;;  %v410_v52 = vrot.slane %v5868_v46, 1  ;;  %v443_v54 = vrot.slane %v5878_v50, 1  ;;  %v476_v55 = vrot.slane %v5881_v51, 1  ;;  %v5890_v56 = vsel %vm144_vm0, %v156_v43, %v157_v47 }
   0xd   :  { %9680 = vst [vmem:[#allocation11_spill] sm:$0xff] %v5875_v49  ;;  %9682 = vst [vmem:[#allocation13_spill] sm:$0xff] %v5890_v56  ;;  %v5893_v57 = vsel %vm144_vm0, 0.0, %v156_v43  ;;  %4497 = vrot.lane.b32.xlu0 %v5875_v49, %s5750_s5  ;;  %v5901_v59 = vsel %vm144_vm0, %v157_v47, 0.0  ;;  %v444_v61 = vrot.slane %v5890_v56, 1  ;;  %v160_v3 = vrot.slane %v24_v53, 7 }
   0xe   :  { %9683 = vst [vmem:[#allocation14_spill] sm:$0xff] %v5893_v57  ;;  %v411_v60 = vrot.slane %v5893_v57, 1  ;;  %v512_v63 = vsel %vm508_vm1, %v443_v54, %v476_v55  ;;  %v545_v0 = vsel %vm508_vm1, %v410_v52, %v443_v54  ;;  %v477_v1 = vrot.slane %v5901_v59, 1 }
   0xf   :  { %v5913_v5 = vpack.i.bf16 %v512_v63, %v545_v0  ;;  %v5918_v8 = vsel %vm144_vm0, 0.0, %v159_v62  ;;  %v162_v9 = vrot.slane %v25_v58, 7  ;;  %v5932_v16 = vsel %vm144_vm0, %v159_v62, %v160_v3  ;;  %v32_v62 = vld [vmem:[%s9345_s0 + $0x88] sm:$0xff] }
  0x10   :  { %v546_v7 = vsel %vm508_vm1, %v411_v60, %v444_v61  ;;  %9685 = vst [vmem:[#allocation16_spill] sm:$0xff] %v5918_v8  ;;  %v513_v15 = vsel %vm508_vm1, %v444_v61, %v477_v1  ;;  %9686 = vst [vmem:[#allocation17_spill] sm:$0xff] %v5932_v16  ;;  %v5935_v21 = vsel %vm144_vm0, %v160_v3, 0.0  ;;  %v412_v22 = vrot.slane %v5918_v8, 1  ;;  %v31_v61 = vld [vmem:[%s9345_s0 + $0x80] sm:$0xff] }
  0x11   :  { %9684 = vst [vmem:[#allocation15_spill] sm:$0xff] %v5913_v5  ;;  %4507 = vrot.lane.b32.xlu1 %v5913_v5, %s5750_s5  ;;  %v5940_v23 = vpack.i.bf16 %v513_v15, %v546_v7  ;;  %v445_v24 = vrot.slane %v5932_v16, 1  ;;  %v478_v25 = vrot.slane %v5935_v21, 1  ;;  %v163_v28 = vrot.slane %v26_v4, 7  ;;  %v33_v4 = vld [vmem:[%s9345_s0 + $0x90] sm:$0xff]  ;;  %v34_v7 = vld [vmem:[%s9345_s0 + $0x98] sm:$0xff] }
  0x12   :  { %v5945_v29 = vsel %vm144_vm0, 0.0, %v162_v9  ;;  %v165_v30 = vrot.slane %v27_v10, 7  ;;  %v166_v31 = vrot.slane %v28_v13, 7  ;;  %v168_v35 = vrot.slane %v29_v14, 7 }
  0x13   :  { %9687 = vst [vmem:[#allocation18_spill] sm:$0xff] %v5940_v23  ;;  %4512 = vrot.lane.b32.xlu0 %v5940_v23, %s5750_s5  ;;  %v514_v36 = vsel %vm508_vm1, %v445_v24, %v478_v25  ;;  %v547_v37 = vsel %vm508_vm1, %v412_v22, %v445_v24  ;;  %v5957_v38 = vsel %vm144_vm0, %v162_v9, %v163_v28  ;;  %v5960_v39 = vsel %vm144_vm0, %v163_v28, 0.0 }
  0x14   :  { %v5962_v42 = vpack.i.bf16 %v514_v36, %v547_v37  ;;  %v413_v43 = vrot.slane %v5945_v29, 1  ;;  %v446_v44 = vrot.slane %v5957_v38, 1  ;;  %v479_v45 = vrot.slane %v5960_v39, 1 }
  0x15   :  { %v5968_v47 = vsel %vm144_vm0, %v165_v30, %v166_v31  ;;  %v5971_v48 = vsel %vm144_vm0, 0.0, %v165_v30  ;;  %v5974_v52 = vsel %vm144_vm0, %v166_v31, 0.0  ;;  %v169_v53 = vrot.slane %v30_v34, 7 }
  0x16   :  { %9688 = vst [vmem:[#allocation19_spill] sm:$0xff] %v5962_v42  ;;  %4517 = vrot.lane.b32.xlu1 %v5962_v42, %s5750_s5  ;;  %v515_v54 = vsel %vm508_vm1, %v446_v44, %v479_v45  ;;  %v548_v55 = vsel %vm508_vm1, %v413_v43, %v446_v44  ;;  %v414_v58 = vrot.slane %v5971_v48, 1  ;;  %v447_v60 = vrot.slane %v5968_v47, 1 }
  0x17   :  { %v5990_v63 = vpack.i.bf16 %v515_v54, %v548_v55  ;;  %v480_v0 = vrot.slane %v5974_v52, 1  ;;  %v5994_v1 = vsel %vm144_vm0, %v168_v35, %v169_v53  ;;  %v5997_v3 = vsel %vm144_vm0, 0.0, %v168_v35  ;;  %v35_v35 = vld [vmem:[%s9345_s0 + $0xa0] sm:$0xff] }
  0x18   :  { %v549_v9 = vsel %vm508_vm1, %v414_v58, %v447_v60  ;;  %v6008_v10 = vsel %vm144_vm0, %v169_v53, 0.0  ;;  %v415_v13 = vrot.slane %v5997_v3, 1  ;;  %v448_v14 = vrot.slane %v5994_v1, 1  ;;  %v36_v58 = vld [vmem:[%s9345_s0 + $0xa8] sm:$0xff] }
  0x19   :  { %9689 = vst [vmem:[#allocation20_spill] sm:$0xff] %v5990_v63  ;;  %4522 = vrot.lane.b32.xlu0 %v5990_v63, %s5750_s5  ;;  %v516_v15 = vsel %vm508_vm1, %v447_v60, %v480_v0  ;;  %v481_v22 = vrot.slane %v6008_v10, 1  ;;  %v171_v24 = vrot.slane %v31_v61, 7  ;;  %v172_v25 = vrot.slane %v32_v62, 7 }
  0x1a   :  { %v6017_v28 = vpack.i.bf16 %v516_v15, %v549_v9  ;;  %v550_v30 = vsel %vm508_vm1, %v415_v13, %v448_v14  ;;  %v174_v31 = vrot.slane %v33_v4, 7  ;;  %v175_v34 = vrot.slane %v34_v7, 7  ;;  %v37_v4 = vld [vmem:[%s9345_s0 + $0xb0] sm:$0xff]  ;;  %v38_v7 = vld [vmem:[%s9345_s0 + $0xb8] sm:$0xff] }
  0x1b   :  { %v517_v36 = vsel %vm508_vm1, %v448_v14, %v481_v22  ;;  %v6027_v37 = vsel %vm144_vm0, %v171_v24, %v172_v25  ;;  %v6030_v43 = vsel %vm144_vm0, 0.0, %v171_v24  ;;  %v6033_v44 = vsel %vm144_vm0, %v172_v25, 0.0  ;;  %v39_v22 = vld [vmem:[%s9345_s0 + $0xc0] sm:$0xff] }
  0x1c   :  { %9690 = vst [vmem:[#allocation21_spill] sm:$0xff] %v6017_v28  ;;  %4527 = vrot.lane.b32.xlu1 %v6017_v28, %s5750_s5  ;;  %v6037_v45 = vpack.i.bf16 %v517_v36, %v550_v30  ;;  %v416_v53 = vrot.slane %v6030_v43, 1  ;;  %v449_v54 = vrot.slane %v6027_v37, 1  ;;  %v482_v55 = vrot.slane %v6033_v44, 1 }
  0x1d   :  { %v6046_v60 = vsel %vm144_vm0, %v174_v31, %v175_v34  ;;  %v6049_v61 = vsel %vm144_vm0, 0.0, %v174_v31  ;;  %v6052_v62 = vsel %vm144_vm0, %v175_v34, 0.0  ;;  %v177_v0 = vrot.slane %v35_v35, 7 }
  0x1e   :  { %9691 = vst [vmem:[#allocation22_spill] sm:$0xff] %v6037_v45  ;;  %4532 = vrot.lane.b32.xlu0 %v6037_v45, %s5750_s5  ;;  %v518_v9 = vsel %vm508_vm1, %v449_v54, %v482_v55  ;;  %v551_v13 = vsel %vm508_vm1, %v416_v53, %v449_v54  ;;  %v417_v14 = vrot.slane %v6049_v61, 1  ;;  %v450_v15 = vrot.slane %v6046_v60, 1  ;;  %v40_v54 = vld [vmem:[%s9345_s0 + $0xc8] sm:$0xff] }
  0x1f   :  { %v6071_v24 = vpack.i.bf16 %v518_v9, %v551_v13  ;;  %v483_v25 = vrot.slane %v6052_v62, 1  ;;  %v178_v30 = vrot.slane %v36_v58, 7  ;;  %v6075_v31 = vsel %vm144_vm0, 0.0, %v177_v0 }
  0x20   :  { %v552_v34 = vsel %vm508_vm1, %v417_v14, %v450_v15  ;;  %v418_v35 = vrot.slane %v6075_v31, 1  ;;  %v180_v36 = vrot.slane %v37_v4, 7  ;;  %v181_v53 = vrot.slane %v38_v7, 7 }
  0x21   :  { %9692 = vst [vmem:[#allocation23_spill] sm:$0xff] %v6071_v24  ;;  %4537 = vrot.lane.b32.xlu1 %v6071_v24, %s5750_s5  ;;  %v519_v55 = vsel %vm508_vm1, %v450_v15, %v483_v25  ;;  %v6088_v58 = vsel %vm144_vm0, %v177_v0, %v178_v30  ;;  %v6091_v9 = vsel %vm144_vm0, %v178_v30, 0.0  ;;  %v183_v13 = vrot.slane %v39_v22, 7 }
  0x22   :  { %v6093_v14 = vpack.i.bf16 %v519_v55, %v552_v34  ;;  %v451_v4 = vrot.slane %v6088_v58, 1  ;;  %v484_v7 = vrot.slane %v6091_v9, 1  ;;  %v6098_v40 = vsel %vm144_vm0, %v180_v36, %v181_v53 }
  0x23   :  { %v6101_v26 = vsel %vm144_vm0, 0.0, %v180_v36  ;;  %v6104_v15 = vsel %vm144_vm0, %v181_v53, 0.0  ;;  %v452_v0 = vrot.slane %v6098_v40, 1  ;;  %v184_v25 = vrot.slane %v40_v54, 7  ;;  %v41_v53 = vld [vmem:[%s9345_s0 + $0xd0] sm:$0xff]  ;;  %v42_v54 = vld [vmem:[%s9345_s0 + $0xd8] sm:$0xff] }
  0x24   :  { %9693 = vst [vmem:[#allocation24_spill] sm:$0xff] %v6093_v14  ;;  %4542 = vrot.lane.b32.xlu0 %v6093_v14, %s5750_s5  ;;  %v520_v22 = vsel %vm508_vm1, %v451_v4, %v484_v7  ;;  %v553_v30 = vsel %vm508_vm1, %v418_v35, %v451_v4  ;;  %v419_v34 = vrot.slane %v6101_v26, 1  ;;  %v485_v36 = vrot.slane %v6104_v15, 1  ;;  %v43_v4 = vld [vmem:[%s9345_s0 + $0xe0] sm:$0xff]  ;;  %v44_v14 = vld [vmem:[%s9345_s0 + $0xe8] sm:$0xff] }
  0x25   :  { %v6121_v55 = vpack.i.bf16 %v520_v22, %v553_v30  ;;  %v6124_v27 = vsel %vm144_vm0, %v183_v13, %v184_v25  ;;  %v6127_v7 = vsel %vm144_vm0, 0.0, %v183_v13  ;;  %v6130_v35 = vsel %vm144_vm0, %v184_v25, 0.0  ;;  %v47_v22 = vld [vmem:[%s9345_s0 + $0x100] sm:$0xff] }
  0x26   :  { %9695 = vst [vmem:[#allocation26_spill] sm:$0xff] %v6130_v35  ;;  %v521_v30 = vsel %vm508_vm1, %v452_v0, %v485_v36  ;;  %v554_v13 = vsel %vm508_vm1, %v419_v34, %v452_v0  ;;  %v420_v25 = vrot.slane %v6127_v7, 1  ;;  %v453_v24 = vrot.slane %v6124_v27, 1  ;;  %v48_v0 = vld [vmem:[%s9345_s0 + $0x108] sm:$0xff] }
  0x27   :  { %9694 = vst [vmem:[#allocation25_spill] sm:$0xff] %v6121_v55  ;;  %4547 = vrot.lane.b32.xlu1 %v6121_v55, %s5750_s5  ;;  %v6149_v45 = vpack.i.bf16 %v521_v30, %v554_v13  ;;  %v486_v28 = vrot.slane %v6130_v35, 1  ;;  %v186_v63 = vrot.slane %v41_v53, 7  ;;  %v187_v42 = vrot.slane %v42_v54, 7 }
  0x28   :  { %v555_v23 = vsel %vm508_vm1, %v420_v25, %v453_v24  ;;  %v189_v36 = vrot.slane %v43_v4, 7  ;;  %v190_v5 = vrot.slane %v44_v14, 7  ;;  %v195_v34 = vrot.slane %v47_v22, 7 }
  0x29   :  { %9696 = vst [vmem:[#allocation27_spill] sm:$0xff] %v6149_v45  ;;  %4552 = vrot.lane.b32.xlu0 %v6149_v45, %s5750_s5  ;;  %v522_v30 = vsel %vm508_vm1, %v453_v24, %v486_v28  ;;  %v6162_v13 = vsel %vm144_vm0, %v186_v63, %v187_v42  ;;  %v6165_v53 = vsel %vm144_vm0, 0.0, %v186_v63  ;;  %v6168_v54 = vsel %vm144_vm0, %v187_v42, 0.0 }
  0x2a   :  { %9697 = vst [vmem:[#allocation28_spill] sm:$0xff] %v6162_v13  ;;  %9698 = vst [vmem:[#allocation29_spill] sm:$0xff] %v6165_v53  ;;  %v6170_v14 = vpack.i.bf16 %v522_v30, %v555_v23  ;;  %v421_v4 = vrot.slane %v6165_v53, 1  ;;  %v454_v22 = vrot.slane %v6162_v13, 1  ;;  %v487_v25 = vrot.slane %v6168_v54, 1 }
  0x2b   :  { %9699 = vst [vmem:[#allocation30_spill] sm:$0xff] %v6168_v54  ;;  %v6176_v45 = vsel %vm144_vm0, %v189_v36, %v190_v5  ;;  %v6179_v28 = vsel %vm144_vm0, 0.0, %v189_v36  ;;  %v6182_v63 = vsel %vm144_vm0, %v190_v5, 0.0  ;;  %v196_v24 = vrot.slane %v48_v0, 7  ;;  %v49_v36 = vld [vmem:[%s9345_s0 + $0x110] sm:$0xff]  ;;  %v50_v5 = vld [vmem:[%s9345_s0 + $0x118] sm:$0xff] }
  0x2c   :  { %9700 = vst [vmem:[#allocation31_spill] sm:$0xff] %v6170_v14  ;;  %9701 = vst [vmem:[#allocation32_spill] sm:$0xff] %v6176_v45  ;;  %4557 = vrot.lane.b32.xlu1 %v6170_v14, %s5750_s5  ;;  %v523_v23 = vsel %vm508_vm1, %v454_v22, %v487_v25  ;;  %v556_v42 = vsel %vm508_vm1, %v421_v4, %v454_v22  ;;  %v422_v30 = vrot.slane %v6179_v28, 1  ;;  %v455_v55 = vrot.slane %v6176_v45, 1  ;;  %v51_v22 = vld [vmem:[%s9345_s0 + $0x120] sm:$0xff] }
  0x2d   :  { %9702 = vst [vmem:[#allocation33_spill] sm:$0xff] %v6179_v28  ;;  %9703 = vst [vmem:[#allocation34_spill] sm:$0xff] %v6182_v63  ;;  %v6198_v0 = vpack.i.bf16 %v523_v23, %v556_v42  ;;  %v488_v14 = vrot.slane %v6182_v63, 1  ;;  %v6202_v25 = vsel %vm144_vm0, %v195_v34, %v196_v24  ;;  %v6205_v4 = vsel %vm144_vm0, 0.0, %v195_v34 }
  0x2e   :  { %9705 = vst [vmem:[#allocation36_spill] sm:$0xff] %v6202_v25  ;;  %9706 = vst [vmem:[#allocation37_spill] sm:$0xff] %v6205_v4  ;;  %v557_v23 = vsel %vm508_vm1, %v422_v30, %v455_v55  ;;  %v6216_v42 = vsel %vm144_vm0, %v196_v24, 0.0  ;;  %v424_v49 = vrot.slane %v6205_v4, 1  ;;  %v457_v28 = vrot.slane %v6202_v25, 1 }
  0x2f   :  { %9704 = vst [vmem:[#allocation35_spill] sm:$0xff] %v6198_v0  ;;  %9707 = vst [vmem:[#allocation38_spill] sm:$0xff] %v6216_v42  ;;  %4562 = vrot.lane.b32.xlu0 %v6198_v0, %s5750_s5  ;;  %v524_v34 = vsel %vm508_vm1, %v455_v55, %v488_v14  ;;  %v490_v63 = vrot.slane %v6216_v42, 1  ;;  %v198_v45 = vrot.slane %v49_v36, 7  ;;  %v199_v54 = vrot.slane %v50_v5, 7 }
  0x30   :  { %v6225_v13 = vpack.i.bf16 %v524_v34, %v557_v23  ;;  %v559_v24 = vsel %vm508_vm1, %v424_v49, %v457_v28  ;;  %v201_v30 = vrot.slane %v51_v22, 7  ;;  %v202_v53 = vrot.slane %v52_v41, 7  ;;  %v56_v22 = vld [vmem:[%s9345_s0 + $0x148] sm:$0xff] }
  0x31   :  { %v526_v25 = vsel %vm508_vm1, %v457_v28, %v490_v63  ;;  %v6232_v4 = vsel %vm144_vm0, %v198_v45, %v199_v54  ;;  %v6235_v0 = vsel %vm144_vm0, 0.0, %v198_v45  ;;  %v6238_v55 = vsel %vm144_vm0, %v199_v54, 0.0  ;;  %v53_v28 = vld [vmem:[%s9345_s0 + $0x130] sm:$0xff]  ;;  %v54_v45 = vld [vmem:[%s9345_s0 + $0x138] sm:$0xff]  ;;  %v55_v54 = vld [vmem:[%s9345_s0 + $0x140] sm:$0xff] }
  0x32   :  { %9708 = vst [vmem:[#allocation39_spill] sm:$0xff] %v6225_v13  ;;  %9709 = vst [vmem:[#allocation40_spill] sm:$0xff] %v6232_v4  ;;  %4567 = vrot.lane.b32.xlu1 %v6225_v13, %s5750_s5  ;;  %v6242_v14 = vpack.i.bf16 %v526_v25, %v559_v24  ;;  %v425_v49 = vrot.slane %v6235_v0, 1  ;;  %v458_v41 = vrot.slane %v6232_v4, 1  ;;  %v491_v63 = vrot.slane %v6238_v55, 1 }
  0x33   :  { %9710 = vst [vmem:[#allocation41_spill] sm:$0xff] %v6235_v0  ;;  %9711 = vst [vmem:[#allocation42_spill] sm:$0xff] %v6238_v55  ;;  %v6257_v36 = vsel %vm144_vm0, %v201_v30, %v202_v53  ;;  %v6260_v5 = vsel %vm144_vm0, 0.0, %v201_v30  ;;  %v6263_v25 = vsel %vm144_vm0, %v202_v53, 0.0  ;;  %v204_v13 = vrot.slane %v53_v28, 7 }
  0x34   :  { %9712 = vst [vmem:[#allocation43_spill] sm:$0xff] %v6242_v14  ;;  %9713 = vst [vmem:[#allocation44_spill] sm:$0xff] %v6257_v36  ;;  %4572 = vrot.lane.b32.xlu0 %v6242_v14, %s5750_s5  ;;  %v560_v23 = vsel %vm508_vm1, %v425_v49, %v458_v41  ;;  %v426_v34 = vrot.slane %v6260_v5, 1  ;;  %v459_v24 = vrot.slane %v6257_v36, 1  ;;  %v492_v30 = vrot.slane %v6263_v25, 1  ;;  %v57_v36 = vld [vmem:[%s9345_s0 + $0x150] sm:$0xff] }
  0x35   :  { %9714 = vst [vmem:[#allocation45_spill] sm:$0xff] %v6260_v5  ;;  %9715 = vst [vmem:[#allocation46_spill] sm:$0xff] %v6263_v25  ;;  %v527_v53 = vsel %vm508_vm1, %v458_v41, %v491_v63  ;;  %v205_v55 = vrot.slane %v54_v45, 7  ;;  %v207_v4 = vrot.slane %v55_v54, 7  ;;  %v208_v42 = vrot.slane %v56_v22, 7 }
  0x36   :  { %v6277_v0 = vpack.i.bf16 %v527_v53, %v560_v23  ;;  %v528_v14 = vsel %vm508_vm1, %v459_v24, %v492_v30  ;;  %v561_v49 = vsel %vm508_vm1, %v426_v34, %v459_v24  ;;  %v6292_v28 = vsel %vm144_vm0, 0.0, %v204_v13  ;;  %v60_v53 = vld [vmem:[%s9345_s0 + $0x168] sm:$0xff] }
  0x37   :  { %v6286_v25 = vpack.i.bf16 %v528_v14, %v561_v49  ;;  %v6289_v41 = vsel %vm144_vm0, %v204_v13, %v205_v55  ;;  %9719 = vst [vmem:[#allocation50_spill] sm:$0xff] %v6292_v28  ;;  %v6295_v45 = vsel %vm144_vm0, %v205_v55, 0.0  ;;  %v427_v54 = vrot.slane %v6292_v28, 1  ;;  %v58_v13 = vld [vmem:[%s9345_s0 + $0x158] sm:$0xff]  ;;  %v59_v55 = vld [vmem:[%s9345_s0 + $0x160] sm:$0xff] }
  0x38   :  { %9716 = vst [vmem:[#allocation47_spill] sm:$0xff] %v6277_v0  ;;  %9718 = vst [vmem:[#allocation49_spill] sm:$0xff] %v6289_v41  ;;  %4577 = vrot.lane.b32.xlu1 %v6277_v0, %s5750_s5  ;;  %v460_v63 = vrot.slane %v6289_v41, 1  ;;  %v493_v22 = vrot.slane %v6295_v45, 1  ;;  %v6303_v14 = vsel %vm144_vm0, %v207_v4, %v208_v42  ;;  %v6314_v23 = vsel %vm144_vm0, 0.0, %v207_v4 }
  0x39   :  { %9717 = vst [vmem:[#allocation48_spill] sm:$0xff] %v6286_v25  ;;  %9720 = vst [vmem:[#allocation51_spill] sm:$0xff] %v6295_v45  ;;  %4582 = vrot.lane.b32.xlu0 %v6286_v25, %s5750_s5  ;;  %v6317_v34 = vsel %vm144_vm0, %v208_v42, 0.0  ;;  %v461_v24 = vrot.slane %v6303_v14, 1  ;;  %v210_v30 = vrot.slane %v57_v36, 7  ;;  %v428_v25 = vrot.slane %v6314_v23, 1 }
  0x3a   :  { %9721 = vst [vmem:[#allocation52_spill] sm:$0xff] %v6303_v14  ;;  %9722 = vst [vmem:[#allocation53_spill] sm:$0xff] %v6314_v23  ;;  %v529_v49 = vsel %vm508_vm1, %v460_v63, %v493_v22  ;;  %v562_v0 = vsel %vm508_vm1, %v427_v54, %v460_v63  ;;  %v494_v4 = vrot.slane %v6317_v34, 1  ;;  %v211_v42 = vrot.slane %v58_v13, 7  ;;  %v61_v63 = vld [vmem:[%s9345_s0 + $0x170] sm:$0xff] }
  0x3b   :  { %9723 = vst [vmem:[#allocation54_spill] sm:$0xff] %v6317_v34  ;;  %v6329_v45 = vpack.i.bf16 %v529_v49, %v562_v0  ;;  %v6332_v14 = vsel %vm144_vm0, 0.0, %v210_v30  ;;  %v213_v36 = vrot.slane %v59_v55, 7  ;;  %v563_v22 = vsel %vm508_vm1, %v428_v25, %v461_v24 }
  0x3c   :  { %9725 = vst [vmem:[#allocation56_spill] sm:$0xff] %v6332_v14  ;;  %v530_v41 = vsel %vm508_vm1, %v461_v24, %v494_v4  ;;  %v429_v28 = vrot.slane %v6332_v14, 1  ;;  %v214_v54 = vrot.slane %v60_v53, 7  ;;  %v6347_v13 = vsel %vm144_vm0, %v210_v30, %v211_v42  ;;  %v62_v24 = vld [vmem:[%s9345_s0 + $0x178] sm:$0xff]  ;;  %v63_v53 = vld [vmem:[%s9345_s0 + $0x180] sm:$0xff] }
  0x3d   :  { %9724 = vst [vmem:[#allocation55_spill] sm:$0xff] %v6329_v45  ;;  %4587 = vrot.lane.b32.xlu1 %v6329_v45, %s5750_s5  ;;  %v6344_v0 = vpack.i.bf16 %v530_v41, %v563_v22  ;;  %9727 = vst [vmem:[#allocation58_spill] sm:$0xff] %v6347_v13  ;;  %v6350_v55 = vsel %vm144_vm0, %v211_v42, 0.0  ;;  %v6353_v25 = vsel %vm144_vm0, 0.0, %v213_v36  ;;  %v462_v41 = vrot.slane %v6347_v13, 1 }
  0x3e   :  { %9728 = vst [vmem:[#allocation59_spill] sm:$0xff] %v6350_v55  ;;  %9729 = vst [vmem:[#allocation60_spill] sm:$0xff] %v6353_v25  ;;  %v495_v49 = vrot.slane %v6350_v55, 1  ;;  %v6364_v30 = vsel %vm144_vm0, %v213_v36, %v214_v54  ;;  %v6367_v4 = vsel %vm144_vm0, %v214_v54, 0.0  ;;  %v430_v42 = vrot.slane %v6353_v25, 1  ;;  %v64_v54 = vld [vmem:[%s9345_s0 + $0x188] sm:$0xff] }
  0x3f   :  { %9726 = vst [vmem:[#allocation57_spill] sm:$0xff] %v6344_v0  ;;  %9730 = vst [vmem:[#allocation61_spill] sm:$0xff] %v6364_v30  ;;  %4592 = vrot.lane.b32.xlu0 %v6344_v0, %s5750_s5  ;;  %v463_v22 = vrot.slane %v6364_v30, 1  ;;  %v496_v45 = vrot.slane %v6367_v4, 1  ;;  %v216_v14 = vrot.slane %v61_v63, 7  ;;  %v564_v36 = vsel %vm508_vm1, %v429_v28, %v462_v41  ;;  %v65_v28 = vld [vmem:[%s9345_s0 + $0x190] sm:$0xff] }
  0x40   :  { %9731 = vst [vmem:[#allocation62_spill] sm:$0xff] %v6367_v4  ;;  %v531_v13 = vsel %vm508_vm1, %v462_v41, %v495_v49  ;;  %v217_v55 = vrot.slane %v62_v24, 7  ;;  %v219_v23 = vrot.slane %v63_v53, 7  ;;  %v66_v24 = vld [vmem:[%s9345_s0 + $0x198] sm:$0xff]  ;;  %vm674_vm2 = vcmp.lt.s32.totalorder %v5794_v6, 6 }
  0x41   :  { %v6381_v0 = vpack.i.bf16 %v531_v13, %v564_v36  ;;  %v532_v30 = vsel %vm508_vm1, %v463_v22, %v496_v45  ;;  %v565_v63 = vsel %vm508_vm1, %v430_v42, %v463_v22  ;;  %v6388_v4 = vsel %vm144_vm0, 0.0, %v216_v14  ;;  %v67_v13 = vld [vmem:[%s9345_s0 + $0x1a0] sm:$0xff] }
  0x42   :  { %9733 = vst [vmem:[#allocation64_spill] sm:$0xff] %v6388_v4  ;;  %v6399_v53 = vpack.i.bf16 %v532_v30, %v565_v63  ;;  %v6402_v45 = vsel %vm144_vm0, %v216_v14, %v217_v55  ;;  %v6405_v41 = vsel %vm144_vm0, %v217_v55, 0.0  ;;  %v431_v49 = vrot.slane %v6388_v4, 1  ;;  %v68_v63 = vld [vmem:[%s9345_s0 + $0x1a8] sm:$0xff] }
  0x43   :  { %9732 = vst [vmem:[#allocation63_spill] sm:$0xff] %v6381_v0  ;;  %9735 = vst [vmem:[#allocation66_spill] sm:$0xff] %v6402_v45  ;;  %4597 = vrot.lane.b32.xlu1 %v6381_v0, %s5750_s5  ;;  %v464_v42 = vrot.slane %v6402_v45, 1  ;;  %v497_v22 = vrot.slane %v6405_v41, 1  ;;  %v220_v36 = vrot.slane %v64_v54, 7  ;;  %v6413_v25 = vsel %vm144_vm0, 0.0, %v219_v23 }
  0x44   :  { %9734 = vst [vmem:[#allocation65_spill] sm:$0xff] %v6399_v53  ;;  %9736 = vst [vmem:[#allocation67_spill] sm:$0xff] %v6405_v41  ;;  %4602 = vrot.lane.b32.xlu0 %v6399_v53, %s5750_s5  ;;  %v432_v14 = vrot.slane %v6413_v25, 1  ;;  %v222_v55 = vrot.slane %v65_v28, 7  ;;  %v223_v30 = vrot.slane %v66_v24, 7  ;;  %v225_v0 = vrot.slane %v67_v13, 7 }
  0x45   :  { %9737 = vst [vmem:[#allocation68_spill] sm:$0xff] %v6413_v25  ;;  %v533_v45 = vsel %vm508_vm1, %v464_v42, %v497_v22  ;;  %v566_v54 = vsel %vm508_vm1, %v431_v49, %v464_v42  ;;  %v6426_v41 = vsel %vm144_vm0, %v219_v23, %v220_v36  ;;  %v6429_v53 = vsel %vm144_vm0, %v220_v36, 0.0 }
  0x46   :  { %9738 = vst [vmem:[#allocation69_spill] sm:$0xff] %v6426_v41  ;;  %9739 = vst [vmem:[#allocation70_spill] sm:$0xff] %v6429_v53  ;;  %v6431_v25 = vpack.i.bf16 %v533_v45, %v566_v54  ;;  %v465_v28 = vrot.slane %v6426_v41, 1  ;;  %v498_v24 = vrot.slane %v6429_v53, 1  ;;  %v6436_v13 = vsel %vm144_vm0, %v222_v55, %v223_v30 }
  0x47   :  { %9741 = vst [vmem:[#allocation72_spill] sm:$0xff] %v6436_v13  ;;  %v6439_v22 = vsel %vm144_vm0, 0.0, %v222_v55  ;;  %v6442_v49 = vsel %vm144_vm0, %v223_v30, 0.0  ;;  %v466_v23 = vrot.slane %v6436_v13, 1  ;;  %v226_v42 = vrot.slane %v68_v63, 7  ;;  %v69_v30 = vld [vmem:[%s9345_s0 + $0x1b0] sm:$0xff] }
  0x48   :  { %9740 = vst [vmem:[#allocation71_spill] sm:$0xff] %v6431_v25  ;;  %9742 = vst [vmem:[#allocation73_spill] sm:$0xff] %v6439_v22  ;;  %4607 = vrot.lane.b32.xlu1 %v6431_v25, %s5750_s5  ;;  %v534_v45 = vsel %vm508_vm1, %v465_v28, %v498_v24  ;;  %v567_v36 = vsel %vm508_vm1, %v432_v14, %v465_v28  ;;  %v433_v54 = vrot.slane %v6439_v22, 1  ;;  %v499_v55 = vrot.slane %v6442_v49, 1  ;;  %v70_v63 = vld [vmem:[%s9345_s0 + $0x1b8] sm:$0xff]  ;;  %v71_v28 = vld [vmem:[%s9345_s0 + $0x1c0] sm:$0xff] }
  0x49   :  { %9743 = vst [vmem:[#allocation74_spill] sm:$0xff] %v6442_v49  ;;  %v6459_v13 = vpack.i.bf16 %v534_v45, %v567_v36  ;;  %v6462_v25 = vsel %vm144_vm0, %v225_v0, %v226_v42  ;;  %v6465_v24 = vsel %vm144_vm0, 0.0, %v225_v0  ;;  %v6468_v14 = vsel %vm144_vm0, %v226_v42, 0.0  ;;  %v72_v49 = vld [vmem:[%s9345_s0 + $0x1c8] sm:$0xff]  ;;  %v73_v45 = vld [vmem:[%s9345_s0 + $0x1d0] sm:$0xff] }
  0x4a   :  { %9745 = vst [vmem:[#allocation76_spill] sm:$0xff] %v6462_v25  ;;  %9746 = vst [vmem:[#allocation77_spill] sm:$0xff] %v6465_v24  ;;  %v535_v36 = vsel %vm508_vm1, %v466_v23, %v499_v55  ;;  %v568_v0 = vsel %vm508_vm1, %v433_v54, %v466_v23  ;;  %v434_v42 = vrot.slane %v6465_v24, 1  ;;  %v467_v22 = vrot.slane %v6462_v25, 1  ;;  %v74_v23 = vld [vmem:[%s9345_s0 + $0x1d8] sm:$0xff] }
  0x4b   :  { %9744 = vst [vmem:[#allocation75_spill] sm:$0xff] %v6459_v13  ;;  %4612 = vrot.lane.b32.xlu0 %v6459_v13, %s5750_s5  ;;  %v6487_v53 = vpack.i.bf16 %v535_v36, %v568_v0  ;;  %v500_v41 = vrot.slane %v6468_v14, 1  ;;  %v228_v4 = vrot.slane %v69_v30, 7  ;;  %v229_v34 = vrot.slane %v70_v63, 7 }
  0x4c   :  { %v569_v5 = vsel %vm508_vm1, %v434_v42, %v467_v22  ;;  %v231_v55 = vrot.slane %v71_v28, 7  ;;  %v232_v35 = vrot.slane %v72_v49, 7  ;;  %v234_v54 = vrot.slane %v73_v45, 7 }
  0x4d   :  { %9747 = vst [vmem:[#allocation78_spill] sm:$0xff] %v6487_v53  ;;  %4617 = vrot.lane.b32.xlu1 %v6487_v53, %s5750_s5  ;;  %v536_v36 = vsel %vm508_vm1, %v467_v22, %v500_v41  ;;  %v6500_v0 = vsel %vm144_vm0, %v228_v4, %v229_v34  ;;  %v6503_v30 = vsel %vm144_vm0, 0.0, %v228_v4  ;;  %v6506_v63 = vsel %vm144_vm0, %v229_v34, 0.0 }
  0x4e   :  { %9748 = vst [vmem:[#allocation79_spill] sm:$0xff] %v6500_v0  ;;  %9749 = vst [vmem:[#allocation80_spill] sm:$0xff] %v6503_v30  ;;  %v6508_v49 = vpack.i.bf16 %v536_v36, %v569_v5  ;;  %v435_v28 = vrot.slane %v6503_v30, 1  ;;  %v468_v45 = vrot.slane %v6500_v0, 1  ;;  %v501_v42 = vrot.slane %v6506_v63, 1 }
  0x4f   :  { %9750 = vst [vmem:[#allocation81_spill] sm:$0xff] %v6506_v63  ;;  %v6514_v53 = vsel %vm144_vm0, %v231_v55, %v232_v35  ;;  %v6517_v41 = vsel %vm144_vm0, 0.0, %v231_v55  ;;  %v6520_v4 = vsel %vm144_vm0, %v232_v35, 0.0  ;;  %v235_v22 = vrot.slane %v74_v23, 7  ;;  %v75_v55 = vld [vmem:[%s9345_s0 + $0x1e0] sm:$0xff]  ;;  %v76_v35 = vld [vmem:[%s9345_s0 + $0x1e8] sm:$0xff] }
  0x50   :  { %9751 = vst [vmem:[#allocation82_spill] sm:$0xff] %v6508_v49  ;;  %9752 = vst [vmem:[#allocation83_spill] sm:$0xff] %v6514_v53  ;;  %4622 = vrot.lane.b32.xlu0 %v6508_v49, %s5750_s5  ;;  %v537_v5 = vsel %vm508_vm1, %v468_v45, %v501_v42  ;;  %v570_v34 = vsel %vm508_vm1, %v435_v28, %v468_v45  ;;  %v436_v36 = vrot.slane %v6517_v41, 1  ;;  %v469_v13 = vrot.slane %v6514_v53, 1 }
  0x51   :  { %9753 = vst [vmem:[#allocation84_spill] sm:$0xff] %v6517_v41  ;;  %9754 = vst [vmem:[#allocation85_spill] sm:$0xff] %v6520_v4  ;;  %v6536_v23 = vpack.i.bf16 %v537_v5, %v570_v34  ;;  %v502_v49 = vrot.slane %v6520_v4, 1  ;;  %v6540_v42 = vsel %vm144_vm0, %v234_v54, %v235_v22  ;;  %v6543_v28 = vsel %vm144_vm0, 0.0, %v234_v54 }
  0x52   :  { %9756 = vst [vmem:[#allocation87_spill] sm:$0xff] %v6540_v42  ;;  %9757 = vst [vmem:[#allocation88_spill] sm:$0xff] %v6543_v28  ;;  %v571_v45 = vsel %vm508_vm1, %v436_v36, %v469_v13  ;;  %v6548_v41 = vsel %vm144_vm0, %v235_v22, 0.0  ;;  %v437_v53 = vrot.slane %v6543_v28, 1  ;;  %v470_v63 = vrot.slane %v6540_v42, 1 }
  0x53   :  { %9755 = vst [vmem:[#allocation86_spill] sm:$0xff] %v6536_v23  ;;  %4627 = vrot.lane.b32.xlu1 %v6536_v23, %s5750_s5  ;;  %v538_v5 = vsel %vm508_vm1, %v469_v13, %v502_v49  ;;  %v503_v34 = vrot.slane %v6548_v41, 1  ;;  %v237_v54 = vrot.slane %v75_v55, 7  ;;  %v238_v4 = vrot.slane %v76_v35, 7 }
  0x54   :  { %v6557_v0 = vpack.i.bf16 %v538_v5, %v571_v45  ;;  %v572_v22 = vsel %vm508_vm1, %v437_v53, %v470_v63  ;;  %v575_v36 = vrot.slane %v5801_v11, 2  ;;  %v608_v28 = vrot.slane %v5783_v2, 2 }
  0x55   :  { %v539_v42 = vsel %vm508_vm1, %v470_v63, %v503_v34  ;;  %v6566_v23 = vsel %vm144_vm0, %v237_v54, %v238_v4  ;;  %v6569_v13 = vsel %vm144_vm0, 0.0, %v237_v54  ;;  %v6572_v49 = vsel %vm144_vm0, %v238_v4, 0.0 }
  0x56   :  { %9758 = vst [vmem:[#allocation89_spill] sm:$0xff] %v6557_v0  ;;  %9759 = vst [vmem:[#allocation90_spill] sm:$0xff] %v6566_v23  ;;  %4632 = vrot.lane.b32.xlu0 %v6557_v0, %s5750_s5  ;;  %v6576_v53 = vpack.i.bf16 %v539_v42, %v572_v22  ;;  %v438_v55 = vrot.slane %v6569_v13, 1  ;;  %v471_v35 = vrot.slane %v6566_v23, 1  ;;  %v504_v63 = vrot.slane %v6572_v49, 1  ;;  %v9798_v0 = vld [vmem:[#allocation49_spill] sm:$0xff] }
  0x57   :  { %9760 = vst [vmem:[#allocation91_spill] sm:$0xff] %v6569_v13  ;;  %v576_v45 = vrot.slane %v5845_v32, 2  ;;  %v609_v5 = vrot.slane %v5821_v20, 2  ;;  %v642_v4 = vrot.slane %v5848_v33, 2  ;;  %v9762_v54 = vrot.slane %v5805_v12, 2 }
  0x58   :  { %9761 = vst [vmem:[#allocation92_spill] sm:$0xff] %v6576_v53  ;;  %4637 = vrot.lane.b32.xlu1 %v6576_v53, %s5750_s5  ;;  %v540_v42 = vsel %vm508_vm1, %v471_v35, %v504_v63  ;;  %v573_v34 = vsel %vm508_vm1, %v438_v55, %v471_v35  ;;  %v708_v11 = vsel %vm674_vm2, %v575_v36, %v608_v28  ;;  %v577_v55 = vrot.slane %v5815_v18, 2 }
  0x59   :  { %v675_v22 = vsel %vm674_vm2, %v608_v28, %v9762_v54  ;;  %v6597_v2 = vpack.i.bf16 %v540_v42, %v573_v34  ;;  %v676_v53 = vsel %vm674_vm2, %v609_v5, %v642_v4  ;;  %v709_v63 = vsel %vm674_vm2, %v576_v45, %v609_v5 }
  0x5a   :  { %v6599_v33 = vpack.i.bf16 %v675_v22, %v708_v11  ;;  %v610_v12 = vrot.slane %v5812_v17, 2  ;;  %v578_v35 = vrot.slane %v5868_v46, 2  ;;  %v6610_v28 = vpack.i.bf16 %v676_v53, %v709_v63 }
  0x5b   :  { %9763 = vst [vmem:[#allocation93_spill] sm:$0xff] %v6597_v2  ;;  %4642 = vrot.lane.b32.xlu0 %v6597_v2, %s5750_s5  ;;  %v611_v11 = vrot.slane %v5878_v50, 2  ;;  %v644_v36 = vrot.slane %v5881_v51, 2  ;;  %v9766_v45 = vrot.slane %v5818_v19, 2  ;;  %v579_v42 = vrot.slane %v5893_v57, 2  ;;  %s5752_s5 = smov 12  }
  0x5c   :  { %9764 = vst [vmem:[#allocation94_spill] sm:$0xff] %v6599_v33  ;;  %9765 = vst [vmem:[#allocation95_spill] sm:$0xff] %v6610_v28  ;;  %4647 = vrot.lane.b32.xlu1 %v6599_v33, %s5751_s10  ;;  %v710_v4 = vsel %vm674_vm2, %v577_v55, %v610_v12  ;;  %v612_v53 = vrot.slane %v5890_v56, 2  ;;  %v645_v19 = vrot.slane %v5901_v59, 2  ;;  %v580_v55 = vrot.slane %v5918_v8, 2 }
  0x5d   :  { %v677_v5 = vsel %vm674_vm2, %v610_v12, %v9766_v45  ;;  %v678_v51 = vsel %vm674_vm2, %v611_v11, %v644_v36  ;;  %v711_v54 = vsel %vm674_vm2, %v578_v35, %v611_v11  ;;  %v613_v12 = vrot.slane %v5932_v16, 2 }
  0x5e   :  { %v6624_v34 = vpack.i.bf16 %v677_v5, %v710_v4  ;;  %v6631_v22 = vpack.i.bf16 %v678_v51, %v711_v54  ;;  %v712_v63 = vsel %vm674_vm2, %v579_v42, %v612_v53  ;;  %v679_v36 = vsel %vm674_vm2, %v612_v53, %v645_v19 }
  0x5f   :  { %4652 = vrot.lane.b32.xlu0 %v6610_v28, %s5751_s10  ;;  %v646_v45 = vrot.slane %v5935_v21, 2  ;;  %v581_v35 = vrot.slane %v5945_v29, 2  ;;  %v614_v59 = vrot.slane %v5957_v38, 2  ;;  %v6646_v11 = vpack.i.bf16 %v679_v36, %v712_v63 }
  0x60   :  { %9767 = vst [vmem:[#allocation96_spill] sm:$0xff] %v6624_v34  ;;  %9768 = vst [vmem:[#allocation97_spill] sm:$0xff] %v6631_v22  ;;  %4657 = vrot.lane.b32.xlu1 %v6624_v34, %s5751_s10  ;;  %v713_v5 = vsel %vm674_vm2, %v580_v55, %v613_v12  ;;  %v647_v4 = vrot.slane %v5960_v39, 2  ;;  %v582_v42 = vrot.slane %v5971_v48, 2  ;;  %v615_v51 = vrot.slane %v5968_v47, 2  ;;  %v9784_v34 = vld [vmem:[#allocation34_spill] sm:$0xff] }
  0x61   :  { %9769 = vst [vmem:[#allocation98_spill] sm:$0xff] %v6646_v11  ;;  %v680_v53 = vsel %vm674_vm2, %v613_v12, %v646_v45  ;;  %v714_v21 = vsel %vm674_vm2, %v581_v35, %v614_v59  ;;  %v648_v54 = vrot.slane %v5974_v52, 2  ;;  %v583_v63 = vrot.slane %v5997_v3, 2 }
  0x62   :  { %v681_v19 = vsel %vm674_vm2, %v614_v59, %v647_v4  ;;  %v616_v55 = vrot.slane %v5994_v1, 2  ;;  %v6664_v39 = vpack.i.bf16 %v680_v53, %v713_v5  ;;  %v649_v45 = vrot.slane %v6008_v10, 2 }
  0x63   :  { %4662 = vrot.lane.b32.xlu0 %v6631_v22, %s5751_s10  ;;  %v6666_v12 = vpack.i.bf16 %v681_v19, %v714_v21  ;;  %v682_v36 = vsel %vm674_vm2, %v615_v51, %v648_v54  ;;  %v715_v52 = vsel %vm674_vm2, %v582_v42, %v615_v51  ;;  %v584_v59 = vrot.slane %v6030_v43, 2  ;;  %v9783_v22 = vld [vmem:[#allocation32_spill] sm:$0xff] }
  0x64   :  { %9770 = vst [vmem:[#allocation99_spill] sm:$0xff] %v6664_v39  ;;  %4667 = vrot.lane.b32.xlu1 %v6646_v11, %s5751_s10  ;;  %v716_v35 = vsel %vm674_vm2, %v583_v63, %v616_v55  ;;  %v617_v5 = vrot.slane %v6027_v37, 2  ;;  %v683_v4 = vsel %vm674_vm2, %v616_v55, %v649_v45  ;;  %v650_v53 = vrot.slane %v6033_v44, 2 }
  0x65   :  { %9771 = vst [vmem:[#allocation100_spill] sm:$0xff] %v6666_v12  ;;  %v585_v10 = vrot.slane %v6049_v61, 2  ;;  %v618_v21 = vrot.slane %v6046_v60, 2  ;;  %v651_v54 = vrot.slane %v6052_v62, 2  ;;  %v6687_v42 = vpack.i.bf16 %v682_v36, %v715_v52 }
  0x66   :  { %v586_v51 = vrot.slane %v6075_v31, 2  ;;  %v619_v19 = vrot.slane %v6088_v58, 2  ;;  %v652_v63 = vrot.slane %v6091_v9, 2  ;;  %v6694_v44 = vpack.i.bf16 %v683_v4, %v716_v35 }
  0x67   :  { %4672 = vrot.lane.b32.xlu0 %v6664_v39, %s5751_s10  ;;  %9772 = vst [vmem:[#allocation101_spill] sm:$0xff] %v6687_v42  ;;  %v684_v55 = vsel %vm674_vm2, %v617_v5, %v650_v53  ;;  %v717_v62 = vsel %vm674_vm2, %v584_v59, %v617_v5  ;;  %v718_v36 = vsel %vm674_vm2, %v585_v10, %v618_v21  ;;  %v587_v52 = vrot.slane %v6101_v26, 2  ;;  %v9775_v10 = vld [vmem:[#allocation26_spill] sm:$0xff]  ;;  %v9778_v39 = vld [vmem:[#allocation28_spill] sm:$0xff] }
  0x68   :  { %4677 = vrot.lane.b32.xlu1 %v6666_v12, %s5751_s10  ;;  %9773 = vst [vmem:[#allocation102_spill] sm:$0xff] %v6694_v44  ;;  %v685_v45 = vsel %vm674_vm2, %v618_v21, %v651_v54  ;;  %v620_v9 = vrot.slane %v6098_v40, 2  ;;  %v653_v33 = vrot.slane %v6104_v15, 2  ;;  %v588_v35 = vrot.slane %v6127_v7, 2  ;;  %v9777_v54 = vld [vmem:[#allocation29_spill] sm:$0xff] }
  0x69   :  { %v621_v4 = vrot.slane %v6124_v27, 2  ;;  %v6711_v59 = vpack.i.bf16 %v684_v55, %v717_v62  ;;  %v686_v5 = vsel %vm674_vm2, %v619_v19, %v652_v63  ;;  %v719_v53 = vsel %vm674_vm2, %v586_v51, %v619_v19 }
  0x6a   :  { %v654_v21 = vrot.slane %v9775_v10, 2  ;;  %v6720_v15 = vpack.i.bf16 %v685_v45, %v718_v36  ;;  %v589_v12 = vrot.slane %v9777_v54, 2  ;;  %v622_v11 = vrot.slane %v9778_v39, 2  ;;  %v9781_v10 = vld [vmem:[#allocation37_spill] sm:$0xff]  ;;  %v9782_v45 = vld [vmem:[#allocation36_spill] sm:$0xff] }
  0x6b   :  { %4682 = vrot.lane.b32.xlu0 %v6687_v42, %s5751_s10  ;;  %9774 = vst [vmem:[#allocation103_spill] sm:$0xff] %v6711_v59  ;;  %v9779_v42 = vld [vmem:[#allocation30_spill] sm:$0xff]  ;;  %v687_v62 = vsel %vm674_vm2, %v620_v9, %v653_v33  ;;  %v720_v63 = vsel %vm674_vm2, %v587_v52, %v620_v9  ;;  %v6729_v51 = vpack.i.bf16 %v686_v5, %v719_v53  ;;  %v592_v36 = vrot.slane %v9781_v10, 2 }
  0x6c   :  { %4687 = vrot.lane.b32.xlu1 %v6694_v44, %s5751_s10  ;;  %9776 = vst [vmem:[#allocation26_spill] sm:$0xff] %v6720_v15  ;;  %v655_v55 = vrot.slane %v9779_v42, 2  ;;  %v721_v19 = vsel %vm674_vm2, %v588_v35, %v621_v4  ;;  %v625_v44 = vrot.slane %v9782_v45, 2  ;;  %v688_v42 = vsel %vm674_vm2, %v621_v4, %v654_v21  ;;  %v9785_v52 = vld [vmem:[#allocation38_spill] sm:$0xff]  ;;  %v9799_v45 = vld [vmem:[#allocation51_spill] sm:$0xff] }
  0x6d   :  { %9780 = vst [vmem:[#allocation29_spill] sm:$0xff] %v6729_v51  ;;  %v623_v33 = vrot.slane %v9783_v22, 2  ;;  %v656_v28 = vrot.slane %v9784_v34, 2  ;;  %v658_v9 = vrot.slane %v9785_v52, 2  ;;  %v6744_v35 = vpack.i.bf16 %v687_v62, %v720_v63  ;;  %v9792_v63 = vld [vmem:[#allocation40_spill] sm:$0xff] }
  0x6e   :  { %v689_v5 = vsel %vm674_vm2, %v622_v11, %v655_v55  ;;  %v722_v53 = vsel %vm674_vm2, %v589_v12, %v622_v11  ;;  %v725_v34 = vsel %vm674_vm2, %v592_v36, %v625_v44  ;;  %v6755_v21 = vpack.i.bf16 %v688_v42, %v721_v19  ;;  %v9791_v12 = vld [vmem:[#allocation41_spill] sm:$0xff]  ;;  %v9793_v19 = vld [vmem:[#allocation42_spill] sm:$0xff] }
  0x6f   :  { %4692 = vrot.lane.b32.xlu0 %v6711_v59, %s5751_s10  ;;  %9786 = vst [vmem:[#allocation28_spill] sm:$0xff] %v6744_v35  ;;  %v9787_v59 = vld [vmem:[#allocation33_spill] sm:$0xff]  ;;  %v692_v4 = vsel %vm674_vm2, %v625_v44, %v658_v9  ;;  %v6761_v62 = vpack.i.bf16 %v689_v5, %v722_v53  ;;  %v690_v11 = vsel %vm674_vm2, %v623_v33, %v656_v28  ;;  %v593_v55 = vrot.slane %v9791_v12, 2  ;;  %v9796_v53 = vld [vmem:[#allocation46_spill] sm:$0xff] }
  0x70   :  { %4697 = vrot.lane.b32.xlu1 %v6720_v15, %s5751_s10  ;;  %v590_v2 = vrot.slane %v9787_v59, 2  ;;  %9788 = vst [vmem:[#allocation30_spill] sm:$0xff] %v6755_v21  ;;  %v6757_v52 = vpack.i.bf16 %v692_v4, %v725_v34  ;;  %v626_v15 = vrot.slane %v9792_v63, 2  ;;  %v659_v36 = vrot.slane %v9793_v19, 2  ;;  %v9794_v42 = vld [vmem:[#allocation45_spill] sm:$0xff]  ;;  %v9795_v4 = vld [vmem:[#allocation44_spill] sm:$0xff] }
  0x71   :  { %9790 = vst [vmem:[#allocation38_spill] sm:$0xff] %v6761_v62  ;;  %v594_v9 = vrot.slane %v9794_v42, 2  ;;  %v627_v5 = vrot.slane %v9795_v4, 2  ;;  %v660_v34 = vrot.slane %v9796_v53, 2  ;;  %v628_v12 = vrot.slane %v9798_v0, 2  ;;  %v9801_v53 = vld [vmem:[#allocation52_spill] sm:$0xff] }
  0x72   :  { %9789 = vst [vmem:[#allocation34_spill] sm:$0xff] %v6757_v52  ;;  %v723_v44 = vsel %vm674_vm2, %v590_v2, %v623_v33  ;;  %v661_v63 = vrot.slane %v9799_v45, 2  ;;  %v726_v2 = vsel %vm674_vm2, %v593_v55, %v626_v15  ;;  %v693_v33 = vsel %vm674_vm2, %v626_v15, %v659_v36  ;;  %v9802_v45 = vld [vmem:[#allocation54_spill] sm:$0xff]  ;;  %v9804_v4 = vld [vmem:[#allocation56_spill] sm:$0xff] }
  0x73   :  { %4702 = vrot.lane.b32.xlu0 %v6729_v51, %s5751_s10  ;;  %v9797_v51 = vld [vmem:[#allocation50_spill] sm:$0xff]  ;;  %v727_v19 = vsel %vm674_vm2, %v594_v9, %v627_v5  ;;  %v629_v0 = vrot.slane %v9801_v53, 2  ;;  %v597_v15 = vrot.slane %v9804_v4, 2  ;;  %v9806_v9 = vld [vmem:[#allocation59_spill] sm:$0xff]  ;;  %vm2603_vm6 = vcmask 130048  }
  0x74   :  { %4707 = vrot.lane.b32.xlu1 %v6744_v35, %s5751_s10  ;;  %v595_v28 = vrot.slane %v9797_v51, 2  ;;  %v6780_v35 = vpack.i.bf16 %v690_v11, %v723_v44  ;;  %v662_v51 = vrot.slane %v9802_v45, 2  ;;  %v694_v11 = vsel %vm674_vm2, %v627_v5, %v660_v34  ;;  %v9805_v36 = vld [vmem:[#allocation58_spill] sm:$0xff]  ;;  %v9811_v45 = vld [vmem:[#allocation60_spill] sm:$0xff] }
  0x75   :  { %v695_v44 = vsel %vm674_vm2, %v628_v12, %v661_v63  ;;  %v630_v42 = vrot.slane %v9805_v36, 2  ;;  %v663_v10 = vrot.slane %v9806_v9, 2  ;;  %v6806_v5 = vpack.i.bf16 %v693_v33, %v726_v2 }
  0x76   :  { %9800 = vst [vmem:[#allocation33_spill] sm:$0xff] %v6780_v35  ;;  %v728_v55 = vsel %vm674_vm2, %v595_v28, %v628_v12  ;;  %v6810_v63 = vpack.i.bf16 %v694_v11, %v727_v19  ;;  %v696_v34 = vsel %vm674_vm2, %v629_v0, %v662_v51  ;;  %v598_v9 = vrot.slane %v9811_v45, 2  ;;  %v9816_v51 = vld [vmem:[#allocation66_spill] sm:$0xff] }
  0x77   :  { %4712 = vrot.lane.b32.xlu0 %v6755_v21, %s5751_s10  ;;  %9808 = vst [vmem:[#allocation46_spill] sm:$0xff] %v6806_v5  ;;  %v6812_v12 = vpack.i.bf16 %v695_v44, %v728_v55  ;;  %v697_v19 = vsel %vm674_vm2, %v630_v42, %v663_v10  ;;  %v730_v11 = vsel %vm674_vm2, %v597_v15, %v630_v42  ;;  %v9815_v44 = vld [vmem:[#allocation64_spill] sm:$0xff]  ;;  %vm3077_vm7 = vcmask 1041408  }
  0x78   :  { %4717 = vrot.lane.b32.xlu1 %v6761_v62, %s5751_s10  ;;  %v9803_v62 = vld [vmem:[#allocation53_spill] sm:$0xff]  ;;  %9809 = vst [vmem:[#allocation51_spill] sm:$0xff] %v6810_v63  ;;  %v599_v55 = vrot.slane %v9815_v44, 2  ;;  %vm2668_vm8 = vcmask 162816   ;;  %vm2733_vm9 = vcmask 195584   ;;  %vm2798_vm10 = vcmask 228352  }
  0x79   :  { %v596_v21 = vrot.slane %v9803_v62, 2  ;;  %9810 = vst [vmem:[#allocation54_spill] sm:$0xff] %v6812_v12  ;;  %vm2863_vm11 = vcmask 261120   ;;  %vm2980_vm12 = vcmask 293888   ;;  %vm3650_vm13 = vcmask 1041409  }
  0x7a   :  { %vm3652_vm14 = vcmask 1042434   ;;  %vm3654_vm15 = vcmask 1043459  }
  0x7b   :  { %v6802_v53 = vpop.permute.xlu0 %4492  ;;  %4722 = vrot.lane.b32.xlu0 %v6780_v35, %s5751_s10  ;;  %v729_v28 = vsel %vm674_vm2, %v596_v21, %v629_v0  ;;  %v9813_v35 = vld [vmem:[#allocation62_spill] sm:$0xff]  ;;  %v9817_v0 = vld [vmem:[#allocation67_spill] sm:$0xff] }
  0x7c   :  { %9807 = vst [vmem:[#allocation42_spill] sm:$0xff] %v6802_v53  ;;  %4727 = vrot.lane.b32.xlu1 %v6757_v52, %s5751_s10  ;;  %v9812_v53 = vld [vmem:[#allocation61_spill] sm:$0xff]  ;;  %v664_v2 = vrot.slane %v9813_v35, 2  ;;  %v632_v52 = vrot.slane %v9816_v51, 2  ;;  %v665_v21 = vrot.slane %v9817_v0, 2  ;;  %v6839_v10 = vpack.i.bf16 %v696_v34, %v729_v28 }
  0x7d   :  { %v631_v36 = vrot.slane %v9812_v53, 2  ;;  %v6821_v33 = vpop.permute.xlu1 %4502  ;;  %v9818_v53 = vld [vmem:[#allocation68_spill] sm:$0xff]  ;;  %v9819_v35 = vld [vmem:[#allocation69_spill] sm:$0xff]  ;;  %v6845_v0 = vpack.i.bf16 %v697_v19, %v730_v11 }
  0x7e   :  { %9814 = vst [vmem:[#allocation59_spill] sm:$0xff] %v6821_v33  ;;  %v600_v45 = vrot.slane %v9818_v53, 2  ;;  %v633_v4 = vrot.slane %v9819_v35, 2  ;;  %v9820_v33 = vld [vmem:[#allocation70_spill] sm:$0xff]  ;;  %9822 = vst [vmem:[#allocation67_spill] sm:$0xff] %v6839_v10  ;;  %v9824_v35 = vld [vmem:[#allocation73_spill] sm:$0xff]  ;;  %v699_v34 = vsel %vm674_vm2, %v632_v52, %v665_v21 }
  0x7f   :  { %4732 = vrot.lane.b32.xlu0 %v6806_v5, %s5751_s10  ;;  %v666_v62 = vrot.slane %v9820_v33, 2  ;;  %v6835_v22 = vpop.permute.xlu0 %4497  ;;  %v698_v42 = vsel %vm674_vm2, %v631_v36, %v664_v2  ;;  %v731_v15 = vsel %vm674_vm2, %v598_v9, %v631_v36  ;;  %9823 = vst [vmem:[#allocation70_spill] sm:$0xff] %v6845_v0  ;;  %v732_v5 = vsel %vm674_vm2, %v599_v55, %v632_v52  ;;  %v9825_v53 = vld [vmem:[#allocation72_spill] sm:$0xff]  ;;  %v9826_v9 = vld [vmem:[#allocation74_spill] sm:$0xff] }
  0x80   :  { %9821 = vst [vmem:[#allocation62_spill] sm:$0xff] %v6835_v22  ;;  %4737 = vrot.lane.b32.xlu1 %v6810_v63, %s5751_s10  ;;  %v601_v33 = vrot.slane %v9824_v35, 2  ;;  %v634_v22 = vrot.slane %v9825_v53, 2  ;;  %v733_v36 = vsel %vm674_vm2, %v600_v45, %v633_v4  ;;  %v667_v2 = vrot.slane %v9826_v9, 2  ;;  %v9832_v9 = vld [vmem:[#allocation79_spill] sm:$0xff] }
  0x81   :  { %v700_v28 = vsel %vm674_vm2, %v633_v4, %v666_v62  ;;  %v6864_v11 = vpack.i.bf16 %v698_v42, %v731_v15  ;;  %v602_v55 = vrot.slane %v6465_v24, 2  ;;  %v668_v52 = vrot.slane %v6468_v14, 2  ;;  %v9833_v14 = vld [vmem:[#allocation81_spill] sm:$0xff] }
  0x82   :  { %v6871_v62 = vpack.i.bf16 %v699_v34, %v732_v5  ;;  %v6873_v4 = vpack.i.bf16 %v700_v28, %v733_v36  ;;  %v734_v45 = vsel %vm674_vm2, %v601_v33, %v634_v22  ;;  %v701_v42 = vsel %vm674_vm2, %v634_v22, %v667_v2  ;;  %v9834_v34 = vld [vmem:[#allocation83_spill] sm:$0xff]  ;;  %v9835_v36 = vld [vmem:[#allocation85_spill] sm:$0xff]  ;;  %v9837_v2 = vld [vmem:[#allocation84_spill] sm:$0xff] }
  0x83   :  { %4742 = vrot.lane.b32.xlu0 %v6812_v12, %s5751_s10  ;;  %v6860_v19 = vpop.permute.xlu1 %4507  ;;  %9828 = vst [vmem:[#allocation104_spill] sm:$0xff] %v6864_v11  ;;  %v635_v12 = vrot.slane %v6462_v25, 2  ;;  %v603_v15 = vrot.slane %v6503_v30, 2  ;;  %v637_v28 = vrot.slane %v9834_v34, 2 }
  0x84   :  { %9827 = vst [vmem:[#allocation74_spill] sm:$0xff] %v6860_v19  ;;  %4747 = vrot.lane.b32.xlu1 %v6839_v10, %s5751_s10  ;;  %9830 = vst [vmem:[#allocation106_spill] sm:$0xff] %v6871_v62  ;;  %v636_v19 = vrot.slane %v9832_v9, 2  ;;  %v669_v10 = vrot.slane %v9833_v14, 2  ;;  %v6897_v14 = vpack.i.bf16 %v701_v42, %v734_v45  ;;  %v9841_v45 = vld [vmem:[#allocation87_spill] sm:$0xff] }
  0x85   :  { %v6869_v21 = vpop.permute.xlu0 %4512  ;;  %9831 = vst [vmem:[#allocation107_spill] sm:$0xff] %v6873_v4  ;;  %v702_v5 = vsel %vm674_vm2, %v635_v12, %v668_v52  ;;  %v735_v33 = vsel %vm674_vm2, %v602_v55, %v635_v12  ;;  %v638_v42 = vrot.slane %v9841_v45, 2 }
  0x86   :  { %9829 = vst [vmem:[#allocation105_spill] sm:$0xff] %v6869_v21  ;;  %v670_v21 = vrot.slane %v9835_v36, 2  ;;  %9838 = vst [vmem:[#allocation85_spill] sm:$0xff] %v6897_v14  ;;  %v703_v52 = vsel %vm674_vm2, %v636_v19, %v669_v10  ;;  %v736_v12 = vsel %vm674_vm2, %v603_v15, %v636_v19  ;;  %v639_v19 = vrot.slane %v6566_v23, 2 }
  0x87   :  { %4752 = vrot.lane.b32.xlu0 %v6845_v0, %s5751_s10  ;;  %v604_v0 = vrot.slane %v9837_v2, 2  ;;  %v672_v15 = vrot.slane %v6572_v49, 2 }
  0x88   :  { %4757 = vrot.lane.b32.xlu1 %v6864_v11, %s5751_s10  ;;  %v6892_v22 = vpop.permute.xlu1 %4517  ;;  %v6899_v11 = vpack.i.bf16 %v702_v5, %v735_v33  ;;  %v704_v36 = vsel %vm674_vm2, %v637_v28, %v670_v21  ;;  %v671_v5 = vrot.slane %v6548_v41, 2  ;;  %v606_v33 = vrot.slane %v6569_v13, 2 }
  0x89   :  { %9836 = vst [vmem:[#allocation81_spill] sm:$0xff] %v6892_v22  ;;  %v9840_v22 = vld [vmem:[#allocation88_spill] sm:$0xff]  ;;  %v737_v10 = vsel %vm674_vm2, %v604_v0, %v637_v28  ;;  %v6923_v21 = vpack.i.bf16 %v703_v52, %v736_v12  ;;  %v706_v49 = vsel %vm674_vm2, %v639_v19, %v672_v15 }
  0x8a   :  { %9839 = vst [vmem:[#allocation108_spill] sm:$0xff] %v6899_v11  ;;  %v6927_v41 = vpack.i.bf16 %v704_v36, %v737_v10  ;;  %v705_v0 = vsel %vm674_vm2, %v638_v42, %v671_v5  ;;  %v739_v52 = vsel %vm674_vm2, %v606_v33, %v639_v19  ;;  %v6959_v10 = vpack.i.bf16 %v5812_v17, %v5815_v18  ;;  %v45_v18 = vld [vmem:[%s9345_s0 + $0xf0] sm:$0xff]  ;;  %v7025_v17 = vld [vmem:[%s9345_s0 + $0xf8] sm:$0xff] }
  0x8b   :  { %4762 = vrot.lane.b32.xlu0 %v6871_v62, %s5751_s10  ;;  %v6905_v55 = vpop.permute.xlu0 %4522  ;;  %v605_v62 = vrot.slane %v9840_v22, 2  ;;  %9842 = vst [vmem:[#allocation109_spill] sm:$0xff] %v6923_v21  ;;  %v6947_v5 = vpack.i.bf16 %v706_v49, %v739_v52  ;;  %v6966_v19 = vpack.i.bf16 %v5878_v50, %v5868_v46  ;;  %v4821_v49 = vpack.i.bf16 %v5932_v16, %v5918_v8 }
  0x8c   :  { %4767 = vrot.lane.b32.xlu1 %v6873_v4, %s5751_s10  ;;  %9843 = vst [vmem:[#allocation110_spill] sm:$0xff] %v6927_v41  ;;  %9846 = vst [vmem:[#allocation113_spill] sm:$0xff] %v6959_v10  ;;  %v6986_v52 = vpack.i.bf16 %v5957_v38, %v5945_v29 }
  0x8d   :  { %v738_v28 = vsel %vm674_vm2, %v605_v62, %v638_v42  ;;  %9845 = vst [vmem:[#allocation112_spill] sm:$0xff] %v6947_v5  ;;  %v4801_v42 = vpack.i.bf16 %v5821_v20, %v5845_v32  ;;  %9847 = vst [vmem:[#allocation114_spill] sm:$0xff] %v6966_v19  ;;  %v7015_v32 = vpack.i.bf16 %v6046_v60, %v6049_v61 }
  0x8e   :  { %v6919_v63 = vpop.permute.xlu1 %4527  ;;  %v6941_v12 = vpack.i.bf16 %v705_v0, %v738_v28  ;;  %v6974_v0 = vpack.i.bf16 %v5890_v56, %v5893_v57  ;;  %9849 = vst [vmem:[#allocation116_spill] sm:$0xff] %v6986_v52  ;;  %v6993_v57 = vpack.i.bf16 %v5968_v47, %v5971_v48  ;;  %v6999_v56 = vpack.i.bf16 %v5994_v1, %v5997_v3 }
  0x8f   :  { %4772 = vrot.lane.b32.xlu0 %v6897_v14, %s5751_s10  ;;  %9854 = vst [vmem:[#allocation121_spill] sm:$0xff] %v7015_v32 }
  0x90   :  { %4777 = vrot.lane.b32.xlu1 %v6899_v11, %s5751_s10  ;;  %v6933_v4 = vpop.permute.xlu0 %4532  ;;  %9844 = vst [vmem:[#allocation111_spill] sm:$0xff] %v6941_v12  ;;  %9848 = vst [vmem:[#allocation115_spill] sm:$0xff] %v6974_v0  ;;  %v9873_v11 = vld [vmem:[#allocation49_spill] sm:$0xff] }
  0x91   :  { %9850 = vst [vmem:[#allocation117_spill] sm:$0xff] %v6993_v57  ;;  %9851 = vst [vmem:[#allocation118_spill] sm:$0xff] %v6999_v56 }
  0x93   :  { %4782 = vrot.lane.b32.xlu0 %v6923_v21, %s5751_s10  ;;  %v6943_v36 = vpop.permute.xlu1 %4537 }
  0x94   :  { %4787 = vrot.lane.b32.xlu1 %v6927_v41, %s5751_s10  ;;  %v9871_v41 = vld [vmem:[#allocation44_spill] sm:$0xff] }
  0x96   :  { %v6949_v62 = vpop.permute.xlu0 %4542 }
  0x97   :  { %4792 = vrot.lane.b32.xlu0 %v6941_v12, %s5751_s10  ;;  %v9870_v12 = vld [vmem:[#allocation45_spill] sm:$0xff] }
  0x98   :  { %4797 = vrot.lane.b32.xlu1 %v6947_v5, %s5751_s10  ;;  %v4891_v21 = vpack.i.bf16 %v9871_v41, %v9870_v12  ;;  %v9881_v41 = vld [vmem:[#allocation58_spill] sm:$0xff] }
  0x99   :  { %v6961_v33 = vpop.permute.xlu1 %4547 }
  0x9b   :  { %4802 = vrot.lane.b32.xlu0 %v4801_v42, %s5752_s5  ;;  %v6968_v15 = vpop.permute.xlu0 %4552 }
  0x9c   :  { %4807 = vrot.lane.b32.xlu1 %v6959_v10, %s5752_s5  ;;  %v9869_v10 = vld [vmem:[#allocation40_spill] sm:$0xff] }
  0x9e   :  { %v6976_v28 = vpop.permute.xlu1 %4557 }
  0x9f   :  { %4812 = vrot.lane.b32.xlu0 %v6966_v19, %s5752_s5  ;;  %v9868_v19 = vld [vmem:[#allocation41_spill] sm:$0xff] }
  0xa0   :  { %4817 = vrot.lane.b32.xlu1 %v6974_v0, %s5752_s5 }
  0xa1   :  { %v6988_v42 = vpop.permute.xlu0 %4562 }
  0xa3   :  { %4822 = vrot.lane.b32.xlu0 %v4821_v49, %s5752_s5  ;;  %v7009_v49 = vpack.i.bf16 %v6027_v37, %v6030_v43 }
  0xa4   :  { %4827 = vrot.lane.b32.xlu1 %v6986_v52, %s5752_s5  ;;  %v7001_v46 = vpop.permute.xlu1 %4567  ;;  %v9561_v52 = vrot.slane %v7025_v17, 7 }
  0xa5   :  { %9853 = vst [vmem:[#allocation120_spill] sm:$0xff] %v7009_v49 }
  0xa6   :  { %v7003_v50 = vpop.permute.xlu0 %4572 }
  0xa7   :  { %9852 = vst [vmem:[#allocation119_spill] sm:$0xff] %v7003_v50  ;;  %4832 = vrot.lane.b32.xlu0 %v6993_v57, %s5752_s5  ;;  %v192_v57 = vrot.slane %v45_v18, 7 }
  0xa8   :  { %4837 = vrot.lane.b32.xlu1 %v6999_v56, %s5752_s5  ;;  %v7031_v56 = vpack.i.bf16 %v6088_v58, %v6075_v31 }
  0xa9   :  { %v7059_v18 = vsel %vm144_vm0, %v192_v57, %v9561_v52 }
  0xaa   :  { %v7017_v20 = vpop.permute.xlu1 %4577  ;;  %9856 = vst [vmem:[#allocation123_spill] sm:$0xff] %v7031_v56 }
  0xab   :  { %9855 = vst [vmem:[#allocation122_spill] sm:$0xff] %v7017_v20  ;;  %4842 = vrot.lane.b32.xlu0 %v7009_v49, %s5752_s5  ;;  %v7033_v50 = vpop.permute.xlu0 %4582  ;;  %v7039_v20 = vpack.i.bf16 %v6098_v40, %v6101_v26  ;;  %v7046_v49 = vpack.i.bf16 %v6124_v27, %v6127_v7 }
  0xac   :  { %9857 = vst [vmem:[#allocation124_spill] sm:$0xff] %v7033_v50  ;;  %4847 = vrot.lane.b32.xlu1 %v7015_v32, %s5752_s5  ;;  %v7054_v32 = vpack.i.bf16 %v9778_v39, %v9777_v54 }
  0xad   :  { %9858 = vst [vmem:[#allocation125_spill] sm:$0xff] %v7039_v20  ;;  %9859 = vst [vmem:[#allocation126_spill] sm:$0xff] %v7046_v49 }
  0xae   :  { %9861 = vst [vmem:[#allocation128_spill] sm:$0xff] %v7054_v32 }
  0xaf   :  { %4852 = vrot.lane.b32.xlu0 %v7031_v56, %s5752_s5  ;;  %v7048_v16 = vpop.permute.xlu1 %4587  ;;  %v7062_v56 = vsel %vm144_vm0, 0.0, %v192_v57  ;;  %v9866_v57 = vld [vmem:[#allocation37_spill] sm:$0xff] }
  0xb0   :  { %9860 = vst [vmem:[#allocation127_spill] sm:$0xff] %v7048_v16  ;;  %4857 = vrot.lane.b32.xlu1 %v7039_v20, %s5752_s5  ;;  %v9863_v16 = vld [vmem:[#allocation32_spill] sm:$0xff]  ;;  %v7076_v0 = vpack.i.bf16 %v7059_v18, %v7062_v56 }
  0xb1   :  { %v7064_v50 = vpop.permute.xlu0 %4592  ;;  %v7070_v20 = vpack.i.bf16 %v9863_v16, %v9787_v59 }
  0xb2   :  { %9862 = vst [vmem:[#allocation129_spill] sm:$0xff] %v7064_v50  ;;  %9865 = vst [vmem:[#allocation130_spill] sm:$0xff] %v7076_v0  ;;  %v9867_v50 = vld [vmem:[#allocation36_spill] sm:$0xff] }
  0xb3   :  { %4862 = vrot.lane.b32.xlu0 %v7046_v49, %s5752_s5  ;;  %9864 = vst [vmem:[#allocation32_spill] sm:$0xff] %v7070_v20  ;;  %v4881_v8 = vpack.i.bf16 %v9867_v50, %v9866_v57 }
  0xb4   :  { %4867 = vrot.lane.b32.xlu1 %v7054_v32, %s5752_s5  ;;  %v4886_v32 = vpack.i.bf16 %v9869_v10, %v9868_v19  ;;  %v9877_v10 = vld [vmem:[#allocation53_spill] sm:$0xff]  ;;  %v9878_v19 = vld [vmem:[#allocation52_spill] sm:$0xff] }
  0xb5   :  { %v7078_v52 = vpop.permute.xlu1 %4597  ;;  %v7107_v14 = vpack.i.bf16 %v9878_v19, %v9877_v10  ;;  %v7127_v10 = vpack.i.bf16 %v9816_v51, %v9815_v44 }
  0xb6   :  { %v7084_v49 = vpop.permute.xlu0 %4602 }
  0xb7   :  { %4872 = vrot.lane.b32.xlu0 %v7070_v20, %s5752_s5  ;;  %v9872_v20 = vld [vmem:[#allocation50_spill] sm:$0xff]  ;;  %9879 = vst [vmem:[#allocation134_spill] sm:$0xff] %v7107_v14  ;;  %9887 = vst [vmem:[#allocation136_spill] sm:$0xff] %v7127_v10 }
  0xb8   :  { %4877 = vrot.lane.b32.xlu1 %v7076_v0, %s5752_s5  ;;  %v7098_v57 = vpack.i.bf16 %v9873_v11, %v9872_v20  ;;  %v9884_v20 = vld [vmem:[#allocation60_spill] sm:$0xff] }
  0xba   :  { %v7090_v5 = vpop.permute.xlu1 %4607  ;;  %9874 = vst [vmem:[#allocation131_spill] sm:$0xff] %v7098_v57 }
  0xbb   :  { %4882 = vrot.lane.b32.xlu0 %v4881_v8, %s5752_s5  ;;  %v9880_v8 = vld [vmem:[#allocation56_spill] sm:$0xff] }
  0xbc   :  { %4887 = vrot.lane.b32.xlu1 %v4886_v32, %s5752_s5  ;;  %v7113_v32 = vpack.i.bf16 %v9881_v41, %v9880_v8 }
  0xbd   :  { %v7100_v50 = vpop.permute.xlu0 %4612 }
  0xbe   :  { %9875 = vst [vmem:[#allocation132_spill] sm:$0xff] %v7100_v50  ;;  %9882 = vst [vmem:[#allocation56_spill] sm:$0xff] %v7113_v32 }
  0xbf   :  { %4892 = vrot.lane.b32.xlu0 %v4891_v21, %s5752_s5  ;;  %v7103_v0 = vpop.permute.xlu1 %4617  ;;  %v9885_v21 = vld [vmem:[#allocation61_spill] sm:$0xff] }
  0xc0   :  { %9876 = vst [vmem:[#allocation133_spill] sm:$0xff] %v7103_v0  ;;  %4897 = vrot.lane.b32.xlu1 %v7098_v57, %s5752_s5  ;;  %v7121_v11 = vpack.i.bf16 %v9885_v21, %v9884_v20  ;;  %v9889_v57 = vld [vmem:[#allocation68_spill] sm:$0xff]  ;;  %v9924_v21 = vld [vmem:[#allocation31_spill] sm:$0xff] }
  0xc2   :  { %v7115_v12 = vpop.permute.xlu0 %4622  ;;  %9886 = vst [vmem:[#allocation135_spill] sm:$0xff] %v7121_v11 }
  0xc3   :  { %9883 = vst [vmem:[#allocation58_spill] sm:$0xff] %v7115_v12  ;;  %4902 = vrot.lane.b32.xlu0 %v7107_v14, %s5752_s5  ;;  %v9890_v12 = vld [vmem:[#allocation69_spill] sm:$0xff] }
  0xc4   :  { %4907 = vrot.lane.b32.xlu1 %v7113_v32, %s5752_s5  ;;  %v7135_v0 = vpack.i.bf16 %v9890_v12, %v9889_v57  ;;  %v7143_v32 = vpack.i.bf16 %v9825_v53, %v9824_v35 }
  0xc5   :  { %v7129_v19 = vpop.permute.xlu1 %4627 }
  0xc6   :  { %9888 = vst [vmem:[#allocation137_spill] sm:$0xff] %v7129_v19  ;;  %9891 = vst [vmem:[#allocation138_spill] sm:$0xff] %v7135_v0  ;;  %v77_v19 = vld [vmem:[%s9345_s0 + $0x1f0] sm:$0xff] }
  0xc7   :  { %4912 = vrot.lane.b32.xlu0 %v7121_v11, %s5752_s5  ;;  %9893 = vst [vmem:[#allocation140_spill] sm:$0xff] %v7143_v32  ;;  %v7153_v11 = vld [vmem:[%s9345_s0 + $0x1f8] sm:$0xff]  ;;  %s5753_s0 = smov 16  }
  0xc8   :  { %4917 = vrot.lane.b32.xlu1 %v7127_v10, %s5752_s5  ;;  %v7139_v14 = vpop.permute.xlu0 %4632  ;;  %v7159_v10 = vpack.i.bf16 %v6462_v25, %v6465_v24  ;;  %v9603_v53 = vrot.slane %v7153_v11, 7  ;;  %v456_v24 = vrot.slane %v7059_v18, 1 }
  0xc9   :  { %9892 = vst [vmem:[#allocation139_spill] sm:$0xff] %v7139_v14  ;;  %v240_v14 = vrot.slane %v77_v19, 7 }
  0xca   :  { %v7145_v44 = vpop.permute.xlu1 %4637  ;;  %9895 = vst [vmem:[#allocation142_spill] sm:$0xff] %v7159_v10 }
  0xcb   :  { %9894 = vst [vmem:[#allocation141_spill] sm:$0xff] %v7145_v44  ;;  %4922 = vrot.lane.b32.xlu0 %v7135_v0, %s5752_s5  ;;  %v7165_v44 = vpack.i.bf16 %v9832_v9, %v6503_v30  ;;  %v7176_v0 = vpack.i.bf16 %v9834_v34, %v9837_v2  ;;  %v7189_v19 = vsel %vm144_vm0, %v240_v14, %v9603_v53  ;;  %v9914_v2 = vld [vmem:[#allocation21_spill] sm:$0xff]  ;;  %v9916_v30 = vrot.slane %v7025_v17, 7  ;;  %v9918_v9 = vld [vmem:[#allocation24_spill] sm:$0xff] }
  0xcc   :  { %4927 = vrot.lane.b32.xlu1 %v7143_v32, %s5752_s5  ;;  %v7182_v32 = vpack.i.bf16 %v9841_v45, %v9840_v22  ;;  %v9912_v22 = vld [vmem:[#allocation19_spill] sm:$0xff]  ;;  %v9920_v17 = vld [vmem:[#allocation25_spill] sm:$0xff] }
  0xcd   :  { %9896 = vst [vmem:[#allocation143_spill] sm:$0xff] %v7165_v44  ;;  %v7167_v35 = vpop.permute.xlu0 %4642  ;;  %9899 = vst [vmem:[#allocation146_spill] sm:$0xff] %v7176_v0 }
  0xce   :  { %9897 = vst [vmem:[#allocation144_spill] sm:$0xff] %v7167_v35  ;;  %v7170_v57 = vpop.permute.xlu1 %4647  ;;  %9900 = vst [vmem:[#allocation147_spill] sm:$0xff] %v7182_v32 }
  0xcf   :  { %9898 = vst [vmem:[#allocation145_spill] sm:$0xff] %v7170_v57  ;;  %4932 = vrot.lane.b32.xlu0 %v7159_v10, %s5752_s5  ;;  %v7192_v10 = vsel %vm144_vm0, 0.0, %v240_v14 }
  0xd0   :  { %4937 = vrot.lane.b32.xlu1 %v7165_v44, %s5752_s5  ;;  %v7200_v44 = vpack.i.bf16 %v6566_v23, %v6569_v13  ;;  %v9909_v13 = vld [vmem:[#allocation9_spill] sm:$0xff] }
  0xd1   :  { %v7184_v35 = vpop.permute.xlu0 %4652 }
  0xd2   :  { %9901 = vst [vmem:[#allocation148_spill] sm:$0xff] %v7184_v35  ;;  %v7194_v57 = vpop.permute.xlu1 %4657  ;;  %9903 = vst [vmem:[#allocation150_spill] sm:$0xff] %v7200_v44  ;;  %v7206_v35 = vpack.i.bf16 %v7189_v19, %v7192_v10 }
  0xd3   :  { %9902 = vst [vmem:[#allocation149_spill] sm:$0xff] %v7194_v57  ;;  %4942 = vrot.lane.b32.xlu0 %v7176_v0, %s5752_s5 }
  0xd4   :  { %4947 = vrot.lane.b32.xlu1 %v7182_v32, %s5752_s5  ;;  %9904 = vst [vmem:[#allocation151_spill] sm:$0xff] %v7206_v35  ;;  %v9908_v32 = vld [vmem:[#allocation11_spill] sm:$0xff] }
  0xd5   :  { %v7208_v53 = vpop.permute.xlu0 %4662 }
  0xd6   :  { %9905 = vst [vmem:[#allocation152_spill] sm:$0xff] %v7208_v53  ;;  %v7210_v14 = vpop.permute.xlu1 %4667 }
  0xd7   :  { %9906 = vst [vmem:[#allocation153_spill] sm:$0xff] %v7210_v14  ;;  %4952 = vrot.lane.b32.xlu0 %v7200_v44, %s5752_s5  ;;  %v9910_v44 = vld [vmem:[#allocation15_spill] sm:$0xff] }
  0xd8   :  { %4957 = vrot.lane.b32.xlu1 %v7206_v35, %s5752_s5  ;;  %v9911_v35 = vld [vmem:[#allocation18_spill] sm:$0xff] }
  0xd9   :  { %v7216_v0 = vpop.permute.xlu0 %4672 }
  0xda   :  { %9907 = vst [vmem:[#allocation154_spill] sm:$0xff] %v7216_v0  ;;  %v7218_v57 = vpop.permute.xlu1 %4677 }
  0xdb   :  { %4962 = vrot.lane.b32.xlu0 %v9908_v32, %s5753_s0  ;;  %v9913_v32 = vld [vmem:[#allocation20_spill] sm:$0xff] }
  0xdc   :  { %4967 = vrot.lane.b32.xlu1 %v9909_v13, %s5753_s0 }
  0xdd   :  { %v7224_v53 = vpop.permute.xlu0 %4682 }
  0xde   :  { %v7226_v14 = vpop.permute.xlu1 %4687 }
  0xdf   :  { %4972 = vrot.lane.b32.xlu0 %v9910_v44, %s5753_s0  ;;  %v9915_v44 = vld [vmem:[#allocation22_spill] sm:$0xff] }
  0xe0   :  { %4977 = vrot.lane.b32.xlu1 %v9911_v35, %s5753_s0 }
  0xe1   :  { %v7232_v0 = vpop.permute.xlu0 %4692 }
  0xe2   :  { %v7234_v23 = vpop.permute.xlu1 %4697 }
  0xe3   :  { %4982 = vrot.lane.b32.xlu0 %v9912_v22, %s5753_s0  ;;  %v7255_v22 = vsel %vm144_vm0, %v9916_v30, 0.0  ;;  %v9921_v30 = vld [vmem:[#allocation27_spill] sm:$0xff] }
  0xe4   :  { %4987 = vrot.lane.b32.xlu1 %v9913_v32, %s5753_s0  ;;  %v9917_v32 = vld [vmem:[#allocation23_spill] sm:$0xff]  ;;  %v489_v25 = vrot.slane %v7255_v22, 1 }
  0xe5   :  { %v7240_v13 = vpop.permute.xlu0 %4702 }
  0xe6   :  { %v7242_v45 = vpop.permute.xlu1 %4707 }
  0xe7   :  { %4992 = vrot.lane.b32.xlu0 %v9914_v2, %s5753_s0  ;;  %v423_v2 = vrot.slane %v7062_v56, 1 }
  0xe8   :  { %4997 = vrot.lane.b32.xlu1 %v9915_v44, %s5753_s0 }
  0xe9   :  { %v7248_v35 = vpop.permute.xlu0 %4712  ;;  %v558_v51 = vsel %vm508_vm1, %v423_v2, %v456_v24  ;;  %v9931_v2 = vld [vmem:[#allocation43_spill] sm:$0xff] }
  0xea   :  { %v7250_v34 = vpop.permute.xlu1 %4717 }
  0xeb   :  { %5002 = vrot.lane.b32.xlu0 %v9917_v32, %s5753_s0 }
  0xec   :  { %5007 = vrot.lane.b32.xlu1 %v9918_v9, %s5753_s0  ;;  %v525_v9 = vsel %vm508_vm1, %v456_v24, %v489_v25 }
  0xed   :  { %v7263_v44 = vpop.permute.xlu0 %4722 }
  0xee   :  { %v7266_v12 = vpop.permute.xlu1 %4727 }
  0xef   :  { %9919 = vst [vmem:[#allocation11_spill] sm:$0xff] %v7266_v12  ;;  %5012 = vrot.lane.b32.xlu0 %v9920_v17, %s5753_s0  ;;  %v9925_v12 = vld [vmem:[#allocation35_spill] sm:$0xff]  ;;  %v7284_v17 = vpack.i.bf16 %v525_v9, %v558_v51 }
  0xf0   :  { %5017 = vrot.lane.b32.xlu1 %v9921_v30, %s5753_s0  ;;  %v9932_v51 = vld [vmem:[#allocation47_spill] sm:$0xff] }
  0xf1   :  { %v7272_v32 = vpop.permute.xlu0 %4732  ;;  %9926 = vst [vmem:[#allocation157_spill] sm:$0xff] %v7284_v17 }
  0xf2   :  { %9922 = vst [vmem:[#allocation155_spill] sm:$0xff] %v7272_v32  ;;  %v7278_v20 = vpop.permute.xlu1 %4737  ;;  %v9929_v32 = vld [vmem:[#allocation39_spill] sm:$0xff] }
  0xf3   :  { %9923 = vst [vmem:[#allocation156_spill] sm:$0xff] %v7278_v20  ;;  %5022 = vrot.lane.b32.xlu0 %v9924_v21, %s5753_s0  ;;  %v9935_v21 = vld [vmem:[#allocation48_spill] sm:$0xff]  ;;  %v4524_v20 = vunpack.i.l.bf16 %v6905_v55 }
  0xf4   :  { %5027 = vrot.lane.b32.xlu1 %v9925_v12, %s5753_s0 }
  0xf5   :  { %v7286_v50 = vpop.permute.xlu0 %4742 }
  0xf6   :  { %9927 = vst [vmem:[#allocation158_spill] sm:$0xff] %v7286_v50  ;;  %v7288_v30 = vpop.permute.xlu1 %4747  ;;  %v9939_v50 = vld [vmem:[#allocation57_spill] sm:$0xff] }
  0xf7   :  { %9928 = vst [vmem:[#allocation159_spill] sm:$0xff] %v7288_v30  ;;  %5032 = vrot.lane.b32.xlu0 %v9929_v32, %s5753_s0  ;;  %v9936_v32 = vld [vmem:[#allocation55_spill] sm:$0xff] }
  0xf8   :  { %5037 = vrot.lane.b32.xlu1 %v7284_v17, %s5753_s0 }
  0xf9   :  { %v7294_v25 = vpop.permute.xlu0 %4752 }
  0xfa   :  { %v7296_v24 = vpop.permute.xlu1 %4757 }
  0xfb   :  { %9930 = vst [vmem:[#allocation160_spill] sm:$0xff] %v7296_v24  ;;  %5042 = vrot.lane.b32.xlu0 %v9931_v2, %s5753_s0  ;;  %v4525_v2 = vunpack.i.h.bf16 %v6905_v55  ;;  %v4545_v55 = vunpack.i.h.bf16 %v6949_v62 }
  0xfc   :  { %5047 = vrot.lane.b32.xlu1 %v9932_v51, %s5753_s0  ;;  %v9940_v51 = vld [vmem:[#allocation63_spill] sm:$0xff] }
  0xfd   :  { %v7302_v9 = vpop.permute.xlu0 %4762 }
  0xfe   :  { %9933 = vst [vmem:[#allocation43_spill] sm:$0xff] %v7302_v9  ;;  %v7304_v12 = vpop.permute.xlu1 %4767 }
  0xff   :  { %9934 = vst [vmem:[#allocation161_spill] sm:$0xff] %v7304_v12  ;;  %5052 = vrot.lane.b32.xlu0 %v9935_v21, %s5753_s0  ;;  %v4530_v12 = vunpack.i.h.bf16 %v6919_v63  ;;  %v4529_v21 = vunpack.i.l.bf16 %v6919_v63  ;;  %v7335_v63 = vsel %vm2412_vm3, %v5957_v38, %v4525_v2 }
 0x100   :  { %5057 = vrot.lane.b32.xlu1 %v9936_v32, %s5753_s0  ;;  %v4535_v32 = vunpack.i.h.bf16 %v6933_v4 }
 0x101   :  { %v7310_v17 = vpop.permute.xlu0 %4772 }
 0x102   :  { %9937 = vst [vmem:[#allocation162_spill] sm:$0xff] %v7310_v17  ;;  %v7312_v30 = vpop.permute.xlu1 %4777  ;;  %v4534_v17 = vunpack.i.l.bf16 %v6933_v4  ;;  %v7339_v4 = vsel %vm2412_vm3, %v5945_v29, %v4524_v20 }
 0x103   :  { %9938 = vst [vmem:[#allocation163_spill] sm:$0xff] %v7312_v30  ;;  %5062 = vrot.lane.b32.xlu0 %v9939_v50, %s5753_s0  ;;  %v4540_v30 = vunpack.i.h.bf16 %v6943_v36  ;;  %v4539_v50 = vunpack.i.l.bf16 %v6943_v36  ;;  %v7345_v36 = vsel %vm2412_vm3, %v5968_v47, %v4530_v12 }
 0x104   :  { %5067 = vrot.lane.b32.xlu1 %v9940_v51, %s5753_s0  ;;  %v9943_v51 = vld [vmem:[#allocation65_spill] sm:$0xff]  ;;  %v7357_v38 = vsel %vm2412_vm3, %v5997_v3, %v4534_v17  ;;  %v7379_v3 = vsel %vm2412_vm3, %v6046_v60, %v4545_v55  ;;  %v9948_v17 = vld [vmem:[#allocation78_spill] sm:$0xff]  ;;  %v439_v60 = vrot.slane %v7192_v10, 1 }
 0x105   :  { %v7324_v9 = vpop.permute.xlu0 %4782  ;;  %v7363_v29 = vsel %vm2412_vm3, %v6027_v37, %v4540_v30  ;;  %v7367_v47 = vsel %vm2412_vm3, %v6030_v43, %v4539_v50  ;;  %v4544_v37 = vunpack.i.l.bf16 %v6949_v62  ;;  %v9947_v50 = vld [vmem:[#allocation75_spill] sm:$0xff]  ;;  %v4549_v43 = vunpack.i.l.bf16 %v6961_v33 }
 0x106   :  { %9941 = vst [vmem:[#allocation164_spill] sm:$0xff] %v7324_v9  ;;  %v7328_v24 = vpop.permute.xlu1 %4787  ;;  %v9944_v9 = vld [vmem:[#allocation71_spill] sm:$0xff]  ;;  %v4554_v30 = vunpack.i.l.bf16 %v6968_v15  ;;  %v472_v62 = vrot.slane %v7189_v19, 1 }
 0x107   :  { %9942 = vst [vmem:[#allocation165_spill] sm:$0xff] %v7328_v24  ;;  %5072 = vrot.lane.b32.xlu0 %v9943_v51, %s5753_s0  ;;  %v7349_v24 = vsel %vm2412_vm3, %v5971_v48, %v4529_v21  ;;  %v7353_v51 = vsel %vm2412_vm3, %v5994_v1, %v4535_v32  ;;  %v591_v48 = vrot.slane %v7062_v56, 2  ;;  %v9945_v1 = vrot.slane %v7153_v11, 7 }
 0x108   :  { %5077 = vrot.lane.b32.xlu1 %v9944_v9, %s5753_s0  ;;  %v4550_v56 = vunpack.i.h.bf16 %v6961_v33  ;;  %v4555_v11 = vunpack.i.h.bf16 %v6968_v15  ;;  %v4559_v32 = vunpack.i.l.bf16 %v6976_v28  ;;  %v4565_v33 = vunpack.i.h.bf16 %v6988_v42 }
 0x109   :  { %v7359_v20 = vpop.permute.xlu0 %4792  ;;  %v7375_v21 = vsel %vm144_vm0, %v9945_v1, 0.0  ;;  %v4560_v1 = vunpack.i.h.bf16 %v6976_v28  ;;  %v7404_v15 = vsel %vm2412_vm3, %v6049_v61, %v4544_v37  ;;  %v9952_v61 = vld [vmem:[#allocation86_spill] sm:$0xff]  ;;  %v4690_v37 = vunpack.i.h.bf16 %v7226_v14 }
 0x10a   :  { %v7370_v12 = vpop.permute.xlu1 %4797  ;;  %9946 = vst [vmem:[#allocation166_spill] sm:$0xff] %v7375_v21  ;;  %v505_v55 = vrot.slane %v7375_v21, 1  ;;  %v9951_v21 = vld [vmem:[#allocation82_spill] sm:$0xff]  ;;  %v7412_v28 = vsel %vm2412_vm3, %v6088_v58, %v4550_v56  ;;  %v574_v56 = vsel %vm508_vm1, %v439_v60, %v472_v62  ;;  %vm3656_vm0 = vcmask 1044484  }
 0x10b   :  { %5082 = vrot.lane.b32.xlu0 %v9947_v50, %s5753_s0  ;;  %v4564_v50 = vunpack.i.l.bf16 %v6988_v42  ;;  %v7416_v42 = vsel %vm2412_vm3, %v6075_v31, %v4549_v43  ;;  %v7441_v43 = vsel %vm2412_vm3, %v6127_v7, %v4559_v32  ;;  %v9955_v7 = vld [vmem:[#allocation89_spill] sm:$0xff] }
 0x10c   :  { %5087 = vrot.lane.b32.xlu1 %v9948_v17, %s5753_s0  ;;  %v4570_v17 = vunpack.i.h.bf16 %v7001_v46  ;;  %v541_v31 = vsel %vm508_vm1, %v472_v62, %v505_v55  ;;  %v4685_v55 = vunpack.i.h.bf16 %v7224_v53  ;;  %vm3658_vm1 = vcmask 1045509  }
 0x10d   :  { %v7393_v2 = vpop.permute.xlu0 %4802  ;;  %v7465_v32 = vpack.i.bf16 %v541_v31, %v574_v56 }
 0x10e   :  { %9949 = vst [vmem:[#allocation167_spill] sm:$0xff] %v7393_v2  ;;  %v7400_v9 = vpop.permute.xlu1 %4807  ;;  %v4569_v2 = vunpack.i.l.bf16 %v7001_v46  ;;  %v7426_v46 = vsel %vm2412_vm3, %v6101_v26, %v4554_v30  ;;  %v7445_v26 = vsel %vm2412_vm3, %v9778_v39, %v4565_v33  ;;  %v7455_v60 = vsel %vm2412_vm3, %v9863_v16, %v4570_v17  ;;  %v9956_v39 = vld [vmem:[#allocation92_spill] sm:$0xff] }
 0x10f   :  { %9950 = vst [vmem:[#allocation168_spill] sm:$0xff] %v7400_v9  ;;  %5092 = vrot.lane.b32.xlu0 %v9951_v21, %s5753_s0  ;;  %v7420_v9 = vsel %vm2412_vm3, %v6098_v40, %v4555_v11  ;;  %v7437_v40 = vsel %vm2412_vm3, %v6124_v27, %v4560_v1  ;;  %v7449_v11 = vsel %vm2412_vm3, %v9777_v54, %v4564_v50  ;;  %9957 = vst [vmem:[#allocation171_spill] sm:$0xff] %v7465_v32 }
 0x110   :  { %5097 = vrot.lane.b32.xlu1 %v9952_v61, %s5753_s0  ;;  %v7459_v27 = vsel %vm2412_vm3, %v9787_v59, %v4569_v2  ;;  %v4680_v50 = vunpack.i.h.bf16 %v7218_v57  ;;  %v4679_v16 = vunpack.i.l.bf16 %v7218_v57  ;;  %v9960_v59 = vld [vmem:[#allocation93_spill] sm:$0xff]  ;;  %v4684_v1 = vunpack.i.l.bf16 %v7224_v53  ;;  %v9962_v61 = vld [vmem:[#allocation95_spill] sm:$0xff] }
 0x111   :  { %v7429_v58 = vpop.permute.xlu0 %4812  ;;  %v9961_v33 = vrot.slane %v7059_v18, 2  ;;  %v4689_v2 = vunpack.i.l.bf16 %v7226_v14  ;;  %v2491_v14 = vsel %vm2475_vm4, %v7345_v36, %v4685_v55 }
 0x112   :  { %9953 = vst [vmem:[#allocation169_spill] sm:$0xff] %v7429_v58  ;;  %v7451_v30 = vpop.permute.xlu1 %4817  ;;  %v2488_v53 = vsel %vm2475_vm4, %v7339_v4, %v4679_v16  ;;  %v2490_v4 = vsel %vm2475_vm4, %v7349_v24, %v4684_v1  ;;  %v4700_v16 = vunpack.i.h.bf16 %v7234_v23  ;;  %v9964_v1 = vld [vmem:[#allocation97_spill] sm:$0xff] }
 0x113   :  { %9954 = vst [vmem:[#allocation170_spill] sm:$0xff] %v7451_v30  ;;  %5102 = vrot.lane.b32.xlu0 %v9955_v7, %s5753_s0  ;;  %v7485_v57 = vsel %vm674_vm2, %v591_v48, %v9961_v33  ;;  %v4695_v48 = vunpack.i.h.bf16 %v7232_v0  ;;  %v4694_v33 = vunpack.i.l.bf16 %v7232_v0  ;;  %v9963_v0 = vld [vmem:[#allocation96_spill] sm:$0xff]  ;;  %v10006_v30 = vld [vmem:[#allocation79_spill] sm:$0xff] }
 0x114   :  { %5107 = vrot.lane.b32.xlu1 %v9956_v39, %s5753_s0 }
 0x115   :  { %v7467_v54 = vpop.permute.xlu0 %4822 }
 0x116   :  { %9958 = vst [vmem:[#allocation172_spill] sm:$0xff] %v7467_v54  ;;  %v7471_v17 = vpop.permute.xlu1 %4827  ;;  %v10004_v54 = vld [vmem:[#allocation77_spill] sm:$0xff] }
 0x117   :  { %9959 = vst [vmem:[#allocation173_spill] sm:$0xff] %v7471_v17  ;;  %5112 = vrot.lane.b32.xlu0 %v9960_v59, %s5753_s0  ;;  %v9999_v17 = vld [vmem:[#allocation30_spill] sm:$0xff] }
 0x118   :  { %5117 = vrot.lane.b32.xlu1 %v7465_v32, %s5753_s0  ;;  %v2489_v32 = vsel %vm2475_vm4, %v7335_v63, %v4680_v50 }
 0x119   :  { %v4833_v62 = vpop.permute.xlu0 %4832 }
 0x11a   :  { %v4835_v59 = vunpack.i.h.bf16 %v4833_v62  ;;  %v4834_v39 = vunpack.i.l.bf16 %v4833_v62  ;;  %v4838_v7 = vpop.permute.xlu1 %4837 }
 0x11b   :  { %v4840_v31 = vunpack.i.h.bf16 %v4838_v7  ;;  %v4839_v56 = vunpack.i.l.bf16 %v4838_v7  ;;  %5122 = vrot.lane.b32.xlu0 %v9962_v61, %s5754_s19  ;;  %v2492_v7 = vsel %vm2475_vm4, %v7357_v38, %v4689_v2  ;;  %v2493_v61 = vsel %vm2475_vm4, %v7353_v51, %v4690_v37 }
 0x11c   :  { %v7504_v63 = vsel %vm2538_vm5, %v2488_v53, %v4834_v39  ;;  %v7507_v50 = vsel %vm2538_vm5, %v2489_v32, %v4835_v59  ;;  %5127 = vrot.lane.b32.xlu1 %v9963_v0, %s5754_s19  ;;  %v4699_v32 = vunpack.i.l.bf16 %v7234_v23  ;;  %v2495_v38 = vsel %vm2475_vm4, %v7363_v29, %v4695_v48  ;;  %v9965_v29 = vld [vmem:[#allocation98_spill] sm:$0xff] }
 0x11d   :  { %v7516_v36 = vsel %vm2538_vm5, %v2490_v4, %v4839_v56  ;;  %v7519_v24 = vsel %vm2538_vm5, %v2491_v14, %v4840_v31  ;;  %v4843_v39 = vpop.permute.xlu0 %4842  ;;  %v2494_v51 = vsel %vm2475_vm4, %v7367_v47, %v4694_v33  ;;  %v4705_v31 = vunpack.i.h.bf16 %v7240_v13 }
 0x11e   :  { %v4845_v59 = vunpack.i.h.bf16 %v4843_v39  ;;  %v4844_v62 = vunpack.i.l.bf16 %v4843_v39  ;;  %v4848_v55 = vpop.permute.xlu1 %4847  ;;  %v4704_v56 = vunpack.i.l.bf16 %v7240_v13  ;;  %v4710_v47 = vunpack.i.h.bf16 %v7242_v45 }
 0x11f   :  { %v4850_v37 = vunpack.i.h.bf16 %v4848_v55  ;;  %v4849_v2 = vunpack.i.l.bf16 %v4848_v55  ;;  %5132 = vrot.lane.b32.xlu0 %v9964_v1, %s5754_s19  ;;  %v4709_v48 = vunpack.i.l.bf16 %v7242_v45  ;;  %v2496_v4 = vsel %vm2475_vm4, %v7404_v15, %v4699_v32  ;;  %v9967_v32 = vld [vmem:[#allocation100_spill] sm:$0xff] }
 0x120   :  { %v7532_v23 = vsel %vm2538_vm5, %v2492_v7, %v4844_v62  ;;  %v7535_v53 = vsel %vm2538_vm5, %v2493_v61, %v4845_v59  ;;  %5137 = vrot.lane.b32.xlu1 %v9965_v29, %s5754_s19  ;;  %v2497_v7 = vsel %vm2475_vm4, %v7379_v3, %v4700_v16  ;;  %v4715_v62 = vunpack.i.h.bf16 %v7248_v35 }
 0x121   :  { %v7542_v33 = vsel %vm2538_vm5, %v2494_v51, %v4849_v2  ;;  %v7545_v14 = vsel %vm2538_vm5, %v2495_v38, %v4850_v37  ;;  %v4853_v13 = vpop.permute.xlu0 %4852  ;;  %v4714_v45 = vunpack.i.l.bf16 %v7248_v35  ;;  %v9966_v2 = vld [vmem:[#allocation99_spill] sm:$0xff]  ;;  %v2499_v38 = vsel %vm2475_vm4, %v7412_v28, %v4705_v31 }
 0x122   :  { %v4855_v61 = vunpack.i.h.bf16 %v4853_v13  ;;  %v4854_v39 = vunpack.i.l.bf16 %v4853_v13  ;;  %v4858_v59 = vpop.permute.xlu1 %4857  ;;  %v2498_v15 = vsel %vm2475_vm4, %v7416_v42, %v4704_v56  ;;  %v2500_v35 = vsel %vm2475_vm4, %v7426_v46, %v4709_v48 }
 0x123   :  { %v4860_v55 = vunpack.i.h.bf16 %v4858_v59  ;;  %v4859_v51 = vunpack.i.l.bf16 %v4858_v59  ;;  %5142 = vrot.lane.b32.xlu0 %v9966_v2, %s5754_s19  ;;  %v2501_v37 = vsel %vm2475_vm4, %v7420_v9, %v4710_v47  ;;  %v4720_v56 = vunpack.i.h.bf16 %v7250_v34 }
 0x124   :  { %v7560_v3 = vsel %vm2538_vm5, %v2496_v4, %v4854_v39  ;;  %v7563_v16 = vsel %vm2538_vm5, %v2497_v7, %v4855_v61  ;;  %5147 = vrot.lane.b32.xlu1 %v9967_v32, %s5754_s19  ;;  %v4719_v13 = vunpack.i.l.bf16 %v7250_v34  ;;  %v2503_v46 = vsel %vm2475_vm4, %v7437_v40, %v4715_v62  ;;  %v9968_v39 = vld [vmem:[#allocation101_spill] sm:$0xff]  ;;  %v9969_v40 = vld [vmem:[#allocation102_spill] sm:$0xff] }
 0x125   :  { %v7572_v28 = vsel %vm2538_vm5, %v2498_v15, %v4859_v51  ;;  %v7575_v42 = vsel %vm2538_vm5, %v2499_v38, %v4860_v55  ;;  %v4863_v31 = vpop.permute.xlu0 %4862  ;;  %v2502_v9 = vsel %vm2475_vm4, %v7441_v43, %v4714_v45  ;;  %v4725_v59 = vunpack.i.h.bf16 %v7263_v44 }
 0x126   :  { %v4865_v4 = vunpack.i.h.bf16 %v4863_v31  ;;  %v4864_v7 = vunpack.i.l.bf16 %v4863_v31  ;;  %v4868_v61 = vpop.permute.xlu1 %4867  ;;  %v4724_v55 = vunpack.i.l.bf16 %v7263_v44  ;;  %v4604_v43 = vunpack.i.l.bf16 %v7084_v49 }
 0x127   :  { %v4870_v47 = vunpack.i.h.bf16 %v4868_v61  ;;  %v4869_v48 = vunpack.i.l.bf16 %v4868_v61  ;;  %5152 = vrot.lane.b32.xlu0 %v9968_v39, %s5754_s19  ;;  %v9970_v44 = vrot.slane %v7255_v22, 2  ;;  %v9971_v15 = vrot.slane %v7059_v18, 2  ;;  %v9972_v18 = vld [vmem:[#allocation103_spill] sm:$0xff]  ;;  %v10017_v39 = vld [vmem:[#allocation161_spill] sm:$0xff] }
 0x128   :  { %v7588_v34 = vsel %vm2538_vm5, %v2500_v35, %v4864_v7  ;;  %v7591_v51 = vsel %vm2538_vm5, %v2501_v37, %v4865_v4  ;;  %5157 = vrot.lane.b32.xlu1 %v9969_v40, %s5754_s19  ;;  %v4610_v37 = vunpack.i.h.bf16 %v7090_v5  ;;  %v4609_v31 = vunpack.i.l.bf16 %v7090_v5 }
 0x129   :  { %v7597_v62 = vsel %vm2538_vm5, %v2502_v9, %v4869_v48  ;;  %v7600_v45 = vsel %vm2538_vm5, %v2503_v46, %v4870_v47  ;;  %v4873_v38 = vpop.permute.xlu0 %4872  ;;  %v691_v35 = vsel %vm674_vm2, %v9971_v15, %v9970_v44  ;;  %v2504_v9 = vsel %vm2475_vm4, %v7449_v11, %v4719_v13  ;;  %v9974_v11 = vld [vmem:[#allocation26_spill] sm:$0xff]  ;;  %v9980_v15 = vld [vmem:[#allocation132_spill] sm:$0xff] }
 0x12a   :  { %v4875_v4 = vunpack.i.h.bf16 %v4873_v38  ;;  %v4874_v7 = vunpack.i.l.bf16 %v4873_v38  ;;  %v4878_v61 = vpop.permute.xlu1 %4877  ;;  %v2505_v46 = vsel %vm2475_vm4, %v7445_v26, %v4720_v56  ;;  %v2507_v48 = vsel %vm2475_vm4, %v7455_v60, %v4725_v59 }
 0x12b   :  { %v4880_v47 = vunpack.i.h.bf16 %v4878_v61  ;;  %v4879_v22 = vunpack.i.l.bf16 %v4878_v61  ;;  %5162 = vrot.lane.b32.xlu0 %v9972_v18, %s5754_s19  ;;  %v2506_v5 = vsel %vm2475_vm4, %v7459_v27, %v4724_v55  ;;  %v9978_v60 = vunpack.i.h.bf16 %v7078_v52  ;;  %v10018_v18 = vld [vmem:[#allocation34_spill] sm:$0xff] }
 0x12c   :  { %v7621_v38 = vsel %vm2538_vm5, %v2504_v9, %v4874_v7  ;;  %v7624_v44 = vsel %vm2538_vm5, %v2505_v46, %v4875_v4  ;;  %5167 = vrot.lane.b32.xlu1 %v9974_v11, %s5754_s19  ;;  %v9979_v59 = vunpack.i.l.bf16 %v7078_v52  ;;  %v4615_v4 = vunpack.i.h.bf16 %v9980_v15  ;;  %v9983_v46 = vld [vmem:[#allocation61_spill] sm:$0xff] }
 0x12d   :  { %9973 = vst [vmem:[#allocation95_spill] sm:$0xff] %v7624_v44  ;;  %v7629_v26 = vsel %vm2538_vm5, %v2506_v5, %v4879_v22  ;;  %v7632_v56 = vsel %vm2538_vm5, %v2507_v48, %v4880_v47  ;;  %v7634_v13 = vpop.permute.xlu0 %4882  ;;  %v2456_v27 = vsel %vm2412_vm3, %v9881_v41, %v9978_v60  ;;  %v4614_v7 = vunpack.i.l.bf16 %v9980_v15  ;;  %v9984_v22 = vld [vmem:[#allocation60_spill] sm:$0xff]  ;;  %v9985_v41 = vld [vmem:[#allocation133_spill] sm:$0xff]  ;;  %v9988_v60 = vld [vmem:[#allocation66_spill] sm:$0xff] }
 0x12e   :  { %9975 = vst [vmem:[#allocation96_spill] sm:$0xff] %v7629_v26  ;;  %9976 = vst [vmem:[#allocation97_spill] sm:$0xff] %v7632_v56  ;;  %v2455_v55 = vsel %vm2412_vm3, %v9880_v8, %v9979_v59  ;;  %v7646_v61 = vpop.permute.xlu1 %4887  ;;  %v9982_v9 = vunpack.i.h.bf16 %v7084_v49  ;;  %v2457_v48 = vsel %vm2412_vm3, %v9984_v22, %v4604_v43  ;;  %v4620_v5 = vunpack.i.h.bf16 %v9985_v41  ;;  %v9986_v52 = vld [vmem:[#allocation29_spill] sm:$0xff]  ;;  %v9989_v15 = vld [vmem:[#allocation64_spill] sm:$0xff] }
 0x12f   :  { %9977 = vst [vmem:[#allocation174_spill] sm:$0xff] %v7634_v13  ;;  %9981 = vst [vmem:[#allocation132_spill] sm:$0xff] %v7646_v61  ;;  %5172 = vrot.lane.b32.xlu0 %v9986_v52, %s5754_s19  ;;  %v7658_v8 = vpack.i.bf16 %v691_v35, %v7485_v57  ;;  %v2460_v59 = vsel %vm2412_vm3, %v9988_v60, %v4610_v37  ;;  %v2459_v49 = vsel %vm2412_vm3, %v9989_v15, %v4609_v31  ;;  %v9991_v43 = vld [vmem:[#allocation58_spill] sm:$0xff]  ;;  %v9993_v52 = vld [vmem:[#allocation69_spill] sm:$0xff] }
 0x130   :  { %v2458_v47 = vsel %vm2412_vm3, %v9983_v46, %v9982_v9  ;;  %v4619_v21 = vunpack.i.l.bf16 %v9985_v41  ;;  %v9990_v9 = vld [vmem:[#allocation28_spill] sm:$0xff]  ;;  %v4625_v46 = vunpack.i.h.bf16 %v9991_v43  ;;  %v4624_v22 = vunpack.i.l.bf16 %v9991_v43  ;;  %v9995_v60 = vld [vmem:[#allocation137_spill] sm:$0xff]  ;;  %v9998_v13 = vld [vmem:[#allocation139_spill] sm:$0xff] }
 0x131   :  { %9987 = vst [vmem:[#allocation61_spill] sm:$0xff] %v7658_v8  ;;  %5177 = vrot.lane.b32.xlu1 %v9990_v9, %s5754_s19  ;;  %v7669_v11 = vpop.permute.xlu0 %4892  ;;  %v2462_v57 = vsel %vm2412_vm3, %v9993_v52, %v4615_v4  ;;  %v9994_v35 = vld [vmem:[#allocation68_spill] sm:$0xff]  ;;  %v4630_v61 = vunpack.i.h.bf16 %v9995_v60  ;;  %v4629_v31 = vunpack.i.l.bf16 %v9995_v60  ;;  %v4635_v43 = vunpack.i.h.bf16 %v9998_v13  ;;  %v10000_v4 = vld [vmem:[#allocation73_spill] sm:$0xff] }
 0x132   :  { %9992 = vst [vmem:[#allocation60_spill] sm:$0xff] %v7669_v11  ;;  %v2461_v37 = vsel %vm2412_vm3, %v9994_v35, %v4614_v7  ;;  %v7677_v41 = vpop.permute.xlu1 %4897  ;;  %v9997_v15 = vld [vmem:[#allocation72_spill] sm:$0xff]  ;;  %v4634_v11 = vunpack.i.l.bf16 %v9998_v13  ;;  %v7689_v7 = vsel %vm2412_vm3, %v10000_v4, %v4619_v21  ;;  %v10001_v52 = vld [vmem:[#allocation141_spill] sm:$0xff]  ;;  %v7701_v13 = vsel %vm2412_vm3, %v10004_v54, %v4624_v22 }
 0x133   :  { %9996 = vst [vmem:[#allocation133_spill] sm:$0xff] %v7677_v41  ;;  %v7681_v9 = vsel %vm2412_vm3, %v9997_v15, %v4620_v5  ;;  %5182 = vrot.lane.b32.xlu0 %v9999_v17, %s5754_s19  ;;  %v4640_v35 = vunpack.i.h.bf16 %v10001_v52  ;;  %v4639_v60 = vunpack.i.l.bf16 %v10001_v52  ;;  %v10002_v41 = vld [vmem:[#allocation38_spill] sm:$0xff]  ;;  %v10003_v5 = vld [vmem:[#allocation76_spill] sm:$0xff]  ;;  %v7707_v21 = vsel %vm2412_vm3, %v10006_v30, %v4630_v61  ;;  %v10011_v30 = vld [vmem:[#allocation33_spill] sm:$0xff] }
 0x134   :  { %v7697_v15 = vsel %vm2412_vm3, %v10003_v5, %v4625_v46  ;;  %v10007_v4 = vld [vmem:[#allocation80_spill] sm:$0xff]  ;;  %v4755_v22 = vunpack.i.h.bf16 %v7294_v25  ;;  %v10012_v61 = vld [vmem:[#allocation87_spill] sm:$0xff]  ;;  %v4770_v32 = vunpack.i.h.bf16 %v10017_v39 }
 0x135   :  { %5187 = vrot.lane.b32.xlu1 %v10002_v41, %s5754_s19  ;;  %v7703_v17 = vpop.permute.xlu0 %4902  ;;  %v7711_v52 = vsel %vm2412_vm3, %v10007_v4, %v4629_v31  ;;  %v10009_v41 = vld [vmem:[#allocation83_spill] sm:$0xff]  ;;  %v10010_v5 = vld [vmem:[#allocation84_spill] sm:$0xff]  ;;  %v7729_v31 = vsel %vm2412_vm3, %v10012_v61, %v4640_v35 }
 0x136   :  { %10005 = vst [vmem:[#allocation66_spill] sm:$0xff] %v7703_v17  ;;  %v7713_v58 = vpop.permute.xlu1 %4907  ;;  %v7717_v46 = vsel %vm2412_vm3, %v10009_v41, %v4635_v43  ;;  %v7721_v54 = vsel %vm2412_vm3, %v10010_v5, %v4634_v11  ;;  %v4754_v17 = vunpack.i.l.bf16 %v7294_v25  ;;  %v10013_v4 = vld [vmem:[#allocation88_spill] sm:$0xff] }
 0x137   :  { %10008 = vst [vmem:[#allocation64_spill] sm:$0xff] %v7713_v58  ;;  %5192 = vrot.lane.b32.xlu0 %v10011_v30, %s5754_s19  ;;  %v7733_v58 = vsel %vm2412_vm3, %v10013_v4, %v4639_v60  ;;  %v10014_v41 = vld [vmem:[#allocation160_spill] sm:$0xff]  ;;  %v10016_v30 = vld [vmem:[#allocation43_spill] sm:$0xff]  ;;  %v4769_v60 = vunpack.i.l.bf16 %v10017_v39 }
 0x138   :  { %v4760_v43 = vunpack.i.h.bf16 %v10014_v41  ;;  %v4759_v11 = vunpack.i.l.bf16 %v10014_v41  ;;  %v10015_v5 = vld [vmem:[#allocation144_spill] sm:$0xff]  ;;  %v4765_v40 = vunpack.i.h.bf16 %v10016_v30  ;;  %v4764_v35 = vunpack.i.l.bf16 %v10016_v30 }
 0x139   :  { %5197 = vrot.lane.b32.xlu1 %v7658_v8, %s5754_s19  ;;  %v4913_v61 = vpop.permute.xlu0 %4912  ;;  %v2519_v41 = vsel %vm2475_vm4, %v2456_v27, %v4755_v22  ;;  %v2518_v8 = vsel %vm2475_vm4, %v2455_v55, %v4754_v17 }
 0x13a   :  { %v4915_v4 = vunpack.i.h.bf16 %v4913_v61  ;;  %v4914_v2 = vunpack.i.l.bf16 %v4913_v61  ;;  %v4918_v29 = vpop.permute.xlu1 %4917  ;;  %v2520_v26 = vsel %vm2475_vm4, %v2457_v48, %v4759_v11  ;;  %v2521_v30 = vsel %vm2475_vm4, %v2458_v47, %v4760_v43  ;;  %v10019_v61 = vld [vmem:[#allocation46_spill] sm:$0xff] }
 0x13b   :  { %v4920_v56 = vunpack.i.h.bf16 %v4918_v29  ;;  %v4919_v25 = vunpack.i.l.bf16 %v4918_v29  ;;  %5202 = vrot.lane.b32.xlu0 %v10018_v18, %s5754_s19  ;;  %v2523_v17 = vsel %vm2475_vm4, %v2460_v59, %v4765_v40  ;;  %v2522_v29 = vsel %vm2475_vm4, %v2459_v49, %v4764_v35  ;;  %v10020_v43 = vld [vmem:[#allocation162_spill] sm:$0xff] }
 0x13c   :  { %v7752_v44 = vsel %vm2538_vm5, %v2518_v8, %v4914_v2  ;;  %v7755_v39 = vsel %vm2538_vm5, %v2519_v41, %v4915_v4  ;;  %v2524_v2 = vsel %vm2475_vm4, %v2461_v37, %v4769_v60  ;;  %v2525_v47 = vsel %vm2475_vm4, %v2462_v57, %v4770_v32  ;;  %v10024_v57 = vld [vmem:[#allocation54_spill] sm:$0xff]  ;;  %v10025_v60 = vld [vmem:[#allocation164_spill] sm:$0xff] }
 0x13d   :  { %5207 = vrot.lane.b32.xlu1 %v10019_v61, %s5754_s19  ;;  %v7762_v27 = vsel %vm2538_vm5, %v2520_v26, %v4919_v25  ;;  %v7765_v18 = vsel %vm2538_vm5, %v2521_v30, %v4920_v56  ;;  %v4923_v55 = vpop.permute.xlu0 %4922  ;;  %v4775_v11 = vunpack.i.h.bf16 %v10020_v43  ;;  %v4774_v40 = vunpack.i.l.bf16 %v10020_v43  ;;  %v10021_v26 = vld [vmem:[#allocation51_spill] sm:$0xff]  ;;  %v10026_v43 = vld [vmem:[#allocation165_spill] sm:$0xff] }
 0x13e   :  { %v4925_v48 = vunpack.i.h.bf16 %v4923_v55  ;;  %v4924_v8 = vunpack.i.l.bf16 %v4923_v55  ;;  %v4928_v22 = vpop.permute.xlu1 %4927  ;;  %v10022_v25 = vld [vmem:[#allocation163_spill] sm:$0xff]  ;;  %v4785_v4 = vunpack.i.h.bf16 %v10025_v60  ;;  %v4784_v41 = vunpack.i.l.bf16 %v10025_v60 }
 0x13f   :  { %v4930_v59 = vunpack.i.h.bf16 %v4928_v22  ;;  %v4929_v49 = vunpack.i.l.bf16 %v4928_v22  ;;  %5212 = vrot.lane.b32.xlu0 %v10021_v26, %s5754_s19  ;;  %v4780_v56 = vunpack.i.h.bf16 %v10022_v25  ;;  %v4779_v35 = vunpack.i.l.bf16 %v10022_v25 }
 0x140   :  { %v7776_v37 = vsel %vm2538_vm5, %v2522_v29, %v4924_v8  ;;  %v7779_v32 = vsel %vm2538_vm5, %v2523_v17, %v4925_v48  ;;  %v4790_v29 = vunpack.i.h.bf16 %v10026_v43  ;;  %v4789_v8 = vunpack.i.l.bf16 %v10026_v43 }
 0x141   :  { %10023 = vst [vmem:[#allocation58_spill] sm:$0xff] %v7779_v32  ;;  %5217 = vrot.lane.b32.xlu1 %v10024_v57, %s5754_s19  ;;  %v7786_v30 = vsel %vm2538_vm5, %v2524_v2, %v4929_v49  ;;  %v7789_v55 = vsel %vm2538_vm5, %v2525_v47, %v4930_v59  ;;  %v4933_v22 = vpop.permute.xlu0 %4932  ;;  %v2527_v57 = vsel %vm2475_vm4, %v7681_v9, %v4775_v11  ;;  %v10027_v49 = vld [vmem:[#allocation67_spill] sm:$0xff]  ;;  %v10028_v9 = vld [vmem:[#allocation70_spill] sm:$0xff] }
 0x142   :  { %v4935_v17 = vunpack.i.h.bf16 %v4933_v22  ;;  %v4934_v48 = vunpack.i.l.bf16 %v4933_v22  ;;  %v4938_v25 = vpop.permute.xlu1 %4937  ;;  %v2526_v60 = vsel %vm2475_vm4, %v7689_v7, %v4774_v40  ;;  %v2528_v47 = vsel %vm2475_vm4, %v7701_v13, %v4779_v35 }
 0x143   :  { %v4940_v32 = vunpack.i.h.bf16 %v4938_v25  ;;  %v4939_v2 = vunpack.i.l.bf16 %v4938_v25  ;;  %5222 = vrot.lane.b32.xlu0 %v10027_v49, %s5754_s19  ;;  %v2529_v59 = vsel %vm2475_vm4, %v7697_v15, %v4780_v56  ;;  %v2531_v7 = vsel %vm2475_vm4, %v7707_v21, %v4785_v4  ;;  %v10029_v25 = vld [vmem:[#allocation104_spill] sm:$0xff] }
 0x144   :  { %v7804_v22 = vsel %vm2538_vm5, %v2526_v60, %v4934_v48  ;;  %v7807_v43 = vsel %vm2538_vm5, %v2527_v57, %v4935_v17  ;;  %v2530_v11 = vsel %vm2475_vm4, %v7711_v52, %v4784_v41  ;;  %v2532_v56 = vsel %vm2475_vm4, %v7721_v54, %v4789_v8 }
 0x145   :  { %5227 = vrot.lane.b32.xlu1 %v10028_v9, %s5754_s19  ;;  %v7816_v13 = vsel %vm2538_vm5, %v2528_v47, %v4939_v2  ;;  %v7819_v15 = vsel %vm2538_vm5, %v2529_v59, %v4940_v32  ;;  %v4943_v40 = vpop.permute.xlu0 %4942  ;;  %v2533_v35 = vsel %vm2475_vm4, %v7717_v46, %v4790_v29  ;;  %v4795_v21 = vunpack.i.h.bf16 %v7359_v20  ;;  %v10030_v29 = vld [vmem:[#allocation106_spill] sm:$0xff] }
 0x146   :  { %v4945_v57 = vunpack.i.h.bf16 %v4943_v40  ;;  %v4944_v17 = vunpack.i.l.bf16 %v4943_v40  ;;  %v4948_v48 = vpop.permute.xlu1 %4947  ;;  %v4794_v52 = vunpack.i.l.bf16 %v7359_v20  ;;  %v4800_v32 = vunpack.i.h.bf16 %v7370_v12  ;;  %v10032_v59 = vld [vmem:[#allocation90_spill] sm:$0xff]  ;;  %v10034_v40 = vld [vmem:[#allocation91_spill] sm:$0xff] }
 0x147   :  { %v4950_v4 = vunpack.i.h.bf16 %v4948_v48  ;;  %v4949_v41 = vunpack.i.l.bf16 %v4948_v48  ;;  %5232 = vrot.lane.b32.xlu0 %v10029_v25, %s5754_s19  ;;  %v4799_v60 = vunpack.i.l.bf16 %v7370_v12  ;;  %v10031_v47 = vunpack.i.h.bf16 %v10015_v5 }
 0x148   :  { %v7832_v54 = vsel %vm2538_vm5, %v2530_v11, %v4944_v17  ;;  %v7835_v46 = vsel %vm2538_vm5, %v2531_v7, %v4945_v57  ;;  %v10033_v11 = vunpack.i.l.bf16 %v10015_v5 }
 0x149   :  { %5237 = vrot.lane.b32.xlu1 %v10030_v29, %s5754_s19  ;;  %v7840_v20 = vsel %vm2538_vm5, %v2532_v56, %v4949_v41  ;;  %v7843_v8 = vsel %vm2538_vm5, %v2533_v35, %v4950_v4  ;;  %v4953_v2 = vpop.permute.xlu0 %4952  ;;  %v2474_v12 = vsel %vm2412_vm3, %v10032_v59, %v10031_v47  ;;  %v2535_v56 = vsel %vm2475_vm4, %v7729_v31, %v4795_v21  ;;  %v10035_v29 = vld [vmem:[#allocation107_spill] sm:$0xff]  ;;  %v10036_v31 = vld [vmem:[#allocation85_spill] sm:$0xff] }
 0x14a   :  { %v2473_v7 = vsel %vm2412_vm3, %v10034_v40, %v10033_v11  ;;  %v4955_v57 = vunpack.i.h.bf16 %v4953_v2  ;;  %v4954_v17 = vunpack.i.l.bf16 %v4953_v2  ;;  %v4958_v48 = vpop.permute.xlu1 %4957  ;;  %v2534_v35 = vsel %vm2475_vm4, %v7733_v58, %v4794_v52  ;;  %v10040_v40 = vld [vmem:[#allocation108_spill] sm:$0xff] }
 0x14b   :  { %v4960_v4 = vunpack.i.h.bf16 %v4958_v48  ;;  %v4959_v41 = vunpack.i.l.bf16 %v4958_v48  ;;  %5242 = vrot.lane.b32.xlu0 %v10035_v29, %s5754_s19  ;;  %v2536_v47 = vsel %vm2475_vm4, %v2473_v7, %v4799_v60  ;;  %v2537_v5 = vsel %vm2475_vm4, %v2474_v12, %v4800_v32  ;;  %v10038_v32 = vld [vmem:[#allocation166_spill] sm:$0xff]  ;;  %v10041_v7 = vld [vmem:[#allocation109_spill] sm:$0xff] }
 0x14c   :  { %v7862_v59 = vsel %vm2538_vm5, %v2534_v35, %v4954_v17  ;;  %v7865_v2 = vsel %vm2538_vm5, %v2535_v56, %v4955_v57  ;;  %v640_v58 = vrot.slane %v7189_v19, 2  ;;  %v673_v12 = vrot.slane %v10038_v32, 2  ;;  %v5746_v35 = vld [vmem:[%s9346_s1] sm:$0xff]  }
 0x14d   :  { %5247 = vrot.lane.b32.xlu1 %v10036_v31, %s5754_s19  ;;  %v7871_v21 = vsel %vm2538_vm5, %v2536_v47, %v4959_v41  ;;  %v7874_v52 = vsel %vm2538_vm5, %v2537_v5, %v4960_v4  ;;  %v7876_v60 = vpop.permute.xlu0 %4962  ;;  %v10043_v17 = vrot.slane %v7192_v10, 2  ;;  %v10045_v4 = vld [vmem:[#allocation110_spill] sm:$0xff]  ;;  %v10046_v41 = vld [vmem:[#allocation111_spill] sm:$0xff]  ;;  %4404 = vmatprep.subr.bf16.mxu0 %v5746_v35 }
 0x14e   :  { %10037 = vst [vmem:[#allocation69_spill] sm:$0xff] %v7876_v60  ;;  %v7879_v11 = vpop.permute.xlu1 %4967  ;;  %v707_v19 = vsel %vm674_vm2, %v640_v58, %v673_v12  ;;  %4405 = vmatpush3.bf16.msra.mxu0 %v5746_v35  ;;  %4474 = vmatprep.subr.bf16.mxu1 %v5746_v35  ;;  %v5747_v10 = vld [vmem:[%s9346_s1 + $0x8] sm:$0xff]  }
 0x14f   :  { %10039 = vst [vmem:[#allocation68_spill] sm:$0xff] %v7879_v11  ;;  %5252 = vrot.lane.b32.xlu0 %v10040_v40, %s5754_s19  ;;  %v740_v48 = vsel %vm674_vm2, %v10043_v17, %v640_v58  ;;  %4477 = vmatpush3.bf16.msra.mxu1 %v5746_v35  ;;  %v10050_v58 = vld [vmem:[#allocation112_spill] sm:$0xff]  ;;  %v10055_v31 = vld [vmem:[#allocation115_spill] sm:$0xff]  ;;  %vm3660_vm2 = vcmask 1046534  }
 0x150   :  { %v7902_v47 = vpack.i.bf16 %v707_v19, %v740_v48  ;;  %4406 = vmatprep.subr.bf16.mxu0 %v5747_v10  ;;  %4475 = vmatprep.subr.bf16.mxu1 %v5747_v10  ;;  %v5748_v48 = vld [vmem:[%s9346_s1 + $0x10] ss:$0 sps:$4 sm:$0x33]   ;;  %s5756_s1 = smov 28  }
 0x151   :  { %5257 = vrot.lane.b32.xlu1 %v10041_v7, %s5754_s19  ;;  %v7885_v57 = vpop.permute.xlu0 %4972 }
 0x152   :  { %10042 = vst [vmem:[#allocation137_spill] sm:$0xff] %v7885_v57  ;;  %v7893_v56 = vpop.permute.xlu1 %4977  ;;  %10047 = vst [vmem:[#allocation139_spill] sm:$0xff] %v7902_v47  ;;  %4407 = vmatpush3.bf16.msra.mxu0 %v5747_v10  ;;  %v10062_v57 = vld [vmem:[#allocation95_spill] sm:$0xff] }
 0x153   :  { %10044 = vst [vmem:[#allocation72_spill] sm:$0xff] %v7893_v56  ;;  %5262 = vrot.lane.b32.xlu0 %v10045_v4, %s5754_s19  ;;  %4478 = vmatpush3.bf16.msra.mxu1 %v5747_v10  ;;  %v10054_v10 = vld [vmem:[#allocation41_spill] sm:$0xff] }
 0x154   :  { %4480 = vmatprep.subr.msk.bf16.mxu0 %vm3077_vm7, %v5748_v48  ;;  %4481 = vmatprep.subr.msk.bf16.mxu1 %vm3077_vm7, %v5748_v48 }
 0x155   :  { %5267 = vrot.lane.b32.xlu1 %v10046_v41, %s5754_s19  ;;  %v7904_v5 = vpop.permute.xlu0 %4982 }
 0x156   :  { %10048 = vst [vmem:[#allocation73_spill] sm:$0xff] %v7904_v5  ;;  %v7906_v6 = vpop.permute.xlu1 %4987  ;;  %v10053_v5 = vld [vmem:[#allocation16_spill] sm:$0xff] }
 0x157   :  { %10049 = vst [vmem:[#allocation141_spill] sm:$0xff] %v7906_v6  ;;  %5272 = vrot.lane.b32.xlu0 %v10050_v58, %s5754_s19  ;;  %v10051_v58 = vld [vmem:[#allocation113_spill] sm:$0xff]  ;;  %v10052_v6 = vld [vmem:[#allocation114_spill] sm:$0xff]  ;;  %v5296_v4 = vpack.i.bf16 %v10054_v10, %v10053_v5 }
 0x159   :  { %5277 = vrot.lane.b32.xlu1 %v7902_v47, %s5754_s19  ;;  %v4993_v32 = vpop.permute.xlu0 %4992 }
 0x15a   :  { %v4995_v12 = vunpack.i.h.bf16 %v4993_v32  ;;  %v4994_v19 = vunpack.i.l.bf16 %v4993_v32  ;;  %v4998_v17 = vpop.permute.xlu1 %4997 }
 0x15b   :  { %v5000_v35 = vunpack.i.h.bf16 %v4998_v17  ;;  %v4999_v41 = vunpack.i.l.bf16 %v4998_v17  ;;  %5282 = vrot.lane.b32.xlu0 %v10051_v58, %s5755_s26  ;;  %v3079_v17 = vsel %vm3077_vm7, %v5748_v48, 0 }
 0x15c   :  { %v7922_v47 = vsel %vm2603_vm6, %v7504_v63, %v4994_v19  ;;  %v7926_v32 = vsel %vm2603_vm6, %v7507_v50, %v4995_v12  ;;  %4409 = vmatpush3.bf16.msra.mxu0 %v3079_v17  ;;  %4479 = vmatpush3.bf16.msra.mxu1 %v3079_v17 }
 0x15d   :  { %5287 = vrot.lane.b32.xlu1 %v10052_v6, %s5755_s26  ;;  %v7934_v58 = vsel %vm2603_vm6, %v7516_v36, %v4999_v41  ;;  %v7938_v63 = vsel %vm2603_vm6, %v7519_v24, %v5000_v35  ;;  %v5003_v19 = vpop.permute.xlu0 %5002 }
 0x15e   :  { %v5005_v50 = vunpack.i.h.bf16 %v5003_v19  ;;  %v5004_v12 = vunpack.i.l.bf16 %v5003_v19  ;;  %v5008_v7 = vpop.permute.xlu1 %5007 }
 0x15f   :  { %v5010_v6 = vunpack.i.h.bf16 %v5008_v7  ;;  %v5009_v40 = vunpack.i.l.bf16 %v5008_v7  ;;  %5292 = vrot.lane.b32.xlu0 %v10055_v31, %s5755_s26 }
 0x160   :  { %v7944_v36 = vsel %vm2603_vm6, %v7532_v23, %v5004_v12  ;;  %v7948_v24 = vsel %vm2603_vm6, %v7535_v53, %v5005_v50  ;;  %v10056_v53 = vld [vmem:[#allocation9_spill] sm:$0xff] }
 0x161   :  { %5297 = vrot.lane.b32.xlu1 %v5296_v4, %s5755_s26  ;;  %v7953_v41 = vsel %vm2603_vm6, %v7542_v33, %v5009_v40  ;;  %v7957_v7 = vsel %vm2603_vm6, %v7545_v14, %v5010_v6  ;;  %v5013_v48 = vpop.permute.xlu0 %5012  ;;  %v10057_v14 = vld [vmem:[#allocation15_spill] sm:$0xff] }
 0x162   :  { %v5015_v31 = vunpack.i.h.bf16 %v5013_v48  ;;  %v5014_v35 = vunpack.i.l.bf16 %v5013_v48  ;;  %v5018_v17 = vpop.permute.xlu1 %5017 }
 0x163   :  { %v5020_v23 = vunpack.i.h.bf16 %v5018_v17  ;;  %v5019_v19 = vunpack.i.l.bf16 %v5018_v17  ;;  %5302 = vrot.lane.b32.xlu0 %v10056_v53, %s5756_s1 }
 0x164   :  { %v7963_v4 = vsel %vm2603_vm6, %v7560_v3, %v5014_v35  ;;  %v7967_v33 = vsel %vm2603_vm6, %v7563_v16, %v5015_v31  ;;  %v10058_v16 = vld [vmem:[#allocation40_spill] sm:$0xff]  ;;  %v10059_v31 = vld [vmem:[#allocation45_spill] sm:$0xff] }
 0x165   :  { %5307 = vrot.lane.b32.xlu1 %v10057_v14, %s5756_s1  ;;  %v7973_v40 = vsel %vm2603_vm6, %v7572_v28, %v5019_v19  ;;  %v7977_v50 = vsel %vm2603_vm6, %v7575_v42, %v5020_v23  ;;  %v5023_v12 = vpop.permute.xlu0 %5022  ;;  %v5321_v53 = vpack.i.bf16 %v10059_v31, %v10058_v16  ;;  %v10060_v23 = vld [vmem:[#allocation44_spill] sm:$0xff]  ;;  %v10061_v19 = vld [vmem:[#allocation17_spill] sm:$0xff] }
 0x166   :  { %v5025_v6 = vunpack.i.h.bf16 %v5023_v12  ;;  %v5024_v48 = vunpack.i.l.bf16 %v5023_v12  ;;  %v5028_v3 = vpop.permute.xlu1 %5027  ;;  %v5326_v14 = vpack.i.bf16 %v10061_v19, %v10060_v23 }
 0x167   :  { %v5030_v35 = vunpack.i.h.bf16 %v5028_v3  ;;  %v5029_v17 = vunpack.i.l.bf16 %v5028_v3  ;;  %5312 = vrot.lane.b32.xlu0 %v9963_v0, %s5757_s27 }
 0x168   :  { %v7985_v28 = vsel %vm2603_vm6, %v7588_v34, %v5024_v48  ;;  %v7989_v42 = vsel %vm2603_vm6, %v7591_v51, %v5025_v6 }
 0x169   :  { %5317 = vrot.lane.b32.xlu1 %v9964_v1, %s5757_s27  ;;  %v7997_v0 = vsel %vm2603_vm6, %v7597_v62, %v5029_v17  ;;  %v8001_v12 = vsel %vm2603_vm6, %v7600_v45, %v5030_v35  ;;  %v5033_v34 = vpop.permute.xlu0 %5032  ;;  %v10063_v45 = vld [vmem:[#allocation96_spill] sm:$0xff]  ;;  %v10064_v17 = vld [vmem:[#allocation97_spill] sm:$0xff] }
 0x16a   :  { %v5035_v48 = vunpack.i.h.bf16 %v5033_v34  ;;  %v5034_v3 = vunpack.i.l.bf16 %v5033_v34  ;;  %v5038_v56 = vpop.permute.xlu1 %5037 }
 0x16b   :  { %v5040_v51 = vunpack.i.h.bf16 %v5038_v56  ;;  %v5039_v6 = vunpack.i.l.bf16 %v5038_v56  ;;  %5322 = vrot.lane.b32.xlu0 %v5321_v53, %s5755_s26 }
 0x16c   :  { %v8006_v1 = vsel %vm2603_vm6, %v7621_v38, %v5034_v3  ;;  %v8010_v62 = vsel %vm2603_vm6, %v10062_v57, %v5035_v48  ;;  %v10067_v38 = vld [vmem:[#allocation47_spill] sm:$0xff]  ;;  %v10068_v57 = vld [vmem:[#allocation48_spill] sm:$0xff] }
 0x16d   :  { %5327 = vrot.lane.b32.xlu1 %v5326_v14, %s5755_s26  ;;  %v8015_v35 = vsel %vm2603_vm6, %v10063_v45, %v5039_v6  ;;  %v8019_v34 = vsel %vm2603_vm6, %v10064_v17, %v5040_v51  ;;  %v8021_v56 = vpop.permute.xlu0 %5042  ;;  %v10073_v6 = vld [vmem:[#allocation18_spill] sm:$0xff]  ;;  %v10074_v45 = vld [vmem:[#allocation19_spill] sm:$0xff] }
 0x16e   :  { %10065 = vst [vmem:[#allocation76_spill] sm:$0xff] %v8021_v56  ;;  %v8023_v53 = vpop.permute.xlu1 %5047 }
 0x16f   :  { %10066 = vst [vmem:[#allocation77_spill] sm:$0xff] %v8023_v53  ;;  %5332 = vrot.lane.b32.xlu0 %v10067_v38, %s5756_s1 }
 0x171   :  { %5337 = vrot.lane.b32.xlu1 %v10068_v57, %s5756_s1  ;;  %v8029_v48 = vpop.permute.xlu0 %5052 }
 0x172   :  { %10069 = vst [vmem:[#allocation79_spill] sm:$0xff] %v8029_v48  ;;  %v8031_v14 = vpop.permute.xlu1 %5057 }
 0x173   :  { %10070 = vst [vmem:[#allocation80_spill] sm:$0xff] %v8031_v14  ;;  %5342 = vrot.lane.b32.xlu0 %v10019_v61, %s5757_s27  ;;  %v10075_v61 = vld [vmem:[#allocation98_spill] sm:$0xff] }
 0x175   :  { %5347 = vrot.lane.b32.xlu1 %v10021_v26, %s5757_s27  ;;  %v8037_v3 = vpop.permute.xlu0 %5062 }
 0x176   :  { %10071 = vst [vmem:[#allocation83_spill] sm:$0xff] %v8037_v3  ;;  %v8039_v51 = vpop.permute.xlu1 %5067 }
 0x177   :  { %10072 = vst [vmem:[#allocation84_spill] sm:$0xff] %v8039_v51  ;;  %5352 = vrot.lane.b32.xlu0 %v10073_v6, %s5756_s1  ;;  %v10076_v6 = vld [vmem:[#allocation99_spill] sm:$0xff] }
 0x179   :  { %5357 = vrot.lane.b32.xlu1 %v10074_v45, %s5756_s1  ;;  %v5073_v17 = vpop.permute.xlu0 %5072 }
 0x17a   :  { %v5075_v38 = vunpack.i.h.bf16 %v5073_v17  ;;  %v5074_v57 = vunpack.i.l.bf16 %v5073_v17  ;;  %v5078_v14 = vpop.permute.xlu1 %5077 }
 0x17b   :  { %v5080_v48 = vunpack.i.h.bf16 %v5078_v14  ;;  %v5079_v53 = vunpack.i.l.bf16 %v5078_v14  ;;  %5362 = vrot.lane.b32.xlu0 %v10075_v61, %s5757_s27 }
 0x17c   :  { %v8049_v26 = vsel %vm2603_vm6, %v7752_v44, %v5074_v57  ;;  %v8053_v51 = vsel %vm2603_vm6, %v7755_v39, %v5075_v38  ;;  %v10077_v39 = vld [vmem:[#allocation131_spill] sm:$0xff] }
 0x17d   :  { %5367 = vrot.lane.b32.xlu1 %v10076_v6, %s5757_s27  ;;  %v8059_v45 = vsel %vm2603_vm6, %v7762_v27, %v5079_v53  ;;  %v8063_v14 = vsel %vm2603_vm6, %v7765_v18, %v5080_v48  ;;  %v5083_v17 = vpop.permute.xlu0 %5082  ;;  %v10078_v6 = vld [vmem:[#allocation58_spill] sm:$0xff] }
 0x17e   :  { %v5085_v61 = vunpack.i.h.bf16 %v5083_v17  ;;  %v5084_v3 = vunpack.i.l.bf16 %v5083_v17  ;;  %v5088_v44 = vpop.permute.xlu1 %5087  ;;  %v10079_v18 = vld [vmem:[#allocation134_spill] sm:$0xff] }
 0x17f   :  { %v5090_v57 = vunpack.i.h.bf16 %v5088_v44  ;;  %v5089_v56 = vunpack.i.l.bf16 %v5088_v44  ;;  %5372 = vrot.lane.b32.xlu0 %v10077_v39, %s5755_s26 }
 0x180   :  { %v8069_v38 = vsel %vm2603_vm6, %v7776_v37, %v5084_v3  ;;  %v8073_v27 = vsel %vm2603_vm6, %v10078_v6, %v5085_v61  ;;  %v10080_v61 = vld [vmem:[#allocation55_spill] sm:$0xff] }
 0x181   :  { %5377 = vrot.lane.b32.xlu1 %v10079_v18, %s5755_s26  ;;  %v8079_v53 = vsel %vm2603_vm6, %v7786_v30, %v5089_v56  ;;  %v8083_v48 = vsel %vm2603_vm6, %v7789_v55, %v5090_v57  ;;  %v5093_v17 = vpop.permute.xlu0 %5092  ;;  %v10083_v55 = vld [vmem:[#allocation57_spill] sm:$0xff] }
 0x182   :  { %v5095_v44 = vunpack.i.h.bf16 %v5093_v17  ;;  %v5094_v39 = vunpack.i.l.bf16 %v5093_v17  ;;  %v5098_v37 = vpop.permute.xlu1 %5097 }
 0x183   :  { %v5100_v3 = vunpack.i.h.bf16 %v5098_v37  ;;  %v5099_v11 = vunpack.i.l.bf16 %v5098_v37  ;;  %5382 = vrot.lane.b32.xlu0 %v10080_v61, %s5756_s1 }
 0x184   :  { %v8089_v6 = vsel %vm2603_vm6, %v7804_v22, %v5094_v39  ;;  %v8093_v30 = vsel %vm2603_vm6, %v7807_v43, %v5095_v44  ;;  %v10086_v43 = vld [vmem:[#allocation54_spill] sm:$0xff] }
 0x185   :  { %10081 = vst [vmem:[#allocation87_spill] sm:$0xff] %v8089_v6  ;;  %10082 = vst [vmem:[#allocation88_spill] sm:$0xff] %v8093_v30  ;;  %5387 = vrot.lane.b32.xlu1 %v10083_v55, %s5756_s1  ;;  %v8099_v56 = vsel %vm2603_vm6, %v7816_v13, %v5099_v11  ;;  %v8103_v57 = vsel %vm2603_vm6, %v7819_v15, %v5100_v3  ;;  %v5103_v18 = vpop.permute.xlu0 %5102  ;;  %v10119_v30 = vld [vmem:[#allocation8_spill] sm:$0xff] }
 0x186   :  { %10084 = vst [vmem:[#allocation160_spill] sm:$0xff] %v8099_v56  ;;  %10085 = vst [vmem:[#allocation144_spill] sm:$0xff] %v8103_v57  ;;  %v5105_v17 = vunpack.i.h.bf16 %v5103_v18  ;;  %v5104_v37 = vunpack.i.l.bf16 %v5103_v18  ;;  %v5108_v22 = vpop.permute.xlu1 %5107 }
 0x187   :  { %v5110_v39 = vunpack.i.h.bf16 %v5108_v22  ;;  %v5109_v61 = vunpack.i.l.bf16 %v5108_v22  ;;  %5392 = vrot.lane.b32.xlu0 %v10086_v43, %s5757_s27 }
 0x188   :  { %v8109_v44 = vsel %vm2603_vm6, %v7832_v54, %v5104_v37  ;;  %v8113_v13 = vsel %vm2603_vm6, %v7835_v46, %v5105_v17  ;;  %v10091_v46 = vld [vmem:[#allocation116_spill] sm:$0xff]  ;;  %v10095_v17 = vld [vmem:[#allocation42_spill] sm:$0xff] }
 0x189   :  { %10087 = vst [vmem:[#allocation43_spill] sm:$0xff] %v8109_v44  ;;  %10088 = vst [vmem:[#allocation161_spill] sm:$0xff] %v8113_v13  ;;  %5397 = vrot.lane.b32.xlu1 %v10027_v49, %s5757_s27  ;;  %v8119_v15 = vsel %vm2603_vm6, %v7840_v20, %v5109_v61  ;;  %v8123_v11 = vsel %vm2603_vm6, %v7843_v8, %v5110_v39  ;;  %v5113_v3 = vpop.permute.xlu0 %5112  ;;  %v10094_v8 = vld [vmem:[#allocation117_spill] sm:$0xff]  ;;  %v4495_v39 = vunpack.i.h.bf16 %v10095_v17  ;;  %v10114_v13 = vld [vmem:[#allocation4_spill] sm:$0xff] }
 0x18a   :  { %10089 = vst [vmem:[#allocation34_spill] sm:$0xff] %v8119_v15  ;;  %10090 = vst [vmem:[#allocation46_spill] sm:$0xff] %v8123_v11  ;;  %v5115_v55 = vunpack.i.h.bf16 %v5113_v3  ;;  %v5114_v18 = vunpack.i.l.bf16 %v5113_v3  ;;  %v5118_v54 = vpop.permute.xlu1 %5117  ;;  %v10112_v11 = vld [vmem:[#allocation119_spill] sm:$0xff] }
 0x18b   :  { %v5120_v37 = vunpack.i.h.bf16 %v5118_v54  ;;  %v5119_v22 = vunpack.i.l.bf16 %v5118_v54  ;;  %5402 = vrot.lane.b32.xlu0 %v10091_v46, %s5755_s26  ;;  %v10102_v54 = vld [vmem:[#allocation2_spill] sm:$0xff]  ;;  %v4575_v15 = vunpack.i.h.bf16 %v10112_v11 }
 0x18c   :  { %v8129_v49 = vsel %vm2603_vm6, %v7862_v59, %v5114_v18  ;;  %v8133_v20 = vsel %vm2603_vm6, %v7865_v2, %v5115_v55  ;;  %v4494_v59 = vunpack.i.l.bf16 %v10095_v17  ;;  %v10100_v2 = vld [vmem:[#allocation20_spill] sm:$0xff]  ;;  %v10101_v55 = vld [vmem:[#allocation21_spill] sm:$0xff] }
 0x18d   :  { %10092 = vst [vmem:[#allocation162_spill] sm:$0xff] %v8129_v49  ;;  %10093 = vst [vmem:[#allocation51_spill] sm:$0xff] %v8133_v20  ;;  %5407 = vrot.lane.b32.xlu1 %v10094_v8, %s5755_s26  ;;  %v8140_v61 = vsel %vm2603_vm6, %v7871_v21, %v5119_v22  ;;  %v8144_v43 = vsel %vm2603_vm6, %v7874_v52, %v5120_v37  ;;  %v8146_v3 = vpop.permute.xlu0 %5122  ;;  %v8157_v21 = vsel %vm2412_vm3, %v10102_v54, %v4495_v39  ;;  %v10103_v22 = vld [vmem:[#allocation59_spill] sm:$0xff]  ;;  %v10109_v54 = vld [vmem:[#allocation105_spill] sm:$0xff] }
 0x18e   :  { %10096 = vst [vmem:[#allocation163_spill] sm:$0xff] %v8140_v61  ;;  %10097 = vst [vmem:[#allocation164_spill] sm:$0xff] %v8144_v43  ;;  %v8149_v18 = vpop.permute.xlu1 %5127  ;;  %v4505_v46 = vunpack.i.h.bf16 %v10103_v22  ;;  %v4504_v52 = vunpack.i.l.bf16 %v10103_v22  ;;  %v10105_v8 = vld [vmem:[#allocation3_spill] sm:$0xff]  ;;  %v10107_v43 = vld [vmem:[#allocation74_spill] sm:$0xff]  ;;  %v4515_v20 = vunpack.i.h.bf16 %v10109_v54  ;;  %v4514_v22 = vunpack.i.l.bf16 %v10109_v54 }
 0x18f   :  { %10098 = vst [vmem:[#allocation165_spill] sm:$0xff] %v8146_v3  ;;  %10099 = vst [vmem:[#allocation67_spill] sm:$0xff] %v8149_v18  ;;  %5412 = vrot.lane.b32.xlu0 %v10100_v2, %s5756_s1  ;;  %v8165_v17 = vsel %vm2412_vm3, %v10105_v8, %v4494_v59  ;;  %v10106_v18 = vld [vmem:[#allocation62_spill] sm:$0xff]  ;;  %v4509_v39 = vunpack.i.l.bf16 %v10107_v43  ;;  %v10111_v49 = vld [vmem:[#allocation81_spill] sm:$0xff]  ;;  %v4574_v54 = vunpack.i.l.bf16 %v10112_v11 }
 0x190   :  { %v4500_v3 = vunpack.i.h.bf16 %v10106_v18  ;;  %v4499_v2 = vunpack.i.l.bf16 %v10106_v18  ;;  %v4520_v59 = vunpack.i.h.bf16 %v10111_v49  ;;  %v4519_v8 = vunpack.i.l.bf16 %v10111_v49  ;;  %v10113_v18 = vld [vmem:[#allocation101_spill] sm:$0xff]  ;;  %v10118_v49 = vld [vmem:[#allocation6_spill] sm:$0xff] }
 0x191   :  { %5417 = vrot.lane.b32.xlu1 %v10101_v55, %s5756_s1  ;;  %v8161_v37 = vpop.permute.xlu0 %5132  ;;  %v4510_v55 = vunpack.i.h.bf16 %v10107_v43  ;;  %v10115_v43 = vld [vmem:[#allocation5_spill] sm:$0xff]  ;;  %v10122_v11 = vld [vmem:[#allocation10_spill] sm:$0xff] }
 0x192   :  { %10104 = vst [vmem:[#allocation70_spill] sm:$0xff] %v8161_v37  ;;  %v8170_v61 = vpop.permute.xlu1 %5137  ;;  %v10110_v37 = vld [vmem:[#allocation100_spill] sm:$0xff]  ;;  %v8188_v44 = vsel %vm2412_vm3, %v10115_v43, %v4504_v52  ;;  %v8196_v56 = vsel %vm2412_vm3, %v10118_v49, %v4500_v3  ;;  %v8211_v6 = vsel %vm2412_vm3, %v10122_v11, %v4509_v39  ;;  %v10124_v49 = vld [vmem:[#allocation14_spill] sm:$0xff] }
 0x193   :  { %10108 = vst [vmem:[#allocation104_spill] sm:$0xff] %v8170_v61  ;;  %5422 = vrot.lane.b32.xlu0 %v10110_v37, %s5757_s27  ;;  %v8184_v61 = vsel %vm2412_vm3, %v10114_v13, %v4505_v46  ;;  %v10116_v37 = vld [vmem:[#allocation122_spill] sm:$0xff]  ;;  %v10120_v13 = vld [vmem:[#allocation12_spill] sm:$0xff] }
 0x194   :  { %v4580_v60 = vunpack.i.h.bf16 %v10116_v37  ;;  %v8204_v46 = vsel %vm2412_vm3, %v10120_v13, %v4510_v55  ;;  %v4579_v52 = vunpack.i.l.bf16 %v10116_v37  ;;  %v8225_v55 = vsel %vm2412_vm3, %v10061_v19, %v4520_v59  ;;  %v10126_v39 = vld [vmem:[#allocation36_spill] sm:$0xff] }
 0x195   :  { %5427 = vrot.lane.b32.xlu1 %v10113_v18, %s5757_s27  ;;  %v8192_v57 = vpop.permute.xlu0 %5142  ;;  %v8200_v18 = vsel %vm2412_vm3, %v10119_v30, %v4499_v2  ;;  %v8219_v30 = vsel %vm2412_vm3, %v10124_v49, %v4514_v22  ;;  %v10125_v2 = vld [vmem:[#allocation56_spill] sm:$0xff]  ;;  %v8229_v37 = vsel %vm2412_vm3, %v10053_v5, %v4519_v8  ;;  %v8233_v13 = vsel %vm2412_vm3, %v10126_v39, %v4575_v15  ;;  %v10130_v49 = vld [vmem:[#allocation127_spill] sm:$0xff] }
 0x196   :  { %10117 = vst [vmem:[#allocation90_spill] sm:$0xff] %v8192_v57  ;;  %v8207_v43 = vpop.permute.xlu1 %5147  ;;  %v10123_v57 = vld [vmem:[#allocation13_spill] sm:$0xff]  ;;  %v8243_v11 = vsel %vm2412_vm3, %v10058_v16, %v4580_v60  ;;  %v10129_v19 = vld [vmem:[#allocation124_spill] sm:$0xff]  ;;  %v8249_v15 = vsel %vm2412_vm3, %v10054_v10, %v4579_v52  ;;  %v10131_v60 = vld [vmem:[#allocation63_spill] sm:$0xff]  ;;  %v4589_v16 = vunpack.i.l.bf16 %v10130_v49 }
 0x197   :  { %10121 = vst [vmem:[#allocation91_spill] sm:$0xff] %v8207_v43  ;;  %v8215_v3 = vsel %vm2412_vm3, %v10123_v57, %v4515_v20  ;;  %5432 = vrot.lane.b32.xlu0 %v10125_v2, %s5755_s26  ;;  %v10127_v57 = vld [vmem:[#allocation135_spill] sm:$0xff]  ;;  %v10128_v20 = vld [vmem:[#allocation37_spill] sm:$0xff]  ;;  %v4585_v59 = vunpack.i.h.bf16 %v10129_v19  ;;  %v4584_v5 = vunpack.i.l.bf16 %v10129_v19  ;;  %v4590_v2 = vunpack.i.h.bf16 %v10130_v49 }
 0x198   :  { %v8239_v22 = vsel %vm2412_vm3, %v10128_v20, %v4574_v54  ;;  %v10134_v52 = vld [vmem:[#allocation65_spill] sm:$0xff] }
 0x199   :  { %5437 = vrot.lane.b32.xlu1 %v10127_v57, %s5755_s26  ;;  %v5153_v8 = vpop.permute.xlu0 %5152 }
 0x19a   :  { %v5155_v39 = vunpack.i.h.bf16 %v5153_v8  ;;  %v5154_v57 = vunpack.i.l.bf16 %v5153_v8  ;;  %v5158_v43 = vpop.permute.xlu1 %5157  ;;  %v8267_v8 = vsel %vm2412_vm3, %v10060_v23, %v4585_v59 }
 0x19b   :  { %v5160_v54 = vunpack.i.h.bf16 %v5158_v43  ;;  %v5159_v20 = vunpack.i.l.bf16 %v5158_v43  ;;  %5442 = vrot.lane.b32.xlu0 %v10131_v60, %s5756_s1  ;;  %v8271_v43 = vsel %vm2412_vm3, %v10059_v31, %v4584_v5 }
 0x19c   :  { %v8257_v19 = vsel %vm2668_vm8, %v7922_v47, %v5154_v57  ;;  %v8261_v10 = vsel %vm2668_vm8, %v7926_v32, %v5155_v39  ;;  %v10135_v39 = vld [vmem:[#allocation129_spill] sm:$0xff] }
 0x19d   :  { %10132 = vst [vmem:[#allocation107_spill] sm:$0xff] %v8257_v19  ;;  %10133 = vst [vmem:[#allocation166_spill] sm:$0xff] %v8261_v10  ;;  %5447 = vrot.lane.b32.xlu1 %v10134_v52, %s5756_s1  ;;  %v8275_v49 = vsel %vm2668_vm8, %v7934_v58, %v5159_v20  ;;  %v8279_v47 = vsel %vm2668_vm8, %v7938_v63, %v5160_v54  ;;  %v5163_v32 = vpop.permute.xlu0 %5162  ;;  %v4595_v57 = vunpack.i.h.bf16 %v10135_v39  ;;  %v4594_v60 = vunpack.i.l.bf16 %v10135_v39  ;;  %v10136_v10 = vld [vmem:[#allocation49_spill] sm:$0xff]  ;;  %v10137_v58 = vld [vmem:[#allocation50_spill] sm:$0xff] }
 0x19e   :  { %v5165_v52 = vunpack.i.h.bf16 %v5163_v32  ;;  %v5164_v23 = vunpack.i.l.bf16 %v5163_v32  ;;  %v5168_v59 = vpop.permute.xlu1 %5167  ;;  %v8285_v31 = vsel %vm2412_vm3, %v10136_v10, %v4590_v2  ;;  %v8291_v63 = vsel %vm2412_vm3, %v10137_v58, %v4589_v16  ;;  %v10140_v2 = vld [vmem:[#allocation145_spill] sm:$0xff]  ;;  %v10143_v39 = vld [vmem:[#allocation52_spill] sm:$0xff] }
 0x19f   :  { %v5170_v5 = vunpack.i.h.bf16 %v5168_v59  ;;  %v5169_v19 = vunpack.i.l.bf16 %v5168_v59  ;;  %5452 = vrot.lane.b32.xlu0 %v10028_v9, %s5757_s27  ;;  %v4650_v10 = vunpack.i.h.bf16 %v10140_v2  ;;  %v4649_v32 = vunpack.i.l.bf16 %v10140_v2  ;;  %v10145_v2 = vld [vmem:[#allocation148_spill] sm:$0xff] }
 0x1a0   :  { %v8295_v54 = vsel %vm2668_vm8, %v7944_v36, %v5164_v23  ;;  %v8299_v20 = vsel %vm2668_vm8, %v7948_v24, %v5165_v52  ;;  %v8315_v24 = vsel %vm2412_vm3, %v10143_v39, %v4595_v57  ;;  %v10144_v52 = vld [vmem:[#allocation53_spill] sm:$0xff] }
 0x1a1   :  { %10138 = vst [vmem:[#allocation113_spill] sm:$0xff] %v8295_v54  ;;  %10139 = vst [vmem:[#allocation114_spill] sm:$0xff] %v8299_v20  ;;  %5457 = vrot.lane.b32.xlu1 %v10029_v25, %s5757_s27  ;;  %v8307_v9 = vsel %vm2668_vm8, %v7953_v41, %v5169_v19  ;;  %v8311_v16 = vsel %vm2668_vm8, %v7957_v7, %v5170_v5  ;;  %v5173_v36 = vpop.permute.xlu0 %5172  ;;  %v8319_v25 = vsel %vm2412_vm3, %v10144_v52, %v4594_v60  ;;  %v10149_v5 = vld [vmem:[#allocation120_spill] sm:$0xff]  ;;  %v10152_v52 = vld [vmem:[#allocation149_spill] sm:$0xff]  ;;  %vm3662_vm3 = vcmask 1047559  }
 0x1a2   :  { %10141 = vst [vmem:[#allocation16_spill] sm:$0xff] %v8307_v9  ;;  %10142 = vst [vmem:[#allocation41_spill] sm:$0xff] %v8311_v16  ;;  %v5175_v23 = vunpack.i.h.bf16 %v5173_v36  ;;  %v5174_v59 = vunpack.i.l.bf16 %v5173_v36  ;;  %v4654_v20 = vunpack.i.l.bf16 %v10145_v2  ;;  %v10146_v9 = vld [vmem:[#allocation118_spill] sm:$0xff]  ;;  %v4655_v7 = vunpack.i.h.bf16 %v10145_v2 }
 0x1a3   :  { %v5178_v58 = vpop.permute.xlu1 %5177  ;;  %5462 = vrot.lane.b32.xlu0 %v10146_v9, %s5755_s26  ;;  %v8337_v36 = vsel %vm2475_vm4, %v8157_v21, %v4650_v10  ;;  %v8341_v9 = vsel %vm2475_vm4, %v8165_v17, %v4649_v32 }
 0x1a4   :  { %v5180_v41 = vunpack.i.h.bf16 %v5178_v58  ;;  %v5179_v19 = vunpack.i.l.bf16 %v5178_v58  ;;  %v8327_v57 = vsel %vm2668_vm8, %v7963_v4, %v5174_v59  ;;  %v8331_v60 = vsel %vm2668_vm8, %v7967_v33, %v5175_v23 }
 0x1a5   :  { %10147 = vst [vmem:[#allocation115_spill] sm:$0xff] %v8327_v57  ;;  %10148 = vst [vmem:[#allocation9_spill] sm:$0xff] %v8331_v60  ;;  %5467 = vrot.lane.b32.xlu1 %v10149_v5, %s5755_s26  ;;  %v5183_v33 = vpop.permute.xlu0 %5182  ;;  %v4660_v23 = vunpack.i.h.bf16 %v10152_v52  ;;  %v4659_v59 = vunpack.i.l.bf16 %v10152_v52  ;;  %v8355_v17 = vsel %vm2475_vm4, %v8200_v18, %v4654_v20  ;;  %v10156_v18 = vld [vmem:[#allocation23_spill] sm:$0xff]  ;;  %v10157_v20 = vld [vmem:[#allocation152_spill] sm:$0xff] }
 0x1a6   :  { %v8345_v39 = vsel %vm2668_vm8, %v7973_v40, %v5179_v19  ;;  %v8349_v4 = vsel %vm2668_vm8, %v7977_v50, %v5180_v41  ;;  %v5185_v58 = vunpack.i.h.bf16 %v5183_v33  ;;  %v5184_v21 = vunpack.i.l.bf16 %v5183_v33  ;;  %v10153_v40 = vld [vmem:[#allocation22_spill] sm:$0xff]  ;;  %v10220_v57 = vld [vmem:[#allocation137_spill] sm:$0xff] }
 0x1a7   :  { %10150 = vst [vmem:[#allocation15_spill] sm:$0xff] %v8345_v39  ;;  %10151 = vst [vmem:[#allocation40_spill] sm:$0xff] %v8349_v4  ;;  %v5188_v10 = vpop.permute.xlu1 %5187  ;;  %5472 = vrot.lane.b32.xlu0 %v10153_v40, %s5756_s1  ;;  %v8361_v50 = vsel %vm2475_vm4, %v8196_v56, %v4655_v7  ;;  %v4665_v5 = vunpack.i.h.bf16 %v10157_v20  ;;  %v4664_v33 = vunpack.i.l.bf16 %v10157_v20  ;;  %v10160_v7 = vld [vmem:[#allocation153_spill] sm:$0xff]  ;;  %v10162_v4 = vld [vmem:[#allocation102_spill] sm:$0xff] }
 0x1a8   :  { %v5190_v32 = vunpack.i.h.bf16 %v5188_v10  ;;  %v5189_v2 = vunpack.i.l.bf16 %v5188_v10  ;;  %v8365_v41 = vsel %vm2668_vm8, %v7985_v28, %v5184_v21  ;;  %v8369_v19 = vsel %vm2668_vm8, %v7989_v42, %v5185_v58 }
 0x1a9   :  { %10154 = vst [vmem:[#allocation45_spill] sm:$0xff] %v8365_v41  ;;  %10155 = vst [vmem:[#allocation44_spill] sm:$0xff] %v8369_v19  ;;  %5477 = vrot.lane.b32.xlu1 %v10156_v18, %s5756_s1  ;;  %v5193_v28 = vpop.permute.xlu0 %5192  ;;  %v4670_v21 = vunpack.i.h.bf16 %v10160_v7  ;;  %v4669_v42 = vunpack.i.l.bf16 %v10160_v7  ;;  %v10161_v18 = vld [vmem:[#allocation154_spill] sm:$0xff] }
 0x1aa   :  { %v8377_v52 = vsel %vm2668_vm8, %v7997_v0, %v5189_v2  ;;  %v8381_v56 = vsel %vm2668_vm8, %v8001_v12, %v5190_v32  ;;  %v5195_v58 = vunpack.i.h.bf16 %v5193_v28  ;;  %v5194_v10 = vunpack.i.l.bf16 %v5193_v28  ;;  %v10165_v2 = vld [vmem:[#allocation103_spill] sm:$0xff] }
 0x1ab   :  { %10158 = vst [vmem:[#allocation17_spill] sm:$0xff] %v8377_v52  ;;  %10159 = vst [vmem:[#allocation95_spill] sm:$0xff] %v8381_v56  ;;  %v5198_v40 = vpop.permute.xlu1 %5197  ;;  %v4675_v19 = vunpack.i.h.bf16 %v10161_v18  ;;  %5482 = vrot.lane.b32.xlu0 %v10162_v4, %s5757_s27  ;;  %v4674_v0 = vunpack.i.l.bf16 %v10161_v18  ;;  %v10166_v28 = vld [vmem:[#allocation11_spill] sm:$0xff]  ;;  %v10190_v56 = vld [vmem:[#allocation24_spill] sm:$0xff] }
 0x1ac   :  { %v5200_v41 = vunpack.i.h.bf16 %v5198_v40  ;;  %v5199_v20 = vunpack.i.l.bf16 %v5198_v40  ;;  %v8391_v12 = vsel %vm2668_vm8, %v8006_v1, %v5194_v10  ;;  %v8395_v32 = vsel %vm2668_vm8, %v8010_v62, %v5195_v58  ;;  %v10169_v10 = vld [vmem:[#allocation155_spill] sm:$0xff] }
 0x1ad   :  { %10163 = vst [vmem:[#allocation96_spill] sm:$0xff] %v8391_v12  ;;  %10164 = vst [vmem:[#allocation97_spill] sm:$0xff] %v8395_v32  ;;  %5487 = vrot.lane.b32.xlu1 %v10165_v2, %s5757_s27  ;;  %v4730_v7 = vunpack.i.h.bf16 %v10166_v28  ;;  %v4729_v40 = vunpack.i.l.bf16 %v10166_v28  ;;  %v8409_v1 = vpop.permute.xlu0 %5202  ;;  %v2480_v62 = vsel %vm2475_vm4, %v8188_v44, %v4659_v59  ;;  %v2481_v58 = vsel %vm2475_vm4, %v8184_v61, %v4660_v23  ;;  %v10170_v44 = vld [vmem:[#allocation136_spill] sm:$0xff] }
 0x1ae   :  { %v8403_v4 = vsel %vm2668_vm8, %v8015_v35, %v5199_v20  ;;  %v8407_v18 = vsel %vm2668_vm8, %v8019_v34, %v5200_v41  ;;  %v4735_v2 = vunpack.i.h.bf16 %v10169_v10  ;;  %v4734_v28 = vunpack.i.l.bf16 %v10169_v10  ;;  %v10174_v20 = vld [vmem:[#allocation159_spill] sm:$0xff] }
 0x1af   :  { %10167 = vst [vmem:[#allocation47_spill] sm:$0xff] %v8403_v4  ;;  %10168 = vst [vmem:[#allocation48_spill] sm:$0xff] %v8407_v18  ;;  %v8417_v32 = vpop.permute.xlu1 %5207  ;;  %v2483_v35 = vsel %vm2475_vm4, %v8204_v46, %v4665_v5  ;;  %v2482_v34 = vsel %vm2475_vm4, %v8211_v6, %v4664_v33  ;;  %v2484_v41 = vsel %vm2475_vm4, %v8219_v30, %v4669_v42  ;;  %5492 = vrot.lane.b32.xlu0 %v10170_v44, %s5755_s26  ;;  %v10171_v46 = vld [vmem:[#allocation138_spill] sm:$0xff]  ;;  %v10176_v44 = vld [vmem:[#allocation71_spill] sm:$0xff] }
 0x1b0   :  { %v2485_v61 = vsel %vm2475_vm4, %v8215_v3, %v4670_v21  ;;  %v8431_v23 = vsel %vm2475_vm4, %v8225_v55, %v4675_v19  ;;  %v8435_v59 = vsel %vm2475_vm4, %v8229_v37, %v4674_v0  ;;  %v8441_v6 = vsel %vm2475_vm4, %v8239_v22, %v4729_v40  ;;  %v10172_v3 = vld [vmem:[#allocation156_spill] sm:$0xff]  ;;  %v10173_v22 = vld [vmem:[#allocation158_spill] sm:$0xff]  ;;  %v10175_v40 = vld [vmem:[#allocation167_spill] sm:$0xff] }
 0x1b1   :  { %5497 = vrot.lane.b32.xlu1 %v10171_v46, %s5755_s26  ;;  %v8445_v30 = vsel %vm2475_vm4, %v8233_v13, %v4730_v7  ;;  %v4740_v5 = vunpack.i.h.bf16 %v10172_v3  ;;  %v4739_v55 = vunpack.i.l.bf16 %v10172_v3  ;;  %v8449_v19 = vpop.permute.xlu0 %5212  ;;  %v8453_v37 = vsel %vm2475_vm4, %v8243_v11, %v4735_v2  ;;  %v10177_v2 = vld [vmem:[#allocation168_spill] sm:$0xff]  ;;  %v10178_v46 = vld [vmem:[#allocation75_spill] sm:$0xff] }
 0x1b2   :  { %v8457_v33 = vsel %vm2475_vm4, %v8249_v15, %v4734_v28  ;;  %v4745_v21 = vunpack.i.h.bf16 %v10173_v22  ;;  %v4744_v42 = vunpack.i.l.bf16 %v10173_v22  ;;  %v4750_v0 = vunpack.i.h.bf16 %v10174_v20 }
 0x1b3   :  { %v8461_v13 = vpop.permute.xlu1 %5217  ;;  %v4749_v7 = vunpack.i.l.bf16 %v10174_v20  ;;  %v4805_v10 = vunpack.i.h.bf16 %v10175_v40  ;;  %5502 = vrot.lane.b32.xlu0 %v10176_v44, %s5756_s1  ;;  %v4804_v11 = vunpack.i.l.bf16 %v10175_v40  ;;  %v4810_v15 = vunpack.i.h.bf16 %v10177_v2  ;;  %v10179_v20 = vld [vmem:[#allocation169_spill] sm:$0xff] }
 0x1b4   :  { %v4809_v28 = vunpack.i.l.bf16 %v10177_v2  ;;  %v8475_v3 = vsel %vm2475_vm4, %v8271_v43, %v4739_v55  ;;  %v8479_v22 = vsel %vm2475_vm4, %v8267_v8, %v4740_v5  ;;  %v4815_v18 = vunpack.i.h.bf16 %v10179_v20  ;;  %v10180_v43 = vld [vmem:[#allocation170_spill] sm:$0xff] }
 0x1b5   :  { %5507 = vrot.lane.b32.xlu1 %v10178_v46, %s5756_s1  ;;  %v4814_v44 = vunpack.i.l.bf16 %v10179_v20  ;;  %v8483_v40 = vpop.permute.xlu0 %5222  ;;  %v8487_v2 = vsel %vm2475_vm4, %v8285_v31, %v4745_v21  ;;  %v8491_v46 = vsel %vm2475_vm4, %v8291_v63, %v4744_v42  ;;  %v4820_v55 = vunpack.i.h.bf16 %v10180_v43  ;;  %v10181_v63 = vld [vmem:[#allocation106_spill] sm:$0xff] }
 0x1b6   :  { %v4819_v4 = vunpack.i.l.bf16 %v10180_v43  ;;  %v8499_v5 = vsel %vm2475_vm4, %v8319_v25, %v4749_v7  ;;  %v8503_v20 = vsel %vm2475_vm4, %v8315_v24, %v4750_v0  ;;  %v8507_v31 = vsel %vm2538_vm5, %v8337_v36, %v4805_v10  ;;  %v10182_v7 = vld [vmem:[#allocation172_spill] sm:$0xff] }
 0x1b7   :  { %v8495_v8 = vpop.permute.xlu1 %5227  ;;  %5512 = vrot.lane.b32.xlu0 %v10181_v63, %s5757_s27  ;;  %v8513_v21 = vsel %vm2538_vm5, %v8341_v9, %v4804_v11  ;;  %v8517_v42 = vsel %vm2538_vm5, %v8355_v17, %v4809_v28  ;;  %v8521_v25 = vsel %vm2538_vm5, %v8361_v50, %v4810_v15  ;;  %v8526_v24 = vsel %vm2538_vm5, %v2481_v58, %v4815_v18  ;;  %v10183_v63 = vld [vmem:[#allocation173_spill] sm:$0xff] }
 0x1b8   :  { %v8529_v0 = vsel %vm2538_vm5, %v2480_v62, %v4814_v44  ;;  %v4825_v10 = vunpack.i.h.bf16 %v10182_v7  ;;  %v4824_v11 = vunpack.i.l.bf16 %v10182_v7  ;;  %v8534_v17 = vsel %vm2538_vm5, %v2482_v34, %v4819_v4  ;;  %v10184_v62 = vld [vmem:[#allocation121_spill] sm:$0xff] }
 0x1b9   :  { %5517 = vrot.lane.b32.xlu1 %v10035_v29, %s5757_s27  ;;  %v5233_v43 = vpop.permute.xlu0 %5232  ;;  %v8537_v50 = vsel %vm2538_vm5, %v2483_v35, %v4820_v55  ;;  %v4830_v18 = vunpack.i.h.bf16 %v10183_v63  ;;  %v4829_v44 = vunpack.i.l.bf16 %v10183_v63  ;;  %v10185_v35 = vld [vmem:[#allocation123_spill] sm:$0xff] }
 0x1ba   :  { %v5235_v15 = vunpack.i.h.bf16 %v5233_v43  ;;  %v5234_v28 = vunpack.i.l.bf16 %v5233_v43  ;;  %v8554_v34 = vsel %vm2538_vm5, %v2484_v41, %v4824_v11  ;;  %v8557_v55 = vsel %vm2538_vm5, %v2485_v61, %v4825_v10  ;;  %v10189_v11 = vld [vmem:[#allocation132_spill] sm:$0xff] }
 0x1bb   :  { %v5238_v29 = vpop.permute.xlu1 %5237  ;;  %5522 = vrot.lane.b32.xlu0 %v10184_v62, %s5755_s26 }
 0x1bc   :  { %v5240_v58 = vunpack.i.h.bf16 %v5238_v29  ;;  %v5239_v12 = vunpack.i.l.bf16 %v5238_v29  ;;  %v8545_v7 = vsel %vm2668_vm8, %v8049_v26, %v5234_v28  ;;  %v8549_v4 = vsel %vm2668_vm8, %v8053_v51, %v5235_v15  ;;  %v10188_v51 = vld [vmem:[#allocation174_spill] sm:$0xff] }
 0x1bd   :  { %5527 = vrot.lane.b32.xlu1 %v10185_v35, %s5755_s26  ;;  %v5243_v28 = vpop.permute.xlu0 %5242  ;;  %v4885_v15 = vunpack.i.h.bf16 %v10188_v51  ;;  %v4884_v29 = vunpack.i.l.bf16 %v10188_v51  ;;  %v4889_v35 = vunpack.i.l.bf16 %v10189_v11 }
 0x1be   :  { %v8561_v43 = vsel %vm2668_vm8, %v8059_v45, %v5239_v12  ;;  %v8565_v26 = vsel %vm2668_vm8, %v8063_v14, %v5240_v58  ;;  %v5245_v63 = vunpack.i.h.bf16 %v5243_v28  ;;  %v5244_v62 = vunpack.i.l.bf16 %v5243_v28  ;;  %v10193_v58 = vld [vmem:[#allocation25_spill] sm:$0xff] }
 0x1bf   :  { %10186 = vst [vmem:[#allocation18_spill] sm:$0xff] %v8561_v43  ;;  %10187 = vst [vmem:[#allocation19_spill] sm:$0xff] %v8565_v26  ;;  %v5248_v41 = vpop.permute.xlu1 %5247  ;;  %5532 = vrot.lane.b32.xlu0 %v10190_v56, %s5756_s1  ;;  %v4890_v45 = vunpack.i.h.bf16 %v10189_v11  ;;  %v8585_v28 = vsel %vm2538_vm5, %v8435_v59, %v4829_v44  ;;  %v8589_v56 = vsel %vm2538_vm5, %v8431_v23, %v4830_v18 }
 0x1c0   :  { %v5250_v61 = vunpack.i.h.bf16 %v5248_v41  ;;  %v5249_v10 = vunpack.i.l.bf16 %v5248_v41  ;;  %v8575_v14 = vsel %vm2668_vm8, %v8069_v38, %v5244_v62  ;;  %v8579_v12 = vsel %vm2668_vm8, %v8073_v27, %v5245_v63 }
 0x1c1   :  { %10191 = vst [vmem:[#allocation98_spill] sm:$0xff] %v8575_v14  ;;  %10192 = vst [vmem:[#allocation99_spill] sm:$0xff] %v8579_v12  ;;  %5537 = vrot.lane.b32.xlu1 %v10193_v58, %s5756_s1  ;;  %v5253_v27 = vpop.permute.xlu0 %5252  ;;  %v8601_v63 = vsel %vm2538_vm5, %v8337_v36, %v4885_v15  ;;  %v8605_v59 = vsel %vm2538_vm5, %v8341_v9, %v4884_v29  ;;  %v8615_v36 = vsel %vm2538_vm5, %v8445_v30, %v4890_v45  ;;  %v10197_v15 = vld [vmem:[#allocation87_spill] sm:$0xff]  ;;  %v10199_v29 = vld [vmem:[#allocation88_spill] sm:$0xff] }
 0x1c2   :  { %v8593_v51 = vsel %vm2668_vm8, %v8079_v53, %v5249_v10  ;;  %v8597_v38 = vsel %vm2668_vm8, %v8083_v48, %v5250_v61  ;;  %v5255_v44 = vunpack.i.h.bf16 %v5253_v27  ;;  %v5254_v23 = vunpack.i.l.bf16 %v5253_v27  ;;  %v10196_v48 = vld [vmem:[#allocation26_spill] sm:$0xff]  ;;  %v10203_v58 = vld [vmem:[#allocation160_spill] sm:$0xff] }
 0x1c3   :  { %10194 = vst [vmem:[#allocation131_spill] sm:$0xff] %v8593_v51  ;;  %10195 = vst [vmem:[#allocation58_spill] sm:$0xff] %v8597_v38  ;;  %v5258_v18 = vpop.permute.xlu1 %5257  ;;  %v8609_v53 = vsel %vm2538_vm5, %v8441_v6, %v4889_v35  ;;  %5542 = vrot.lane.b32.xlu0 %v10196_v48, %s5757_s27  ;;  %v10201_v6 = vld [vmem:[#allocation29_spill] sm:$0xff]  ;;  %v10202_v35 = vld [vmem:[#allocation60_spill] sm:$0xff] }
 0x1c4   :  { %v5260_v62 = vunpack.i.h.bf16 %v5258_v18  ;;  %v5259_v41 = vunpack.i.l.bf16 %v5258_v18  ;;  %v8619_v9 = vsel %vm2668_vm8, %v10197_v15, %v5254_v23  ;;  %v8623_v11 = vsel %vm2668_vm8, %v10199_v29, %v5255_v44  ;;  %v10205_v30 = vld [vmem:[#allocation144_spill] sm:$0xff]  ;;  %v10207_v18 = vld [vmem:[#allocation133_spill] sm:$0xff]  ;;  %v10214_v48 = vld [vmem:[#allocation142_spill] sm:$0xff] }
 0x1c5   :  { %10198 = vst [vmem:[#allocation134_spill] sm:$0xff] %v8619_v9  ;;  %10200 = vst [vmem:[#allocation55_spill] sm:$0xff] %v8623_v11  ;;  %5547 = vrot.lane.b32.xlu1 %v10201_v6, %s5757_s27  ;;  %v4895_v61 = vunpack.i.h.bf16 %v10202_v35  ;;  %v4894_v10 = vunpack.i.l.bf16 %v10202_v35  ;;  %v5263_v23 = vpop.permute.xlu0 %5262  ;;  %v4899_v44 = vunpack.i.l.bf16 %v10207_v18  ;;  %v10208_v35 = vld [vmem:[#allocation140_spill] sm:$0xff]  ;;  %v10209_v9 = vld [vmem:[#allocation69_spill] sm:$0xff] }
 0x1c6   :  { %v8631_v27 = vsel %vm2668_vm8, %v10203_v58, %v5259_v41  ;;  %v8635_v45 = vsel %vm2668_vm8, %v10205_v30, %v5260_v62  ;;  %v5265_v15 = vunpack.i.h.bf16 %v5263_v23  ;;  %v5264_v29 = vunpack.i.l.bf16 %v5263_v23  ;;  %v10210_v58 = vld [vmem:[#allocation43_spill] sm:$0xff]  ;;  %v10212_v62 = vld [vmem:[#allocation161_spill] sm:$0xff]  ;;  %v10227_v12 = vld [vmem:[#allocation82_spill] sm:$0xff] }
 0x1c7   :  { %10204 = vst [vmem:[#allocation57_spill] sm:$0xff] %v8631_v27  ;;  %10206 = vst [vmem:[#allocation54_spill] sm:$0xff] %v8635_v45  ;;  %v5268_v6 = vpop.permute.xlu1 %5267  ;;  %5552 = vrot.lane.b32.xlu0 %v10208_v35, %s5755_s26  ;;  %v4965_v41 = vunpack.i.h.bf16 %v10209_v9  ;;  %v4964_v23 = vunpack.i.l.bf16 %v10209_v9  ;;  %v10215_v45 = vld [vmem:[#allocation34_spill] sm:$0xff]  ;;  %v4974_v9 = vunpack.i.l.bf16 %v10220_v57 }
 0x1c8   :  { %v5270_v52 = vunpack.i.h.bf16 %v5268_v6  ;;  %v5269_v11 = vunpack.i.l.bf16 %v5268_v6  ;;  %v8644_v27 = vsel %vm2668_vm8, %v10210_v58, %v5264_v29  ;;  %v8648_v30 = vsel %vm2668_vm8, %v10212_v62, %v5265_v15  ;;  %v10217_v35 = vld [vmem:[#allocation46_spill] sm:$0xff]  ;;  %v10219_v29 = vld [vmem:[#allocation68_spill] sm:$0xff] }
 0x1c9   :  { %10211 = vst [vmem:[#allocation116_spill] sm:$0xff] %v8644_v27  ;;  %10213 = vst [vmem:[#allocation117_spill] sm:$0xff] %v8648_v30  ;;  %5557 = vrot.lane.b32.xlu1 %v10214_v48, %s5755_s26  ;;  %v5273_v60 = vpop.permute.xlu0 %5272  ;;  %v4970_v58 = vunpack.i.h.bf16 %v10219_v29  ;;  %v4969_v27 = vunpack.i.l.bf16 %v10219_v29  ;;  %v4975_v48 = vunpack.i.h.bf16 %v10220_v57  ;;  %v10225_v29 = vld [vmem:[#allocation51_spill] sm:$0xff]  ;;  %v8681_v57 = vsel %vm2538_vm5, %v8457_v33, %v4894_v10  ;;  %v10232_v10 = vld [vmem:[#allocation85_spill] sm:$0xff] }
 0x1ca   :  { %v8655_v6 = vsel %vm2668_vm8, %v10215_v45, %v5269_v11  ;;  %v8659_v39 = vsel %vm2668_vm8, %v10217_v35, %v5270_v52  ;;  %v5275_v15 = vunpack.i.h.bf16 %v5273_v60  ;;  %v5274_v62 = vunpack.i.l.bf16 %v5273_v60  ;;  %v10221_v11 = vld [vmem:[#allocation78_spill] sm:$0xff]  ;;  %v10222_v45 = vld [vmem:[#allocation72_spill] sm:$0xff] }
 0x1cb   :  { %10216 = vst [vmem:[#allocation42_spill] sm:$0xff] %v8655_v6  ;;  %10218 = vst [vmem:[#allocation20_spill] sm:$0xff] %v8659_v39  ;;  %v5278_v30 = vpop.permute.xlu1 %5277  ;;  %5562 = vrot.lane.b32.xlu0 %v10221_v11, %s5756_s1  ;;  %v4980_v52 = vunpack.i.h.bf16 %v10222_v45  ;;  %v4979_v35 = vunpack.i.l.bf16 %v10222_v45  ;;  %v10223_v39 = vld [vmem:[#allocation162_spill] sm:$0xff]  ;;  %v10228_v11 = vld [vmem:[#allocation163_spill] sm:$0xff]  ;;  %v2604_v33 = vsel %vm2603_vm6, %v8513_v21, %v4964_v23  ;;  %v8715_v21 = vsel %vm2603_vm6, %v8526_v24, %v4975_v48 }
 0x1cc   :  { %v5280_v38 = vunpack.i.h.bf16 %v5278_v30  ;;  %v5279_v51 = vunpack.i.l.bf16 %v5278_v30  ;;  %v8671_v6 = vsel %vm2668_vm8, %v10223_v39, %v5274_v62  ;;  %v8675_v60 = vsel %vm2668_vm8, %v10225_v29, %v5275_v15  ;;  %v10230_v39 = vld [vmem:[#allocation164_spill] sm:$0xff]  ;;  %v10234_v24 = vld [vmem:[#allocation125_spill] sm:$0xff]  ;;  %v10236_v23 = vld [vmem:[#allocation126_spill] sm:$0xff] }
 0x1cd   :  { %10224 = vst [vmem:[#allocation21_spill] sm:$0xff] %v8671_v6  ;;  %10226 = vst [vmem:[#allocation59_spill] sm:$0xff] %v8675_v60  ;;  %5567 = vrot.lane.b32.xlu1 %v10227_v12, %s5756_s1  ;;  %v8685_v30 = vsel %vm2538_vm5, %v8453_v37, %v4895_v61  ;;  %v5283_v15 = vpop.permute.xlu0 %5282  ;;  %v8697_v12 = vsel %vm2538_vm5, %v8475_v3, %v4899_v44  ;;  %v2605_v37 = vsel %vm2603_vm6, %v8507_v31, %v4965_v41  ;;  %v10235_v44 = vld [vmem:[#allocation165_spill] sm:$0xff]  ;;  %v10238_v29 = vld [vmem:[#allocation76_spill] sm:$0xff] }
 0x1ce   :  { %v8689_v45 = vsel %vm2668_vm8, %v10228_v11, %v5279_v51  ;;  %v8693_v62 = vsel %vm2668_vm8, %v10230_v39, %v5280_v38  ;;  %v2606_v51 = vsel %vm2603_vm6, %v8517_v42, %v4969_v27  ;;  %v2607_v38 = vsel %vm2603_vm6, %v8521_v25, %v4970_v58  ;;  %v10233_v25 = vld [vmem:[#allocation108_spill] sm:$0xff]  ;;  %v10239_v60 = vld [vmem:[#allocation77_spill] sm:$0xff] }
 0x1cf   :  { %10229 = vst [vmem:[#allocation62_spill] sm:$0xff] %v8689_v45  ;;  %10231 = vst [vmem:[#allocation74_spill] sm:$0xff] %v8693_v62  ;;  %v5288_v61 = vpop.permute.xlu1 %5287  ;;  %5572 = vrot.lane.b32.xlu0 %v10232_v10, %s5757_s27  ;;  %v8711_v3 = vsel %vm2603_vm6, %v8529_v0, %v4974_v9  ;;  %v8719_v31 = vsel %vm2603_vm6, %v8534_v17, %v4979_v35  ;;  %v8723_v42 = vsel %vm2603_vm6, %v8537_v50, %v4980_v52  ;;  %v10237_v50 = vld [vmem:[#allocation67_spill] sm:$0xff] }
 0x1d0   :  { %v5125_v41 = vunpack.i.h.bf16 %v10235_v44  ;;  %v5124_v17 = vunpack.i.l.bf16 %v10235_v44  ;;  %v5130_v58 = vunpack.i.h.bf16 %v10237_v50  ;;  %v5129_v48 = vunpack.i.l.bf16 %v10237_v50  ;;  %v10240_v45 = vld [vmem:[#allocation27_spill] sm:$0xff] }
 0x1d1   :  { %5577 = vrot.lane.b32.xlu1 %v10233_v25, %s5757_s27  ;;  %v8727_v27 = vpop.permute.xlu0 %5292  ;;  %v5285_v9 = vunpack.i.h.bf16 %v5283_v15  ;;  %v5284_v52 = vunpack.i.l.bf16 %v5283_v15  ;;  %v5045_v11 = vunpack.i.h.bf16 %v10238_v29  ;;  %v5044_v39 = vunpack.i.l.bf16 %v10238_v29  ;;  %v10241_v29 = vld [vmem:[#allocation31_spill] sm:$0xff] }
 0x1d2   :  { %v5290_v10 = vunpack.i.h.bf16 %v5288_v61  ;;  %v5289_v25 = vunpack.i.l.bf16 %v5288_v61  ;;  %v5050_v44 = vunpack.i.h.bf16 %v10239_v60  ;;  %v5049_v6 = vunpack.i.l.bf16 %v10239_v60 }
 0x1d3   :  { %v8729_v0 = vpop.permute.xlu1 %5297  ;;  %5582 = vrot.lane.b32.xlu0 %v10234_v24, %s5755_s26  ;;  %v2669_v50 = vsel %vm2668_vm8, %v2604_v33, %v5124_v17  ;;  %v2670_v15 = vsel %vm2668_vm8, %v2605_v37, %v5125_v41  ;;  %v2671_v61 = vsel %vm2668_vm8, %v2606_v51, %v5129_v48  ;;  %v2672_v54 = vsel %vm2668_vm8, %v2607_v38, %v5130_v58 }
 0x1d4   :  { %v2734_v60 = vsel %vm2733_vm9, %v2669_v50, %v5284_v52  ;;  %v2737_v33 = vsel %vm2733_vm9, %v2672_v54, %v5290_v10 }
 0x1d5   :  { %5587 = vrot.lane.b32.xlu1 %v10236_v23, %s5755_s26  ;;  %v5303_v35 = vpop.permute.xlu0 %5302 }
 0x1d6   :  { %v5305_v23 = vunpack.i.h.bf16 %v5303_v35  ;;  %v5304_v62 = vunpack.i.l.bf16 %v5303_v35  ;;  %v2735_v35 = vsel %vm2733_vm9, %v2670_v15, %v5285_v9  ;;  %v10243_v9 = vld [vmem:[#allocation30_spill] sm:$0xff]  ;;  %v2638_v15 = vsel %vm2603_vm6, %v8609_v53, %v5049_v6 }
 0x1d7   :  { %v5308_v24 = vpop.permute.xlu1 %5307  ;;  %5592 = vrot.lane.b32.xlu0 %v10240_v45, %s5756_s1  ;;  %v2736_v45 = vsel %vm2733_vm9, %v2671_v61, %v5289_v25  ;;  %v2639_v61 = vsel %vm2603_vm6, %v8615_v36, %v5050_v44  ;;  %v10246_v53 = vld [vmem:[#allocation146_spill] sm:$0xff]  ;;  %v5210_v44 = vunpack.i.h.bf16 %v8417_v32 }
 0x1d8   :  { %v5310_v14 = vunpack.i.h.bf16 %v5308_v24  ;;  %v5309_v16 = vunpack.i.l.bf16 %v5308_v24  ;;  %v2799_v51 = vsel %vm2798_vm10, %v2734_v60, %v5304_v62  ;;  %v2800_v38 = vsel %vm2798_vm10, %v2735_v35, %v5305_v23  ;;  %v10244_v60 = vld [vmem:[#allocation143_spill] sm:$0xff]  ;;  %v10247_v36 = vld [vmem:[#allocation70_spill] sm:$0xff] }
 0x1d9   :  { %5597 = vrot.lane.b32.xlu1 %v10241_v29, %s5756_s1  ;;  %v5313_v26 = vpop.permute.xlu0 %5312  ;;  %v10242_v29 = vld [vmem:[#allocation28_spill] sm:$0xff]  ;;  %v2636_v62 = vsel %vm2603_vm6, %v8605_v59, %v5044_v39  ;;  %v10245_v59 = vld [vmem:[#allocation79_spill] sm:$0xff]  ;;  %v5209_v35 = vunpack.i.l.bf16 %v8417_v32  ;;  %v5135_v6 = vunpack.i.h.bf16 %v10247_v36  ;;  %v10249_v32 = vld [vmem:[#allocation86_spill] sm:$0xff] }
 0x1da   :  { %v5315_v17 = vunpack.i.h.bf16 %v5313_v26  ;;  %v5314_v37 = vunpack.i.l.bf16 %v5313_v26  ;;  %v2801_v58 = vsel %vm2798_vm10, %v2736_v45, %v5309_v16  ;;  %v2802_v48 = vsel %vm2798_vm10, %v2737_v33, %v5310_v14 }
 0x1db   :  { %v5318_v41 = vpop.permute.xlu1 %5317  ;;  %5602 = vrot.lane.b32.xlu0 %v10242_v29, %s5757_s27  ;;  %v2637_v16 = vsel %vm2603_vm6, %v8601_v63, %v5045_v11  ;;  %v5055_v39 = vunpack.i.h.bf16 %v10245_v59  ;;  %v5054_v63 = vunpack.i.l.bf16 %v10245_v59  ;;  %v5205_v11 = vunpack.i.h.bf16 %v8409_v1 }
 0x1dc   :  { %v5320_v24 = vunpack.i.h.bf16 %v5318_v41  ;;  %v5319_v43 = vunpack.i.l.bf16 %v5318_v41  ;;  %v2864_v54 = vsel %vm2863_vm11, %v2799_v51, %v5314_v37  ;;  %v2865_v26 = vsel %vm2863_vm11, %v2800_v38, %v5315_v17  ;;  %v10248_v41 = vld [vmem:[#allocation104_spill] sm:$0xff] }
 0x1dd   :  { %5607 = vrot.lane.b32.xlu1 %v10243_v9, %s5757_s27  ;;  %v5323_v25 = vpop.permute.xlu0 %5322  ;;  %v2928_v50 = vpack.c.bf16 %v2865_v26, %v2864_v54  ;;  %v5300_v45 = vunpack.i.h.bf16 %v8729_v0  ;;  %v5134_v37 = vunpack.i.l.bf16 %v10247_v36  ;;  %v5139_v38 = vunpack.i.l.bf16 %v10248_v41 }
 0x1de   :  { %v2866_v52 = vsel %vm2863_vm11, %v2801_v58, %v5319_v43  ;;  %v2867_v10 = vsel %vm2863_vm11, %v2802_v48, %v5320_v24  ;;  %v5204_v43 = vunpack.i.l.bf16 %v8409_v1  ;;  %v5324_v33 = vunpack.i.l.bf16 %v5323_v25 }
 0x1df   :  { %v2929_v14 = vpack.c.bf16 %v2867_v10, %v2866_v52  ;;  %v8771_v23 = vpop.permute.xlu1 %5327  ;;  %5612 = vrot.lane.b32.xlu0 %v10244_v60, %s5755_s26  ;;  %4410 = vmatprep.mubr.msk.bf16.mxu0 %vm2980_vm12, %v2928_v50  ;;  %v5140_v24 = vunpack.i.h.bf16 %v10248_v41  ;;  %v5325_v1 = vunpack.i.h.bf16 %v5323_v25  ;;  %v2702_v54 = vsel %vm2668_vm8, %v2637_v16, %v5205_v11  ;;  %v10250_v25 = vld [vmem:[#allocation89_spill] sm:$0xff] }
 0x1e0   :  { %v5329_v29 = vunpack.i.l.bf16 %v8771_v23  ;;  %v2701_v58 = vsel %vm2668_vm8, %v2636_v62, %v5204_v43  ;;  %v2703_v26 = vsel %vm2668_vm8, %v2638_v15, %v5209_v35  ;;  %v2704_v50 = vsel %vm2668_vm8, %v2639_v61, %v5210_v44  ;;  %v10251_v41 = vld [vmem:[#allocation109_spill] sm:$0xff] }
 0x1e1   :  { %5617 = vrot.lane.b32.xlu1 %v10246_v53, %s5755_s26  ;;  %4411 = vmatmul.mubr.msk.bf16.vlgmr.msra.gmra.mrb[0].mxu0 %vm2980_vm12, %v2929_v14  ;;  %v5333_v17 = vpop.permute.xlu0 %5332  ;;  %v5295_v14 = vunpack.i.h.bf16 %v8727_v27  ;;  %v2766_v62 = vsel %vm2733_vm9, %v2701_v58, %v5300_v45  ;;  %v2767_v43 = vsel %vm2733_vm9, %v2702_v54, %v5324_v33  ;;  %v2768_v53 = vsel %vm2733_vm9, %v2703_v26, %v5325_v1  ;;  %v10252_v1 = vld [vmem:[#allocation110_spill] sm:$0xff] }
 0x1e2   :  { %v5335_v48 = vunpack.i.h.bf16 %v5333_v17  ;;  %v5334_v9 = vunpack.i.l.bf16 %v5333_v17  ;;  %v2769_v16 = vsel %vm2733_vm9, %v2704_v50, %v5329_v29  ;;  %v5294_v58 = vunpack.i.l.bf16 %v8727_v27  ;;  %v10253_v50 = vld [vmem:[#allocation80_spill] sm:$0xff] }
 0x1e3   :  { %v5338_v51 = vpop.permute.xlu1 %5337  ;;  %5622 = vrot.lane.b32.xlu0 %v10249_v32, %s5756_s1  ;;  %v10254_v27 = vld [vmem:[#allocation128_spill] sm:$0xff] }
 0x1e4   :  { %v5340_v52 = vunpack.i.h.bf16 %v5338_v51  ;;  %v5339_v10 = vunpack.i.l.bf16 %v5338_v51  ;;  %v2831_v61 = vsel %vm2798_vm10, %v2766_v62, %v5334_v9  ;;  %v2832_v44 = vsel %vm2798_vm10, %v2767_v43, %v5335_v48 }
 0x1e5   :  { %5627 = vrot.lane.b32.xlu1 %v10250_v25, %s5756_s1  ;;  %v5343_v60 = vpop.permute.xlu0 %5342  ;;  %v5299_v48 = vunpack.i.l.bf16 %v8729_v0  ;;  %v5060_v62 = vunpack.i.h.bf16 %v10253_v50  ;;  %v5059_v43 = vunpack.i.l.bf16 %v10253_v50  ;;  %v2674_v0 = vsel %vm2668_vm8, %v8715_v21, %v5135_v6 }
 0x1e6   :  { %v5345_v11 = vunpack.i.h.bf16 %v5343_v60  ;;  %v5344_v15 = vunpack.i.l.bf16 %v5343_v60  ;;  %v2833_v45 = vsel %vm2798_vm10, %v2768_v53, %v5339_v10  ;;  %v2834_v33 = vsel %vm2798_vm10, %v2769_v16, %v5340_v52 }
 0x1e7   :  { %v5348_v35 = vpop.permute.xlu1 %5347  ;;  %5632 = vrot.lane.b32.xlu0 %v10251_v41, %s5757_s27  ;;  %v5330_v10 = vunpack.i.h.bf16 %v8771_v23  ;;  %v2673_v16 = vsel %vm2668_vm8, %v8711_v3, %v5134_v37  ;;  %v2739_v3 = vsel %vm2733_vm9, %v2674_v0, %v5295_v14  ;;  %v2640_v50 = vsel %vm2603_vm6, %v8681_v57, %v5054_v63  ;;  %v10261_v0 = vld [vmem:[#allocation38_spill] sm:$0xff] }
 0x1e8   :  { %v5350_v36 = vunpack.i.h.bf16 %v5348_v35  ;;  %v5349_v17 = vunpack.i.l.bf16 %v5348_v35  ;;  %v2896_v29 = vsel %vm2863_vm11, %v2831_v61, %v5344_v15  ;;  %v2897_v51 = vsel %vm2863_vm11, %v2832_v44, %v5345_v11  ;;  %v10255_v15 = vld [vmem:[#allocation32_spill] sm:$0xff] }
 0x1e9   :  { %5637 = vrot.lane.b32.xlu1 %v10252_v1, %s5757_s27  ;;  %v5353_v9 = vpop.permute.xlu0 %5352  ;;  %v2944_v26 = vpack.c.bf16 %v2897_v51, %v2896_v29  ;;  %v2675_v35 = vsel %vm2668_vm8, %v8719_v31, %v5139_v38  ;;  %v10257_v51 = vld [vmem:[#allocation39_spill] sm:$0xff]  ;;  %v5215_v57 = vunpack.i.h.bf16 %v8449_v19  ;;  %v5214_v63 = vunpack.i.l.bf16 %v8449_v19 }
 0x1ea   :  { %v2898_v32 = vsel %vm2863_vm11, %v2833_v45, %v5349_v17  ;;  %v2899_v54 = vsel %vm2863_vm11, %v2834_v33, %v5350_v36  ;;  %v5355_v60 = vunpack.i.h.bf16 %v5353_v9  ;;  %v5354_v53 = vunpack.i.l.bf16 %v5353_v9 }
 0x1eb   :  { %v2945_v52 = vpack.c.bf16 %v2899_v54, %v2898_v32  ;;  %v5358_v25 = vpop.permute.xlu1 %5357  ;;  %5642 = vrot.lane.b32.xlu0 %v10254_v27, %s5755_s26  ;;  %4442 = vmatprep.mubr.msk.bf16.mxu1 %vm2980_vm12, %v2944_v26  ;;  %v2676_v36 = vsel %vm2668_vm8, %v8723_v42, %v5140_v24  ;;  %v2738_v17 = vsel %vm2733_vm9, %v2673_v16, %v5294_v58  ;;  %v10256_v42 = vld [vmem:[#allocation35_spill] sm:$0xff]  ;;  %v10258_v58 = vunpack.i.h.bf16 %v10207_v18 }
 0x1ec   :  { %v5360_v23 = vunpack.i.h.bf16 %v5358_v25  ;;  %v5359_v11 = vunpack.i.l.bf16 %v5358_v25  ;;  %v2740_v21 = vsel %vm2733_vm9, %v2675_v35, %v5299_v48  ;;  %v2741_v6 = vsel %vm2733_vm9, %v2676_v36, %v5330_v10  ;;  %v10259_v10 = vld [vmem:[#allocation73_spill] sm:$0xff] }
 0x1ed   :  { %5647 = vrot.lane.b32.xlu1 %v10255_v15, %s5755_s26  ;;  %4443 = vmatmul.mubr.msk.bf16.vlgmr.msra.gmra.mrb[0].mxu1 %vm2980_vm12, %v2945_v52  ;;  %v5363_v37 = vpop.permute.xlu0 %5362  ;;  %v2803_v45 = vsel %vm2798_vm10, %v2738_v17, %v5354_v53  ;;  %v2804_v33 = vsel %vm2798_vm10, %v2739_v3, %v5355_v60  ;;  %v2578_v32 = vsel %vm2538_vm5, %v8479_v22, %v10258_v58  ;;  %v4985_v52 = vunpack.i.h.bf16 %v10259_v10  ;;  %v10260_v53 = vld [vmem:[#allocation141_spill] sm:$0xff]  ;;  %v10263_v3 = vld [vmem:[#allocation147_spill] sm:$0xff] }
 0x1ee   :  { %v5365_v41 = vunpack.i.h.bf16 %v5363_v37  ;;  %v5364_v61 = vunpack.i.l.bf16 %v5363_v37  ;;  %v2805_v24 = vsel %vm2798_vm10, %v2740_v21, %v5359_v11  ;;  %v2806_v14 = vsel %vm2798_vm10, %v2741_v6, %v5360_v23  ;;  %v10262_v11 = vld [vmem:[#allocation33_spill] sm:$0xff] }
 0x1ef   :  { %v5368_v44 = vpop.permute.xlu1 %5367  ;;  %5652 = vrot.lane.b32.xlu0 %v10256_v42, %s5756_s1  ;;  %v4984_v25 = vunpack.i.l.bf16 %v10259_v10  ;;  %v4989_v27 = vunpack.i.l.bf16 %v10260_v53  ;;  %v2641_v22 = vsel %vm2603_vm6, %v8685_v30, %v5055_v39  ;;  %v2642_v16 = vsel %vm2603_vm6, %v8697_v12, %v5059_v43  ;;  %v10273_v10 = vld [vmem:[#allocation2_spill] sm:$0xff] }
 0x1f0   :  { %v5370_v31 = vunpack.i.h.bf16 %v5368_v44  ;;  %v5369_v38 = vunpack.i.l.bf16 %v5368_v44  ;;  %v2868_v1 = vsel %vm2863_vm11, %v2803_v45, %v5364_v61  ;;  %v2869_v29 = vsel %vm2863_vm11, %v2804_v33, %v5365_v41  ;;  %v10264_v41 = vld [vmem:[#allocation150_spill] sm:$0xff] }
 0x1f1   :  { %5657 = vrot.lane.b32.xlu1 %v10257_v51, %s5756_s1  ;;  %v2930_v54 = vpack.c.bf16 %v2869_v29, %v2868_v1  ;;  %v5373_v48 = vpop.permute.xlu0 %5372  ;;  %v2643_v23 = vsel %vm2603_vm6, %v2578_v32, %v5060_v62  ;;  %v5220_v30 = vunpack.i.h.bf16 %v8461_v13  ;;  %v5219_v12 = vunpack.i.l.bf16 %v8461_v13  ;;  %v10265_v32 = vld [vmem:[#allocation92_spill] sm:$0xff] }
 0x1f2   :  { %v2870_v9 = vsel %vm2863_vm11, %v2805_v24, %v5369_v38  ;;  %v2871_v26 = vsel %vm2863_vm11, %v2806_v14, %v5370_v31  ;;  %v5375_v59 = vunpack.i.h.bf16 %v5373_v48  ;;  %v5374_v39 = vunpack.i.l.bf16 %v5373_v48 }
 0x1f3   :  { %v2931_v60 = vpack.c.bf16 %v2871_v26, %v2870_v9  ;;  %v5378_v18 = vpop.permute.xlu1 %5377  ;;  %5662 = vrot.lane.b32.xlu0 %v10261_v0, %s5757_s27  ;;  %4414 = vmatprep.mubr.msk.bf16.mxu0 %vm2980_vm12, %v2930_v54  ;;  %v2705_v19 = vsel %vm2668_vm8, %v2640_v50, %v5214_v63  ;;  %v2706_v37 = vsel %vm2668_vm8, %v2641_v22, %v5215_v57  ;;  %v10266_v50 = vld [vmem:[#allocation93_spill] sm:$0xff]  ;;  %v10268_v63 = vld [vmem:[#allocation64_spill] sm:$0xff] }
 0x1f4   :  { %v5380_v15 = vunpack.i.h.bf16 %v5378_v18  ;;  %v5379_v35 = vunpack.i.l.bf16 %v5378_v18  ;;  %v2707_v13 = vsel %vm2668_vm8, %v2642_v16, %v5219_v12  ;;  %v2708_v61 = vsel %vm2668_vm8, %v2643_v23, %v5220_v30 }
 0x1f5   :  { %5667 = vrot.lane.b32.xlu1 %v10262_v11, %s5757_s27  ;;  %4415 = vmatmul.mubr.msk.bf16.gmra.mrb[4].mxu0 %vm2980_vm12, %v2931_v60  ;;  %v5383_v43 = vpop.permute.xlu0 %5382  ;;  %v2770_v44 = vsel %vm2733_vm9, %v2705_v19, %v5374_v39  ;;  %v2771_v45 = vsel %vm2733_vm9, %v2706_v37, %v5375_v59  ;;  %v10267_v60 = vld [vmem:[#allocation66_spill] sm:$0xff]  ;;  %v4910_v11 = vunpack.i.h.bf16 %v10268_v63  ;;  %v4990_v30 = vunpack.i.h.bf16 %v10260_v53 }
 0x1f6   :  { %v5385_v62 = vunpack.i.h.bf16 %v5383_v43  ;;  %v5384_v17 = vunpack.i.l.bf16 %v5383_v43  ;;  %v2772_v31 = vsel %vm2733_vm9, %v2707_v13, %v5379_v35  ;;  %v2773_v38 = vsel %vm2733_vm9, %v2708_v61, %v5380_v15  ;;  %v10269_v35 = vld [vmem:[#allocation111_spill] sm:$0xff] }
 0x1f7   :  { %v5388_v36 = vpop.permute.xlu1 %5387  ;;  %5672 = vrot.lane.b32.xlu0 %v10263_v3, %s5755_s26  ;;  %v4905_v18 = vunpack.i.h.bf16 %v10267_v60  ;;  %v4904_v57 = vunpack.i.l.bf16 %v10267_v60  ;;  %v4909_v39 = vunpack.i.l.bf16 %v10268_v63  ;;  %v2612_v43 = vsel %vm2603_vm6, %v8554_v34, %v4984_v25  ;;  %v10271_v3 = vld [vmem:[#allocation112_spill] sm:$0xff]  ;;  %v10272_v34 = vld [vmem:[#allocation3_spill] sm:$0xff]  ;;  %v10280_v60 = vld [vmem:[#allocation61_spill] sm:$0xff] }
 0x1f8   :  { %v5390_v21 = vunpack.i.h.bf16 %v5388_v36  ;;  %v5389_v6 = vunpack.i.l.bf16 %v5388_v36  ;;  %v2835_v1 = vsel %vm2798_vm10, %v2770_v44, %v5384_v17  ;;  %v2836_v29 = vsel %vm2798_vm10, %v2771_v45, %v5385_v62  ;;  %v10270_v36 = vld [vmem:[#allocation90_spill] sm:$0xff] }
 0x1f9   :  { %5677 = vrot.lane.b32.xlu1 %v10264_v41, %s5755_s26  ;;  %v5393_v33 = vpop.permute.xlu0 %5392  ;;  %v2613_v15 = vsel %vm2603_vm6, %v8557_v55, %v4985_v52  ;;  %v2614_v53 = vsel %vm2603_vm6, %v8585_v28, %v4989_v27  ;;  %v5145_v62 = vunpack.i.h.bf16 %v10270_v36  ;;  %v5144_v17 = vunpack.i.l.bf16 %v10270_v36  ;;  %v10274_v52 = vld [vmem:[#allocation91_spill] sm:$0xff] }
 0x1fa   :  { %v5395_v42 = vunpack.i.h.bf16 %v5393_v33  ;;  %v5394_v24 = vunpack.i.l.bf16 %v5393_v33  ;;  %v2837_v54 = vsel %vm2798_vm10, %v2772_v31, %v5389_v6  ;;  %v2838_v9 = vsel %vm2798_vm10, %v2773_v38, %v5390_v21  ;;  %v10275_v27 = vld [vmem:[#allocation83_spill] sm:$0xff]  ;;  %v10276_v31 = vld [vmem:[#allocation130_spill] sm:$0xff] }
 0x1fb   :  { %v5398_v14 = vpop.permute.xlu1 %5397  ;;  %5682 = vrot.lane.b32.xlu0 %v10265_v32, %s5756_s1  ;;  %v5706_v55 = vpack.i.bf16 %v10273_v10, %v10272_v34  ;;  %v5150_v25 = vunpack.i.h.bf16 %v10274_v52  ;;  %v5149_v19 = vunpack.i.l.bf16 %v10274_v52  ;;  %v2615_v28 = vsel %vm2603_vm6, %v8589_v56, %v4990_v30  ;;  %v10279_v10 = vld [vmem:[#allocation84_spill] sm:$0xff] }
 0x1fc   :  { %v5400_v51 = vunpack.i.h.bf16 %v5398_v14  ;;  %v5399_v58 = vunpack.i.l.bf16 %v5398_v14  ;;  %v2900_v26 = vsel %vm2863_vm11, %v2835_v1, %v5394_v24  ;;  %v2901_v48 = vsel %vm2863_vm11, %v2836_v29, %v5395_v42 }
 0x1fd   :  { %5687 = vrot.lane.b32.xlu1 %v10266_v50, %s5756_s1  ;;  %v2946_v22 = vpack.c.bf16 %v2901_v48, %v2900_v26  ;;  %v5403_v23 = vpop.permute.xlu0 %5402  ;;  %v5064_v41 = vunpack.i.l.bf16 %v10275_v27  ;;  %v2677_v38 = vsel %vm2668_vm8, %v2612_v43, %v5144_v17  ;;  %v2678_v42 = vsel %vm2668_vm8, %v2613_v15, %v5145_v62  ;;  %v10278_v15 = vld [vmem:[#allocation7_spill] sm:$0xff] }
 0x1fe   :  { %v2902_v16 = vsel %vm2863_vm11, %v2837_v54, %v5399_v58  ;;  %v2903_v0 = vsel %vm2863_vm11, %v2838_v9, %v5400_v51  ;;  %v5405_v37 = vunpack.i.h.bf16 %v5403_v23  ;;  %v5404_v21 = vunpack.i.l.bf16 %v5403_v23  ;;  %v10277_v23 = vld [vmem:[#allocation157_spill] sm:$0xff] }
 0x1ff   :  { %v2947_v12 = vpack.c.bf16 %v2903_v0, %v2902_v16  ;;  %v5408_v59 = vpop.permute.xlu1 %5407  ;;  %5692 = vrot.lane.b32.xlu0 %v10269_v35, %s5757_s27  ;;  %4446 = vmatprep.mubr.msk.bf16.mxu1 %vm2980_vm12, %v2946_v22  ;;  %v2679_v56 = vsel %vm2668_vm8, %v2614_v53, %v5149_v19  ;;  %v2680_v1 = vsel %vm2668_vm8, %v2615_v28, %v5150_v25  ;;  %v5065_v34 = vunpack.i.h.bf16 %v10275_v27 }
 0x200   :  { %v5410_v13 = vunpack.i.h.bf16 %v5408_v59  ;;  %v5409_v61 = vunpack.i.l.bf16 %v5408_v59  ;;  %v2742_v29 = vsel %vm2733_vm9, %v2677_v38, %v5404_v21  ;;  %v2743_v51 = vsel %vm2733_vm9, %v2678_v42, %v5405_v37  ;;  %v10283_v42 = vld [vmem:[#allocation171_spill] sm:$0xff] }
 0x201   :  { %5697 = vrot.lane.b32.xlu1 %v10271_v3, %s5757_s27  ;;  %4447 = vmatmul.mubr.msk.bf16.gmra.mrb[4].mxu1 %vm2980_vm12, %v2947_v12  ;;  %v5413_v6 = vpop.permute.xlu0 %5412  ;;  %v2579_v35 = vsel %vm2538_vm5, %v8491_v46, %v4904_v57  ;;  %v2580_v3 = vsel %vm2538_vm5, %v8487_v2, %v4905_v18  ;;  %v2581_v46 = vsel %vm2538_vm5, %v8499_v5, %v4909_v39  ;;  %v5070_v19 = vunpack.i.h.bf16 %v10279_v10  ;;  %v10281_v5 = vld [vmem:[#allocation94_spill] sm:$0xff] }
 0x202   :  { %v5415_v45 = vunpack.i.h.bf16 %v5413_v6  ;;  %v5414_v33 = vunpack.i.l.bf16 %v5413_v6  ;;  %v2744_v32 = vsel %vm2733_vm9, %v2679_v56, %v5409_v61  ;;  %v2745_v54 = vsel %vm2733_vm9, %v2680_v1, %v5410_v13 }
 0x203   :  { %v5418_v44 = vpop.permute.xlu1 %5417  ;;  %5702 = vrot.lane.b32.xlu0 %v10276_v31, %s5755_s26  ;;  %v2582_v57 = vsel %vm2538_vm5, %v8503_v20, %v4910_v11  ;;  %v2644_v2 = vsel %vm2603_vm6, %v2579_v35, %v5064_v41  ;;  %v5225_v18 = vunpack.i.h.bf16 %v8483_v40  ;;  %v5224_v37 = vunpack.i.l.bf16 %v8483_v40 }
 0x204   :  { %v5420_v24 = vunpack.i.h.bf16 %v5418_v44  ;;  %v5419_v14 = vunpack.i.l.bf16 %v5418_v44  ;;  %v2807_v50 = vsel %vm2798_vm10, %v2742_v29, %v5414_v33  ;;  %v2808_v22 = vsel %vm2798_vm10, %v2743_v51, %v5415_v45  ;;  %v10282_v45 = vld [vmem:[#allocation151_spill] sm:$0xff] }
 0x205   :  { %5707 = vrot.lane.b32.xlu1 %v5706_v55, %s5755_s26  ;;  %v5423_v58 = vpop.permute.xlu0 %5422  ;;  %v5069_v55 = vunpack.i.l.bf16 %v10279_v10  ;;  %v5230_v20 = vunpack.i.h.bf16 %v8495_v8  ;;  %v5229_v63 = vunpack.i.l.bf16 %v8495_v8  ;;  %v2645_v6 = vsel %vm2603_vm6, %v2580_v3, %v5065_v34 }
 0x206   :  { %v5425_v9 = vunpack.i.h.bf16 %v5423_v58  ;;  %v5424_v26 = vunpack.i.l.bf16 %v5423_v58  ;;  %v2809_v30 = vsel %vm2798_vm10, %v2744_v32, %v5419_v14  ;;  %v2810_v12 = vsel %vm2798_vm10, %v2745_v54, %v5420_v24 }
 0x207   :  { %v5428_v48 = vpop.permute.xlu1 %5427  ;;  %5712 = vrot.lane.b32.xlu0 %v10277_v23, %s5756_s1  ;;  %v2646_v28 = vsel %vm2603_vm6, %v2581_v46, %v5069_v55  ;;  %v2647_v40 = vsel %vm2603_vm6, %v2582_v57, %v5070_v19  ;;  %v2709_v33 = vsel %vm2668_vm8, %v2644_v2, %v5224_v37  ;;  %v2710_v8 = vsel %vm2668_vm8, %v2645_v6, %v5225_v18  ;;  %v10285_v19 = vld [vmem:[#allocation107_spill] sm:$0xff]  ;;  %v10286_v2 = vld [vmem:[#allocation166_spill] sm:$0xff] }
 0x208   :  { %v5430_v16 = vunpack.i.h.bf16 %v5428_v48  ;;  %v5429_v0 = vunpack.i.l.bf16 %v5428_v48  ;;  %v2872_v59 = vsel %vm2863_vm11, %v2807_v50, %v5424_v26  ;;  %v2873_v43 = vsel %vm2863_vm11, %v2808_v22, %v5425_v9 }
 0x209   :  { %5717 = vrot.lane.b32.xlu1 %v10278_v15, %s5756_s1  ;;  %v2932_v53 = vpack.c.bf16 %v2873_v43, %v2872_v59  ;;  %v5433_v17 = vpop.permute.xlu0 %5432  ;;  %v2711_v24 = vsel %vm2668_vm8, %v2646_v28, %v5229_v63  ;;  %v2712_v14 = vsel %vm2668_vm8, %v2647_v40, %v5230_v20 }
 0x20a   :  { %v2874_v36 = vsel %vm2863_vm11, %v2809_v30, %v5429_v0  ;;  %v2875_v62 = vsel %vm2863_vm11, %v2810_v12, %v5430_v16  ;;  %v5435_v11 = vunpack.i.h.bf16 %v5433_v17  ;;  %v5434_v39 = vunpack.i.l.bf16 %v5433_v17  ;;  %v10284_v16 = vld [vmem:[#allocation139_spill] sm:$0xff] }
 0x20b   :  { %v2933_v52 = vpack.c.bf16 %v2875_v62, %v2874_v36  ;;  %v5438_v25 = vpop.permute.xlu1 %5437  ;;  %5722 = vrot.lane.b32.xlu0 %v10280_v60, %s5757_s27  ;;  %4418 = vmatprep.mubr.msk.bf16.mxu0 %vm2980_vm12, %v2932_v53 }
 0x20c   :  { %v5440_v27 = vunpack.i.h.bf16 %v5438_v25  ;;  %v5439_v41 = vunpack.i.l.bf16 %v5438_v25  ;;  %v2774_v56 = vsel %vm2733_vm9, %v2709_v33, %v5434_v39  ;;  %v2775_v1 = vsel %vm2733_vm9, %v2710_v8, %v5435_v11 }
 0x20d   :  { %5727 = vrot.lane.b32.xlu1 %v10281_v5, %s5757_s27  ;;  %4419 = vmatmul.mubr.msk.bf16.gmra.mrb[8].mxu0 %vm2980_vm12, %v2933_v52  ;;  %v5443_v21 = vpop.permute.xlu0 %5442 }
 0x20e   :  { %v5445_v61 = vunpack.i.h.bf16 %v5443_v21  ;;  %v5444_v44 = vunpack.i.l.bf16 %v5443_v21  ;;  %v2776_v51 = vsel %vm2733_vm9, %v2711_v24, %v5439_v41  ;;  %v2777_v58 = vsel %vm2733_vm9, %v2712_v14, %v5440_v27 }
 0x20f   :  { %v5448_v13 = vpop.permute.xlu1 %5447  ;;  %5732 = vrot.lane.b32.xlu0 %v10282_v45, %s5755_s26 }
 0x210   :  { %v5450_v31 = vunpack.i.h.bf16 %v5448_v13  ;;  %v5449_v38 = vunpack.i.l.bf16 %v5448_v13  ;;  %v2839_v26 = vsel %vm2798_vm10, %v2774_v56, %v5444_v44  ;;  %v2840_v48 = vsel %vm2798_vm10, %v2775_v1, %v5445_v61 }
 0x211   :  { %5737 = vrot.lane.b32.xlu1 %v10283_v42, %s5756_s1  ;;  %v5453_v29 = vpop.permute.xlu0 %5452 }
 0x212   :  { %v5455_v32 = vunpack.i.h.bf16 %v5453_v29  ;;  %v5454_v54 = vunpack.i.l.bf16 %v5453_v29  ;;  %v2841_v0 = vsel %vm2798_vm10, %v2776_v51, %v5449_v38  ;;  %v2842_v23 = vsel %vm2798_vm10, %v2777_v58, %v5450_v31 }
 0x213   :  { %v5458_v9 = vpop.permute.xlu1 %5457  ;;  %5742 = vrot.lane.b32.xlu0 %v10284_v16, %s5757_s27 }
 0x214   :  { %v5460_v50 = vunpack.i.h.bf16 %v5458_v9  ;;  %v5459_v22 = vunpack.i.l.bf16 %v5458_v9  ;;  %v2904_v30 = vsel %vm2863_vm11, %v2839_v26, %v5454_v54  ;;  %v2905_v12 = vsel %vm2863_vm11, %v2840_v48, %v5455_v32  ;;  %v10287_v26 = vld [vmem:[#allocation18_spill] sm:$0xff] }
 0x215   :  { %v2948_v59 = vpack.c.bf16 %v2905_v12, %v2904_v30  ;;  %v5463_v35 = vpop.permute.xlu0 %5462 }
 0x216   :  { %v2906_v43 = vsel %vm2863_vm11, %v2841_v0, %v5459_v22  ;;  %v2907_v15 = vsel %vm2863_vm11, %v2842_v23, %v5460_v50  ;;  %v5465_v62 = vunpack.i.h.bf16 %v5463_v35  ;;  %v5464_v17 = vunpack.i.l.bf16 %v5463_v35  ;;  %v10288_v50 = vld [vmem:[#allocation19_spill] sm:$0xff] }
 0x217   :  { %v2949_v53 = vpack.c.bf16 %v2907_v15, %v2906_v43  ;;  %v5468_v36 = vpop.permute.xlu1 %5467  ;;  %4450 = vmatprep.mubr.msk.bf16.mxu1 %vm2980_vm12, %v2948_v59 }
 0x218   :  { %v5470_v34 = vunpack.i.h.bf16 %v5468_v36  ;;  %v5469_v10 = vunpack.i.l.bf16 %v5468_v36  ;;  %v2746_v60 = vsel %vm2733_vm9, %v10285_v19, %v5464_v17  ;;  %v2747_v18 = vsel %vm2733_vm9, %v10286_v2, %v5465_v62 }
 0x219   :  { %4451 = vmatmul.mubr.msk.bf16.gmra.mrb[8].mxu1 %vm2980_vm12, %v2949_v53  ;;  %v5473_v3 = vpop.permute.xlu0 %5472 }
 0x21a   :  { %v5475_v52 = vunpack.i.h.bf16 %v5473_v3  ;;  %v5474_v25 = vunpack.i.l.bf16 %v5473_v3  ;;  %v2748_v5 = vsel %vm2733_vm9, %v8275_v49, %v5469_v10  ;;  %v2749_v20 = vsel %vm2733_vm9, %v8279_v47, %v5470_v34 }
 0x21b   :  { %v5478_v55 = vpop.permute.xlu1 %5477 }
 0x21c   :  { %v5480_v46 = vunpack.i.h.bf16 %v5478_v55  ;;  %v5479_v57 = vunpack.i.l.bf16 %v5478_v55  ;;  %v2811_v21 = vsel %vm2798_vm10, %v2746_v60, %v5474_v25  ;;  %v2812_v6 = vsel %vm2798_vm10, %v2747_v18, %v5475_v52 }
 0x21d   :  { %v5483_v37 = vpop.permute.xlu0 %5482 }
 0x21e   :  { %v5485_v63 = vunpack.i.h.bf16 %v5483_v37  ;;  %v5484_v11 = vunpack.i.l.bf16 %v5483_v37  ;;  %v2813_v41 = vsel %vm2798_vm10, %v2748_v5, %v5479_v57  ;;  %v2814_v13 = vsel %vm2798_vm10, %v2749_v20, %v5480_v46  ;;  %v10289_v37 = vld [vmem:[#allocation113_spill] sm:$0xff]  ;;  %v10290_v20 = vld [vmem:[#allocation114_spill] sm:$0xff] }
 0x21f   :  { %v5488_v39 = vpop.permute.xlu1 %5487 }
 0x220   :  { %v5490_v28 = vunpack.i.h.bf16 %v5488_v39  ;;  %v5489_v27 = vunpack.i.l.bf16 %v5488_v39  ;;  %v2876_v40 = vsel %vm2863_vm11, %v2811_v21, %v5484_v11  ;;  %v2877_v49 = vsel %vm2863_vm11, %v2812_v6, %v5485_v63  ;;  %v10291_v39 = vld [vmem:[#allocation16_spill] sm:$0xff]  ;;  %v10292_v6 = vld [vmem:[#allocation41_spill] sm:$0xff] }
 0x221   :  { %v2934_v61 = vpack.c.bf16 %v2877_v49, %v2876_v40  ;;  %v5493_v45 = vpop.permute.xlu0 %5492 }
 0x222   :  { %v2878_v47 = vsel %vm2863_vm11, %v2813_v41, %v5489_v27  ;;  %v2879_v44 = vsel %vm2863_vm11, %v2814_v13, %v5490_v28  ;;  %v5495_v31 = vunpack.i.h.bf16 %v5493_v45  ;;  %v5494_v38 = vunpack.i.l.bf16 %v5493_v45 }
 0x223   :  { %v2935_v33 = vpack.c.bf16 %v2879_v44, %v2878_v47  ;;  %v5498_v8 = vpop.permute.xlu1 %5497  ;;  %4422 = vmatprep.mubr.msk.bf16.mxu0 %vm2980_vm12, %v2934_v61 }
 0x224   :  { %v5500_v24 = vunpack.i.h.bf16 %v5498_v8  ;;  %v5499_v14 = vunpack.i.l.bf16 %v5498_v8  ;;  %v2778_v32 = vsel %vm2733_vm9, %v8545_v7, %v5494_v38  ;;  %v2779_v54 = vsel %vm2733_vm9, %v8549_v4, %v5495_v31 }
 0x225   :  { %4423 = vmatmul.mubr.msk.bf16.gmra.mrb[12].mxu0 %vm2980_vm12, %v2935_v33  ;;  %v5503_v42 = vpop.permute.xlu0 %5502 }
 0x226   :  { %v5505_v1 = vunpack.i.h.bf16 %v5503_v42  ;;  %v5504_v29 = vunpack.i.l.bf16 %v5503_v42  ;;  %v2780_v48 = vsel %vm2733_vm9, %v10287_v26, %v5499_v14  ;;  %v2781_v22 = vsel %vm2733_vm9, %v10288_v50, %v5500_v24 }
 0x227   :  { %v5508_v56 = vpop.permute.xlu1 %5507 }
 0x228   :  { %v5510_v51 = vunpack.i.h.bf16 %v5508_v56  ;;  %v5509_v58 = vunpack.i.l.bf16 %v5508_v56  ;;  %v2843_v30 = vsel %vm2798_vm10, %v2778_v32, %v5504_v29  ;;  %v2844_v12 = vsel %vm2798_vm10, %v2779_v54, %v5505_v1 }
 0x229   :  { %v5513_v9 = vpop.permute.xlu0 %5512 }
 0x22a   :  { %v5515_v16 = vunpack.i.h.bf16 %v5513_v9  ;;  %v5514_v0 = vunpack.i.l.bf16 %v5513_v9  ;;  %v2845_v7 = vsel %vm2798_vm10, %v2780_v48, %v5509_v58  ;;  %v2846_v4 = vsel %vm2798_vm10, %v2781_v22, %v5510_v51  ;;  %v10293_v22 = vld [vmem:[#allocation98_spill] sm:$0xff] }
 0x22b   :  { %v5518_v23 = vpop.permute.xlu1 %5517 }
 0x22c   :  { %v5520_v59 = vunpack.i.h.bf16 %v5518_v23  ;;  %v5519_v43 = vunpack.i.l.bf16 %v5518_v23  ;;  %v2908_v15 = vsel %vm2863_vm11, %v2843_v30, %v5514_v0  ;;  %v2909_v35 = vsel %vm2863_vm11, %v2844_v12, %v5515_v16  ;;  %v10294_v0 = vld [vmem:[#allocation99_spill] sm:$0xff] }
 0x22d   :  { %v2950_v53 = vpack.c.bf16 %v2909_v35, %v2908_v15  ;;  %v5523_v17 = vpop.permute.xlu0 %5522  ;;  %v10295_v12 = vld [vmem:[#allocation131_spill] sm:$0xff] }
 0x22e   :  { %v2910_v36 = vsel %vm2863_vm11, %v2845_v7, %v5519_v43  ;;  %v2911_v62 = vsel %vm2863_vm11, %v2846_v4, %v5520_v59  ;;  %v5525_v10 = vunpack.i.h.bf16 %v5523_v17  ;;  %v5524_v55 = vunpack.i.l.bf16 %v5523_v17  ;;  %v10296_v43 = vld [vmem:[#allocation58_spill] sm:$0xff] }
 0x22f   :  { %v2951_v3 = vpack.c.bf16 %v2911_v62, %v2910_v36  ;;  %v5528_v34 = vpop.permute.xlu1 %5527  ;;  %4454 = vmatprep.mubr.msk.bf16.mxu1 %vm2980_vm12, %v2950_v53 }
 0x230   :  { %v5530_v25 = vunpack.i.h.bf16 %v5528_v34  ;;  %v5529_v46 = vunpack.i.l.bf16 %v5528_v34  ;;  %v2750_v5 = vsel %vm2733_vm9, %v10289_v37, %v5524_v55  ;;  %v2751_v63 = vsel %vm2733_vm9, %v10290_v20, %v5525_v10 }
 0x231   :  { %4455 = vmatmul.mubr.msk.bf16.gmra.mrb[12].mxu1 %vm2980_vm12, %v2951_v3  ;;  %v5533_v52 = vpop.permute.xlu0 %5532 }
 0x232   :  { %v5535_v19 = vunpack.i.h.bf16 %v5533_v52  ;;  %v5534_v60 = vunpack.i.l.bf16 %v5533_v52  ;;  %v2752_v21 = vsel %vm2733_vm9, %v10291_v39, %v5529_v46  ;;  %v2753_v28 = vsel %vm2733_vm9, %v10292_v6, %v5530_v25 }
 0x233   :  { %v5538_v57 = vpop.permute.xlu1 %5537 }
 0x234   :  { %v5540_v2 = vunpack.i.h.bf16 %v5538_v57  ;;  %v5539_v18 = vunpack.i.l.bf16 %v5538_v57  ;;  %v2815_v40 = vsel %vm2798_vm10, %v2750_v5, %v5534_v60  ;;  %v2816_v49 = vsel %vm2798_vm10, %v2751_v63, %v5535_v19 }
 0x235   :  { %v5543_v11 = vpop.permute.xlu0 %5542 }
 0x236   :  { %v5545_v27 = vunpack.i.h.bf16 %v5543_v11  ;;  %v5544_v41 = vunpack.i.l.bf16 %v5543_v11  ;;  %v2817_v44 = vsel %vm2798_vm10, %v2752_v21, %v5539_v18  ;;  %v2818_v45 = vsel %vm2798_vm10, %v2753_v28, %v5540_v2  ;;  %v10297_v28 = vld [vmem:[#allocation115_spill] sm:$0xff] }
 0x237   :  { %v5548_v13 = vpop.permute.xlu1 %5547 }
 0x238   :  { %v5550_v61 = vunpack.i.h.bf16 %v5548_v13  ;;  %v5549_v47 = vunpack.i.l.bf16 %v5548_v13  ;;  %v2880_v33 = vsel %vm2863_vm11, %v2815_v40, %v5544_v41  ;;  %v2881_v8 = vsel %vm2863_vm11, %v2816_v49, %v5545_v27  ;;  %v10298_v41 = vld [vmem:[#allocation9_spill] sm:$0xff]  ;;  %v10299_v49 = vld [vmem:[#allocation15_spill] sm:$0xff] }
 0x239   :  { %v2936_v31 = vpack.c.bf16 %v2881_v8, %v2880_v33  ;;  %v5553_v24 = vpop.permute.xlu0 %5552 }
 0x23a   :  { %v2882_v38 = vsel %vm2863_vm11, %v2817_v44, %v5549_v47  ;;  %v2883_v42 = vsel %vm2863_vm11, %v2818_v45, %v5550_v61  ;;  %v5555_v1 = vunpack.i.h.bf16 %v5553_v24  ;;  %v5554_v29 = vunpack.i.l.bf16 %v5553_v24  ;;  %v10300_v47 = vld [vmem:[#allocation40_spill] sm:$0xff] }
 0x23b   :  { %v2937_v14 = vpack.c.bf16 %v2883_v42, %v2882_v38  ;;  %v5558_v56 = vpop.permute.xlu1 %5557  ;;  %4426 = vmatprep.mubr.msk.bf16.mxu0 %vm2980_vm12, %v2936_v31 }
 0x23c   :  { %v5560_v58 = vunpack.i.h.bf16 %v5558_v56  ;;  %v5559_v32 = vunpack.i.l.bf16 %v5558_v56  ;;  %v2782_v16 = vsel %vm2733_vm9, %v10293_v22, %v5554_v29  ;;  %v2783_v23 = vsel %vm2733_vm9, %v10294_v0, %v5555_v1 }
 0x23d   :  { %4427 = vmatmul.mubr.msk.bf16.gmra.mrb[16].mxu0 %vm2980_vm12, %v2937_v14  ;;  %v5563_v51 = vpop.permute.xlu0 %5562 }
 0x23e   :  { %v5565_v9 = vunpack.i.h.bf16 %v5563_v51  ;;  %v5564_v26 = vunpack.i.l.bf16 %v5563_v51  ;;  %v2784_v59 = vsel %vm2733_vm9, %v10295_v12, %v5559_v32  ;;  %v2785_v7 = vsel %vm2733_vm9, %v10296_v43, %v5560_v58 }
 0x23f   :  { %v5568_v54 = vpop.permute.xlu1 %5567 }
 0x240   :  { %v5570_v48 = vunpack.i.h.bf16 %v5568_v54  ;;  %v5569_v50 = vunpack.i.l.bf16 %v5568_v54  ;;  %v2847_v53 = vsel %vm2798_vm10, %v2782_v16, %v5564_v26  ;;  %v2848_v36 = vsel %vm2798_vm10, %v2783_v23, %v5565_v9 }
 0x241   :  { %v5573_v30 = vpop.permute.xlu0 %5572 }
 0x242   :  { %v5575_v4 = vunpack.i.h.bf16 %v5573_v30  ;;  %v5574_v15 = vunpack.i.l.bf16 %v5573_v30  ;;  %v2849_v3 = vsel %vm2798_vm10, %v2784_v59, %v5569_v50  ;;  %v2850_v34 = vsel %vm2798_vm10, %v2785_v7, %v5570_v48  ;;  %v10301_v7 = vld [vmem:[#allocation134_spill] sm:$0xff] }
 0x243   :  { %v5578_v35 = vpop.permute.xlu1 %5577 }
 0x244   :  { %v5580_v62 = vunpack.i.h.bf16 %v5578_v35  ;;  %v5579_v17 = vunpack.i.l.bf16 %v5578_v35  ;;  %v2912_v10 = vsel %vm2863_vm11, %v2847_v53, %v5574_v15  ;;  %v2913_v55 = vsel %vm2863_vm11, %v2848_v36, %v5575_v4  ;;  %v10302_v15 = vld [vmem:[#allocation55_spill] sm:$0xff]  ;;  %v10303_v36 = vld [vmem:[#allocation57_spill] sm:$0xff] }
 0x245   :  { %v2952_v52 = vpack.c.bf16 %v2913_v55, %v2912_v10  ;;  %v5583_v57 = vpop.permute.xlu0 %5582 }
 0x246   :  { %v2914_v25 = vsel %vm2863_vm11, %v2849_v3, %v5579_v17  ;;  %v2915_v46 = vsel %vm2863_vm11, %v2850_v34, %v5580_v62  ;;  %v5585_v2 = vunpack.i.h.bf16 %v5583_v57  ;;  %v5584_v18 = vunpack.i.l.bf16 %v5583_v57  ;;  %v10304_v17 = vld [vmem:[#allocation54_spill] sm:$0xff] }
 0x247   :  { %v2953_v19 = vpack.c.bf16 %v2915_v46, %v2914_v25  ;;  %v5588_v60 = vpop.permute.xlu1 %5587  ;;  %4458 = vmatprep.mubr.msk.bf16.mxu1 %vm2980_vm12, %v2952_v52 }
 0x248   :  { %v5590_v5 = vunpack.i.h.bf16 %v5588_v60  ;;  %v5589_v20 = vunpack.i.l.bf16 %v5588_v60  ;;  %v2754_v27 = vsel %vm2733_vm9, %v10297_v28, %v5584_v18  ;;  %v2755_v13 = vsel %vm2733_vm9, %v10298_v41, %v5585_v2 }
 0x249   :  { %4459 = vmatmul.mubr.msk.bf16.gmra.mrb[16].mxu1 %vm2980_vm12, %v2953_v19  ;;  %v5593_v37 = vpop.permute.xlu0 %5592 }
 0x24a   :  { %v5595_v11 = vunpack.i.h.bf16 %v5593_v37  ;;  %v5594_v39 = vunpack.i.l.bf16 %v5593_v37  ;;  %v2756_v61 = vsel %vm2733_vm9, %v10299_v49, %v5589_v20  ;;  %v2757_v44 = vsel %vm2733_vm9, %v10300_v47, %v5590_v5 }
 0x24b   :  { %v5598_v63 = vpop.permute.xlu1 %5597 }
 0x24c   :  { %v5600_v21 = vunpack.i.h.bf16 %v5598_v63  ;;  %v5599_v6 = vunpack.i.l.bf16 %v5598_v63  ;;  %v2819_v31 = vsel %vm2798_vm10, %v2754_v27, %v5594_v39  ;;  %v2820_v38 = vsel %vm2798_vm10, %v2755_v13, %v5595_v11 }
 0x24d   :  { %v5603_v40 = vpop.permute.xlu0 %5602 }
 0x24e   :  { %v5605_v45 = vunpack.i.h.bf16 %v5603_v40  ;;  %v5604_v33 = vunpack.i.l.bf16 %v5603_v40  ;;  %v2821_v14 = vsel %vm2798_vm10, %v2756_v61, %v5599_v6  ;;  %v2822_v56 = vsel %vm2798_vm10, %v2757_v44, %v5600_v21  ;;  %v10305_v44 = vld [vmem:[#allocation45_spill] sm:$0xff] }
 0x24f   :  { %v5608_v8 = vpop.permute.xlu1 %5607 }
 0x250   :  { %v5610_v42 = vunpack.i.h.bf16 %v5608_v8  ;;  %v5609_v24 = vunpack.i.l.bf16 %v5608_v8  ;;  %v2884_v1 = vsel %vm2863_vm11, %v2819_v31, %v5604_v33  ;;  %v2885_v29 = vsel %vm2863_vm11, %v2820_v38, %v5605_v45  ;;  %v10306_v33 = vld [vmem:[#allocation44_spill] sm:$0xff]  ;;  %v10307_v38 = vld [vmem:[#allocation17_spill] sm:$0xff] }
 0x251   :  { %v2938_v51 = vpack.c.bf16 %v2885_v29, %v2884_v1  ;;  %v5613_v54 = vpop.permute.xlu0 %5612 }
 0x252   :  { %v2886_v58 = vsel %vm2863_vm11, %v2821_v14, %v5609_v24  ;;  %v2887_v32 = vsel %vm2863_vm11, %v2822_v56, %v5610_v42  ;;  %v5615_v48 = vunpack.i.h.bf16 %v5613_v54  ;;  %v5614_v50 = vunpack.i.l.bf16 %v5613_v54  ;;  %v10308_v24 = vld [vmem:[#allocation95_spill] sm:$0xff] }
 0x253   :  { %v2939_v9 = vpack.c.bf16 %v2887_v32, %v2886_v58  ;;  %v5618_v26 = vpop.permute.xlu1 %5617  ;;  %4430 = vmatprep.mubr.msk.bf16.mxu0 %vm2980_vm12, %v2938_v51 }
 0x254   :  { %v5620_v16 = vunpack.i.h.bf16 %v5618_v26  ;;  %v5619_v0 = vunpack.i.l.bf16 %v5618_v26  ;;  %v2786_v4 = vsel %vm2733_vm9, %v10301_v7, %v5614_v50  ;;  %v2787_v35 = vsel %vm2733_vm9, %v10302_v15, %v5615_v48 }
 0x255   :  { %4431 = vmatmul.mubr.msk.bf16.gmra.mrb[20].mxu0 %vm2980_vm12, %v2939_v9  ;;  %v5623_v22 = vpop.permute.xlu0 %5622 }
 0x256   :  { %v5625_v30 = vunpack.i.h.bf16 %v5623_v22  ;;  %v5624_v12 = vunpack.i.l.bf16 %v5623_v22  ;;  %v2788_v62 = vsel %vm2733_vm9, %v10303_v36, %v5619_v0  ;;  %v2789_v3 = vsel %vm2733_vm9, %v10304_v17, %v5620_v16 }
 0x257   :  { %v5628_v23 = vpop.permute.xlu1 %5627 }
 0x258   :  { %v5630_v59 = vunpack.i.h.bf16 %v5628_v23  ;;  %v5629_v43 = vunpack.i.l.bf16 %v5628_v23  ;;  %v2851_v52 = vsel %vm2798_vm10, %v2786_v4, %v5624_v12  ;;  %v2852_v25 = vsel %vm2798_vm10, %v2787_v35, %v5625_v30 }
 0x259   :  { %v5633_v53 = vpop.permute.xlu0 %5632 }
 0x25a   :  { %v5635_v34 = vunpack.i.h.bf16 %v5633_v53  ;;  %v5634_v10 = vunpack.i.l.bf16 %v5633_v53  ;;  %v2853_v19 = vsel %vm2798_vm10, %v2788_v62, %v5629_v43  ;;  %v2854_v60 = vsel %vm2798_vm10, %v2789_v3, %v5630_v59  ;;  %v10309_v3 = vld [vmem:[#allocation116_spill] sm:$0xff] }
 0x25b   :  { %v5638_v55 = vpop.permute.xlu1 %5637 }
 0x25c   :  { %v5640_v46 = vunpack.i.h.bf16 %v5638_v55  ;;  %v5639_v57 = vunpack.i.l.bf16 %v5638_v55  ;;  %v2916_v2 = vsel %vm2863_vm11, %v2851_v52, %v5634_v10  ;;  %v2917_v18 = vsel %vm2863_vm11, %v2852_v25, %v5635_v34  ;;  %v10310_v10 = vld [vmem:[#allocation117_spill] sm:$0xff]  ;;  %v10311_v25 = vld [vmem:[#allocation42_spill] sm:$0xff] }
 0x25d   :  { %v2954_v37 = vpack.c.bf16 %v2917_v18, %v2916_v2  ;;  %v5643_v63 = vpop.permute.xlu0 %5642 }
 0x25e   :  { %v2918_v5 = vsel %vm2863_vm11, %v2853_v19, %v5639_v57  ;;  %v2919_v20 = vsel %vm2863_vm11, %v2854_v60, %v5640_v46  ;;  %v5645_v21 = vunpack.i.h.bf16 %v5643_v63  ;;  %v5644_v6 = vunpack.i.l.bf16 %v5643_v63  ;;  %v10312_v57 = vld [vmem:[#allocation20_spill] sm:$0xff] }
 0x25f   :  { %v2955_v11 = vpack.c.bf16 %v2919_v20, %v2918_v5  ;;  %v5648_v39 = vpop.permute.xlu1 %5647  ;;  %4462 = vmatprep.mubr.msk.bf16.mxu1 %vm2980_vm12, %v2954_v37 }
 0x260   :  { %v5650_v27 = vunpack.i.h.bf16 %v5648_v39  ;;  %v5649_v41 = vunpack.i.l.bf16 %v5648_v39  ;;  %v2758_v45 = vsel %vm2733_vm9, %v10305_v44, %v5644_v6  ;;  %v2759_v8 = vsel %vm2733_vm9, %v10306_v33, %v5645_v21 }
 0x261   :  { %4463 = vmatmul.mubr.msk.bf16.gmra.mrb[20].mxu1 %vm2980_vm12, %v2955_v11  ;;  %v5653_v28 = vpop.permute.xlu0 %5652 }
 0x262   :  { %v5655_v40 = vunpack.i.h.bf16 %v5653_v28  ;;  %v5654_v49 = vunpack.i.l.bf16 %v5653_v28  ;;  %v2760_v42 = vsel %vm2733_vm9, %v10307_v38, %v5649_v41  ;;  %v2761_v14 = vsel %vm2733_vm9, %v10308_v24, %v5650_v27 }
 0x263   :  { %v5658_v13 = vpop.permute.xlu1 %5657 }
 0x264   :  { %v5660_v61 = vunpack.i.h.bf16 %v5658_v13  ;;  %v5659_v47 = vunpack.i.l.bf16 %v5658_v13  ;;  %v2823_v51 = vsel %vm2798_vm10, %v2758_v45, %v5654_v49  ;;  %v2824_v58 = vsel %vm2798_vm10, %v2759_v8, %v5655_v40 }
 0x265   :  { %v5663_v31 = vpop.permute.xlu0 %5662 }
 0x266   :  { %v5665_v56 = vunpack.i.h.bf16 %v5663_v31  ;;  %v5664_v1 = vunpack.i.l.bf16 %v5663_v31  ;;  %v2825_v9 = vsel %vm2798_vm10, %v2760_v42, %v5659_v47  ;;  %v2826_v26 = vsel %vm2798_vm10, %v2761_v14, %v5660_v61  ;;  %v10313_v14 = vld [vmem:[#allocation96_spill] sm:$0xff] }
 0x267   :  { %v5668_v29 = vpop.permute.xlu1 %5667 }
 0x268   :  { %v5670_v32 = vunpack.i.h.bf16 %v5668_v29  ;;  %v5669_v54 = vunpack.i.l.bf16 %v5668_v29  ;;  %v2888_v48 = vsel %vm2863_vm11, %v2823_v51, %v5664_v1  ;;  %v2889_v50 = vsel %vm2863_vm11, %v2824_v58, %v5665_v56  ;;  %v10314_v1 = vld [vmem:[#allocation97_spill] sm:$0xff]  ;;  %v10315_v51 = vld [vmem:[#allocation47_spill] sm:$0xff] }
 0x269   :  { %v2940_v22 = vpack.c.bf16 %v2889_v50, %v2888_v48  ;;  %v5673_v23 = vpop.permute.xlu0 %5672  ;;  %v10318_v48 = vld [vmem:[#allocation74_spill] sm:$0xff] }
 0x26a   :  { %v2890_v16 = vsel %vm2863_vm11, %v2825_v9, %v5669_v54  ;;  %v2891_v0 = vsel %vm2863_vm11, %v2826_v26, %v5670_v32  ;;  %v5675_v59 = vunpack.i.h.bf16 %v5673_v23  ;;  %v5674_v43 = vunpack.i.l.bf16 %v5673_v23  ;;  %v10316_v32 = vld [vmem:[#allocation48_spill] sm:$0xff]  ;;  %v10317_v9 = vld [vmem:[#allocation62_spill] sm:$0xff] }
 0x26b   :  { %v2941_v30 = vpack.c.bf16 %v2891_v0, %v2890_v16  ;;  %v5678_v12 = vpop.permute.xlu1 %5677  ;;  %4434 = vmatprep.mubr.msk.bf16.mxu0 %vm2980_vm12, %v2940_v22 }
 0x26c   :  { %v5680_v4 = vunpack.i.h.bf16 %v5678_v12  ;;  %v5679_v15 = vunpack.i.l.bf16 %v5678_v12  ;;  %v2790_v34 = vsel %vm2733_vm9, %v10309_v3, %v5674_v43  ;;  %v2791_v55 = vsel %vm2733_vm9, %v10310_v10, %v5675_v59 }
 0x26d   :  { %4435 = vmatmul.mubr.msk.bf16.gmra.mrb[24].mxu0 %vm2980_vm12, %v2941_v30  ;;  %v5683_v7 = vpop.permute.xlu0 %5682 }
 0x26e   :  { %v5685_v53 = vunpack.i.h.bf16 %v5683_v7  ;;  %v5684_v36 = vunpack.i.l.bf16 %v5683_v7  ;;  %v2792_v46 = vsel %vm2733_vm9, %v10311_v25, %v5679_v15  ;;  %v2793_v19 = vsel %vm2733_vm9, %v10312_v57, %v5680_v4 }
 0x26f   :  { %v5688_v35 = vpop.permute.xlu1 %5687 }
 0x270   :  { %v5690_v62 = vunpack.i.h.bf16 %v5688_v35  ;;  %v5689_v17 = vunpack.i.l.bf16 %v5688_v35  ;;  %v2855_v37 = vsel %vm2798_vm10, %v2790_v34, %v5684_v36  ;;  %v2856_v5 = vsel %vm2798_vm10, %v2791_v55, %v5685_v53 }
 0x271   :  { %v5693_v52 = vpop.permute.xlu0 %5692 }
 0x272   :  { %v5695_v60 = vunpack.i.h.bf16 %v5693_v52  ;;  %v5694_v2 = vunpack.i.l.bf16 %v5693_v52  ;;  %v2857_v11 = vsel %vm2798_vm10, %v2792_v46, %v5689_v17  ;;  %v2858_v39 = vsel %vm2798_vm10, %v2793_v19, %v5690_v62 }
 0x273   :  { %v5698_v18 = vpop.permute.xlu1 %5697 }
 0x274   :  { %v5700_v20 = vunpack.i.h.bf16 %v5698_v18  ;;  %v5699_v63 = vunpack.i.l.bf16 %v5698_v18  ;;  %v2920_v21 = vsel %vm2863_vm11, %v2855_v37, %v5694_v2  ;;  %v2921_v6 = vsel %vm2863_vm11, %v2856_v5, %v5695_v60  ;;  %v10319_v18 = vld [vmem:[#allocation21_spill] sm:$0xff]  ;;  %v10320_v5 = vld [vmem:[#allocation59_spill] sm:$0xff] }
 0x275   :  { %v2956_v28 = vpack.c.bf16 %v2921_v6, %v2920_v21  ;;  %v5703_v13 = vpop.permute.xlu0 %5702 }
 0x276   :  { %v2922_v27 = vsel %vm2863_vm11, %v2857_v11, %v5699_v63  ;;  %v2923_v41 = vsel %vm2863_vm11, %v2858_v39, %v5700_v20  ;;  %v5705_v61 = vunpack.i.h.bf16 %v5703_v13  ;;  %v5704_v47 = vunpack.i.l.bf16 %v5703_v13 }
 0x277   :  { %v2957_v40 = vpack.c.bf16 %v2923_v41, %v2922_v27  ;;  %v5708_v49 = vpop.permute.xlu1 %5707  ;;  %4466 = vmatprep.mubr.msk.bf16.mxu1 %vm2980_vm12, %v2956_v28 }
 0x278   :  { %v5710_v44 = vunpack.i.h.bf16 %v5708_v49  ;;  %v5709_v45 = vunpack.i.l.bf16 %v5708_v49  ;;  %v2762_v56 = vsel %vm2733_vm9, %v10313_v14, %v5704_v47  ;;  %v2763_v29 = vsel %vm2733_vm9, %v10314_v1, %v5705_v61 }
 0x279   :  { %4467 = vmatmul.mubr.msk.bf16.gmra.mrb[24].mxu1 %vm2980_vm12, %v2957_v40  ;;  %v5713_v33 = vpop.permute.xlu0 %5712 }
 0x27a   :  { %v5715_v8 = vunpack.i.h.bf16 %v5713_v33  ;;  %v5714_v31 = vunpack.i.l.bf16 %v5713_v33  ;;  %v2764_v58 = vsel %vm2733_vm9, %v10315_v51, %v5709_v45  ;;  %v2765_v54 = vsel %vm2733_vm9, %v10316_v32, %v5710_v44 }
 0x27b   :  { %v5718_v38 = vpop.permute.xlu1 %5717  ;;  %v2796_v26 = vsel %vm2733_vm9, %v10317_v9, %v5709_v45  ;;  %v2797_v50 = vsel %vm2733_vm9, %v10318_v48, %v5710_v44 }
 0x27c   :  { %v5720_v42 = vunpack.i.h.bf16 %v5718_v38  ;;  %v5719_v24 = vunpack.i.l.bf16 %v5718_v38  ;;  %v2827_v16 = vsel %vm2798_vm10, %v2762_v56, %v5714_v31  ;;  %v2828_v0 = vsel %vm2798_vm10, %v2763_v29, %v5715_v8 }
 0x27d   :  { %v5723_v22 = vpop.permute.xlu0 %5722 }
 0x27e   :  { %v5725_v23 = vunpack.i.h.bf16 %v5723_v22  ;;  %v5724_v30 = vunpack.i.l.bf16 %v5723_v22  ;;  %v2829_v59 = vsel %vm2798_vm10, %v2764_v58, %v5719_v24  ;;  %v2830_v43 = vsel %vm2798_vm10, %v2765_v54, %v5720_v42 }
 0x27f   :  { %v5728_v12 = vpop.permute.xlu1 %5727  ;;  %v2861_v15 = vsel %vm2798_vm10, %v2796_v26, %v5719_v24  ;;  %v2862_v35 = vsel %vm2798_vm10, %v2797_v50, %v5720_v42 }
 0x280   :  { %v5730_v7 = vunpack.i.h.bf16 %v5728_v12  ;;  %v5729_v4 = vunpack.i.l.bf16 %v5728_v12  ;;  %v2892_v53 = vsel %vm2863_vm11, %v2827_v16, %v5724_v30  ;;  %v2893_v36 = vsel %vm2863_vm11, %v2828_v0, %v5725_v23 }
 0x281   :  { %v2942_v62 = vpack.c.bf16 %v2893_v36, %v2892_v53  ;;  %v5733_v10 = vpop.permute.xlu0 %5732 }
 0x282   :  { %v2894_v17 = vsel %vm2863_vm11, %v2829_v59, %v5729_v4  ;;  %v2895_v3 = vsel %vm2863_vm11, %v2830_v43, %v5730_v7  ;;  %v2926_v34 = vsel %vm2863_vm11, %v2861_v15, %v5729_v4  ;;  %v2927_v55 = vsel %vm2863_vm11, %v2862_v35, %v5730_v7 }
 0x283   :  { %v2943_v52 = vpack.c.bf16 %v2895_v3, %v2894_v17  ;;  %v5735_v25 = vunpack.i.h.bf16 %v5733_v10  ;;  %v5734_v46 = vunpack.i.l.bf16 %v5733_v10  ;;  %v5738_v57 = vpop.permute.xlu1 %5737  ;;  %v2959_v19 = vpack.c.bf16 %v2927_v55, %v2926_v34  ;;  %4438 = vmatprep.mubr.msk.bf16.mxu0 %vm2980_vm12, %v2942_v62 }
 0x284   :  { %v5740_v60 = vunpack.i.h.bf16 %v5738_v57  ;;  %v5739_v2 = vunpack.i.l.bf16 %v5738_v57 }
 0x285   :  { %v2794_v37 = vsel %vm2733_vm9, %v10319_v18, %v5734_v46  ;;  %v2795_v20 = vsel %vm2733_vm9, %v10320_v5, %v5735_v25  ;;  %4439 = vmatmul.mubr.msk.bf16.gmra.mrb[28].mxu0 %vm2980_vm12, %v2943_v52  ;;  %v5743_v63 = vpop.permute.xlu0 %5742 }
 0x286   :  { %v5745_v11 = vunpack.i.h.bf16 %v5743_v63  ;;  %v5744_v39 = vunpack.i.l.bf16 %v5743_v63  ;;  %v2859_v21 = vsel %vm2798_vm10, %v2794_v37, %v5739_v2  ;;  %v2860_v6 = vsel %vm2798_vm10, %v2795_v20, %v5740_v60 }
 0x288   :  { %v2924_v28 = vsel %vm2863_vm11, %v2859_v21, %v5744_v39  ;;  %v2925_v27 = vsel %vm2863_vm11, %v2860_v6, %v5745_v11 }
 0x289   :  { %v2958_v41 = vpack.c.bf16 %v2925_v27, %v2924_v28 }
 0x28b   :  { %4470 = vmatprep.mubr.msk.bf16.mxu1 %vm2980_vm12, %v2958_v41 }
 0x28c   :  { %4471 = vmatmul.mubr.msk.bf16.gmra.mrb[28].mxu1 %vm2980_vm12, %v2959_v19 }
 0x2b4   :  { %v4412_v13 = vpop.f32.mrb[0].mxu0 }
 0x2b5   :  { %v3115_v40 = vpop.f32.mrb[1].mxu0  ;;  %v3476_v31 = vmul.f32 %v4412_v13, %v4412_v13 }
 0x2b6   :  { %v4413_v49 = vpop.f32.mrb[2].mxu0  ;;  %v3474_v44 = vmul.f32 %v3115_v40, %v3115_v40 }
 0x2b7   :  { %v4186_v61 = vpack.c.bf16 %v4413_v49, %v4412_v13  ;;  %v3118_v47 = vpop.f32.mrb[3].mxu0  ;;  %v3477_v24 = vmul.f32 %v4413_v49, %v4413_v49 }
 0x2b8   :  { %v3370_v45 = vadd.f32 %v3118_v47, %v3115_v40  ;;  %v3475_v33 = vmul.f32 %v3118_v47, %v3118_v47  ;;  %v4181_v8 = vpack.c.bf16 %v3118_v47, %v3115_v40 }
 0x2b9   :  { %4338 = vst [vmem:[%s9347_s2 + $0x8] sm:$0xff] %v4186_v61  }
 0x2ba   :  { %v3371_v38 = vadd.f32 %v4412_v13, %v3370_v45  ;;  %v3538_v42 = vadd.f32 %v3475_v33, %v3474_v44  ;;  %4182 = vst [vmem:[%s9347_s2] sm:$0xff] %v4181_v8  }
 0x2bc   :  { %v3539_v14 = vadd.f32 %v3538_v42, %v3476_v31  ;;  %v3372_v56 = vadd.f32 %v4413_v49, %v3371_v38 }
 0x2be   :  { %v3540_v1 = vadd.f32 %v3539_v14, %v3477_v24 }
 0x2c0   :  { %v4444_v29 = vpop.f32.mrb[0].mxu1 }
 0x2c1   :  { %v3243_v51 = vpop.f32.mrb[1].mxu1  ;;  %v3508_v22 = vmul.f32 %v4444_v29, %v4444_v29 }
 0x2c2   :  { %v4445_v58 = vpop.f32.mrb[2].mxu1  ;;  %v3506_v9 = vmul.f32 %v3243_v51, %v3243_v51 }
 0x2c3   :  { %v4266_v32 = vpack.c.bf16 %v4445_v58, %v4444_v29  ;;  %v3246_v54 = vpop.f32.mrb[3].mxu1  ;;  %v3509_v23 = vmul.f32 %v4445_v58, %v4445_v58 }
 0x2c4   :  { %v3422_v26 = vadd.f32 %v3246_v54, %v3243_v51  ;;  %v3507_v48 = vmul.f32 %v3246_v54, %v3246_v54  ;;  %v4261_v50 = vpack.c.bf16 %v3246_v54, %v3243_v51 }
 0x2c5   :  { %4354 = vst [vmem:[%s9347_s2 + $0x88] sm:$0xff] %v4266_v32  }
 0x2c6   :  { %v3423_v16 = vadd.f32 %v4444_v29, %v3422_v26  ;;  %v3590_v0 = vadd.f32 %v3507_v48, %v3506_v9  ;;  %4353 = vst [vmem:[%s9347_s2 + $0x80] sm:$0xff] %v4261_v50  }
 0x2c8   :  { %v3591_v30 = vadd.f32 %v3590_v0, %v3508_v22  ;;  %v4416_v12 = vpop.f32.mrb[4].mxu0  ;;  %v3424_v59 = vadd.f32 %v4445_v58, %v3423_v16 }
 0x2c9   :  { %v3131_v43 = vpop.f32.mrb[5].mxu0  ;;  %v3480_v10 = vmul.f32 %v4416_v12, %v4416_v12 }
 0x2ca   :  { %v3373_v7 = vadd.f32 %v3372_v56, %v3131_v43  ;;  %v3478_v4 = vmul.f32 %v3131_v43, %v3131_v43  ;;  %v4417_v15 = vpop.f32.mrb[6].mxu0  ;;  %v3592_v35 = vadd.f32 %v3591_v30, %v3509_v23 }
 0x2cb   :  { %v4196_v53 = vpack.c.bf16 %v4417_v15, %v4416_v12  ;;  %v3134_v36 = vpop.f32.mrb[7].mxu0  ;;  %v3481_v25 = vmul.f32 %v4417_v15, %v4417_v15 }
 0x2cc   :  { %v3541_v62 = vadd.f32 %v3540_v1, %v3478_v4  ;;  %v3374_v17 = vadd.f32 %v3373_v7, %v3134_v36  ;;  %v3479_v3 = vmul.f32 %v3134_v36, %v3134_v36  ;;  %v4191_v34 = vpack.c.bf16 %v3134_v36, %v3131_v43 }
 0x2cd   :  { %4340 = vst [vmem:[%s9347_s2 + $0x18] sm:$0xff] %v4196_v53  }
 0x2ce   :  { %v3375_v55 = vadd.f32 %v4416_v12, %v3374_v17  ;;  %v3542_v52 = vadd.f32 %v3541_v62, %v3479_v3  ;;  %4339 = vst [vmem:[%s9347_s2 + $0x10] sm:$0xff] %v4191_v34  }
 0x2d0   :  { %v9209_v46 = vadd.f32 %v4417_v15, %v3375_v55  ;;  %v3543_v57 = vadd.f32 %v3542_v52, %v3480_v10 }
 0x2d2   :  { %v9211_v19 = vadd.f32 %v3543_v57, %v3481_v25 }
 0x2d4   :  { %v4448_v60 = vpop.f32.mrb[4].mxu1  ;;  %v3545_v36 = vrot.slane %v9211_v19, 4 }
 0x2d5   :  { %v3259_v2 = vpop.f32.mrb[5].mxu1  ;;  %v3512_v27 = vmul.f32 %v4448_v60, %v4448_v60 }
 0x2d6   :  { %v3425_v18 = vadd.f32 %v3424_v59, %v3259_v2  ;;  %v3510_v37 = vmul.f32 %v3259_v2, %v3259_v2  ;;  %v4449_v5 = vpop.f32.mrb[6].mxu1 }
 0x2d7   :  { %v4276_v20 = vpack.c.bf16 %v4449_v5, %v4448_v60  ;;  %v3262_v63 = vpop.f32.mrb[7].mxu1  ;;  %v3513_v40 = vmul.f32 %v4449_v5, %v4449_v5 }
 0x2d8   :  { %v3593_v11 = vadd.f32 %v3592_v35, %v3510_v37  ;;  %v3426_v39 = vadd.f32 %v3425_v18, %v3262_v63  ;;  %v3511_v21 = vmul.f32 %v3262_v63, %v3262_v63  ;;  %v4271_v6 = vpack.c.bf16 %v3262_v63, %v3259_v2 }
 0x2d9   :  { %4356 = vst [vmem:[%s9347_s2 + $0x98] sm:$0xff] %v4276_v20   ;;  %v3377_v35 = vrot.slane %v9209_v46, 4  ;;  %v3546_v18 = vadd.f32 %v3545_v36, %v9211_v19 }
 0x2da   :  { %v3427_v28 = vadd.f32 %v4448_v60, %v3426_v39  ;;  %v3594_v41 = vadd.f32 %v3593_v11, %v3511_v21  ;;  %4355 = vst [vmem:[%s9347_s2 + $0x90] sm:$0xff] %v4271_v6  }
 0x2db   :  { %v3378_v10 = vadd.f32 %v3377_v35, %v9209_v46  ;;  %v3547_v21 = vrot.slane %v3546_v18, 2 }
 0x2dc   :  { %v9219_v13 = vadd.f32 %v4449_v5, %v3427_v28  ;;  %v3595_v49 = vadd.f32 %v3594_v41, %v3512_v27 }
 0x2dd   :  { %v3379_v46 = vrot.slane %v3378_v10, 2 }
 0x2de   :  { %v9221_v61 = vadd.f32 %v3595_v49, %v3513_v40  ;;  %v3548_v49 = vadd.f32 %v3547_v21, %v3546_v18 }
 0x2df   :  { %v3380_v27 = vadd.f32 %v3379_v46, %v3378_v10 }
 0x2e0   :  { %v4420_v47 = vpop.f32.mrb[8].mxu0 }
 0x2e1   :  { %v3147_v44 = vpop.f32.mrb[9].mxu0  ;;  %v3484_v14 = vmul.f32 %v4420_v47, %v4420_v47 }
 0x2e2   :  { %v4421_v45 = vpop.f32.mrb[10].mxu0  ;;  %v3482_v31 = vmul.f32 %v3147_v44, %v3147_v44 }
 0x2e3   :  { %v4206_v33 = vpack.c.bf16 %v4421_v45, %v4420_v47  ;;  %v3150_v8 = vpop.f32.mrb[11].mxu0  ;;  %v3485_v29 = vmul.f32 %v4421_v45, %v4421_v45 }
 0x2e4   :  { %v3383_v38 = vadd.f32 %v3150_v8, %v3147_v44  ;;  %v3483_v42 = vmul.f32 %v3150_v8, %v3150_v8  ;;  %v4201_v24 = vpack.c.bf16 %v3150_v8, %v3147_v44 }
 0x2e5   :  { %4342 = vst [vmem:[%s9347_s2 + $0x28] sm:$0xff] %v4206_v33  }
 0x2e6   :  { %v3384_v56 = vadd.f32 %v4420_v47, %v3383_v38  ;;  %v3551_v1 = vadd.f32 %v3483_v42, %v3482_v31  ;;  %4341 = vst [vmem:[%s9347_s2 + $0x20] sm:$0xff] %v4201_v24   ;;  %v3381_v38 = vrot.slane %v3380_v27, 1 }
 0x2e8   :  { %v3552_v51 = vadd.f32 %v3551_v1, %v3484_v14  ;;  %v3385_v58 = vadd.f32 %v4421_v45, %v3384_v56 }
 0x2ea   :  { %v3553_v32 = vadd.f32 %v3552_v51, %v3485_v29 }
 0x2ec   :  { %v4452_v54 = vpop.f32.mrb[8].mxu1 }
 0x2ed   :  { %v3275_v9 = vpop.f32.mrb[9].mxu1  ;;  %v3516_v30 = vmul.f32 %v4452_v54, %v4452_v54 }
 0x2ee   :  { %v4453_v26 = vpop.f32.mrb[10].mxu1  ;;  %v3514_v22 = vmul.f32 %v3275_v9, %v3275_v9 }
 0x2ef   :  { %v4286_v48 = vpack.c.bf16 %v4453_v26, %v4452_v54  ;;  %v3278_v50 = vpop.f32.mrb[11].mxu1  ;;  %v3517_v43 = vmul.f32 %v4453_v26, %v4453_v26 }
 0x2f0   :  { %v3435_v16 = vadd.f32 %v3278_v50, %v3275_v9  ;;  %v3515_v0 = vmul.f32 %v3278_v50, %v3278_v50  ;;  %v4281_v23 = vpack.c.bf16 %v3278_v50, %v3275_v9 }
 0x2f1   :  { %4358 = vst [vmem:[%s9347_s2 + $0xa8] sm:$0xff] %v4286_v48  }
 0x2f2   :  { %v3436_v12 = vadd.f32 %v4452_v54, %v3435_v16  ;;  %v3603_v59 = vadd.f32 %v3515_v0, %v3514_v22  ;;  %4357 = vst [vmem:[%s9347_s2 + $0xa0] sm:$0xff] %v4281_v23   ;;  %v3382_v22 = vadd.f32 %v3381_v38, %v3380_v27 }
 0x2f4   :  { %v3604_v7 = vadd.f32 %v3603_v59, %v3516_v30  ;;  %v3437_v4 = vadd.f32 %v4453_v26, %v3436_v12 }
 0x2f6   :  { %v3605_v15 = vadd.f32 %v3604_v7, %v3517_v43 }
 0x2f8   :  { %v4424_v53 = vpop.f32.mrb[12].mxu0 }
 0x2f9   :  { %v3163_v62 = vpop.f32.mrb[13].mxu0  ;;  %v3488_v37 = vmul.f32 %v4424_v53, %v4424_v53 }
 0x2fa   :  { %v3386_v17 = vadd.f32 %v3385_v58, %v3163_v62  ;;  %v3486_v3 = vmul.f32 %v3163_v62, %v3163_v62  ;;  %v4425_v34 = vpop.f32.mrb[14].mxu0 }
 0x2fb   :  { %v4216_v55 = vpack.c.bf16 %v4425_v34, %v4424_v53  ;;  %v3166_v52 = vpop.f32.mrb[15].mxu0  ;;  %v3489_v63 = vmul.f32 %v4425_v34, %v4425_v34 }
 0x2fc   :  { %v3554_v25 = vadd.f32 %v3553_v32, %v3486_v3  ;;  %v3387_v57 = vadd.f32 %v3386_v17, %v3166_v52  ;;  %v3487_v60 = vmul.f32 %v3166_v52, %v3166_v52  ;;  %v4211_v2 = vpack.c.bf16 %v3166_v52, %v3163_v62 }
 0x2fd   :  { %4344 = vst [vmem:[%s9347_s2 + $0x38] sm:$0xff] %v4216_v55   ;;  %v3549_v32 = vrot.slane %v3548_v49, 1 }
 0x2fe   :  { %v3388_v5 = vadd.f32 %v4424_v53, %v3387_v57  ;;  %v3555_v20 = vadd.f32 %v3554_v25, %v3487_v60  ;;  %4343 = vst [vmem:[%s9347_s2 + $0x30] sm:$0xff] %v4211_v2  }
 0x2ff   :  { %v3550_v59 = vadd.f32 %v3549_v32, %v3548_v49 }
 0x300   :  { %v3389_v11 = vadd.f32 %v4425_v34, %v3388_v5  ;;  %v3556_v39 = vadd.f32 %v3555_v20, %v3488_v37 }
 0x302   :  { %v3390_v6 = vrot.slane %v3389_v11, 4  ;;  %v3557_v28 = vadd.f32 %v3556_v39, %v3489_v63 }
 0x304   :  { %v3391_v19 = vadd.f32 %v3390_v6, %v3389_v11  ;;  %v3558_v41 = vrot.slane %v3557_v28, 4  ;;  %v4456_v40 = vpop.f32.mrb[12].mxu1 }
 0x305   :  { %v3291_v47 = vpop.f32.mrb[13].mxu1  ;;  %v3520_v48 = vmul.f32 %v4456_v40, %v4456_v40 }
 0x306   :  { %v3392_v44 = vrot.slane %v3391_v19, 2  ;;  %v3559_v45 = vadd.f32 %v3558_v41, %v3557_v28  ;;  %v3438_v33 = vadd.f32 %v3437_v4, %v3291_v47  ;;  %v3518_v8 = vmul.f32 %v3291_v47, %v3291_v47  ;;  %v4457_v31 = vpop.f32.mrb[14].mxu1 }
 0x307   :  { %v4296_v42 = vpack.c.bf16 %v4457_v31, %v4456_v40  ;;  %v3294_v24 = vpop.f32.mrb[15].mxu1  ;;  %v3521_v30 = vmul.f32 %v4457_v31, %v4457_v31 }
 0x308   :  { %v3393_v14 = vadd.f32 %v3392_v44, %v3391_v19  ;;  %v3560_v56 = vrot.slane %v3559_v45, 2  ;;  %v3606_v1 = vadd.f32 %v3605_v15, %v3518_v8  ;;  %v3439_v29 = vadd.f32 %v3438_v33, %v3294_v24 }
 0x309   :  { %4360 = vst [vmem:[%s9347_s2 + $0xb8] sm:$0xff] %v4296_v42   ;;  %v3519_v51 = vmul.f32 %v3294_v24, %v3294_v24  ;;  %v4291_v58 = vpack.c.bf16 %v3294_v24, %v3291_v47 }
 0x30a   :  { %v3394_v54 = vrot.slane %v3393_v14, 1  ;;  %v3561_v9 = vadd.f32 %v3560_v56, %v3559_v45  ;;  %v3440_v26 = vadd.f32 %v4456_v40, %v3439_v29 }
 0x30b   :  { %v3607_v50 = vadd.f32 %v3606_v1, %v3519_v51  ;;  %4359 = vst [vmem:[%s9347_s2 + $0xb0] sm:$0xff] %v4291_v58  }
 0x30c   :  { %v3395_v16 = vadd.f32 %v3394_v54, %v3393_v14  ;;  %v3562_v0 = vrot.slane %v3561_v9, 1  ;;  %v9251_v23 = vadd.f32 %v4457_v31, %v3440_v26 }
 0x30d   :  { %v3608_v12 = vadd.f32 %v3607_v50, %v3520_v48 }
 0x30e   :  { %v3563_v43 = vadd.f32 %v3562_v0, %v3561_v9  ;;  %v9253_v7 = vsel %vm3650_vm13, %v3395_v16, %v3382_v22 }
 0x30f   :  { %v9255_v4 = vadd.f32 %v3608_v12, %v3521_v30 }
 0x310   :  { %v9257_v15 = vsel %vm3650_vm13, %v3563_v43, %v3550_v59  ;;  %v4428_v35 = vpop.f32.mrb[16].mxu0 }
 0x311   :  { %v3179_v53 = vpop.f32.mrb[17].mxu0  ;;  %v3492_v52 = vmul.f32 %v4428_v35, %v4428_v35 }
 0x312   :  { %v4429_v36 = vpop.f32.mrb[18].mxu0  ;;  %v3490_v3 = vmul.f32 %v3179_v53, %v3179_v53 }
 0x313   :  { %v4226_v62 = vpack.c.bf16 %v4429_v36, %v4428_v35  ;;  %v3182_v17 = vpop.f32.mrb[19].mxu0  ;;  %v3493_v60 = vmul.f32 %v4429_v36, %v4429_v36 }
 0x314   :  { %v3396_v34 = vadd.f32 %v3182_v17, %v3179_v53  ;;  %v3491_v10 = vmul.f32 %v3182_v17, %v3182_v17  ;;  %v4221_v55 = vpack.c.bf16 %v3182_v17, %v3179_v53 }
 0x315   :  { %4346 = vst [vmem:[%s9347_s2 + $0x48] sm:$0xff] %v4226_v62  }
 0x316   :  { %v3397_v25 = vadd.f32 %v4428_v35, %v3396_v34  ;;  %v3564_v57 = vadd.f32 %v3491_v10, %v3490_v3  ;;  %4345 = vst [vmem:[%s9347_s2 + $0x40] sm:$0xff] %v4221_v55  }
 0x318   :  { %v3565_v2 = vadd.f32 %v3564_v57, %v3492_v52  ;;  %v3398_v18 = vadd.f32 %v4429_v36, %v3397_v25 }
 0x31a   :  { %v3566_v37 = vadd.f32 %v3565_v2, %v3493_v60 }
 0x31c   :  { %v4460_v5 = vpop.f32.mrb[16].mxu1 }
 0x31d   :  { %v3307_v20 = vpop.f32.mrb[17].mxu1  ;;  %v3524_v27 = vmul.f32 %v4460_v5, %v4460_v5 }
 0x31e   :  { %v4461_v46 = vpop.f32.mrb[18].mxu1  ;;  %v3522_v39 = vmul.f32 %v3307_v20, %v3307_v20 }
 0x31f   :  { %v4306_v63 = vpack.c.bf16 %v4461_v46, %v4460_v5  ;;  %v3310_v11 = vpop.f32.mrb[19].mxu1  ;;  %v3525_v40 = vmul.f32 %v4461_v46, %v4461_v46 }
 0x320   :  { %v3448_v21 = vadd.f32 %v3310_v11, %v3307_v20  ;;  %v3523_v6 = vmul.f32 %v3310_v11, %v3310_v11  ;;  %v4301_v28 = vpack.c.bf16 %v3310_v11, %v3307_v20 }
 0x321   :  { %4362 = vst [vmem:[%s9347_s2 + $0xc8] sm:$0xff] %v4306_v63  }
 0x322   :  { %v3449_v19 = vadd.f32 %v4460_v5, %v3448_v21  ;;  %v3616_v41 = vadd.f32 %v3523_v6, %v3522_v39  ;;  %4361 = vst [vmem:[%s9347_s2 + $0xc0] sm:$0xff] %v4301_v28  }
 0x324   :  { %v3617_v49 = vadd.f32 %v3616_v41, %v3524_v27  ;;  %v3450_v47 = vadd.f32 %v4461_v46, %v3449_v19 }
 0x326   :  { %v3618_v44 = vadd.f32 %v3617_v49, %v3525_v40 }
 0x328   :  { %v4432_v45 = vpop.f32.mrb[20].mxu0 }
 0x329   :  { %v3195_v33 = vpop.f32.mrb[21].mxu0  ;;  %v3496_v51 = vmul.f32 %v4432_v45, %v4432_v45 }
 0x32a   :  { %v3399_v8 = vadd.f32 %v3398_v18, %v3195_v33  ;;  %v3494_v31 = vmul.f32 %v3195_v33, %v3195_v33  ;;  %v4433_v38 = vpop.f32.mrb[22].mxu0 }
 0x32b   :  { %v4236_v42 = vpack.c.bf16 %v4433_v38, %v4432_v45  ;;  %v3198_v24 = vpop.f32.mrb[23].mxu0  ;;  %v3497_v54 = vmul.f32 %v4433_v38, %v4433_v38 }
 0x32c   :  { %v3567_v14 = vadd.f32 %v3566_v37, %v3494_v31  ;;  %v3400_v56 = vadd.f32 %v3399_v8, %v3198_v24  ;;  %v3495_v1 = vmul.f32 %v3198_v24, %v3198_v24  ;;  %v4231_v29 = vpack.c.bf16 %v3198_v24, %v3195_v33 }
 0x32d   :  { %4348 = vst [vmem:[%s9347_s2 + $0x58] sm:$0xff] %v4236_v42  }
 0x32e   :  { %v3401_v58 = vadd.f32 %v4432_v45, %v3400_v56  ;;  %v3568_v32 = vadd.f32 %v3567_v14, %v3495_v1  ;;  %4347 = vst [vmem:[%s9347_s2 + $0x50] sm:$0xff] %v4231_v29  }
 0x330   :  { %v3402_v9 = vadd.f32 %v4433_v38, %v3401_v58  ;;  %v3569_v26 = vadd.f32 %v3568_v32, %v3496_v51 }
 0x332   :  { %v3403_v48 = vrot.slane %v3402_v9, 4  ;;  %v3570_v50 = vadd.f32 %v3569_v26, %v3497_v54 }
 0x334   :  { %v3404_v22 = vadd.f32 %v3403_v48, %v3402_v9  ;;  %v3571_v16 = vrot.slane %v3570_v50, 4  ;;  %v4464_v0 = vpop.f32.mrb[20].mxu1 }
 0x335   :  { %v3323_v30 = vpop.f32.mrb[21].mxu1  ;;  %v3528_v2 = vmul.f32 %v4464_v0, %v4464_v0 }
 0x336   :  { %v3405_v12 = vrot.slane %v3404_v22, 2  ;;  %v3572_v59 = vadd.f32 %v3571_v16, %v3570_v50  ;;  %v3451_v43 = vadd.f32 %v3450_v47, %v3323_v30  ;;  %v3526_v35 = vmul.f32 %v3323_v30, %v3323_v30  ;;  %v4465_v53 = vpop.f32.mrb[22].mxu1 }
 0x337   :  { %v4316_v36 = vpack.c.bf16 %v4465_v53, %v4464_v0  ;;  %v3326_v62 = vpop.f32.mrb[23].mxu1  ;;  %v3529_v46 = vmul.f32 %v4465_v53, %v4465_v53  ;;  %v3429_v50 = vrot.slane %v9219_v13, 4 }
 0x338   :  { %v3406_v17 = vadd.f32 %v3405_v12, %v3404_v22  ;;  %v3573_v3 = vrot.slane %v3572_v59, 2  ;;  %v3619_v34 = vadd.f32 %v3618_v44, %v3526_v35  ;;  %v3452_v10 = vadd.f32 %v3451_v43, %v3326_v62 }
 0x339   :  { %4364 = vst [vmem:[%s9347_s2 + $0xd8] sm:$0xff] %v4316_v36   ;;  %v3527_v55 = vmul.f32 %v3326_v62, %v3326_v62  ;;  %v4311_v52 = vpack.c.bf16 %v3326_v62, %v3323_v30  ;;  %v3430_v12 = vadd.f32 %v3429_v50, %v9219_v13  ;;  %v3597_v43 = vrot.slane %v9221_v61, 4 }
 0x33a   :  { %v3407_v25 = vrot.slane %v3406_v17, 1  ;;  %v3574_v57 = vadd.f32 %v3573_v3, %v3572_v59  ;;  %v3453_v60 = vadd.f32 %v4464_v0, %v3452_v10  ;;  %v3442_v35 = vrot.slane %v9251_v23, 4 }
 0x33b   :  { %v3620_v18 = vadd.f32 %v3619_v34, %v3527_v55  ;;  %4363 = vst [vmem:[%s9347_s2 + $0xd0] sm:$0xff] %v4311_v52   ;;  %v3431_v3 = vrot.slane %v3430_v12, 2  ;;  %v3610_v34 = vrot.slane %v9255_v4, 4 }
 0x33c   :  { %v3408_v37 = vadd.f32 %v3407_v25, %v3406_v17  ;;  %v3575_v5 = vrot.slane %v3574_v57, 1  ;;  %v9283_v20 = vadd.f32 %v4465_v53, %v3453_v60 }
 0x33d   :  { %v3621_v63 = vadd.f32 %v3620_v18, %v3528_v2  ;;  %v3598_v2 = vadd.f32 %v3597_v43, %v9221_v61  ;;  %v3443_v18 = vadd.f32 %v3442_v35, %v9251_v23 }
 0x33e   :  { %v3576_v11 = vadd.f32 %v3575_v5, %v3574_v57  ;;  %v9286_v39 = vsel %vm3652_vm14, %v3408_v37, %v9253_v7  ;;  %v3455_v10 = vrot.slane %v9283_v20, 4 }
 0x33f   :  { %v9288_v21 = vadd.f32 %v3621_v63, %v3529_v46 }
 0x340   :  { %v9291_v6 = vsel %vm3652_vm14, %v3576_v11, %v9257_v15  ;;  %v4436_v28 = vpop.f32.mrb[24].mxu0  ;;  %v3432_v11 = vadd.f32 %v3431_v3, %v3430_v12  ;;  %v3456_v61 = vadd.f32 %v3455_v10, %v9283_v20 }
 0x341   :  { %v3211_v27 = vpop.f32.mrb[25].mxu0  ;;  %v3500_v7 = vmul.f32 %v4436_v28, %v4436_v28  ;;  %v3623_v37 = vrot.slane %v9288_v21, 4 }
 0x342   :  { %v4437_v19 = vpop.f32.mrb[26].mxu0  ;;  %v3498_v49 = vmul.f32 %v3211_v27, %v3211_v27 }
 0x343   :  { %v4246_v41 = vpack.c.bf16 %v4437_v19, %v4436_v28  ;;  %v3214_v40 = vpop.f32.mrb[27].mxu0  ;;  %v3501_v15 = vmul.f32 %v4437_v19, %v4437_v19 }
 0x344   :  { %v3409_v47 = vadd.f32 %v3214_v40, %v3211_v27  ;;  %v3499_v44 = vmul.f32 %v3214_v40, %v3214_v40  ;;  %v4241_v45 = vpack.c.bf16 %v3214_v40, %v3211_v27  ;;  %v3599_v40 = vrot.slane %v3598_v2, 2 }
 0x345   :  { %4350 = vst [vmem:[%s9347_s2 + $0x68] sm:$0xff] %v4246_v41  }
 0x346   :  { %v3410_v33 = vadd.f32 %v4436_v28, %v3409_v47  ;;  %v3577_v8 = vadd.f32 %v3499_v44, %v3498_v49  ;;  %4349 = vst [vmem:[%s9347_s2 + $0x60] sm:$0xff] %v4241_v45   ;;  %v3611_v28 = vadd.f32 %v3610_v34, %v9255_v4  ;;  %v3444_v49 = vrot.slane %v3443_v18, 2 }
 0x347   :  { %v3624_v47 = vadd.f32 %v3623_v37, %v9288_v21 }
 0x348   :  { %v3578_v31 = vadd.f32 %v3577_v8, %v3500_v7  ;;  %v3411_v38 = vadd.f32 %v4437_v19, %v3410_v33 }
 0x34a   :  { %v3579_v42 = vadd.f32 %v3578_v31, %v3501_v15  ;;  %v3433_v31 = vrot.slane %v3432_v11, 1 }
 0x34c   :  { %v4468_v24 = vpop.f32.mrb[24].mxu1 }
 0x34d   :  { %v3339_v14 = vpop.f32.mrb[25].mxu1  ;;  %v3532_v9 = vmul.f32 %v4468_v24, %v4468_v24 }
 0x34e   :  { %v4469_v56 = vpop.f32.mrb[26].mxu1  ;;  %v3530_v51 = vmul.f32 %v3339_v14, %v3339_v14 }
 0x34f   :  { %v4326_v1 = vpack.c.bf16 %v4469_v56, %v4468_v24  ;;  %v3342_v29 = vpop.f32.mrb[27].mxu1  ;;  %v3533_v22 = vmul.f32 %v4469_v56, %v4469_v56 }
 0x350   :  { %v3461_v58 = vadd.f32 %v3342_v29, %v3339_v14  ;;  %v3531_v32 = vmul.f32 %v3342_v29, %v3342_v29  ;;  %v4321_v54 = vpack.c.bf16 %v3342_v29, %v3339_v14  ;;  %v3600_v29 = vadd.f32 %v3599_v40, %v3598_v2 }
 0x351   :  { %4366 = vst [vmem:[%s9347_s2 + $0xe8] sm:$0xff] %v4326_v1  }
 0x352   :  { %v3462_v26 = vadd.f32 %v4468_v24, %v3461_v58  ;;  %v3629_v48 = vadd.f32 %v3531_v32, %v3530_v51  ;;  %4365 = vst [vmem:[%s9347_s2 + $0xe0] sm:$0xff] %v4321_v54   ;;  %v3625_v51 = vrot.slane %v3624_v47, 2  ;;  %v3445_v32 = vadd.f32 %v3444_v49, %v3443_v18 }
 0x353   :  { %v3601_v43 = vrot.slane %v3600_v29, 1 }
 0x354   :  { %v3630_v16 = vadd.f32 %v3629_v48, %v3532_v9  ;;  %v3463_v0 = vadd.f32 %v4469_v56, %v3462_v26  ;;  %v3434_v48 = vadd.f32 %v3433_v31, %v3432_v11  ;;  %v3626_v35 = vadd.f32 %v3625_v51, %v3624_v47 }
 0x356   :  { %v3631_v30 = vadd.f32 %v3630_v16, %v3533_v22 }
 0x358   :  { %v4440_v59 = vpop.f32.mrb[28].mxu0 }
 0x359   :  { %v3227_v53 = vpop.f32.mrb[29].mxu0  ;;  %v3504_v5 = vmul.f32 %v4440_v59, %v4440_v59 }
 0x35a   :  { %v3412_v36 = vadd.f32 %v3411_v38, %v3227_v53  ;;  %v3502_v62 = vmul.f32 %v3227_v53, %v3227_v53  ;;  %v4441_v17 = vpop.f32.mrb[30].mxu0  ;;  %v3612_v38 = vrot.slane %v3611_v28, 2 }
 0x35b   :  { %v4256_v55 = vpack.c.bf16 %v4441_v17, %v4440_v59  ;;  %v3230_v52 = vpop.f32.mrb[31].mxu0  ;;  %v3505_v27 = vmul.f32 %v4441_v17, %v4441_v17 }
 0x35c   :  { %v3580_v25 = vadd.f32 %v3579_v42, %v3502_v62  ;;  %v3413_v57 = vadd.f32 %v3412_v36, %v3230_v52  ;;  %v3503_v60 = vmul.f32 %v3230_v52, %v3230_v52  ;;  %v4251_v13 = vpack.c.bf16 %v3230_v52, %v3227_v53 }
 0x35d   :  { %4352 = vst [vmem:[%s9347_s2 + $0x78] sm:$0xff] %v4256_v55   ;;  %v3457_v42 = vrot.slane %v3456_v61, 2  ;;  %v3446_v62 = vrot.slane %v3445_v32, 1 }
 0x35e   :  { %v3414_v46 = vadd.f32 %v4440_v59, %v3413_v57  ;;  %v3581_v63 = vadd.f32 %v3580_v25, %v3503_v60  ;;  %4351 = vst [vmem:[%s9347_s2 + $0x70] sm:$0xff] %v4251_v13   ;;  %v3627_v13 = vrot.slane %v3626_v35, 1 }
 0x35f   :  { %v4472_v41 = vpop.f32.mrb[28].mxu1  ;;  %v3458_v50 = vadd.f32 %v3457_v42, %v3456_v61  ;;  %v3447_v18 = vadd.f32 %v3446_v62, %v3445_v32 }
 0x360   :  { %v3415_v23 = vadd.f32 %v4441_v17, %v3414_v46  ;;  %v3582_v19 = vadd.f32 %v3581_v63, %v3504_v5  ;;  %v3355_v44 = vpop.f32.mrb[29].mxu1  ;;  %v3536_v22 = vmul.f32 %v4472_v41, %v4472_v41  ;;  %v3602_v63 = vadd.f32 %v3601_v43, %v3600_v29 }
 0x361   :  { %v3464_v33 = vadd.f32 %v3463_v0, %v3355_v44  ;;  %v3534_v8 = vmul.f32 %v3355_v44, %v3355_v44  ;;  %v4473_v15 = vpop.f32.mrb[30].mxu1  ;;  %v3613_v0 = vadd.f32 %v3612_v38, %v3611_v28  ;;  %v3459_v10 = vrot.slane %v3458_v50, 1 }
 0x362   :  { %v3416_v45 = vrot.slane %v3415_v23, 4  ;;  %v3583_v7 = vadd.f32 %v3582_v19, %v3505_v27  ;;  %v4336_v4 = vpack.c.bf16 %v4473_v15, %v4472_v41  ;;  %v3358_v24 = vpop.f32.mrb[31].mxu1  ;;  %v3537_v53 = vmul.f32 %v4473_v15, %v4473_v15 }
 0x363   :  { %v3632_v56 = vadd.f32 %v3631_v30, %v3534_v8  ;;  %v3465_v1 = vadd.f32 %v3464_v33, %v3358_v24  ;;  %v3535_v21 = vmul.f32 %v3358_v24, %v3358_v24  ;;  %v4331_v58 = vpack.c.bf16 %v3358_v24, %v3355_v44 }
 0x364   :  { %v3417_v20 = vadd.f32 %v3416_v45, %v3415_v23  ;;  %v3584_v14 = vrot.slane %v3583_v7, 4  ;;  %4368 = vst [vmem:[%s9347_s2 + $0xf8] sm:$0xff] %v4336_v4   ;;  %v3614_v52 = vrot.slane %v3613_v0, 1  ;;  %v3460_v11 = vadd.f32 %v3459_v10, %v3458_v50 }
 0x365   :  { %v3466_v26 = vadd.f32 %v4472_v41, %v3465_v1  ;;  %v3633_v16 = vadd.f32 %v3632_v56, %v3535_v21  ;;  %4367 = vst [vmem:[%s9347_s2 + $0xf0] sm:$0xff] %v4331_v58   ;;  %v3628_v40 = vadd.f32 %v3627_v13, %v3626_v35 }
 0x366   :  { %v3418_v54 = vrot.slane %v3417_v20, 2  ;;  %v3585_v9 = vadd.f32 %v3584_v14, %v3583_v7  ;;  %v3615_v27 = vadd.f32 %v3614_v52, %v3613_v0 }
 0x367   :  { %v3467_v59 = vadd.f32 %v4473_v15, %v3466_v26  ;;  %v3634_v36 = vadd.f32 %v3633_v16, %v3536_v22 }
 0x368   :  { %v3419_v30 = vadd.f32 %v3418_v54, %v3417_v20  ;;  %v3586_v12 = vrot.slane %v3585_v9, 2 }
 0x369   :  { %v3468_v34 = vrot.slane %v3467_v59, 4  ;;  %v3635_v55 = vadd.f32 %v3634_v36, %v3537_v53 }
 0x36a   :  { %v3420_v17 = vrot.slane %v3419_v30, 1  ;;  %v3587_v3 = vadd.f32 %v3586_v12, %v3585_v9 }
 0x36b   :  { %v3469_v60 = vadd.f32 %v3468_v34, %v3467_v59  ;;  %v3636_v2 = vrot.slane %v3635_v55, 4 }
 0x36c   :  { %v3421_v25 = vadd.f32 %v3420_v17, %v3419_v30  ;;  %v3588_v57 = vrot.slane %v3587_v3, 1 }
 0x36d   :  { %v3470_v46 = vrot.slane %v3469_v60, 2  ;;  %v3637_v61 = vadd.f32 %v3636_v2, %v3635_v55 }
 0x36e   :  { %v3589_v37 = vadd.f32 %v3588_v57, %v3587_v3  ;;  %v3655_v5 = vsel %vm3654_vm15, %v3421_v25, %v9286_v39 }
 0x36f   :  { %v3657_v28 = vsel %vm3656_vm0, %v3434_v48, %v3655_v5  ;;  %v3471_v19 = vadd.f32 %v3470_v46, %v3469_v60  ;;  %v3638_v47 = vrot.slane %v3637_v61, 2 }
 0x370   :  { %v3676_v23 = vsel %vm3654_vm15, %v3589_v37, %v9291_v6  ;;  %v3659_v41 = vsel %vm3658_vm1, %v3447_v18, %v3657_v28 }
 0x371   :  { %v3677_v49 = vsel %vm3656_vm0, %v3602_v63, %v3676_v23  ;;  %v3661_v44 = vsel %vm3660_vm2, %v3460_v11, %v3659_v41  ;;  %v3472_v39 = vrot.slane %v3471_v19, 1  ;;  %v3639_v7 = vadd.f32 %v3638_v47, %v3637_v61 }
 0x372   :  { %v3678_v45 = vsel %vm3658_vm1, %v3615_v27, %v3677_v49 }
 0x373   :  { %v3679_v33 = vsel %vm3660_vm2, %v3628_v40, %v3678_v45  ;;  %v3473_v8 = vadd.f32 %v3472_v39, %v3471_v19  ;;  %v3640_v15 = vrot.slane %v3639_v7, 1 }
 0x375   :  { %v3663_v31 = vsel %vm3662_vm3, %v3473_v8, %v3661_v44  ;;  %v3641_v6 = vadd.f32 %v3640_v15, %v3639_v7 }
 0x376   :  { %3665 = vst [vmem:[%s9348_s3] sm:$0xff] %v3663_v31 }
 0x377   :  { %v3680_v38 = vsel %vm3662_vm3, %v3641_v6, %v3679_v33 }
 0x378   :  { %3682 = vst [vmem:[%s9349_s4] sm:$0xff] %v3680_v38 }

</bundles_post_ra>
